<compile_context>
chip_gen: v5e
topology: v5e:2x2
jax: 0.10.0
libtpu: 0.0.40
codegen_flags: <defaults>
</compile_context>

<pallas_src>
import functools

import numpy as np

import jax
import jax.numpy as jnp
from jax.experimental import pallas as pl
from jax.experimental.pallas import tpu as pltpu

_INV_SQRT2 = 0.7071067811865476


def _gelu(x):
    # exact (erf-based) GELU, matching torch.nn.GELU() default
    return 0.5 * x * (1.0 + jax.lax.erf(x * _INV_SQRT2))


def _fused_resblock_kernel(x_ref, w1_ref, b1_ref, wd_ref, bd_ref, w2_ref,
                           b2_ref, o_ref, hpad_ref, *, K):
    """x_ref:(D,H,W,C)  w1:(C,Ch) b1:(1,Ch)  wd:(K^3,Ch) bd:(1,Ch)
       w2:(Ch,C) b2:(1,C)  o_ref:(td,H,W,C)
       hpad_ref:(td+2P, H+2P, W+2P, Ch) VMEM scratch (replication-padded hidden).
    """
    D, H, W, C = x_ref.shape
    td = o_ref.shape[0]
    Ch = w1_ref.shape[1]
    P = K // 2

    d0 = pl.program_id(1) * td

    # Hoist all weights out of the unrolled tap loops (no per-tap reloads).
    w1 = w1_ref[...]          # (C, Ch)
    b1 = b1_ref[...]          # (1, Ch)
    wd = wd_ref[...]          # (K^3, Ch)
    bd = bd_ref[...]          # (1, Ch)
    w2 = w2_ref[...]          # (Ch, C)
    b2 = b2_ref[...]          # (1, C)

    # ---- stage 1: GELU -> 1x1x1 conv (C -> Ch) -> GELU, written into the
    #      replication-padded VMEM slab (pad done here, not in XLA) ----------
    for dz in range(td + 2 * P):
        gd = jnp.clip(d0 + dz - P, 0, D - 1)                  # depth rep-pad
        xp = x_ref[pl.ds(gd, 1), :, :, :][0].astype(jnp.float32)   # (H, W, C)
        gx = _gelu(xp)
        # C is tiny: contraction as C broadcast MACs on the VPU (no MXU).
        h = jnp.zeros((H, W, Ch), jnp.float32)
        for c in range(C):
            h = h + gx[:, :, c:c + 1] * w1[c]
        h = _gelu(h + b1)                                     # (H, W, Ch)

        # interior
        hpad_ref[dz, P:P + H, P:P + W, :] = h
        # replicate W edges
        for p in range(P):
            hpad_ref[dz, P:P + H, p:p + 1, :] = h[:, 0:1, :]
            hpad_ref[dz, P:P + H, P + W + p:P + W + p + 1, :] = h[:, W - 1:W, :]
        # replicate H edges (these rows already carry W padding / corners)
        top = hpad_ref[dz, P:P + 1, :, :]
        bot = hpad_ref[dz, P + H - 1:P + H, :, :]
        for p in range(P):
            hpad_ref[dz, p:p + 1, :, :] = top
            hpad_ref[dz, P + H + p:P + H + p + 1, :, :] = bot

    # ---- stage 2+3: depthwise KxKxK conv + GELU, 1x1x1 conv (Ch -> C) + bias
    #      + residual, store -------------------------------------------------
    for od in range(td):
        acc = jnp.zeros((H, W, Ch), jnp.float32)
        for kd in range(K):
            dplane = hpad_ref[od + kd, :, :, :]       # (H+2P, W+2P, Ch); 1 load / kd
            for kh in range(K):
                hplane = dplane[kh:kh + H]            # (H, W+2P, Ch) in-register
                for kw in range(K):
                    k = (kd * K + kh) * K + kw
                    acc = acc + hplane[:, kw:kw + W, :] * wd[k]
        hdw = _gelu(acc + bd)                         # (H, W, Ch)

        # pw2: contraction over Ch (large in real models) -> MXU matmul.
        y = jnp.dot(hdw.reshape(H * W, Ch), w2,
                    preferred_element_type=jnp.float32).reshape(H, W, C)
        res = x_ref[pl.ds(d0 + od, 1), :, :, :][0].astype(jnp.float32)
        o_ref[od, :, :, :] = (res + y + b2).astype(o_ref.dtype)


def resblockvq_forward(x_ncdhw, params, kernel_size=3):
    w1, b1 = params["w1"], params["b1"]
    wd, bd = params["wd"], params["bd"]
    w2, b2 = params["w2"], params["b2"]

    N, C, D, H, W = x_ncdhw.shape
    Ch = w1.shape[0]
    K = kernel_size
    P = K // 2

    # NCDHW -> NDHWC so channels sit on the lane axis inside the kernel.
    x = jnp.transpose(x_ncdhw, (0, 2, 3, 4, 1)).astype(jnp.float32)

    w1m = w1.reshape(Ch, C).T.astype(jnp.float32)           # (C, Ch)
    b1m = b1.reshape(1, Ch).astype(jnp.float32)
    wdm = wd.reshape(Ch, K * K * K).T.astype(jnp.float32)   # (K^3, Ch)
    bdm = bd.reshape(1, Ch).astype(jnp.float32)
    w2m = w2.reshape(C, Ch).T.astype(jnp.float32)           # (Ch, C)
    b2m = b2.reshape(1, C).astype(jnp.float32)

    # Depth tile: largest divisor of D whose padded hidden slab fits a modest
    # VMEM budget (safe on v7x) while keeping >= 8 grid steps to overlap.
    vmem_budget = 12 * 1024 * 1024
    td = 1
    for cand in range(D, 0, -1):
        if D % cand:
            continue
        slab = (cand + 2 * P) * (H + 2 * P) * (W + 2 * P) * Ch * 4
        if slab > vmem_budget:
            continue
        if cand == 1 or N * (D // cand) >= 8:
            td = cand
            break
    nd = D // td

    kern = functools.partial(_fused_resblock_kernel, K=K)
    out = pl.pallas_call(
        kern,
        out_shape=jax.ShapeDtypeStruct((N, D, H, W, C), jnp.float32),
        grid=(N, nd),
        in_specs=[
            pl.BlockSpec((None, D, H, W, C), lambda n, d: (n, 0, 0, 0, 0)),
            pl.BlockSpec((C, Ch), lambda n, d: (0, 0)),
            pl.BlockSpec((1, Ch), lambda n, d: (0, 0)),
            pl.BlockSpec((K * K * K, Ch), lambda n, d: (0, 0)),
            pl.BlockSpec((1, Ch), lambda n, d: (0, 0)),
            pl.BlockSpec((Ch, C), lambda n, d: (0, 0)),
            pl.BlockSpec((1, C), lambda n, d: (0, 0)),
        ],
        out_specs=pl.BlockSpec((None, td, H, W, C),
                               lambda n, d: (n, d, 0, 0, 0)),
        scratch_shapes=[
            pltpu.VMEM((td + 2 * P, H + 2 * P, W + 2 * P, Ch), jnp.float32)],
        compiler_params=pltpu.CompilerParams(
            dimension_semantics=("parallel", "parallel")),
    )(x, w1m, b1m, wdm, bdm, w2m, b2m)

    return jnp.transpose(out, (0, 4, 1, 2, 3)).astype(x_ncdhw.dtype)


# ---------------- pure-JAX (XLA) reference for verification -----------------
def resblockvq_reference(x, params, kernel_size=3):
    w1, b1 = params["w1"], params["b1"]
    wd, bd = params["wd"], params["bd"]
    w2, b2 = params["w2"], params["b2"]
    K = kernel_size
    P = K // 2
    dn = ("NCDHW", "OIDHW", "NCDHW")
    hi = jax.lax.Precision.HIGHEST

    h = jax.nn.gelu(x, approximate=False)
    h = jax.lax.conv_general_dilated(h, w1, (1, 1, 1), "VALID",
                                     dimension_numbers=dn, precision=hi)
    h = h + b1.reshape(1, -1, 1, 1, 1)
    h = jax.nn.gelu(h, approximate=False)
    hp = jnp.pad(h, ((0, 0), (0, 0), (P, P), (P, P), (P, P)), mode="edge")
    Ch = wd.shape[0]
    h = jax.lax.conv_general_dilated(hp, wd, (1, 1, 1), "VALID",
                                     dimension_numbers=dn,
                                     feature_group_count=Ch, precision=hi)
    h = h + bd.reshape(1, -1, 1, 1, 1)
    h = jax.nn.gelu(h, approximate=False)
    h = jax.lax.conv_general_dilated(h, w2, (1, 1, 1), "VALID",
                                     dimension_numbers=dn, precision=hi)
    h = h + b2.reshape(1, -1, 1, 1, 1)
    return x + h


if __name__ == "__main__":
    N, C, D, H, W = 2, 4, 4, 8, 8          # small NCDHW video-like input
    Ch = 32                                # c_hidden
    K = 3                                  # kernel_size

    key = jax.random.PRNGKey(0)
    ks = jax.random.split(key, 7)
    x = jax.random.normal(ks[0], (N, C, D, H, W), jnp.float32)
    params = {
        "w1": jax.random.normal(ks[1], (Ch, C, 1, 1, 1), jnp.float32) * 0.2,
        "b1": jax.random.normal(ks[2], (Ch,), jnp.float32) * 0.1,
        "wd": jax.random.normal(ks[3], (Ch, 1, K, K, K), jnp.float32) * 0.2,
        "bd": jax.random.normal(ks[4], (Ch,), jnp.float32) * 0.1,
        "w2": jax.random.normal(ks[5], (C, Ch, 1, 1, 1), jnp.float32) * 0.2,
        "b2": jax.random.normal(ks[6], (C,), jnp.float32) * 0.1,
    }

    out = resblockvq_forward(x, params, kernel_size=K)
    out = jax.block_until_ready(out)

    ref = resblockvq_reference(x, params, kernel_size=K)
    np.testing.assert_allclose(np.asarray(out), np.asarray(ref),
                               rtol=2e-3, atol=2e-3)
    print("KERNEL_OK")
</pallas_src>

<mosaic_0001>
module attributes {stable_mosaic.version = 11 : i64} {
  func.func @_fused_resblock_kernel(%arg0: i32, %arg1: i32, %arg2: memref<1x4x8x8x4xf32, #tpu.memory_space<vmem>>, %arg3: memref<4x32xf32, #tpu.memory_space<vmem>>, %arg4: memref<1x32xf32, #tpu.memory_space<vmem>>, %arg5: memref<27x32xf32, #tpu.memory_space<vmem>>, %arg6: memref<1x32xf32, #tpu.memory_space<vmem>>, %arg7: memref<32x4xf32, #tpu.memory_space<vmem>>, %arg8: memref<1x4xf32, #tpu.memory_space<vmem>>, %arg9: memref<1x1x8x8x4xf32, #tpu.memory_space<vmem>>, %arg10: memref<3x10x10x32xf32, #tpu.memory_space<vmem>>) attributes {dimension_semantics = [#tpu.dimension_semantics<parallel>, #tpu.dimension_semantics<parallel>], iteration_bounds = array<i64: 2, 4>, scalar_prefetch = 0 : i64, scratch_operands = 1 : i64, tpu.core_type = #tpu.core_type<tc>, window_params = [{transform_indices = @transform_0, window_bounds = array<i64: 1, 4, 8, 8, 4>}, {pipeline_mode = #tpu.pipeline_mode<synchronous>, transform_indices = @transform_1, window_bounds = array<i64: 4, 32>}, {pipeline_mode = #tpu.pipeline_mode<synchronous>, transform_indices = @transform_2, window_bounds = array<i64: 1, 32>}, {pipeline_mode = #tpu.pipeline_mode<synchronous>, transform_indices = @transform_3, window_bounds = array<i64: 27, 32>}, {pipeline_mode = #tpu.pipeline_mode<synchronous>, transform_indices = @transform_4, window_bounds = array<i64: 1, 32>}, {pipeline_mode = #tpu.pipeline_mode<synchronous>, transform_indices = @transform_5, window_bounds = array<i64: 32, 4>}, {pipeline_mode = #tpu.pipeline_mode<synchronous>, transform_indices = @transform_6, window_bounds = array<i64: 1, 4>}, {transform_indices = @transform_7, window_bounds = array<i64: 1, 1, 8, 8, 4>}]} {
    %c1_i32 = arith.constant 1 : i32
    %0 = arith.muli %arg1, %c1_i32 : i32
    %c0 = arith.constant 0 : index
    %c0_0 = arith.constant 0 : index
    %1 = vector.load %arg3[%c0, %c0_0] : memref<4x32xf32, #tpu.memory_space<vmem>>, vector<4x32xf32>
    %c0_1 = arith.constant 0 : index
    %c0_2 = arith.constant 0 : index
    %2 = vector.load %arg4[%c0_1, %c0_2] : memref<1x32xf32, #tpu.memory_space<vmem>>, vector<1x32xf32>
    %c0_3 = arith.constant 0 : index
    %c0_4 = arith.constant 0 : index
    %3 = vector.load %arg5[%c0_3, %c0_4] : memref<27x32xf32, #tpu.memory_space<vmem>>, vector<27x32xf32>
    %c0_5 = arith.constant 0 : index
    %c0_6 = arith.constant 0 : index
    %4 = vector.load %arg6[%c0_5, %c0_6] : memref<1x32xf32, #tpu.memory_space<vmem>>, vector<1x32xf32>
    %c0_7 = arith.constant 0 : index
    %c0_8 = arith.constant 0 : index
    %5 = vector.load %arg7[%c0_7, %c0_8] : memref<32x4xf32, #tpu.memory_space<vmem>>, vector<32x4xf32>
    %c0_9 = arith.constant 0 : index
    %c0_10 = arith.constant 0 : index
    %6 = vector.load %arg8[%c0_9, %c0_10] : memref<1x4xf32, #tpu.memory_space<vmem>>, vector<1x4xf32>
    %c0_i32 = arith.constant 0 : i32
    %7 = arith.addi %0, %c0_i32 : i32
    %c1_i32_11 = arith.constant 1 : i32
    %8 = arith.subi %7, %c1_i32_11 : i32
    %c0_i32_12 = arith.constant 0 : i32
    %c3_i32 = arith.constant 3 : i32
    %9 = arith.maxsi %c0_i32_12, %8 : i32
    %10 = arith.minsi %c3_i32, %9 : i32
    %c0_13 = arith.constant 0 : index
    %11 = arith.index_cast %10 : i32 to index
    %c0_14 = arith.constant 0 : index
    %c0_15 = arith.constant 0 : index
    %c0_16 = arith.constant 0 : index
    %12 = vector.load %arg2[%c0_13, %11, %c0_14, %c0_15, %c0_16] : memref<1x4x8x8x4xf32, #tpu.memory_space<vmem>>, vector<1x1x8x8x4xf32>
    %13 = vector.shape_cast %12 : vector<1x1x8x8x4xf32> to vector<1x8x8x4xf32>
    %14 = vector.shape_cast %13 : vector<1x8x8x4xf32> to vector<8x8x4xf32>
    %cst = arith.constant 5.000000e-01 : f32
    %15 = vector.broadcast %cst : f32 to vector<8x8x4xf32>
    %16 = arith.mulf %15, %14 : vector<8x8x4xf32>
    %cst_17 = arith.constant 0.707106769 : f32
    %17 = vector.broadcast %cst_17 : f32 to vector<8x8x4xf32>
    %18 = arith.mulf %14, %17 : vector<8x8x4xf32>
    %19 = math.erf %18 : vector<8x8x4xf32>
    %cst_18 = arith.constant 1.000000e+00 : f32
    %20 = vector.broadcast %cst_18 : f32 to vector<8x8x4xf32>
    %21 = arith.addf %20, %19 : vector<8x8x4xf32>
    %22 = arith.mulf %16, %21 : vector<8x8x4xf32>
    %cst_19 = arith.constant 0.000000e+00 : f32
    %23 = vector.broadcast %cst_19 : f32 to vector<8x8x32xf32>
    %24 = vector.extract_strided_slice %22 {offsets = [0, 0, 0], sizes = [8, 8, 1], strides = [1, 1, 1]} : vector<8x8x4xf32> to vector<8x8x1xf32>
    %25 = vector.extract_strided_slice %1 {offsets = [0, 0], sizes = [1, 32], strides = [1, 1]} : vector<4x32xf32> to vector<1x32xf32>
    %26 = vector.shape_cast %25 : vector<1x32xf32> to vector<32xf32>
    %27 = vector.shape_cast %26 : vector<32xf32> to vector<1x1x32xf32>
    %28 = vector.broadcast %24 : vector<8x8x1xf32> to vector<8x8x32xf32>
    %29 = vector.broadcast %27 : vector<1x1x32xf32> to vector<8x8x32xf32>
    %30 = arith.mulf %28, %29 : vector<8x8x32xf32>
    %31 = arith.addf %23, %30 : vector<8x8x32xf32>
    %32 = vector.extract_strided_slice %22 {offsets = [0, 0, 1], sizes = [8, 8, 1], strides = [1, 1, 1]} : vector<8x8x4xf32> to vector<8x8x1xf32>
    %33 = vector.extract_strided_slice %1 {offsets = [1, 0], sizes = [1, 32], strides = [1, 1]} : vector<4x32xf32> to vector<1x32xf32>
    %34 = vector.shape_cast %33 : vector<1x32xf32> to vector<32xf32>
    %35 = vector.shape_cast %34 : vector<32xf32> to vector<1x1x32xf32>
    %36 = vector.broadcast %32 : vector<8x8x1xf32> to vector<8x8x32xf32>
    %37 = vector.broadcast %35 : vector<1x1x32xf32> to vector<8x8x32xf32>
    %38 = arith.mulf %36, %37 : vector<8x8x32xf32>
    %39 = arith.addf %31, %38 : vector<8x8x32xf32>
    %40 = vector.extract_strided_slice %22 {offsets = [0, 0, 2], sizes = [8, 8, 1], strides = [1, 1, 1]} : vector<8x8x4xf32> to vector<8x8x1xf32>
    %41 = vector.extract_strided_slice %1 {offsets = [2, 0], sizes = [1, 32], strides = [1, 1]} : vector<4x32xf32> to vector<1x32xf32>
    %42 = vector.shape_cast %41 : vector<1x32xf32> to vector<32xf32>
    %43 = vector.shape_cast %42 : vector<32xf32> to vector<1x1x32xf32>
    %44 = vector.broadcast %40 : vector<8x8x1xf32> to vector<8x8x32xf32>
    %45 = vector.broadcast %43 : vector<1x1x32xf32> to vector<8x8x32xf32>
    %46 = arith.mulf %44, %45 : vector<8x8x32xf32>
    %47 = arith.addf %39, %46 : vector<8x8x32xf32>
    %48 = vector.extract_strided_slice %22 {offsets = [0, 0, 3], sizes = [8, 8, 1], strides = [1, 1, 1]} : vector<8x8x4xf32> to vector<8x8x1xf32>
    %49 = vector.extract_strided_slice %1 {offsets = [3, 0], sizes = [1, 32], strides = [1, 1]} : vector<4x32xf32> to vector<1x32xf32>
    %50 = vector.shape_cast %49 : vector<1x32xf32> to vector<32xf32>
    %51 = vector.shape_cast %50 : vector<32xf32> to vector<1x1x32xf32>
    %52 = vector.broadcast %48 : vector<8x8x1xf32> to vector<8x8x32xf32>
    %53 = vector.broadcast %51 : vector<1x1x32xf32> to vector<8x8x32xf32>
    %54 = arith.mulf %52, %53 : vector<8x8x32xf32>
    %55 = arith.addf %47, %54 : vector<8x8x32xf32>
    %56 = vector.shape_cast %2 : vector<1x32xf32> to vector<1x1x32xf32>
    %57 = vector.broadcast %56 : vector<1x1x32xf32> to vector<8x8x32xf32>
    %58 = arith.addf %55, %57 : vector<8x8x32xf32>
    %cst_20 = arith.constant 5.000000e-01 : f32
    %59 = vector.broadcast %cst_20 : f32 to vector<8x8x32xf32>
    %60 = arith.mulf %59, %58 : vector<8x8x32xf32>
    %cst_21 = arith.constant 0.707106769 : f32
    %61 = vector.broadcast %cst_21 : f32 to vector<8x8x32xf32>
    %62 = arith.mulf %58, %61 : vector<8x8x32xf32>
    %63 = math.erf %62 : vector<8x8x32xf32>
    %cst_22 = arith.constant 1.000000e+00 : f32
    %64 = vector.broadcast %cst_22 : f32 to vector<8x8x32xf32>
    %65 = arith.addf %64, %63 : vector<8x8x32xf32>
    %66 = arith.mulf %60, %65 : vector<8x8x32xf32>
    %c0_23 = arith.constant 0 : index
    %c1 = arith.constant 1 : index
    %c1_24 = arith.constant 1 : index
    %c0_25 = arith.constant 0 : index
    %67 = vector.load %arg10[%c0_23, %c1, %c1_24, %c0_25] : memref<3x10x10x32xf32, #tpu.memory_space<vmem>>, vector<1x8x8x32xf32>
    %68 = vector.shape_cast %67 : vector<1x8x8x32xf32> to vector<8x8x32xf32>
    %69 = vector.shape_cast %66 : vector<8x8x32xf32> to vector<1x8x8x32xf32>
    tpu.vector_store %arg10[%c0_23, %c1, %c1_24, %c0_25], %69 {strides = array<i32>} : memref<3x10x10x32xf32, #tpu.memory_space<vmem>>, vector<1x8x8x32xf32>,
    %70 = vector.extract_strided_slice %66 {offsets = [0, 0, 0], sizes = [8, 1, 32], strides = [1, 1, 1]} : vector<8x8x32xf32> to vector<8x1x32xf32>
    %c0_26 = arith.constant 0 : index
    %c1_27 = arith.constant 1 : index
    %c0_28 = arith.constant 0 : index
    %c0_29 = arith.constant 0 : index
    %71 = vector.load %arg10[%c0_26, %c1_27, %c0_28, %c0_29] : memref<3x10x10x32xf32, #tpu.memory_space<vmem>>, vector<1x8x1x32xf32>
    %72 = vector.shape_cast %71 : vector<1x8x1x32xf32> to vector<8x1x32xf32>
    %73 = vector.shape_cast %70 : vector<8x1x32xf32> to vector<1x8x1x32xf32>
    tpu.vector_store %arg10[%c0_26, %c1_27, %c0_28, %c0_29], %73 {strides = array<i32>} : memref<3x10x10x32xf32, #tpu.memory_space<vmem>>, vector<1x8x1x32xf32>,
    %74 = vector.extract_strided_slice %66 {offsets = [0, 7, 0], sizes = [8, 1, 32], strides = [1, 1, 1]} : vector<8x8x32xf32> to vector<8x1x32xf32>
    %c0_30 = arith.constant 0 : index
    %c1_31 = arith.constant 1 : index
    %c9 = arith.constant 9 : index
    %c0_32 = arith.constant 0 : index
    %75 = vector.load %arg10[%c0_30, %c1_31, %c9, %c0_32] : memref<3x10x10x32xf32, #tpu.memory_space<vmem>>, vector<1x8x1x32xf32>
    %76 = vector.shape_cast %75 : vector<1x8x1x32xf32> to vector<8x1x32xf32>
    %77 = vector.shape_cast %74 : vector<8x1x32xf32> to vector<1x8x1x32xf32>
    tpu.vector_store %arg10[%c0_30, %c1_31, %c9, %c0_32], %77 {strides = array<i32>} : memref<3x10x10x32xf32, #tpu.memory_space<vmem>>, vector<1x8x1x32xf32>,
    %c0_33 = arith.constant 0 : index
    %c1_34 = arith.constant 1 : index
    %c0_35 = arith.constant 0 : index
    %c0_36 = arith.constant 0 : index
    %78 = vector.load %arg10[%c0_33, %c1_34, %c0_35, %c0_36] : memref<3x10x10x32xf32, #tpu.memory_space<vmem>>, vector<1x1x10x32xf32>
    %79 = vector.shape_cast %78 : vector<1x1x10x32xf32> to vector<1x10x32xf32>
    %c0_37 = arith.constant 0 : index
    %c8 = arith.constant 8 : index
    %c0_38 = arith.constant 0 : index
    %c0_39 = arith.constant 0 : index
    %80 = vector.load %arg10[%c0_37, %c8, %c0_38, %c0_39] : memref<3x10x10x32xf32, #tpu.memory_space<vmem>>, vector<1x1x10x32xf32>
    %81 = vector.shape_cast %80 : vector<1x1x10x32xf32> to vector<1x10x32xf32>
    %c0_40 = arith.constant 0 : index
    %c0_41 = arith.constant 0 : index
    %c0_42 = arith.constant 0 : index
    %c0_43 = arith.constant 0 : index
    %82 = vector.load %arg10[%c0_40, %c0_41, %c0_42, %c0_43] : memref<3x10x10x32xf32, #tpu.memory_space<vmem>>, vector<1x1x10x32xf32>
    %83 = vector.shape_cast %82 : vector<1x1x10x32xf32> to vector<1x10x32xf32>
    %84 = vector.shape_cast %79 : vector<1x10x32xf32> to vector<1x1x10x32xf32>
    tpu.vector_store %arg10[%c0_40, %c0_41, %c0_42, %c0_43], %84 {strides = array<i32>} : memref<3x10x10x32xf32, #tpu.memory_space<vmem>>, vector<1x1x10x32xf32>,
    %c0_44 = arith.constant 0 : index
    %c9_45 = arith.constant 9 : index
    %c0_46 = arith.constant 0 : index
    %c0_47 = arith.constant 0 : index
    %85 = vector.load %arg10[%c0_44, %c9_45, %c0_46, %c0_47] : memref<3x10x10x32xf32, #tpu.memory_space<vmem>>, vector<1x1x10x32xf32>
    %86 = vector.shape_cast %85 : vector<1x1x10x32xf32> to vector<1x10x32xf32>
    %87 = vector.shape_cast %81 : vector<1x10x32xf32> to vector<1x1x10x32xf32>
    tpu.vector_store %arg10[%c0_44, %c9_45, %c0_46, %c0_47], %87 {strides = array<i32>} : memref<3x10x10x32xf32, #tpu.memory_space<vmem>>, vector<1x1x10x32xf32>,
    %c1_i32_48 = arith.constant 1 : i32
    %88 = arith.addi %0, %c1_i32_48 : i32
    %c1_i32_49 = arith.constant 1 : i32
    %89 = arith.subi %88, %c1_i32_49 : i32
    %c0_i32_50 = arith.constant 0 : i32
    %c3_i32_51 = arith.constant 3 : i32
    %90 = arith.maxsi %c0_i32_50, %89 : i32
    %91 = arith.minsi %c3_i32_51, %90 : i32
    %c0_52 = arith.constant 0 : index
    %92 = arith.index_cast %91 : i32 to index
    %c0_53 = arith.constant 0 : index
    %c0_54 = arith.constant 0 : index
    %c0_55 = arith.constant 0 : index
    %93 = vector.load %arg2[%c0_52, %92, %c0_53, %c0_54, %c0_55] : memref<1x4x8x8x4xf32, #tpu.memory_space<vmem>>, vector<1x1x8x8x4xf32>
    %94 = vector.shape_cast %93 : vector<1x1x8x8x4xf32> to vector<1x8x8x4xf32>
    %95 = vector.shape_cast %94 : vector<1x8x8x4xf32> to vector<8x8x4xf32>
    %cst_56 = arith.constant 5.000000e-01 : f32
    %96 = vector.broadcast %cst_56 : f32 to vector<8x8x4xf32>
    %97 = arith.mulf %96, %95 : vector<8x8x4xf32>
    %cst_57 = arith.constant 0.707106769 : f32
    %98 = vector.broadcast %cst_57 : f32 to vector<8x8x4xf32>
    %99 = arith.mulf %95, %98 : vector<8x8x4xf32>
    %100 = math.erf %99 : vector<8x8x4xf32>
    %cst_58 = arith.constant 1.000000e+00 : f32
    %101 = vector.broadcast %cst_58 : f32 to vector<8x8x4xf32>
    %102 = arith.addf %101, %100 : vector<8x8x4xf32>
    %103 = arith.mulf %97, %102 : vector<8x8x4xf32>
    %cst_59 = arith.constant 0.000000e+00 : f32
    %104 = vector.broadcast %cst_59 : f32 to vector<8x8x32xf32>
    %105 = vector.extract_strided_slice %103 {offsets = [0, 0, 0], sizes = [8, 8, 1], strides = [1, 1, 1]} : vector<8x8x4xf32> to vector<8x8x1xf32>
    %106 = vector.extract_strided_slice %1 {offsets = [0, 0], sizes = [1, 32], strides = [1, 1]} : vector<4x32xf32> to vector<1x32xf32>
    %107 = vector.shape_cast %106 : vector<1x32xf32> to vector<32xf32>
    %108 = vector.shape_cast %107 : vector<32xf32> to vector<1x1x32xf32>
    %109 = vector.broadcast %105 : vector<8x8x1xf32> to vector<8x8x32xf32>
    %110 = vector.broadcast %108 : vector<1x1x32xf32> to vector<8x8x32xf32>
    %111 = arith.mulf %109, %110 : vector<8x8x32xf32>
    %112 = arith.addf %104, %111 : vector<8x8x32xf32>
    %113 = vector.extract_strided_slice %103 {offsets = [0, 0, 1], sizes = [8, 8, 1], strides = [1, 1, 1]} : vector<8x8x4xf32> to vector<8x8x1xf32>
    %114 = vector.extract_strided_slice %1 {offsets = [1, 0], sizes = [1, 32], strides = [1, 1]} : vector<4x32xf32> to vector<1x32xf32>
    %115 = vector.shape_cast %114 : vector<1x32xf32> to vector<32xf32>
    %116 = vector.shape_cast %115 : vector<32xf32> to vector<1x1x32xf32>
    %117 = vector.broadcast %113 : vector<8x8x1xf32> to vector<8x8x32xf32>
    %118 = vector.broadcast %116 : vector<1x1x32xf32> to vector<8x8x32xf32>
    %119 = arith.mulf %117, %118 : vector<8x8x32xf32>
    %120 = arith.addf %112, %119 : vector<8x8x32xf32>
    %121 = vector.extract_strided_slice %103 {offsets = [0, 0, 2], sizes = [8, 8, 1], strides = [1, 1, 1]} : vector<8x8x4xf32> to vector<8x8x1xf32>
    %122 = vector.extract_strided_slice %1 {offsets = [2, 0], sizes = [1, 32], strides = [1, 1]} : vector<4x32xf32> to vector<1x32xf32>
    %123 = vector.shape_cast %122 : vector<1x32xf32> to vector<32xf32>
    %124 = vector.shape_cast %123 : vector<32xf32> to vector<1x1x32xf32>
    %125 = vector.broadcast %121 : vector<8x8x1xf32> to vector<8x8x32xf32>
    %126 = vector.broadcast %124 : vector<1x1x32xf32> to vector<8x8x32xf32>
    %127 = arith.mulf %125, %126 : vector<8x8x32xf32>
    %128 = arith.addf %120, %127 : vector<8x8x32xf32>
    %129 = vector.extract_strided_slice %103 {offsets = [0, 0, 3], sizes = [8, 8, 1], strides = [1, 1, 1]} : vector<8x8x4xf32> to vector<8x8x1xf32>
    %130 = vector.extract_strided_slice %1 {offsets = [3, 0], sizes = [1, 32], strides = [1, 1]} : vector<4x32xf32> to vector<1x32xf32>
    %131 = vector.shape_cast %130 : vector<1x32xf32> to vector<32xf32>
    %132 = vector.shape_cast %131 : vector<32xf32> to vector<1x1x32xf32>
    %133 = vector.broadcast %129 : vector<8x8x1xf32> to vector<8x8x32xf32>
    %134 = vector.broadcast %132 : vector<1x1x32xf32> to vector<8x8x32xf32>
    %135 = arith.mulf %133, %134 : vector<8x8x32xf32>
    %136 = arith.addf %128, %135 : vector<8x8x32xf32>
    %137 = vector.shape_cast %2 : vector<1x32xf32> to vector<1x1x32xf32>
    %138 = vector.broadcast %137 : vector<1x1x32xf32> to vector<8x8x32xf32>
    %139 = arith.addf %136, %138 : vector<8x8x32xf32>
    %cst_60 = arith.constant 5.000000e-01 : f32
    %140 = vector.broadcast %cst_60 : f32 to vector<8x8x32xf32>
    %141 = arith.mulf %140, %139 : vector<8x8x32xf32>
    %cst_61 = arith.constant 0.707106769 : f32
    %142 = vector.broadcast %cst_61 : f32 to vector<8x8x32xf32>
    %143 = arith.mulf %139, %142 : vector<8x8x32xf32>
    %144 = math.erf %143 : vector<8x8x32xf32>
    %cst_62 = arith.constant 1.000000e+00 : f32
    %145 = vector.broadcast %cst_62 : f32 to vector<8x8x32xf32>
    %146 = arith.addf %145, %144 : vector<8x8x32xf32>
    %147 = arith.mulf %141, %146 : vector<8x8x32xf32>
    %c1_63 = arith.constant 1 : index
    %c1_64 = arith.constant 1 : index
    %c1_65 = arith.constant 1 : index
    %c0_66 = arith.constant 0 : index
    %148 = vector.load %arg10[%c1_63, %c1_64, %c1_65, %c0_66] : memref<3x10x10x32xf32, #tpu.memory_space<vmem>>, vector<1x8x8x32xf32>
    %149 = vector.shape_cast %148 : vector<1x8x8x32xf32> to vector<8x8x32xf32>
    %150 = vector.shape_cast %147 : vector<8x8x32xf32> to vector<1x8x8x32xf32>
    tpu.vector_store %arg10[%c1_63, %c1_64, %c1_65, %c0_66], %150 {strides = array<i32>} : memref<3x10x10x32xf32, #tpu.memory_space<vmem>>, vector<1x8x8x32xf32>,
    %151 = vector.extract_strided_slice %147 {offsets = [0, 0, 0], sizes = [8, 1, 32], strides = [1, 1, 1]} : vector<8x8x32xf32> to vector<8x1x32xf32>
    %c1_67 = arith.constant 1 : index
    %c1_68 = arith.constant 1 : index
    %c0_69 = arith.constant 0 : index
    %c0_70 = arith.constant 0 : index
    %152 = vector.load %arg10[%c1_67, %c1_68, %c0_69, %c0_70] : memref<3x10x10x32xf32, #tpu.memory_space<vmem>>, vector<1x8x1x32xf32>
    %153 = vector.shape_cast %152 : vector<1x8x1x32xf32> to vector<8x1x32xf32>
    %154 = vector.shape_cast %151 : vector<8x1x32xf32> to vector<1x8x1x32xf32>
    tpu.vector_store %arg10[%c1_67, %c1_68, %c0_69, %c0_70], %154 {strides = array<i32>} : memref<3x10x10x32xf32, #tpu.memory_space<vmem>>, vector<1x8x1x32xf32>,
    %155 = vector.extract_strided_slice %147 {offsets = [0, 7, 0], sizes = [8, 1, 32], strides = [1, 1, 1]} : vector<8x8x32xf32> to vector<8x1x32xf32>
    %c1_71 = arith.constant 1 : index
    %c1_72 = arith.constant 1 : index
    %c9_73 = arith.constant 9 : index
    %c0_74 = arith.constant 0 : index
    %156 = vector.load %arg10[%c1_71, %c1_72, %c9_73, %c0_74] : memref<3x10x10x32xf32, #tpu.memory_space<vmem>>, vector<1x8x1x32xf32>
    %157 = vector.shape_cast %156 : vector<1x8x1x32xf32> to vector<8x1x32xf32>
    %158 = vector.shape_cast %155 : vector<8x1x32xf32> to vector<1x8x1x32xf32>
    tpu.vector_store %arg10[%c1_71, %c1_72, %c9_73, %c0_74], %158 {strides = array<i32>} : memref<3x10x10x32xf32, #tpu.memory_space<vmem>>, vector<1x8x1x32xf32>,
    %c1_75 = arith.constant 1 : index
    %c1_76 = arith.constant 1 : index
    %c0_77 = arith.constant 0 : index
    %c0_78 = arith.constant 0 : index
    %159 = vector.load %arg10[%c1_75, %c1_76, %c0_77, %c0_78] : memref<3x10x10x32xf32, #tpu.memory_space<vmem>>, vector<1x1x10x32xf32>
    %160 = vector.shape_cast %159 : vector<1x1x10x32xf32> to vector<1x10x32xf32>
    %c1_79 = arith.constant 1 : index
    %c8_80 = arith.constant 8 : index
    %c0_81 = arith.constant 0 : index
    %c0_82 = arith.constant 0 : index
    %161 = vector.load %arg10[%c1_79, %c8_80, %c0_81, %c0_82] : memref<3x10x10x32xf32, #tpu.memory_space<vmem>>, vector<1x1x10x32xf32>
    %162 = vector.shape_cast %161 : vector<1x1x10x32xf32> to vector<1x10x32xf32>
    %c1_83 = arith.constant 1 : index
    %c0_84 = arith.constant 0 : index
    %c0_85 = arith.constant 0 : index
    %c0_86 = arith.constant 0 : index
    %163 = vector.load %arg10[%c1_83, %c0_84, %c0_85, %c0_86] : memref<3x10x10x32xf32, #tpu.memory_space<vmem>>, vector<1x1x10x32xf32>
    %164 = vector.shape_cast %163 : vector<1x1x10x32xf32> to vector<1x10x32xf32>
    %165 = vector.shape_cast %160 : vector<1x10x32xf32> to vector<1x1x10x32xf32>
    tpu.vector_store %arg10[%c1_83, %c0_84, %c0_85, %c0_86], %165 {strides = array<i32>} : memref<3x10x10x32xf32, #tpu.memory_space<vmem>>, vector<1x1x10x32xf32>,
    %c1_87 = arith.constant 1 : index
    %c9_88 = arith.constant 9 : index
    %c0_89 = arith.constant 0 : index
    %c0_90 = arith.constant 0 : index
    %166 = vector.load %arg10[%c1_87, %c9_88, %c0_89, %c0_90] : memref<3x10x10x32xf32, #tpu.memory_space<vmem>>, vector<1x1x10x32xf32>
    %167 = vector.shape_cast %166 : vector<1x1x10x32xf32> to vector<1x10x32xf32>
    %168 = vector.shape_cast %162 : vector<1x10x32xf32> to vector<1x1x10x32xf32>
    tpu.vector_store %arg10[%c1_87, %c9_88, %c0_89, %c0_90], %168 {strides = array<i32>} : memref<3x10x10x32xf32, #tpu.memory_space<vmem>>, vector<1x1x10x32xf32>,
    %c2_i32 = arith.constant 2 : i32
    %169 = arith.addi %0, %c2_i32 : i32
    %c1_i32_91 = arith.constant 1 : i32
    %170 = arith.subi %169, %c1_i32_91 : i32
    %c0_i32_92 = arith.constant 0 : i32
    %c3_i32_93 = arith.constant 3 : i32
    %171 = arith.maxsi %c0_i32_92, %170 : i32
    %172 = arith.minsi %c3_i32_93, %171 : i32
    %c0_94 = arith.constant 0 : index
    %173 = arith.index_cast %172 : i32 to index
    %c0_95 = arith.constant 0 : index
    %c0_96 = arith.constant 0 : index
    %c0_97 = arith.constant 0 : index
    %174 = vector.load %arg2[%c0_94, %173, %c0_95, %c0_96, %c0_97] : memref<1x4x8x8x4xf32, #tpu.memory_space<vmem>>, vector<1x1x8x8x4xf32>
    %175 = vector.shape_cast %174 : vector<1x1x8x8x4xf32> to vector<1x8x8x4xf32>
    %176 = vector.shape_cast %175 : vector<1x8x8x4xf32> to vector<8x8x4xf32>
    %cst_98 = arith.constant 5.000000e-01 : f32
    %177 = vector.broadcast %cst_98 : f32 to vector<8x8x4xf32>
    %178 = arith.mulf %177, %176 : vector<8x8x4xf32>
    %cst_99 = arith.constant 0.707106769 : f32
    %179 = vector.broadcast %cst_99 : f32 to vector<8x8x4xf32>
    %180 = arith.mulf %176, %179 : vector<8x8x4xf32>
    %181 = math.erf %180 : vector<8x8x4xf32>
    %cst_100 = arith.constant 1.000000e+00 : f32
    %182 = vector.broadcast %cst_100 : f32 to vector<8x8x4xf32>
    %183 = arith.addf %182, %181 : vector<8x8x4xf32>
    %184 = arith.mulf %178, %183 : vector<8x8x4xf32>
    %cst_101 = arith.constant 0.000000e+00 : f32
    %185 = vector.broadcast %cst_101 : f32 to vector<8x8x32xf32>
    %186 = vector.extract_strided_slice %184 {offsets = [0, 0, 0], sizes = [8, 8, 1], strides = [1, 1, 1]} : vector<8x8x4xf32> to vector<8x8x1xf32>
    %187 = vector.extract_strided_slice %1 {offsets = [0, 0], sizes = [1, 32], strides = [1, 1]} : vector<4x32xf32> to vector<1x32xf32>
    %188 = vector.shape_cast %187 : vector<1x32xf32> to vector<32xf32>
    %189 = vector.shape_cast %188 : vector<32xf32> to vector<1x1x32xf32>
    %190 = vector.broadcast %186 : vector<8x8x1xf32> to vector<8x8x32xf32>
    %191 = vector.broadcast %189 : vector<1x1x32xf32> to vector<8x8x32xf32>
    %192 = arith.mulf %190, %191 : vector<8x8x32xf32>
    %193 = arith.addf %185, %192 : vector<8x8x32xf32>
    %194 = vector.extract_strided_slice %184 {offsets = [0, 0, 1], sizes = [8, 8, 1], strides = [1, 1, 1]} : vector<8x8x4xf32> to vector<8x8x1xf32>
    %195 = vector.extract_strided_slice %1 {offsets = [1, 0], sizes = [1, 32], strides = [1, 1]} : vector<4x32xf32> to vector<1x32xf32>
    %196 = vector.shape_cast %195 : vector<1x32xf32> to vector<32xf32>
    %197 = vector.shape_cast %196 : vector<32xf32> to vector<1x1x32xf32>
    %198 = vector.broadcast %194 : vector<8x8x1xf32> to vector<8x8x32xf32>
    %199 = vector.broadcast %197 : vector<1x1x32xf32> to vector<8x8x32xf32>
    %200 = arith.mulf %198, %199 : vector<8x8x32xf32>
    %201 = arith.addf %193, %200 : vector<8x8x32xf32>
    %202 = vector.extract_strided_slice %184 {offsets = [0, 0, 2], sizes = [8, 8, 1], strides = [1, 1, 1]} : vector<8x8x4xf32> to vector<8x8x1xf32>
    %203 = vector.extract_strided_slice %1 {offsets = [2, 0], sizes = [1, 32], strides = [1, 1]} : vector<4x32xf32> to vector<1x32xf32>
    %204 = vector.shape_cast %203 : vector<1x32xf32> to vector<32xf32>
    %205 = vector.shape_cast %204 : vector<32xf32> to vector<1x1x32xf32>
    %206 = vector.broadcast %202 : vector<8x8x1xf32> to vector<8x8x32xf32>
    %207 = vector.broadcast %205 : vector<1x1x32xf32> to vector<8x8x32xf32>
    %208 = arith.mulf %206, %207 : vector<8x8x32xf32>
    %209 = arith.addf %201, %208 : vector<8x8x32xf32>
    %210 = vector.extract_strided_slice %184 {offsets = [0, 0, 3], sizes = [8, 8, 1], strides = [1, 1, 1]} : vector<8x8x4xf32> to vector<8x8x1xf32>
    %211 = vector.extract_strided_slice %1 {offsets = [3, 0], sizes = [1, 32], strides = [1, 1]} : vector<4x32xf32> to vector<1x32xf32>
    %212 = vector.shape_cast %211 : vector<1x32xf32> to vector<32xf32>
    %213 = vector.shape_cast %212 : vector<32xf32> to vector<1x1x32xf32>
    %214 = vector.broadcast %210 : vector<8x8x1xf32> to vector<8x8x32xf32>
    %215 = vector.broadcast %213 : vector<1x1x32xf32> to vector<8x8x32xf32>
    %216 = arith.mulf %214, %215 : vector<8x8x32xf32>
    %217 = arith.addf %209, %216 : vector<8x8x32xf32>
    %218 = vector.shape_cast %2 : vector<1x32xf32> to vector<1x1x32xf32>
    %219 = vector.broadcast %218 : vector<1x1x32xf32> to vector<8x8x32xf32>
    %220 = arith.addf %217, %219 : vector<8x8x32xf32>
    %cst_102 = arith.constant 5.000000e-01 : f32
    %221 = vector.broadcast %cst_102 : f32 to vector<8x8x32xf32>
    %222 = arith.mulf %221, %220 : vector<8x8x32xf32>
    %cst_103 = arith.constant 0.707106769 : f32
    %223 = vector.broadcast %cst_103 : f32 to vector<8x8x32xf32>
    %224 = arith.mulf %220, %223 : vector<8x8x32xf32>
    %225 = math.erf %224 : vector<8x8x32xf32>
    %cst_104 = arith.constant 1.000000e+00 : f32
    %226 = vector.broadcast %cst_104 : f32 to vector<8x8x32xf32>
    %227 = arith.addf %226, %225 : vector<8x8x32xf32>
    %228 = arith.mulf %222, %227 : vector<8x8x32xf32>
    %c2 = arith.constant 2 : index
    %c1_105 = arith.constant 1 : index
    %c1_106 = arith.constant 1 : index
    %c0_107 = arith.constant 0 : index
    %229 = vector.load %arg10[%c2, %c1_105, %c1_106, %c0_107] : memref<3x10x10x32xf32, #tpu.memory_space<vmem>>, vector<1x8x8x32xf32>
    %230 = vector.shape_cast %229 : vector<1x8x8x32xf32> to vector<8x8x32xf32>
    %231 = vector.shape_cast %228 : vector<8x8x32xf32> to vector<1x8x8x32xf32>
    tpu.vector_store %arg10[%c2, %c1_105, %c1_106, %c0_107], %231 {strides = array<i32>} : memref<3x10x10x32xf32, #tpu.memory_space<vmem>>, vector<1x8x8x32xf32>,
    %232 = vector.extract_strided_slice %228 {offsets = [0, 0, 0], sizes = [8, 1, 32], strides = [1, 1, 1]} : vector<8x8x32xf32> to vector<8x1x32xf32>
    %c2_108 = arith.constant 2 : index
    %c1_109 = arith.constant 1 : index
    %c0_110 = arith.constant 0 : index
    %c0_111 = arith.constant 0 : index
    %233 = vector.load %arg10[%c2_108, %c1_109, %c0_110, %c0_111] : memref<3x10x10x32xf32, #tpu.memory_space<vmem>>, vector<1x8x1x32xf32>
    %234 = vector.shape_cast %233 : vector<1x8x1x32xf32> to vector<8x1x32xf32>
    %235 = vector.shape_cast %232 : vector<8x1x32xf32> to vector<1x8x1x32xf32>
    tpu.vector_store %arg10[%c2_108, %c1_109, %c0_110, %c0_111], %235 {strides = array<i32>} : memref<3x10x10x32xf32, #tpu.memory_space<vmem>>, vector<1x8x1x32xf32>,
    %236 = vector.extract_strided_slice %228 {offsets = [0, 7, 0], sizes = [8, 1, 32], strides = [1, 1, 1]} : vector<8x8x32xf32> to vector<8x1x32xf32>
    %c2_112 = arith.constant 2 : index
    %c1_113 = arith.constant 1 : index
    %c9_114 = arith.constant 9 : index
    %c0_115 = arith.constant 0 : index
    %237 = vector.load %arg10[%c2_112, %c1_113, %c9_114, %c0_115] : memref<3x10x10x32xf32, #tpu.memory_space<vmem>>, vector<1x8x1x32xf32>
    %238 = vector.shape_cast %237 : vector<1x8x1x32xf32> to vector<8x1x32xf32>
    %239 = vector.shape_cast %236 : vector<8x1x32xf32> to vector<1x8x1x32xf32>
    tpu.vector_store %arg10[%c2_112, %c1_113, %c9_114, %c0_115], %239 {strides = array<i32>} : memref<3x10x10x32xf32, #tpu.memory_space<vmem>>, vector<1x8x1x32xf32>,
    %c2_116 = arith.constant 2 : index
    %c1_117 = arith.constant 1 : index
    %c0_118 = arith.constant 0 : index
    %c0_119 = arith.constant 0 : index
    %240 = vector.load %arg10[%c2_116, %c1_117, %c0_118, %c0_119] : memref<3x10x10x32xf32, #tpu.memory_space<vmem>>, vector<1x1x10x32xf32>
    %241 = vector.shape_cast %240 : vector<1x1x10x32xf32> to vector<1x10x32xf32>
    %c2_120 = arith.constant 2 : index
    %c8_121 = arith.constant 8 : index
    %c0_122 = arith.constant 0 : index
    %c0_123 = arith.constant 0 : index
    %242 = vector.load %arg10[%c2_120, %c8_121, %c0_122, %c0_123] : memref<3x10x10x32xf32, #tpu.memory_space<vmem>>, vector<1x1x10x32xf32>
    %243 = vector.shape_cast %242 : vector<1x1x10x32xf32> to vector<1x10x32xf32>
    %c2_124 = arith.constant 2 : index
    %c0_125 = arith.constant 0 : index
    %c0_126 = arith.constant 0 : index
    %c0_127 = arith.constant 0 : index
    %244 = vector.load %arg10[%c2_124, %c0_125, %c0_126, %c0_127] : memref<3x10x10x32xf32, #tpu.memory_space<vmem>>, vector<1x1x10x32xf32>
    %245 = vector.shape_cast %244 : vector<1x1x10x32xf32> to vector<1x10x32xf32>
    %246 = vector.shape_cast %241 : vector<1x10x32xf32> to vector<1x1x10x32xf32>
    tpu.vector_store %arg10[%c2_124, %c0_125, %c0_126, %c0_127], %246 {strides = array<i32>} : memref<3x10x10x32xf32, #tpu.memory_space<vmem>>, vector<1x1x10x32xf32>,
    %c2_128 = arith.constant 2 : index
    %c9_129 = arith.constant 9 : index
    %c0_130 = arith.constant 0 : index
    %c0_131 = arith.constant 0 : index
    %247 = vector.load %arg10[%c2_128, %c9_129, %c0_130, %c0_131] : memref<3x10x10x32xf32, #tpu.memory_space<vmem>>, vector<1x1x10x32xf32>
    %248 = vector.shape_cast %247 : vector<1x1x10x32xf32> to vector<1x10x32xf32>
    %249 = vector.shape_cast %243 : vector<1x10x32xf32> to vector<1x1x10x32xf32>
    tpu.vector_store %arg10[%c2_128, %c9_129, %c0_130, %c0_131], %249 {strides = array<i32>} : memref<3x10x10x32xf32, #tpu.memory_space<vmem>>, vector<1x1x10x32xf32>,
    %cst_132 = arith.constant 0.000000e+00 : f32
    %250 = vector.broadcast %cst_132 : f32 to vector<8x8x32xf32>
    %c0_133 = arith.constant 0 : index
    %c0_134 = arith.constant 0 : index
    %c0_135 = arith.constant 0 : index
    %c0_136 = arith.constant 0 : index
    %251 = vector.load %arg10[%c0_133, %c0_134, %c0_135, %c0_136] : memref<3x10x10x32xf32, #tpu.memory_space<vmem>>, vector<1x10x10x32xf32>
    %252 = vector.shape_cast %251 : vector<1x10x10x32xf32> to vector<10x10x32xf32>
    %253 = vector.extract_strided_slice %252 {offsets = [0, 0, 0], sizes = [8, 10, 32], strides = [1, 1, 1]} : vector<10x10x32xf32> to vector<8x10x32xf32>
    %254 = vector.extract_strided_slice %253 {offsets = [0, 0, 0], sizes = [8, 8, 32], strides = [1, 1, 1]} : vector<8x10x32xf32> to vector<8x8x32xf32>
    %255 = vector.extract_strided_slice %3 {offsets = [0, 0], sizes = [1, 32], strides = [1, 1]} : vector<27x32xf32> to vector<1x32xf32>
    %256 = vector.shape_cast %255 : vector<1x32xf32> to vector<32xf32>
    %257 = vector.shape_cast %256 : vector<32xf32> to vector<1x1x32xf32>
    %258 = vector.broadcast %257 : vector<1x1x32xf32> to vector<8x8x32xf32>
    %259 = arith.mulf %254, %258 : vector<8x8x32xf32>
    %260 = arith.addf %250, %259 : vector<8x8x32xf32>
    %261 = vector.extract_strided_slice %253 {offsets = [0, 1, 0], sizes = [8, 8, 32], strides = [1, 1, 1]} : vector<8x10x32xf32> to vector<8x8x32xf32>
    %262 = vector.extract_strided_slice %3 {offsets = [1, 0], sizes = [1, 32], strides = [1, 1]} : vector<27x32xf32> to vector<1x32xf32>
    %263 = vector.shape_cast %262 : vector<1x32xf32> to vector<32xf32>
    %264 = vector.shape_cast %263 : vector<32xf32> to vector<1x1x32xf32>
    %265 = vector.broadcast %264 : vector<1x1x32xf32> to vector<8x8x32xf32>
    %266 = arith.mulf %261, %265 : vector<8x8x32xf32>
    %267 = arith.addf %260, %266 : vector<8x8x32xf32>
    %268 = vector.extract_strided_slice %253 {offsets = [0, 2, 0], sizes = [8, 8, 32], strides = [1, 1, 1]} : vector<8x10x32xf32> to vector<8x8x32xf32>
    %269 = vector.extract_strided_slice %3 {offsets = [2, 0], sizes = [1, 32], strides = [1, 1]} : vector<27x32xf32> to vector<1x32xf32>
    %270 = vector.shape_cast %269 : vector<1x32xf32> to vector<32xf32>
    %271 = vector.shape_cast %270 : vector<32xf32> to vector<1x1x32xf32>
    %272 = vector.broadcast %271 : vector<1x1x32xf32> to vector<8x8x32xf32>
    %273 = arith.mulf %268, %272 : vector<8x8x32xf32>
    %274 = arith.addf %267, %273 : vector<8x8x32xf32>
    %275 = vector.extract_strided_slice %252 {offsets = [1, 0, 0], sizes = [8, 10, 32], strides = [1, 1, 1]} : vector<10x10x32xf32> to vector<8x10x32xf32>
    %276 = vector.extract_strided_slice %275 {offsets = [0, 0, 0], sizes = [8, 8, 32], strides = [1, 1, 1]} : vector<8x10x32xf32> to vector<8x8x32xf32>
    %277 = vector.extract_strided_slice %3 {offsets = [3, 0], sizes = [1, 32], strides = [1, 1]} : vector<27x32xf32> to vector<1x32xf32>
    %278 = vector.shape_cast %277 : vector<1x32xf32> to vector<32xf32>
    %279 = vector.shape_cast %278 : vector<32xf32> to vector<1x1x32xf32>
    %280 = vector.broadcast %279 : vector<1x1x32xf32> to vector<8x8x32xf32>
    %281 = arith.mulf %276, %280 : vector<8x8x32xf32>
    %282 = arith.addf %274, %281 : vector<8x8x32xf32>
    %283 = vector.extract_strided_slice %275 {offsets = [0, 1, 0], sizes = [8, 8, 32], strides = [1, 1, 1]} : vector<8x10x32xf32> to vector<8x8x32xf32>
    %284 = vector.extract_strided_slice %3 {offsets = [4, 0], sizes = [1, 32], strides = [1, 1]} : vector<27x32xf32> to vector<1x32xf32>
    %285 = vector.shape_cast %284 : vector<1x32xf32> to vector<32xf32>
    %286 = vector.shape_cast %285 : vector<32xf32> to vector<1x1x32xf32>
    %287 = vector.broadcast %286 : vector<1x1x32xf32> to vector<8x8x32xf32>
    %288 = arith.mulf %283, %287 : vector<8x8x32xf32>
    %289 = arith.addf %282, %288 : vector<8x8x32xf32>
    %290 = vector.extract_strided_slice %275 {offsets = [0, 2, 0], sizes = [8, 8, 32], strides = [1, 1, 1]} : vector<8x10x32xf32> to vector<8x8x32xf32>
    %291 = vector.extract_strided_slice %3 {offsets = [5, 0], sizes = [1, 32], strides = [1, 1]} : vector<27x32xf32> to vector<1x32xf32>
    %292 = vector.shape_cast %291 : vector<1x32xf32> to vector<32xf32>
    %293 = vector.shape_cast %292 : vector<32xf32> to vector<1x1x32xf32>
    %294 = vector.broadcast %293 : vector<1x1x32xf32> to vector<8x8x32xf32>
    %295 = arith.mulf %290, %294 : vector<8x8x32xf32>
    %296 = arith.addf %289, %295 : vector<8x8x32xf32>
    %297 = vector.extract_strided_slice %252 {offsets = [2, 0, 0], sizes = [8, 10, 32], strides = [1, 1, 1]} : vector<10x10x32xf32> to vector<8x10x32xf32>
    %298 = vector.extract_strided_slice %297 {offsets = [0, 0, 0], sizes = [8, 8, 32], strides = [1, 1, 1]} : vector<8x10x32xf32> to vector<8x8x32xf32>
    %299 = vector.extract_strided_slice %3 {offsets = [6, 0], sizes = [1, 32], strides = [1, 1]} : vector<27x32xf32> to vector<1x32xf32>
    %300 = vector.shape_cast %299 : vector<1x32xf32> to vector<32xf32>
    %301 = vector.shape_cast %300 : vector<32xf32> to vector<1x1x32xf32>
    %302 = vector.broadcast %301 : vector<1x1x32xf32> to vector<8x8x32xf32>
    %303 = arith.mulf %298, %302 : vector<8x8x32xf32>
    %304 = arith.addf %296, %303 : vector<8x8x32xf32>
    %305 = vector.extract_strided_slice %297 {offsets = [0, 1, 0], sizes = [8, 8, 32], strides = [1, 1, 1]} : vector<8x10x32xf32> to vector<8x8x32xf32>
    %306 = vector.extract_strided_slice %3 {offsets = [7, 0], sizes = [1, 32], strides = [1, 1]} : vector<27x32xf32> to vector<1x32xf32>
    %307 = vector.shape_cast %306 : vector<1x32xf32> to vector<32xf32>
    %308 = vector.shape_cast %307 : vector<32xf32> to vector<1x1x32xf32>
    %309 = vector.broadcast %308 : vector<1x1x32xf32> to vector<8x8x32xf32>
    %310 = arith.mulf %305, %309 : vector<8x8x32xf32>
    %311 = arith.addf %304, %310 : vector<8x8x32xf32>
    %312 = vector.extract_strided_slice %297 {offsets = [0, 2, 0], sizes = [8, 8, 32], strides = [1, 1, 1]} : vector<8x10x32xf32> to vector<8x8x32xf32>
    %313 = vector.extract_strided_slice %3 {offsets = [8, 0], sizes = [1, 32], strides = [1, 1]} : vector<27x32xf32> to vector<1x32xf32>
    %314 = vector.shape_cast %313 : vector<1x32xf32> to vector<32xf32>
    %315 = vector.shape_cast %314 : vector<32xf32> to vector<1x1x32xf32>
    %316 = vector.broadcast %315 : vector<1x1x32xf32> to vector<8x8x32xf32>
    %317 = arith.mulf %312, %316 : vector<8x8x32xf32>
    %318 = arith.addf %311, %317 : vector<8x8x32xf32>
    %c1_137 = arith.constant 1 : index
    %c0_138 = arith.constant 0 : index
    %c0_139 = arith.constant 0 : index
    %c0_140 = arith.constant 0 : index
    %319 = vector.load %arg10[%c1_137, %c0_138, %c0_139, %c0_140] : memref<3x10x10x32xf32, #tpu.memory_space<vmem>>, vector<1x10x10x32xf32>
    %320 = vector.shape_cast %319 : vector<1x10x10x32xf32> to vector<10x10x32xf32>
    %321 = vector.extract_strided_slice %320 {offsets = [0, 0, 0], sizes = [8, 10, 32], strides = [1, 1, 1]} : vector<10x10x32xf32> to vector<8x10x32xf32>
    %322 = vector.extract_strided_slice %321 {offsets = [0, 0, 0], sizes = [8, 8, 32], strides = [1, 1, 1]} : vector<8x10x32xf32> to vector<8x8x32xf32>
    %323 = vector.extract_strided_slice %3 {offsets = [9, 0], sizes = [1, 32], strides = [1, 1]} : vector<27x32xf32> to vector<1x32xf32>
    %324 = vector.shape_cast %323 : vector<1x32xf32> to vector<32xf32>
    %325 = vector.shape_cast %324 : vector<32xf32> to vector<1x1x32xf32>
    %326 = vector.broadcast %325 : vector<1x1x32xf32> to vector<8x8x32xf32>
    %327 = arith.mulf %322, %326 : vector<8x8x32xf32>
    %328 = arith.addf %318, %327 : vector<8x8x32xf32>
    %329 = vector.extract_strided_slice %321 {offsets = [0, 1, 0], sizes = [8, 8, 32], strides = [1, 1, 1]} : vector<8x10x32xf32> to vector<8x8x32xf32>
    %330 = vector.extract_strided_slice %3 {offsets = [10, 0], sizes = [1, 32], strides = [1, 1]} : vector<27x32xf32> to vector<1x32xf32>
    %331 = vector.shape_cast %330 : vector<1x32xf32> to vector<32xf32>
    %332 = vector.shape_cast %331 : vector<32xf32> to vector<1x1x32xf32>
    %333 = vector.broadcast %332 : vector<1x1x32xf32> to vector<8x8x32xf32>
    %334 = arith.mulf %329, %333 : vector<8x8x32xf32>
    %335 = arith.addf %328, %334 : vector<8x8x32xf32>
    %336 = vector.extract_strided_slice %321 {offsets = [0, 2, 0], sizes = [8, 8, 32], strides = [1, 1, 1]} : vector<8x10x32xf32> to vector<8x8x32xf32>
    %337 = vector.extract_strided_slice %3 {offsets = [11, 0], sizes = [1, 32], strides = [1, 1]} : vector<27x32xf32> to vector<1x32xf32>
    %338 = vector.shape_cast %337 : vector<1x32xf32> to vector<32xf32>
    %339 = vector.shape_cast %338 : vector<32xf32> to vector<1x1x32xf32>
    %340 = vector.broadcast %339 : vector<1x1x32xf32> to vector<8x8x32xf32>
    %341 = arith.mulf %336, %340 : vector<8x8x32xf32>
    %342 = arith.addf %335, %341 : vector<8x8x32xf32>
    %343 = vector.extract_strided_slice %320 {offsets = [1, 0, 0], sizes = [8, 10, 32], strides = [1, 1, 1]} : vector<10x10x32xf32> to vector<8x10x32xf32>
    %344 = vector.extract_strided_slice %343 {offsets = [0, 0, 0], sizes = [8, 8, 32], strides = [1, 1, 1]} : vector<8x10x32xf32> to vector<8x8x32xf32>
    %345 = vector.extract_strided_slice %3 {offsets = [12, 0], sizes = [1, 32], strides = [1, 1]} : vector<27x32xf32> to vector<1x32xf32>
    %346 = vector.shape_cast %345 : vector<1x32xf32> to vector<32xf32>
    %347 = vector.shape_cast %346 : vector<32xf32> to vector<1x1x32xf32>
    %348 = vector.broadcast %347 : vector<1x1x32xf32> to vector<8x8x32xf32>
    %349 = arith.mulf %344, %348 : vector<8x8x32xf32>
    %350 = arith.addf %342, %349 : vector<8x8x32xf32>
    %351 = vector.extract_strided_slice %343 {offsets = [0, 1, 0], sizes = [8, 8, 32], strides = [1, 1, 1]} : vector<8x10x32xf32> to vector<8x8x32xf32>
    %352 = vector.extract_strided_slice %3 {offsets = [13, 0], sizes = [1, 32], strides = [1, 1]} : vector<27x32xf32> to vector<1x32xf32>
    %353 = vector.shape_cast %352 : vector<1x32xf32> to vector<32xf32>
    %354 = vector.shape_cast %353 : vector<32xf32> to vector<1x1x32xf32>
    %355 = vector.broadcast %354 : vector<1x1x32xf32> to vector<8x8x32xf32>
    %356 = arith.mulf %351, %355 : vector<8x8x32xf32>
    %357 = arith.addf %350, %356 : vector<8x8x32xf32>
    %358 = vector.extract_strided_slice %343 {offsets = [0, 2, 0], sizes = [8, 8, 32], strides = [1, 1, 1]} : vector<8x10x32xf32> to vector<8x8x32xf32>
    %359 = vector.extract_strided_slice %3 {offsets = [14, 0], sizes = [1, 32], strides = [1, 1]} : vector<27x32xf32> to vector<1x32xf32>
    %360 = vector.shape_cast %359 : vector<1x32xf32> to vector<32xf32>
    %361 = vector.shape_cast %360 : vector<32xf32> to vector<1x1x32xf32>
    %362 = vector.broadcast %361 : vector<1x1x32xf32> to vector<8x8x32xf32>
    %363 = arith.mulf %358, %362 : vector<8x8x32xf32>
    %364 = arith.addf %357, %363 : vector<8x8x32xf32>
    %365 = vector.extract_strided_slice %320 {offsets = [2, 0, 0], sizes = [8, 10, 32], strides = [1, 1, 1]} : vector<10x10x32xf32> to vector<8x10x32xf32>
    %366 = vector.extract_strided_slice %365 {offsets = [0, 0, 0], sizes = [8, 8, 32], strides = [1, 1, 1]} : vector<8x10x32xf32> to vector<8x8x32xf32>
    %367 = vector.extract_strided_slice %3 {offsets = [15, 0], sizes = [1, 32], strides = [1, 1]} : vector<27x32xf32> to vector<1x32xf32>
    %368 = vector.shape_cast %367 : vector<1x32xf32> to vector<32xf32>
    %369 = vector.shape_cast %368 : vector<32xf32> to vector<1x1x32xf32>
    %370 = vector.broadcast %369 : vector<1x1x32xf32> to vector<8x8x32xf32>
    %371 = arith.mulf %366, %370 : vector<8x8x32xf32>
    %372 = arith.addf %364, %371 : vector<8x8x32xf32>
    %373 = vector.extract_strided_slice %365 {offsets = [0, 1, 0], sizes = [8, 8, 32], strides = [1, 1, 1]} : vector<8x10x32xf32> to vector<8x8x32xf32>
    %374 = vector.extract_strided_slice %3 {offsets = [16, 0], sizes = [1, 32], strides = [1, 1]} : vector<27x32xf32> to vector<1x32xf32>
    %375 = vector.shape_cast %374 : vector<1x32xf32> to vector<32xf32>
    %376 = vector.shape_cast %375 : vector<32xf32> to vector<1x1x32xf32>
    %377 = vector.broadcast %376 : vector<1x1x32xf32> to vector<8x8x32xf32>
    %378 = arith.mulf %373, %377 : vector<8x8x32xf32>
    %379 = arith.addf %372, %378 : vector<8x8x32xf32>
    %380 = vector.extract_strided_slice %365 {offsets = [0, 2, 0], sizes = [8, 8, 32], strides = [1, 1, 1]} : vector<8x10x32xf32> to vector<8x8x32xf32>
    %381 = vector.extract_strided_slice %3 {offsets = [17, 0], sizes = [1, 32], strides = [1, 1]} : vector<27x32xf32> to vector<1x32xf32>
    %382 = vector.shape_cast %381 : vector<1x32xf32> to vector<32xf32>
    %383 = vector.shape_cast %382 : vector<32xf32> to vector<1x1x32xf32>
    %384 = vector.broadcast %383 : vector<1x1x32xf32> to vector<8x8x32xf32>
    %385 = arith.mulf %380, %384 : vector<8x8x32xf32>
    %386 = arith.addf %379, %385 : vector<8x8x32xf32>
    %c2_141 = arith.constant 2 : index
    %c0_142 = arith.constant 0 : index
    %c0_143 = arith.constant 0 : index
    %c0_144 = arith.constant 0 : index
    %387 = vector.load %arg10[%c2_141, %c0_142, %c0_143, %c0_144] : memref<3x10x10x32xf32, #tpu.memory_space<vmem>>, vector<1x10x10x32xf32>
    %388 = vector.shape_cast %387 : vector<1x10x10x32xf32> to vector<10x10x32xf32>
    %389 = vector.extract_strided_slice %388 {offsets = [0, 0, 0], sizes = [8, 10, 32], strides = [1, 1, 1]} : vector<10x10x32xf32> to vector<8x10x32xf32>
    %390 = vector.extract_strided_slice %389 {offsets = [0, 0, 0], sizes = [8, 8, 32], strides = [1, 1, 1]} : vector<8x10x32xf32> to vector<8x8x32xf32>
    %391 = vector.extract_strided_slice %3 {offsets = [18, 0], sizes = [1, 32], strides = [1, 1]} : vector<27x32xf32> to vector<1x32xf32>
    %392 = vector.shape_cast %391 : vector<1x32xf32> to vector<32xf32>
    %393 = vector.shape_cast %392 : vector<32xf32> to vector<1x1x32xf32>
    %394 = vector.broadcast %393 : vector<1x1x32xf32> to vector<8x8x32xf32>
    %395 = arith.mulf %390, %394 : vector<8x8x32xf32>
    %396 = arith.addf %386, %395 : vector<8x8x32xf32>
    %397 = vector.extract_strided_slice %389 {offsets = [0, 1, 0], sizes = [8, 8, 32], strides = [1, 1, 1]} : vector<8x10x32xf32> to vector<8x8x32xf32>
    %398 = vector.extract_strided_slice %3 {offsets = [19, 0], sizes = [1, 32], strides = [1, 1]} : vector<27x32xf32> to vector<1x32xf32>
    %399 = vector.shape_cast %398 : vector<1x32xf32> to vector<32xf32>
    %400 = vector.shape_cast %399 : vector<32xf32> to vector<1x1x32xf32>
    %401 = vector.broadcast %400 : vector<1x1x32xf32> to vector<8x8x32xf32>
    %402 = arith.mulf %397, %401 : vector<8x8x32xf32>
    %403 = arith.addf %396, %402 : vector<8x8x32xf32>
    %404 = vector.extract_strided_slice %389 {offsets = [0, 2, 0], sizes = [8, 8, 32], strides = [1, 1, 1]} : vector<8x10x32xf32> to vector<8x8x32xf32>
    %405 = vector.extract_strided_slice %3 {offsets = [20, 0], sizes = [1, 32], strides = [1, 1]} : vector<27x32xf32> to vector<1x32xf32>
    %406 = vector.shape_cast %405 : vector<1x32xf32> to vector<32xf32>
    %407 = vector.shape_cast %406 : vector<32xf32> to vector<1x1x32xf32>
    %408 = vector.broadcast %407 : vector<1x1x32xf32> to vector<8x8x32xf32>
    %409 = arith.mulf %404, %408 : vector<8x8x32xf32>
    %410 = arith.addf %403, %409 : vector<8x8x32xf32>
    %411 = vector.extract_strided_slice %388 {offsets = [1, 0, 0], sizes = [8, 10, 32], strides = [1, 1, 1]} : vector<10x10x32xf32> to vector<8x10x32xf32>
    %412 = vector.extract_strided_slice %411 {offsets = [0, 0, 0], sizes = [8, 8, 32], strides = [1, 1, 1]} : vector<8x10x32xf32> to vector<8x8x32xf32>
    %413 = vector.extract_strided_slice %3 {offsets = [21, 0], sizes = [1, 32], strides = [1, 1]} : vector<27x32xf32> to vector<1x32xf32>
    %414 = vector.shape_cast %413 : vector<1x32xf32> to vector<32xf32>
    %415 = vector.shape_cast %414 : vector<32xf32> to vector<1x1x32xf32>
    %416 = vector.broadcast %415 : vector<1x1x32xf32> to vector<8x8x32xf32>
    %417 = arith.mulf %412, %416 : vector<8x8x32xf32>
    %418 = arith.addf %410, %417 : vector<8x8x32xf32>
    %419 = vector.extract_strided_slice %411 {offsets = [0, 1, 0], sizes = [8, 8, 32], strides = [1, 1, 1]} : vector<8x10x32xf32> to vector<8x8x32xf32>
    %420 = vector.extract_strided_slice %3 {offsets = [22, 0], sizes = [1, 32], strides = [1, 1]} : vector<27x32xf32> to vector<1x32xf32>
    %421 = vector.shape_cast %420 : vector<1x32xf32> to vector<32xf32>
    %422 = vector.shape_cast %421 : vector<32xf32> to vector<1x1x32xf32>
    %423 = vector.broadcast %422 : vector<1x1x32xf32> to vector<8x8x32xf32>
    %424 = arith.mulf %419, %423 : vector<8x8x32xf32>
    %425 = arith.addf %418, %424 : vector<8x8x32xf32>
    %426 = vector.extract_strided_slice %411 {offsets = [0, 2, 0], sizes = [8, 8, 32], strides = [1, 1, 1]} : vector<8x10x32xf32> to vector<8x8x32xf32>
    %427 = vector.extract_strided_slice %3 {offsets = [23, 0], sizes = [1, 32], strides = [1, 1]} : vector<27x32xf32> to vector<1x32xf32>
    %428 = vector.shape_cast %427 : vector<1x32xf32> to vector<32xf32>
    %429 = vector.shape_cast %428 : vector<32xf32> to vector<1x1x32xf32>
    %430 = vector.broadcast %429 : vector<1x1x32xf32> to vector<8x8x32xf32>
    %431 = arith.mulf %426, %430 : vector<8x8x32xf32>
    %432 = arith.addf %425, %431 : vector<8x8x32xf32>
    %433 = vector.extract_strided_slice %388 {offsets = [2, 0, 0], sizes = [8, 10, 32], strides = [1, 1, 1]} : vector<10x10x32xf32> to vector<8x10x32xf32>
    %434 = vector.extract_strided_slice %433 {offsets = [0, 0, 0], sizes = [8, 8, 32], strides = [1, 1, 1]} : vector<8x10x32xf32> to vector<8x8x32xf32>
    %435 = vector.extract_strided_slice %3 {offsets = [24, 0], sizes = [1, 32], strides = [1, 1]} : vector<27x32xf32> to vector<1x32xf32>
    %436 = vector.shape_cast %435 : vector<1x32xf32> to vector<32xf32>
    %437 = vector.shape_cast %436 : vector<32xf32> to vector<1x1x32xf32>
    %438 = vector.broadcast %437 : vector<1x1x32xf32> to vector<8x8x32xf32>
    %439 = arith.mulf %434, %438 : vector<8x8x32xf32>
    %440 = arith.addf %432, %439 : vector<8x8x32xf32>
    %441 = vector.extract_strided_slice %433 {offsets = [0, 1, 0], sizes = [8, 8, 32], strides = [1, 1, 1]} : vector<8x10x32xf32> to vector<8x8x32xf32>
    %442 = vector.extract_strided_slice %3 {offsets = [25, 0], sizes = [1, 32], strides = [1, 1]} : vector<27x32xf32> to vector<1x32xf32>
    %443 = vector.shape_cast %442 : vector<1x32xf32> to vector<32xf32>
    %444 = vector.shape_cast %443 : vector<32xf32> to vector<1x1x32xf32>
    %445 = vector.broadcast %444 : vector<1x1x32xf32> to vector<8x8x32xf32>
    %446 = arith.mulf %441, %445 : vector<8x8x32xf32>
    %447 = arith.addf %440, %446 : vector<8x8x32xf32>
    %448 = vector.extract_strided_slice %433 {offsets = [0, 2, 0], sizes = [8, 8, 32], strides = [1, 1, 1]} : vector<8x10x32xf32> to vector<8x8x32xf32>
    %449 = vector.extract_strided_slice %3 {offsets = [26, 0], sizes = [1, 32], strides = [1, 1]} : vector<27x32xf32> to vector<1x32xf32>
    %450 = vector.shape_cast %449 : vector<1x32xf32> to vector<32xf32>
    %451 = vector.shape_cast %450 : vector<32xf32> to vector<1x1x32xf32>
    %452 = vector.broadcast %451 : vector<1x1x32xf32> to vector<8x8x32xf32>
    %453 = arith.mulf %448, %452 : vector<8x8x32xf32>
    %454 = arith.addf %447, %453 : vector<8x8x32xf32>
    %455 = vector.shape_cast %4 : vector<1x32xf32> to vector<1x1x32xf32>
    %456 = vector.broadcast %455 : vector<1x1x32xf32> to vector<8x8x32xf32>
    %457 = arith.addf %454, %456 : vector<8x8x32xf32>
    %cst_145 = arith.constant 5.000000e-01 : f32
    %458 = vector.broadcast %cst_145 : f32 to vector<8x8x32xf32>
    %459 = arith.mulf %458, %457 : vector<8x8x32xf32>
    %cst_146 = arith.constant 0.707106769 : f32
    %460 = vector.broadcast %cst_146 : f32 to vector<8x8x32xf32>
    %461 = arith.mulf %457, %460 : vector<8x8x32xf32>
    %462 = math.erf %461 : vector<8x8x32xf32>
    %cst_147 = arith.constant 1.000000e+00 : f32
    %463 = vector.broadcast %cst_147 : f32 to vector<8x8x32xf32>
    %464 = arith.addf %463, %462 : vector<8x8x32xf32>
    %465 = arith.mulf %459, %464 : vector<8x8x32xf32>
    %466 = vector.shape_cast %465 : vector<8x8x32xf32> to vector<64x32xf32>
    %cst_148 = arith.constant dense<0.000000e+00> : vector<64x4xf32>
    %467 = tpu.matmul %466, %5, %cst_148 {dimension_numbers = #tpu.dot_dimension_numbers<[1], [0], [0], [1], [0, 0, 1, 1], [], []>} : vector<64x32xf32>, vector<32x4xf32>, vector<64x4xf32> -> vector<64x4xf32>
    %468 = vector.shape_cast %467 : vector<64x4xf32> to vector<8x8x4xf32>
    %c0_i32_149 = arith.constant 0 : i32
    %469 = arith.addi %0, %c0_i32_149 : i32
    %c0_150 = arith.constant 0 : index
    %470 = arith.index_cast %469 : i32 to index
    %c0_151 = arith.constant 0 : index
    %c0_152 = arith.constant 0 : index
    %c0_153 = arith.constant 0 : index
    %471 = vector.load %arg2[%c0_150, %470, %c0_151, %c0_152, %c0_153] : memref<1x4x8x8x4xf32, #tpu.memory_space<vmem>>, vector<1x1x8x8x4xf32>
    %472 = vector.shape_cast %471 : vector<1x1x8x8x4xf32> to vector<1x8x8x4xf32>
    %473 = vector.shape_cast %472 : vector<1x8x8x4xf32> to vector<8x8x4xf32>
    %474 = arith.addf %473, %468 : vector<8x8x4xf32>
    %475 = vector.shape_cast %6 : vector<1x4xf32> to vector<1x1x4xf32>
    %476 = vector.broadcast %475 : vector<1x1x4xf32> to vector<8x8x4xf32>
    %477 = arith.addf %474, %476 : vector<8x8x4xf32>
    %c0_154 = arith.constant 0 : index
    %c0_155 = arith.constant 0 : index
    %c0_156 = arith.constant 0 : index
    %c0_157 = arith.constant 0 : index
    %c0_158 = arith.constant 0 : index
    %478 = vector.load %arg9[%c0_154, %c0_155, %c0_156, %c0_157, %c0_158] : memref<1x1x8x8x4xf32, #tpu.memory_space<vmem>>, vector<1x1x8x8x4xf32>
    %479 = vector.shape_cast %478 : vector<1x1x8x8x4xf32> to vector<8x8x4xf32>
    %480 = vector.shape_cast %477 : vector<8x8x4xf32> to vector<1x1x8x8x4xf32>
    tpu.vector_store %arg9[%c0_154, %c0_155, %c0_156, %c0_157, %c0_158], %480 {strides = array<i32>} : memref<1x1x8x8x4xf32, #tpu.memory_space<vmem>>, vector<1x1x8x8x4xf32>,
    return
  }
  func.func @transform_0(%arg0: i32, %arg1: i32) -> (i32, i32, i32, i32, i32) {
    %c0_i32 = arith.constant 0 : i32
    %c0_i32_0 = arith.constant 0 : i32
    %c0_i32_1 = arith.constant 0 : i32
    %c0_i32_2 = arith.constant 0 : i32
    %c0_i32_3 = arith.constant 0 : i32
    return %arg0, %c0_i32, %c0_i32_0, %c0_i32_1, %c0_i32_2 : i32, i32, i32, i32, i32
  }
  func.func @transform_1(%arg0: i32, %arg1: i32) -> (i32, i32) {
    %c0_i32 = arith.constant 0 : i32
    %c0_i32_0 = arith.constant 0 : i32
    %c0_i32_1 = arith.constant 0 : i32
    return %c0_i32, %c0_i32_0 : i32, i32
  }
  func.func @transform_2(%arg0: i32, %arg1: i32) -> (i32, i32) {
    %c0_i32 = arith.constant 0 : i32
    %c0_i32_0 = arith.constant 0 : i32
    %c0_i32_1 = arith.constant 0 : i32
    return %c0_i32, %c0_i32_0 : i32, i32
  }
  func.func @transform_3(%arg0: i32, %arg1: i32) -> (i32, i32) {
    %c0_i32 = arith.constant 0 : i32
    %c0_i32_0 = arith.constant 0 : i32
    %c0_i32_1 = arith.constant 0 : i32
    return %c0_i32, %c0_i32_0 : i32, i32
  }
  func.func @transform_4(%arg0: i32, %arg1: i32) -> (i32, i32) {
    %c0_i32 = arith.constant 0 : i32
    %c0_i32_0 = arith.constant 0 : i32
    %c0_i32_1 = arith.constant 0 : i32
    return %c0_i32, %c0_i32_0 : i32, i32
  }
  func.func @transform_5(%arg0: i32, %arg1: i32) -> (i32, i32) {
    %c0_i32 = arith.constant 0 : i32
    %c0_i32_0 = arith.constant 0 : i32
    %c0_i32_1 = arith.constant 0 : i32
    return %c0_i32, %c0_i32_0 : i32, i32
  }
  func.func @transform_6(%arg0: i32, %arg1: i32) -> (i32, i32) {
    %c0_i32 = arith.constant 0 : i32
    %c0_i32_0 = arith.constant 0 : i32
    %c0_i32_1 = arith.constant 0 : i32
    return %c0_i32, %c0_i32_0 : i32, i32
  }
  func.func @transform_7(%arg0: i32, %arg1: i32) -> (i32, i32, i32, i32, i32) {
    %c0_i32 = arith.constant 0 : i32
    %c0_i32_0 = arith.constant 0 : i32
    %c0_i32_1 = arith.constant 0 : i32
    %c0_i32_2 = arith.constant 0 : i32
    return %arg0, %arg1, %c0_i32, %c0_i32_0, %c0_i32_1 : i32, i32, i32, i32, i32
  }
}

</mosaic_0001>

<bundles_post_ra>
// kernel: tpu_custom_call.1
= control target key start
LH: loop header
LB: loop body
LE: loop exit
PB: predicated region body
PF: predicated region fallthrough
CT: control target
= control target key end

     0   :  { %s5752_s24 = smov 0   ;;  %s5754_s25 = smov 0   ;;  %s9734_s0 = inlined_call_operand.vmem [shape: f32[2,4,8,8,4], index: 0, kind: input, shape index: {}]   ;;  %s9735_s1 = inlined_call_operand.vmem [shape: f32[4,32], index: 1, kind: input, shape index: {}]   ;;  %s9736_s2 = inlined_call_operand.vmem [shape: f32[1,32], index: 2, kind: input, shape index: {}]   ;;  %s9737_s3 = inlined_call_operand.vmem [shape: f32[27,32], index: 3, kind: input, shape index: {}]   ;;  %s9738_s4 = inlined_call_operand.vmem [shape: f32[1,32], index: 4, kind: input, shape index: {}]   ;;  %s9739_s5 = inlined_call_operand.vmem [shape: f32[32,4], index: 5, kind: input, shape index: {}]   ;;  %s9740_s6 = inlined_call_operand.vmem [shape: f32[1,4], index: 6, kind: input, shape index: {}]   ;;  %s9741_s7 = inlined_call_operand.vmem [shape: f32[2,4,8,8,4], index: 7, kind: output, shape index: {}]  }
   0x1   :  { %s5756_s26 = smov 0   ;;  %s5758_s27 = smov 0  }
   0x2   :  { %s5760_s28 = smov 0  }
   0x3 LB: > { %s26_s29 = sadd.s32 1, %s5698_s26  ;;  %s29_s30 = sadd.s32 1, %s5702_s27  ;;  %s5706_s28 = sphi %s5760_s28, %s17_s28   ;;  %s5702_s27 = sphi %s5758_s27, %s10109_s27   ;;  %s5698_s26 = sphi %s5756_s26, %s10108_s26   ;;  %s5694_s25 = sphi %s5754_s25, %s10107_s25   ;;  %s5690_s24 = sphi %s5752_s24, %s10106_s24  }
   0x4   : > { %p27_p0 = scmp.ge.s32.totalorder %s26_s29, 4  ;;  %p5304_p1 = scmp.ge.s32.totalorder %s5706_s28, 1 }
   0x5   : > { %p251_p2 = scmp.lt.s32.totalorder %s5706_s28, 9 }
   0x6   : > { %s10111_s29 = smov (%p27_p0, %s26_s29), 0  ;;  %s10113_s30 = smov (!%p27_p0, %s29_s30), %s5702_s27 }
   0x7   : > { %p252_p3 = pnand %p5304_p1, %p251_p2  ;;  %p31_p4 = scmp.ge.s32.totalorder %s10113_s30, 2 }
   0x9   : > { %s10115_s30 = smov (%p31_p4, %s10113_s30), 0  ;;  %255 = sbr.rel (%p252_p3) target bundleno = 1194 (0x4aa), region = 48 }
   0xe   : > { %p287_p5 = scmp.lt.s32.totalorder %s5694_s25, 1  ;;  %s313_s8 = sadd.s32 4294967295, %s5690_s24  ;;  %v9746_v0 = vmov 1   ;;  %v9742_v1 = vmov 0  }
   0xf   : > { %5461 = vset.pattern.permute.xlu0 %v9746_v0  ;;  %5459 = vset.pattern.permute.xlu2 %v9742_v1  ;;  %p314_p6 = scmp.gt.s32.totalorder %s313_s8, 0  ;;  %p5310_p7 = scmp.lt.s32.totalorder %s313_s8, 3 }
  0x10   : > { %5458 = vset.pattern.permute.xlu1 %v9742_v1  ;;  %s10117_s25 = smov (!%p287_p5, %s5694_s25), 1  ;;  %p1286_p8 = scmp.gt.s32.totalorder %s5690_s24, 0 }
  0x11   : > { %s10119_s8 = smov (!%p314_p6, %s313_s8), 0  ;;  %s5395_s9 = sshll.u32 %s10117_s25, 8 }
  0x12   : > { %s5794_s12 = scalar_lea.vmem %s9734_s0, %s5395_s9  ;;  %s10121_s8 = smov (!%p5310_p7, %s10119_s8), 3 }
  0x13   : > { %s5315_s13 = sshll.u32 %s10121_s8, 6  ;;  %p294_p9 = scmp.lt.s32.totalorder %s5690_s24, 3 }
  0x14   : > { %s5797_s14 = scalar_lea.vmem %s5794_s12, %s5315_s13  ;;  %s6098_s18 = sadd.s32 1, %s5690_s24 }
  0x15   : > { %v5800_v2 = vld [vmem:[%s5797_s14 + $0x20] sm:$0xff]  ;;  %v5803_v3 = vld [vmem:[%s5797_s14 + $0x10] sm:$0xff]  ;;  %v5806_v4 = vld [vmem:[%s5797_s14 + $0x8] sm:$0xff]  ;;  %s1287_s15 = scalar_select %p1286_p8, %s5690_s24, 0 }
  0x16   : > { %v5809_v5 = vmul.f32 0.70710677, %v5800_v2  ;;  %v5812_v6 = vmul.f32 0.70710677, %v5803_v3  ;;  %v5815_v7 = vld [vmem:[%s5797_s14 + $0x28] sm:$0xff]  ;;  %v5843_v21 = vld [vmem:[%s5797_s14 + $0x18] sm:$0xff] }
  0x17   : > { %v5818_v8 = vmul.f32 0.70710677, %v5806_v4  ;;  %v5821_v9 = vmul.f32 0.70710677, %v5815_v7  ;;  %v5856_v38 = vmul.f32 0.70710677, %v5843_v21 }
  0x18   : > { %v504_v10 = vmul.f32 %v5809_v5, %v5809_v5  ;;  %v424_v11 = vmul.f32 %v5812_v6, %v5812_v6  ;;  %s10123_s15 = smov (!%p294_p9, %s1287_s15), 3  ;;  %p2249_p10 = scmp.gt.s32.totalorder %s6098_s18, 0 }
  0x19   : > { %v384_v12 = vmul.f32 %v5818_v8, %v5818_v8  ;;  %v544_v13 = vmul.f32 %v5821_v9, %v5821_v9  ;;  %v464_v59 = vmul.f32 %v5856_v38, %v5856_v38  ;;  %s5337_s16 = sshll.u32 %s10123_s15, 6  ;;  %p5354_p11 = scmp.lt.s32.totalorder %s6098_s18, 3 }
  0x1a   : > { %v5831_v14 = vmin.f32 %v504_v10, 16.0  ;;  %v5833_v15 = vmin.f32 %v424_v11, 16.0  ;;  %s6003_s17 = scalar_lea.vmem %s5794_s12, %s5337_s16  ;;  %s5308_s15 = sshll.u32 %s10117_s25, 5 }
  0x1b   : > { %v5835_v16 = vmin.f32 %v384_v12, 16.0  ;;  %v5837_v17 = vmin.f32 %v544_v13, 16.0  ;;  %s2250_s19 = scalar_select %p2249_p10, %s6098_s18, 0 }
  0x1c   : > { %v506_v18 = vmul.f32 2.1237322e-06, %v5831_v14  ;;  %v517_v19 = vmul.f32 3.8918573e-05, %v5831_v14  ;;  %v426_v20 = vmul.f32 2.1237322e-06, %v5833_v15 }
  0x1d   : > { %v437_v22 = vmul.f32 3.8918573e-05, %v5833_v15  ;;  %v386_v23 = vmul.f32 2.1237322e-06, %v5835_v16  ;;  %v397_v24 = vmul.f32 3.8918573e-05, %v5835_v16 }
  0x1e   : > { %v507_v25 = vadd.f32 0.00028619796, %v506_v18  ;;  %v518_v26 = vadd.f32 0.001143296, %v517_v19  ;;  %v427_v27 = vadd.f32 0.00028619796, %v426_v20 }
  0x1f   : > { %v438_v28 = vadd.f32 0.001143296, %v437_v22  ;;  %v387_v29 = vadd.f32 0.00028619796, %v386_v23  ;;  %v398_v30 = vadd.f32 0.001143296, %v397_v24 }
  0x20   : > { %v508_v31 = vmul.f32 %v507_v25, %v5831_v14  ;;  %v519_v32 = vmul.f32 %v518_v26, %v5831_v14  ;;  %v428_v33 = vmul.f32 %v427_v27, %v5833_v15  ;;  %v546_v34 = vmul.f32 2.1237322e-06, %v5837_v17  ;;  %v5877_v27 = vld [vmem:[%s5797_s14 + $0x30] sm:$0xff]  ;;  %s10125_s19 = smov (!%p5354_p11, %s2250_s19), 3  ;;  %s5392_s16 = sshll.u32 %s5690_s24, 6 }
  0x21   : > { %v439_v35 = vmul.f32 %v438_v28, %v5833_v15  ;;  %v388_v36 = vmul.f32 %v387_v29, %v5835_v16  ;;  %v399_v37 = vmul.f32 %v398_v30, %v5835_v16  ;;  %v557_v52 = vmul.f32 3.8918573e-05, %v5837_v17  ;;  %s5359_s20 = sshll.u32 %s10125_s19, 6  ;;  %s9672_s18 = scalar_lea.vmem %s5794_s12, %s5392_s16 }
  0x22   : > { %v509_v39 = vadd.f32 0.0036580483, %v508_v31  ;;  %v520_v40 = vadd.f32 0.014752088, %v519_v32  ;;  %v429_v41 = vadd.f32 0.0036580483, %v428_v33  ;;  %s6183_s21 = scalar_lea.vmem %s5794_s12, %s5359_s20 }
  0x23   : > { %v440_v42 = vadd.f32 0.014752088, %v439_v35  ;;  %v389_v43 = vadd.f32 0.0036580483, %v388_v36  ;;  %v400_v44 = vadd.f32 0.014752088, %v399_v37 }
  0x24   : > { %v510_v45 = vmul.f32 %v509_v39, %v5831_v14  ;;  %v521_v46 = vmul.f32 %v520_v40, %v5831_v14  ;;  %v430_v47 = vmul.f32 %v429_v41, %v5833_v15  ;;  %v547_v48 = vadd.f32 0.00028619796, %v546_v34  ;;  %s295_s13 = scalar_select %p294_p9, %s5690_s24, 3 }
  0x25   : > { %v441_v49 = vmul.f32 %v440_v42, %v5833_v15  ;;  %v390_v50 = vmul.f32 %v389_v43, %v5835_v16  ;;  %v401_v51 = vmul.f32 %v400_v44, %v5835_v16  ;;  %v558_v13 = vadd.f32 0.001143296, %v557_v52 }
  0x26   : > { %v511_v53 = vadd.f32 0.05243302, %v510_v45  ;;  %v522_v54 = vadd.f32 0.112945676, %v521_v46  ;;  %v431_v55 = vadd.f32 0.05243302, %v430_v47  ;;  %v548_v56 = vmul.f32 %v547_v48, %v5837_v17 }
  0x27   : > { %v442_v57 = vadd.f32 0.112945676, %v441_v49  ;;  %v391_v58 = vadd.f32 0.05243302, %v390_v50  ;;  %v402_v63 = vadd.f32 0.112945676, %v401_v51  ;;  %v559_v26 = vmul.f32 %v558_v13, %v5837_v17 }
  0x28   : > { %v512_v60 = vmul.f32 %v511_v53, %v5831_v14  ;;  %v523_v61 = vmul.f32 %v522_v54, %v5831_v14  ;;  %v432_v62 = vmul.f32 %v431_v55, %v5833_v15  ;;  %v549_v12 = vadd.f32 0.0036580483, %v548_v56 }
  0x29   : > { %v443_v10 = vmul.f32 %v442_v57, %v5833_v15  ;;  %v392_v11 = vmul.f32 %v391_v58, %v5835_v16  ;;  %v403_v22 = vmul.f32 %v402_v63, %v5835_v16  ;;  %v5885_v36 = vmul.f32 0.70710677, %v5877_v27 }
  0x2a   : > { %v513_v18 = vadd.f32 0.18741608, %v512_v60  ;;  %v524_v19 = vadd.f32 0.4994258, %v523_v61  ;;  %v433_v20 = vadd.f32 0.18741608, %v432_v62  ;;  %v550_v25 = vmul.f32 %v549_v12, %v5837_v17 }
  0x2b   : > { %v444_v23 = vadd.f32 0.4994258, %v443_v10  ;;  %v393_v24 = vadd.f32 0.18741608, %v392_v11  ;;  %v404_v31 = vadd.f32 0.4994258, %v403_v22 }
  0x2c   : > { %v514_v28 = vmul.f32 %v513_v18, %v5831_v14  ;;  %v525_v29 = vmul.f32 %v524_v19, %v5831_v14  ;;  %v434_v30 = vmul.f32 %v433_v20, %v5833_v15  ;;  %v551_v34 = vadd.f32 0.05243302, %v550_v25 }
  0x2d   : > { %v445_v32 = vmul.f32 %v444_v23, %v5833_v15  ;;  %v394_v33 = vmul.f32 %v393_v24, %v5835_v16  ;;  %v405_v40 = vmul.f32 %v404_v31, %v5835_v16  ;;  %v560_v41 = vadd.f32 0.014752088, %v559_v26 }
  0x2e   : > { %v526_v35 = vadd.f32 1.0, %v525_v29  ;;  %v515_v37 = vadd.f32 1.1283791, %v514_v28  ;;  %v5891_v14 = vmul.f32 0.5, %v5800_v2  ;;  %v435_v42 = vadd.f32 1.1283791, %v434_v30 }
  0x2f   : > { %v5887_v39 = vadd.f32 1.0, %v445_v32  ;;  %v5893_v43 = vmin.f32 %v464_v59, 16.0  ;;  %v395_v44 = vadd.f32 1.1283791, %v394_v33  ;;  %v552_v45 = vmul.f32 %v551_v34, %v5837_v17 }
  0x30   : > { %5517 = vrcp.f32 %v526_v35  ;;  %v536_v15 = vand.u32 2147483647, %v526_v35  ;;  %v538_v46 = vand.u32 2147483648, %v526_v35  ;;  %v5898_v47 = vmul.f32 0.5, %v5803_v3 }
  0x31   : > { %5519 = vrcp.f32 %v5887_v39  ;;  %v456_v16 = vand.u32 2147483647, %v5887_v39  ;;  %v584_v2 = vmul.f32 %v5885_v36, %v5885_v36  ;;  %v5904_v48 = vmul.f32 %v515_v37, %v5809_v5 }
  0x32   : > { %v458_v49 = vand.u32 2147483648, %v5887_v39  ;;  %v5907_v50 = vadd.f32 1.0, %v405_v40  ;;  %v561_v51 = vmul.f32 %v560_v41, %v5837_v17  ;;  %vm532_vm0 = vweird.f32 %v526_v35 }
  0x33   : > { %v5911_v52 = vmul.f32 %v435_v42, %v5812_v6  ;;  %vm452_vm1 = vweird.f32 %v5887_v39  ;;  %v466_v3 = vmul.f32 2.1237322e-06, %v5893_v43  ;;  %vm5915_vm2 = vcmp.eq.f32.partialorder %v536_v15, 8.507059e+37 }
  0x34   : > { %v5920_v5 = vmul.f32 %v395_v44, %v5818_v8  ;;  %5521 = vrcp.f32 %v5907_v50  ;;  %v553_v54 = vadd.f32 0.18741608, %v552_v45  ;;  %v477_v55 = vmul.f32 3.8918573e-05, %v5893_v43 }
  0x35   : > { %v539_v56 = vor.u32 1.1754944e-38, %v538_v46  ;;  %vm5925_vm3 = vcmp.eq.f32.partialorder %v456_v16, 8.507059e+37  ;;  %v562_v58 = vadd.f32 0.112945676, %v561_v51  ;;  %v467_v59 = vadd.f32 0.00028619796, %v466_v3 }
  0x36   : > { %v5518_v6 = vpop.eup %5517  ;;  %v459_v61 = vor.u32 1.1754944e-38, %v458_v49  ;;  %vm412_vm4 = vweird.f32 %v5907_v50  ;;  %v416_v62 = vand.u32 2147483647, %v5907_v50  ;;  %v418_v10 = vand.u32 2147483648, %v5907_v50  ;;  %v5978_v3 = vld [vmem:[%s5797_s14 + $0x38] sm:$0xff] }
  0x37   : > { %v5520_v60 = vpop.eup %5519  ;;  %v528_v8 = vmul.f32 %v5518_v6, %v526_v35  ;;  %vm533_vm5 = vweird.f32 %v5518_v6  ;;  %v563_v11 = vmul.f32 %v562_v58, %v5837_v17  ;;  %v468_v13 = vmul.f32 %v467_v59, %v5893_v43 }
  0x38   : > { %v448_v63 = vmul.f32 %v5520_v60, %v5887_v39  ;;  %v478_v18 = vadd.f32 0.001143296, %v477_v55  ;;  %v5936_v19 = vmin.f32 %v584_v2, 16.0  ;;  %vm453_vm6 = vweird.f32 %v5520_v60  ;;  %vm5946_vm7 = vmor %vm532_vm0, %vm533_vm5 }
  0x39   : > { %v529_v12 = vsub.f32 1.0, %v528_v8  ;;  %v554_v22 = vmul.f32 %v553_v54, %v5837_v17  ;;  %v564_v23 = vadd.f32 0.4994258, %v563_v11  ;;  %v469_v26 = vadd.f32 0.0036580483, %v468_v13  ;;  %vm5958_vm9 = vmor %vm452_vm1, %vm453_vm6 }
  0x3a   : > { %v449_v20 = vsub.f32 1.0, %v448_v63  ;;  %v5522_v24 = vpop.eup %5521  ;;  %v479_v28 = vmul.f32 %v478_v18, %v5893_v43  ;;  %v586_v29 = vmul.f32 2.1237322e-06, %v5936_v19  ;;  %vm5951_vm8 = vcmp.eq.f32.partialorder %v416_v62, 8.507059e+37 }
  0x3b   : > { %v530_v25 = vmul.f32 %v5518_v6, %v529_v12  ;;  %v408_v32 = vmul.f32 %v5522_v24, %v5907_v50  ;;  %v565_v34 = vmul.f32 %v564_v23, %v5837_v17  ;;  %v470_v35 = vmul.f32 %v469_v26, %v5893_v43 }
  0x3c   : > { %v450_v31 = vmul.f32 %v5520_v60, %v449_v20  ;;  %v480_v41 = vadd.f32 0.014752088, %v479_v28  ;;  %v587_v42 = vadd.f32 0.00028619796, %v586_v29  ;;  %vm413_vm10 = vweird.f32 %v5522_v24  ;;  %v6015_v29 = vld [vmem:[%s6003_s17 + $0x28] sm:$0xff] }
  0x3d   : > { %v531_v37 = vadd.f32 %v5518_v6, %v530_v25  ;;  %v409_v44 = vsub.f32 1.0, %v408_v32  ;;  %v5967_v17 = vadd.f32 1.0, %v565_v34  ;;  %v419_v45 = vor.u32 1.1754944e-38, %v418_v10  ;;  %vm5985_vm11 = vmor %vm412_vm4, %vm413_vm10 }
  0x3e   : > { %v451_v15 = vadd.f32 %v5520_v60, %v450_v31  ;;  %v471_v46 = vadd.f32 0.05243302, %v470_v35  ;;  %v481_v16 = vmul.f32 %v480_v41, %v5893_v43  ;;  %v555_v53 = vadd.f32 1.1283791, %v554_v22 }
  0x3f   : > { %v535_v39 = vsel %vm5946_vm7, %v5518_v6, %v531_v37  ;;  %v410_v51 = vmul.f32 %v5522_v24, %v409_v44  ;;  %5523 = vrcp.f32 %v5967_v17  ;;  %v329_v8 = vmul.f32 0.5, %v5806_v4  ;;  %v6036_v44 = vld [vmem:[%s5797_s14] sm:$0xff]  ;;  %s5307_s14 = sshll.u32 %s295_s13, 3 }
  0x40   : > { %v540_v2 = vsel %vm5915_vm2, %v539_v56, %v535_v39  ;;  %v455_v49 = vsel %vm5958_vm9, %v5520_v60, %v451_v15  ;;  %v588_v56 = vmul.f32 %v587_v42, %v5936_v19  ;;  %v472_v60 = vmul.f32 %v471_v46, %v5893_v43 }
  0x41   : > { %v541_v54 = vmul.f32 %v540_v2, %v5904_v48  ;;  %v460_v55 = vsel %vm5925_vm3, %v459_v61, %v455_v49  ;;  %v411_v59 = vadd.f32 %v5522_v24, %v410_v51  ;;  %v597_v48 = vmul.f32 3.8918573e-05, %v5936_v19 }
  0x42   : > { %v461_v58 = vmul.f32 %v460_v55, %v5911_v52  ;;  %v482_v50 = vadd.f32 0.112945676, %v481_v16  ;;  %v5996_v61 = vmul.f32 0.70710677, %v5978_v3  ;;  %vm572_vm12 = vweird.f32 %v5967_v17 }
  0x43   : > { %v5320_v57 = vclamps-f32 %v541_v54, 1.0  ;;  %v415_v63 = vsel %vm5985_vm11, %v5522_v24, %v411_v59  ;;  %v576_v52 = vand.u32 2147483647, %v5967_v17  ;;  %v589_v12 = vadd.f32 0.0036580483, %v588_v56 }
  0x44   : > { %v5318_v62 = vclamps-f32 %v461_v58, 1.0  ;;  %v420_v11 = vsel %vm5951_vm8, %v419_v45, %v415_v63  ;;  %v483_v4 = vmul.f32 %v482_v50, %v5893_v43  ;;  %v473_v22 = vadd.f32 0.18741608, %v472_v60 }
  0x45   : > { %v668_v10 = vadd.f32 1.0, %v5320_v57  ;;  %v5524_v13 = vpop.eup %5523  ;;  %v421_v20 = vmul.f32 %v420_v11, %v5920_v5  ;;  %v598_v23 = vadd.f32 0.001143296, %v597_v48  ;;  %v578_v26 = vand.u32 2147483648, %v5967_v17 }
  0x46   : > { %v666_v18 = vadd.f32 1.0, %v5318_v62  ;;  %v568_v25 = vmul.f32 %v5524_v13, %v5967_v17  ;;  %v484_v28 = vadd.f32 0.4994258, %v483_v4  ;;  %vm573_vm13 = vweird.f32 %v5524_v13 }
  0x47   : > { %v6010_v24 = vmul.f32 %v668_v10, %v5891_v14  ;;  %v5317_v31 = vclamps-f32 %v421_v20, 1.0  ;;  %v590_v5 = vmul.f32 %v589_v12, %v5936_v19  ;;  %v599_v33 = vmul.f32 %v598_v23, %v5936_v19  ;;  %vm6043_vm14 = vmor %vm572_vm12, %vm573_vm13 }
  0x48   : > { %v6018_v30 = vmul.f32 %v666_v18, %v5898_v47  ;;  %v569_v32 = vsub.f32 1.0, %v568_v25  ;;  %v485_v14 = vmul.f32 %v484_v28, %v5893_v43  ;;  %v624_v34 = vmul.f32 %v5996_v61, %v5996_v61 }
  0x49   : > { %702 = vperm.xlu2 %5459, %v6010_v24   ;;  %v665_v37 = vadd.f32 1.0, %v5317_v31  ;;  %v474_v47 = vmul.f32 %v473_v22, %v5893_v43  ;;  %v6029_v40 = vmul.f32 0.70710677, %v6015_v29  ;;  %v600_v42 = vadd.f32 0.014752088, %v599_v33 }
  0x4a   : > { %692 = vperm.xlu1 %5458, %v6018_v30   ;;  %v570_v35 = vmul.f32 %v5524_v13, %v569_v32  ;;  %v6031_v41 = vadd.f32 1.0, %v485_v14  ;;  %v6033_v15 = vmin.f32 %v624_v34, 16.0  ;;  %v579_v43 = vor.u32 1.1754944e-38, %v578_v26 }
  0x4b   : > { %v6038_v39 = vmul.f32 %v665_v37, %v329_v8  ;;  %v591_v46 = vadd.f32 0.05243302, %v590_v5  ;;  %v1516_v16 = vmul.f32 %v6029_v40, %v6029_v40  ;;  %v556_v2 = vmul.f32 %v555_v53, %v5821_v9 }
  0x4c   : > { %v571_v49 = vadd.f32 %v5524_v13, %v570_v35  ;;  %vm577_vm15 = vcmp.eq.f32.partialorder %v576_v52, 8.507059e+37  ;;  %5525 = vrcp.f32 %v6031_v41  ;;  %v333_v51 = vmul.f32 0.5, %v5815_v7 }
  0x4d   : > { %742 = vperm.xlu0 %5461, %v6038_v39   ;;  %v601_v17 = vmul.f32 %v600_v42, %v5936_v19  ;;  %v626_v54 = vmul.f32 2.1237322e-06, %v6033_v15  ;;  %v6056_v55 = vmul.f32 0.70710677, %v6036_v44  ;;  %v475_v56 = vadd.f32 1.1283791, %v474_v47 }
  0x4e   : > { %v575_v6 = vsel %vm6043_vm14, %v5524_v13, %v571_v49  ;;  %v637_v9 = vmul.f32 3.8918573e-05, %v6033_v15  ;;  %v6061_v53 = vmin.f32 %v1516_v16, 16.0  ;;  %vm492_vm0 = vweird.f32 %v6031_v41 }
  0x4f   : > { %v580_v58 = vsel %vm577_vm15, %v579_v43, %v575_v6  ;;  %v592_v7 = vmul.f32 %v591_v46, %v5936_v19  ;;  %v602_v59 = vadd.f32 0.112945676, %v601_v17  ;;  %v496_v48 = vand.u32 2147483647, %v6031_v41 }
  0x50   : > { %v581_v60 = vmul.f32 %v580_v58, %v556_v2  ;;  %v627_v57 = vadd.f32 0.00028619796, %v626_v54  ;;  %v638_v8 = vadd.f32 0.001143296, %v637_v9  ;;  %v1518_v62 = vmul.f32 2.1237322e-06, %v6061_v53 }
  0x51   : > { %v603_v50 = vmul.f32 %v602_v59, %v5936_v19  ;;  %v1529_v63 = vmul.f32 3.8918573e-05, %v6061_v53  ;;  %v344_v52 = vmul.f32 %v6056_v55, %v6056_v55  ;;  %v498_v4 = vand.u32 2147483648, %v6031_v41 }
  0x52   : > { %v5526_v10 = vpop.eup %5525  ;;  %v5321_v11 = vclamps-f32 %v581_v60, 1.0  ;;  %v628_v12 = vmul.f32 %v627_v57, %v6033_v15  ;;  %v639_v13 = vmul.f32 %v638_v8, %v6033_v15  ;;  %v593_v20 = vadd.f32 0.18741608, %v592_v7 }
  0x53   : > { %v488_v18 = vmul.f32 %v5526_v10, %v6031_v41  ;;  %vm493_vm1 = vweird.f32 %v5526_v10  ;;  %v604_v22 = vadd.f32 0.4994258, %v603_v50  ;;  %v6075_v28 = vmin.f32 %v344_v52, 16.0 }
  0x54   : > { %v669_v23 = vadd.f32 1.0, %v5321_v11  ;;  %v629_v25 = vadd.f32 0.0036580483, %v628_v12  ;;  %v640_v26 = vadd.f32 0.014752088, %v639_v13  ;;  %v499_v42 = vor.u32 1.1754944e-38, %v498_v4  ;;  %vm6090_vm2 = vmor %vm492_vm0, %vm493_vm1 }
  0x55   : > { %v489_v31 = vsub.f32 1.0, %v488_v18  ;;  %v605_v5 = vmul.f32 %v604_v22, %v5936_v19  ;;  %v1519_v32 = vadd.f32 0.00028619796, %v1518_v62  ;;  %v1530_v14 = vadd.f32 0.001143296, %v1529_v63  ;;  %v6111_v63 = vld [vmem:[%s6003_s17 + $0x8] sm:$0xff] }
  0x56   : > { %v6078_v33 = vmul.f32 %v669_v23, %v333_v51  ;;  %v630_v34 = vmul.f32 %v629_v25, %v6033_v15  ;;  %v641_v37 = vmul.f32 %v640_v26, %v6033_v15  ;;  %v346_v47 = vmul.f32 2.1237322e-06, %v6075_v28 }
  0x57   : > { %v490_v35 = vmul.f32 %v5526_v10, %v489_v31  ;;  %v6083_v45 = vadd.f32 1.0, %v605_v5  ;;  %v1520_v43 = vmul.f32 %v1519_v32, %v6061_v53  ;;  %v1531_v49 = vmul.f32 %v1530_v14, %v6061_v53 }
  0x58   : > { %707 = vperm.xlu2 %5459, %v6078_v33   ;;  %v631_v16 = vadd.f32 0.05243302, %v630_v34  ;;  %v642_v2 = vadd.f32 0.112945676, %v641_v37  ;;  %v347_v51 = vadd.f32 0.00028619796, %v346_v47  ;;  %v476_v17 = vmul.f32 %v475_v56, %v5856_v38 }
  0x59   : > { %v491_v54 = vadd.f32 %v5526_v10, %v490_v35  ;;  %vm497_vm3 = vcmp.eq.f32.partialorder %v496_v48, 8.507059e+37  ;;  %5527 = vrcp.f32 %v6083_v45  ;;  %v594_v41 = vmul.f32 %v593_v20, %v5936_v19 }
  0x5a   : > { %v632_v6 = vmul.f32 %v631_v16, %v6033_v15  ;;  %v643_v9 = vmul.f32 %v642_v2, %v6033_v15  ;;  %v1521_v58 = vadd.f32 0.0036580483, %v1520_v43  ;;  %v1532_v59 = vadd.f32 0.014752088, %v1531_v49 }
  0x5b   : > { %v495_v7 = vsel %vm6090_vm2, %v5526_v10, %v491_v54  ;;  %v348_v38 = vmul.f32 %v347_v51, %v6075_v28  ;;  %v331_v56 = vmul.f32 0.5, %v5843_v21  ;;  %v595_v52 = vadd.f32 1.1283791, %v594_v41 }
  0x5c   : > { %v500_v60 = vsel %vm497_vm3, %v499_v42, %v495_v7  ;;  %v633_v48 = vadd.f32 0.18741608, %v632_v6  ;;  %v644_v57 = vadd.f32 0.4994258, %v643_v9  ;;  %v1522_v8 = vmul.f32 %v1521_v58, %v6061_v53  ;;  %v6161_v7 = vld [vmem:[%s6003_s17 + $0x38] sm:$0xff] }
  0x5d   : > { %v501_v19 = vmul.f32 %v500_v60, %v476_v17  ;;  %v1533_v50 = vmul.f32 %v1532_v59, %v6061_v53  ;;  %v349_v62 = vadd.f32 0.0036580483, %v348_v38  ;;  %vm612_vm4 = vweird.f32 %v6083_v45 }
  0x5e   : > { %v618_v21 = vand.u32 2147483648, %v6083_v45  ;;  %v645_v10 = vmul.f32 %v644_v57, %v6033_v15  ;;  %v634_v12 = vmul.f32 %v633_v48, %v6033_v15  ;;  %v1523_v13 = vadd.f32 0.05243302, %v1522_v8 }
  0x5f   : > { %v5528_v11 = vpop.eup %5527  ;;  %v5319_v4 = vclamps-f32 %v501_v19, 1.0  ;;  %v1534_v18 = vadd.f32 0.112945676, %v1533_v50  ;;  %v357_v23 = vmul.f32 3.8918573e-05, %v6075_v28  ;;  %v350_v5 = vmul.f32 %v349_v62, %v6075_v28 }
  0x60   : > { %v608_v20 = vmul.f32 %v5528_v11, %v6083_v45  ;;  %5460 = vset.pattern.permute.xlu2 %v9746_v0  ;;  %v6120_v22 = vadd.f32 1.0, %v645_v10  ;;  %v6124_v25 = vmul.f32 0.70710677, %v6111_v63  ;;  %v1524_v15 = vmul.f32 %v1523_v13, %v6061_v53 }
  0x61   : > { %v667_v26 = vadd.f32 1.0, %v5319_v4  ;;  %v1535_v31 = vmul.f32 %v1534_v18, %v6061_v53  ;;  %vm613_vm5 = vweird.f32 %v5528_v11  ;;  %v616_v14 = vand.u32 2147483647, %v6083_v45 }
  0x62   : > { %v609_v32 = vsub.f32 1.0, %v608_v20  ;;  %5529 = vrcp.f32 %v6120_v22  ;;  %v334_v37 = vmul.f32 0.5, %v5877_v27  ;;  %v635_v47 = vadd.f32 1.1283791, %v634_v12  ;;  %vm6145_vm6 = vmor %vm612_vm4, %vm613_vm5 }
  0x63   : > { %v6134_v34 = vmul.f32 %v667_v26, %v331_v56  ;;  %v1525_v35 = vadd.f32 0.18741608, %v1524_v15  ;;  %v596_v42 = vmul.f32 %v595_v52, %v5885_v36  ;;  %v1536_v46 = vadd.f32 0.4994258, %v1535_v31 }
  0x64   : > { %v610_v43 = vmul.f32 %v5528_v11, %v609_v32  ;;  %v358_v16 = vadd.f32 0.001143296, %v357_v23  ;;  %v619_v27 = vor.u32 1.1754944e-38, %v618_v21  ;;  %v351_v51 = vadd.f32 0.05243302, %v350_v5  ;;  %v6197_v32 = vld [vmem:[%s6183_s21 + $0x18] sm:$0xff] }
  0x65   : > { %697 = vperm.xlu1 %5458, %v6134_v34   ;;  %v1526_v49 = vmul.f32 %v1525_v35, %v6061_v53  ;;  %v1356_v36 = vmul.f32 %v6124_v25, %v6124_v25  ;;  %vm617_vm7 = vcmp.eq.f32.partialorder %v616_v14, 8.507059e+37  ;;  %v1537_v54 = vmul.f32 %v1536_v46, %v6061_v53 }
  0x66   : > { %v611_v17 = vadd.f32 %v5528_v11, %v610_v43  ;;  %v359_v41 = vmul.f32 %v358_v16, %v6075_v28  ;;  %v6155_v45 = vmul.f32 0.5, %v5978_v3  ;;  %v636_v6 = vmul.f32 %v635_v47, %v5996_v61 }
  0x67   : > { %v656_v9 = vand.u32 2147483647, %v6120_v22  ;;  %v658_v58 = vand.u32 2147483648, %v6120_v22  ;;  %v6165_v56 = vadd.f32 1.0, %v1537_v54  ;;  %v6167_v60 = vmin.f32 %v1356_v36, 16.0 }
  0x68   : > { %v5530_v59 = vpop.eup %5529  ;;  %v615_v38 = vsel %vm6145_vm6, %v5528_v11, %v611_v17  ;;  %v360_v53 = vadd.f32 0.014752088, %v359_v41  ;;  %v1527_v48 = vadd.f32 1.1283791, %v1526_v49  ;;  %v352_v57 = vmul.f32 %v351_v51, %v6075_v28 }
  0x69   : > { %v620_v3 = vsel %vm617_vm7, %v619_v27, %v615_v38  ;;  %v648_v61 = vmul.f32 %v5530_v59, %v6120_v22  ;;  %vm652_vm8 = vweird.f32 %v6120_v22  ;;  %5531 = vrcp.f32 %v6165_v56 }
  0x6a   : > { %v621_v19 = vmul.f32 %v620_v3, %v596_v42  ;;  %v6175_v8 = vmul.f32 0.70710677, %v6161_v7  ;;  %vm653_vm9 = vweird.f32 %v5530_v59  ;;  %vm6177_vm10 = vcmp.eq.f32.partialorder %v656_v9, 8.507059e+37 }
  0x6b   : > { %v649_v50 = vsub.f32 1.0, %v648_v61  ;;  %v361_v52 = vmul.f32 %v360_v53, %v6075_v28  ;;  %v659_v10 = vor.u32 1.1754944e-38, %v658_v58  ;;  %v1358_v11 = vmul.f32 2.1237322e-06, %v6167_v60  ;;  %vm6190_vm11 = vmor %vm652_vm8, %vm653_vm9 }
  0x6c   : > { %v5322_v21 = vclamps-f32 %v621_v19, 1.0  ;;  %v1369_v4 = vmul.f32 3.8918573e-05, %v6167_v60  ;;  %v1528_v13 = vmul.f32 %v1527_v48, %v6029_v40  ;;  %v353_v18 = vadd.f32 0.18741608, %v352_v57 }
  0x6d   : > { %v650_v12 = vmul.f32 %v5530_v59, %v649_v50  ;;  %v362_v20 = vadd.f32 0.112945676, %v361_v52  ;;  %v1359_v15 = vadd.f32 0.00028619796, %v1358_v11  ;;  %v1596_v5 = vmul.f32 %v6175_v8, %v6175_v8 }
  0x6e   : > { %v670_v23 = vadd.f32 1.0, %v5322_v21  ;;  %v1370_v31 = vadd.f32 0.001143296, %v1369_v4  ;;  %vm1544_vm12 = vweird.f32 %v6165_v56  ;;  %v1548_v40 = vand.u32 2147483647, %v6165_v56 }
  0x6f   : > { %v651_v14 = vadd.f32 %v5530_v59, %v650_v12  ;;  %v363_v47 = vmul.f32 %v362_v20, %v6075_v28  ;;  %v5532_v35 = vpop.eup %5531  ;;  %v1550_v42 = vand.u32 2147483648, %v6165_v56  ;;  %v1360_v43 = vmul.f32 %v1359_v15, %v6167_v60 }
  0x70   : > { %v6202_v22 = vmul.f32 %v670_v23, %v334_v37  ;;  %v1371_v46 = vmul.f32 %v1370_v31, %v6167_v60  ;;  %v1540_v2 = vmul.f32 %v5532_v35, %v6165_v56  ;;  %v6211_v49 = vmul.f32 0.70710677, %v6197_v32 }
  0x71   : > { %v655_v16 = vsel %vm6190_vm11, %v5530_v59, %v651_v14  ;;  %v364_v27 = vadd.f32 0.4994258, %v363_v47  ;;  %v1361_v51 = vadd.f32 0.0036580483, %v1360_v43  ;;  %v6216_v17 = vmin.f32 %v1596_v5, 16.0 }
  0x72   : > { %762 = vperm.xlu0 %5461, %v6202_v22   ;;  %v660_v37 = vsel %vm6177_vm10, %v659_v10, %v655_v16  ;;  %v1372_v36 = vadd.f32 0.014752088, %v1371_v46  ;;  %v1541_v41 = vsub.f32 1.0, %v1540_v2  ;;  %vm1545_vm13 = vweird.f32 %v5532_v35 }
  0x73   : > { %v661_v54 = vmul.f32 %v660_v37, %v636_v6  ;;  %v365_v9 = vmul.f32 %v364_v27, %v6075_v28  ;;  %v1551_v58 = vor.u32 1.1754944e-38, %v1550_v42  ;;  %v1362_v59 = vmul.f32 %v1361_v51, %v6167_v60  ;;  %vm6225_vm14 = vmor %vm1544_vm12, %vm1545_vm13 }
  0x74   : > { %v1373_v38 = vmul.f32 %v1372_v36, %v6167_v60  ;;  %v1598_v53 = vmul.f32 2.1237322e-06, %v6216_v17  ;;  %v1542_v61 = vmul.f32 %v5532_v35, %v1541_v41  ;;  %v1609_v57 = vmul.f32 3.8918573e-05, %v6216_v17 }
  0x75   : > { %v5323_v3 = vclamps-f32 %v661_v54, 1.0  ;;  %v366_v48 = vadd.f32 1.0, %v365_v9  ;;  %v1363_v19 = vadd.f32 0.05243302, %v1362_v59  ;;  %v2399_v52 = vmul.f32 %v6211_v49, %v6211_v49 }
  0x76   : > { %v1374_v50 = vadd.f32 0.112945676, %v1373_v38  ;;  %v1599_v62 = vadd.f32 0.00028619796, %v1598_v53  ;;  %v1543_v10 = vadd.f32 %v5532_v35, %v1542_v61  ;;  %vm1549_vm15 = vcmp.eq.f32.partialorder %v1548_v40, 8.507059e+37 }
  0x77   : > { %v671_v21 = vadd.f32 1.0, %v5323_v3  ;;  %5533 = vrcp.f32 %v366_v48  ;;  %v354_v11 = vmul.f32 %v353_v18, %v6075_v28  ;;  %v1610_v23 = vadd.f32 0.001143296, %v1609_v57 }
  0x78   : > { %v1375_v4 = vmul.f32 %v1374_v50, %v6167_v60  ;;  %v1547_v12 = vsel %vm6225_vm14, %v5532_v35, %v1543_v10  ;;  %v1600_v20 = vmul.f32 %v1599_v62, %v6216_v17  ;;  %v1305_v26 = vmul.f32 0.5, %v6015_v29 }
  0x79   : > { %v6234_v56 = vmul.f32 %v671_v21, %v6155_v45  ;;  %v1552_v15 = vsel %vm1549_vm15, %v1551_v58, %v1547_v12  ;;  %v1364_v31 = vmul.f32 %v1363_v19, %v6167_v60  ;;  %v6241_v5 = vmin.f32 %v2399_v52, 16.0 }
  0x7a   : > { %v1553_v28 = vmul.f32 %v1552_v15, %v1528_v13  ;;  %v1376_v18 = vadd.f32 0.4994258, %v1375_v4  ;;  %v1601_v14 = vadd.f32 0.0036580483, %v1600_v20  ;;  %v1611_v45 = vmul.f32 %v1610_v23, %v6216_v17 }
  0x7b   : > { %717 = vperm.xlu1 %5458, %v6234_v56   ;;  %v355_v40 = vadd.f32 1.1283791, %v354_v11  ;;  %vm372_vm0 = vweird.f32 %v366_v48  ;;  %v376_v47 = vand.u32 2147483647, %v366_v48  ;;  %v2401_v35 = vmul.f32 2.1237322e-06, %v6241_v5 }
  0x7c   : > { %v5343_v43 = vclamps-f32 %v1553_v28, 1.0  ;;  %v1377_v29 = vmul.f32 %v1376_v18, %v6167_v60  ;;  %v1602_v46 = vmul.f32 %v1601_v14, %v6216_v17  ;;  %v1612_v16 = vadd.f32 0.014752088, %v1611_v45 }
  0x7d   : > { %v5534_v42 = vpop.eup %5533  ;;  %v378_v27 = vand.u32 2147483648, %v366_v48  ;;  %v1365_v37 = vadd.f32 0.18741608, %v1364_v31  ;;  %v2402_v13 = vadd.f32 0.00028619796, %v2401_v35  ;;  %v356_v57 = vmul.f32 %v355_v40, %v6056_v55  ;;  %v6274_v31 = vld [vmem:[%s6003_s17] sm:$0xff] }
  0x7e   : > { %v368_v2 = vmul.f32 %v5534_v42, %v366_v48  ;;  %v1641_v51 = vadd.f32 1.0, %v5343_v43  ;;  %v6248_v36 = vadd.f32 1.0, %v1377_v29  ;;  %v1613_v54 = vmul.f32 %v1612_v16, %v6216_v17 }
  0x7f   : > { %v2412_v41 = vmul.f32 3.8918573e-05, %v6241_v5  ;;  %vm373_vm1 = vweird.f32 %v5534_v42  ;;  %v1603_v58 = vadd.f32 0.05243302, %v1602_v46  ;;  %v2403_v59 = vmul.f32 %v2402_v13, %v6241_v5 }
  0x80   : > { %v369_v9 = vsub.f32 1.0, %v368_v2  ;;  %v6253_v38 = vmul.f32 %v1641_v51, %v1305_v26  ;;  %5535 = vrcp.f32 %v6248_v36  ;;  %v1366_v3 = vmul.f32 %v1365_v37, %v6167_v60  ;;  %vm6260_vm2 = vmor %vm372_vm0, %vm373_vm1 }
  0x81   : > { %v1614_v61 = vadd.f32 0.112945676, %v1613_v54  ;;  %v379_v19 = vor.u32 1.1754944e-38, %v378_v27  ;;  %v2404_v50 = vadd.f32 0.0036580483, %v2403_v59  ;;  %vm377_vm3 = vcmp.eq.f32.partialorder %v376_v47, 8.507059e+37 }
  0x82   : > { %v370_v53 = vmul.f32 %v5534_v42, %v369_v9  ;;  %1729 = vperm.xlu0 %5461, %v6253_v38   ;;  %v2413_v62 = vadd.f32 0.001143296, %v2412_v41  ;;  %v1604_v60 = vmul.f32 %v1603_v58, %v6216_v17  ;;  %v328_v10 = vmul.f32 0.5, %v6036_v44  ;;  %v6305_v59 = vld [vmem:[%s6003_s17 + $0x30] sm:$0xff] }
  0x83   : > { %5462 = vset.pattern.permute.xlu1 %v9746_v0  ;;  %v1615_v21 = vmul.f32 %v1614_v61, %v6216_v17  ;;  %v2405_v55 = vmul.f32 %v2404_v50, %v6241_v5  ;;  %v1367_v4 = vadd.f32 1.1283791, %v1366_v3  ;;  %vm1384_vm4 = vweird.f32 %v6248_v36  ;;  %v6316_v61 = vld [vmem:[%s6003_s17 + $0x10] sm:$0xff] }
  0x84   : > { %v371_v52 = vadd.f32 %v5534_v42, %v370_v53  ;;  %746 = vperm.xlu1 %5462, %v6018_v30   ;;  %v2414_v48 = vmul.f32 %v2413_v62, %v6241_v5  ;;  %v1605_v14 = vadd.f32 0.18741608, %v1604_v60  ;;  %v1388_v45 = vand.u32 2147483647, %v6248_v36 }
  0x85   : > { %v1616_v12 = vadd.f32 0.4994258, %v1615_v21  ;;  %v2406_v26 = vadd.f32 0.05243302, %v2405_v55  ;;  %v1390_v44 = vand.u32 2147483648, %v6248_v36  ;;  %v9748_v29 = vmov 2  }
  0x86   : > { %v375_v11 = vsel %vm6260_vm2, %v5534_v42, %v371_v52  ;;  %v5536_v20 = vpop.eup %5535  ;;  %v2415_v15 = vadd.f32 0.014752088, %v2414_v48  ;;  %v6283_v43 = vmul.f32 0.70710677, %v6274_v31  ;;  %v1606_v13 = vmul.f32 %v1605_v14, %v6216_v17  ;;  %v6329_v21 = vld [vmem:[%s6003_s17 + $0x18] sm:$0xff] }
  0x87   : > { %v380_v23 = vsel %vm377_vm3, %v379_v19, %v375_v11  ;;  %v1380_v18 = vmul.f32 %v5536_v20, %v6248_v36  ;;  %v1617_v40 = vmul.f32 %v1616_v12, %v6216_v17  ;;  %vm1385_vm5 = vweird.f32 %v5536_v20 }
  0x88   : > { %v381_v28 = vmul.f32 %v380_v23, %v356_v57  ;;  %v2416_v47 = vmul.f32 %v2415_v15, %v6241_v5  ;;  %v2407_v16 = vmul.f32 %v2406_v26, %v6241_v5  ;;  %v1316_v51 = vmul.f32 %v6283_v43, %v6283_v43  ;;  %vm6299_vm6 = vmor %vm1384_vm4, %vm1385_vm5 }
  0x89   : > { %v1381_v42 = vsub.f32 1.0, %v1380_v18  ;;  %v6286_v46 = vadd.f32 1.0, %v1617_v40  ;;  %v1301_v54 = vmul.f32 0.5, %v6111_v63  ;;  %v1368_v41 = vmul.f32 %v1367_v4, %v6124_v25 }
  0x8a   : > { %v5316_v35 = vclamps-f32 %v381_v28, 1.0  ;;  %5471 = vset.pattern.permute.xlu0 %v9748_v29  ;;  %v2417_v2 = vadd.f32 0.112945676, %v2416_v47  ;;  %v1391_v58 = vor.u32 1.1754944e-38, %v1390_v44  ;;  %vm1389_vm7 = vcmp.eq.f32.partialorder %v1388_v45, 8.507059e+37 }
  0x8b   : > { %791 = vperm.xlu0 %5471, %v6038_v39   ;;  %v1382_v37 = vmul.f32 %v5536_v20, %v1381_v42  ;;  %5537 = vrcp.f32 %v6286_v46  ;;  %v2408_v25 = vadd.f32 0.18741608, %v2407_v16  ;;  %v6310_v3 = vmin.f32 %v1316_v51, 16.0 }
  0x8c   : > { %v664_v27 = vadd.f32 1.0, %v5316_v35  ;;  %754 = vperm.xlu1 %5462, %v6010_v24   ;;  %v2418_v63 = vmul.f32 %v2417_v2, %v6241_v5  ;;  %v6313_v36 = vmul.f32 0.70710677, %v6305_v59  ;;  %v1607_v6 = vadd.f32 1.1283791, %v1606_v13 }
  0x8d   : > { %v1383_v53 = vadd.f32 %v5536_v20, %v1382_v37  ;;  %v6322_v50 = vmul.f32 0.70710677, %v6316_v61  ;;  %vm1624_vm8 = vweird.f32 %v6286_v46  ;;  %v1329_v52 = vmul.f32 3.8918573e-05, %v6310_v3 }
  0x8e   : > { %v6307_v17 = vmul.f32 %v664_v27, %v328_v10  ;;  %v2419_v19 = vadd.f32 0.4994258, %v2418_v63  ;;  %v1556_v60 = vmul.f32 %v6313_v36, %v6313_v36  ;;  %v1628_v48 = vand.u32 2147483647, %v6286_v46 }
  0x8f   : > { %v1387_v57 = vsel %vm6299_vm6, %v5536_v20, %v1383_v53  ;;  %v1396_v11 = vmul.f32 %v6322_v50, %v6322_v50  ;;  %v2409_v12 = vmul.f32 %v2408_v25, %v6241_v5  ;;  %v1330_v20 = vadd.f32 0.001143296, %v1329_v52 }
  0x90   : > { %738 = vperm.xlu2 %5460, %v6307_v17   ;;  %v1392_v62 = vsel %vm1389_vm7, %v1391_v58, %v1387_v57  ;;  %v2420_v10 = vmul.f32 %v2419_v19, %v6241_v5  ;;  %v6336_v23 = vmin.f32 %v1556_v60, 16.0  ;;  %v6339_v26 = vmul.f32 0.70710677, %v6329_v21 }
  0x91   : > { %v1393_v55 = vmul.f32 %v1392_v62, %v1368_v41  ;;  %v5538_v4 = vpop.eup %5537  ;;  %v1630_v18 = vand.u32 2147483648, %v6286_v46  ;;  %v1331_v45 = vmul.f32 %v1330_v20, %v6310_v3  ;;  %v6349_v44 = vmin.f32 %v1396_v11, 16.0 }
  0x92   : > { %v1620_v28 = vmul.f32 %v5538_v4, %v6286_v46  ;;  %v6345_v14 = vadd.f32 1.0, %v2420_v10  ;;  %v1569_v5 = vmul.f32 3.8918573e-05, %v6336_v23  ;;  %v1436_v40 = vmul.f32 %v6339_v26, %v6339_v26 }
  0x93   : > { %811 = vperm.xlu0 %5471, %v6202_v22   ;;  %v5339_v15 = vclamps-f32 %v1393_v55, 1.0  ;;  %vm1625_vm9 = vweird.f32 %v5538_v4  ;;  %v1307_v42 = vmul.f32 0.5, %v6161_v7  ;;  %v2410_v16 = vadd.f32 1.1283791, %v2409_v12 }
  0x94   : > { %766 = vperm.xlu1 %5462, %v6234_v56   ;;  %v1621_v35 = vsub.f32 1.0, %v1620_v28  ;;  %5539 = vrcp.f32 %v6345_v14  ;;  %v1332_v2 = vadd.f32 0.014752088, %v1331_v45  ;;  %v6355_v27 = vmin.f32 %v1436_v40, 16.0  ;;  %vm6364_vm10 = vmor %vm1624_vm8, %vm1625_vm9 }
  0x95   : > { %v1637_v47 = vadd.f32 1.0, %v5339_v15  ;;  %v1570_v51 = vadd.f32 0.001143296, %v1569_v5  ;;  %v1409_v41 = vmul.f32 3.8918573e-05, %v6349_v44  ;;  %v1608_v9 = vmul.f32 %v1607_v6, %v6175_v8 }
  0x96   : > { %v1622_v13 = vmul.f32 %v5538_v4, %v1621_v35  ;;  %vm6368_vm11 = vcmp.eq.f32.partialorder %v1628_v48, 8.507059e+37  ;;  %v1631_v53 = vor.u32 1.1754944e-38, %v1630_v18  ;;  %v1449_v19 = vmul.f32 3.8918573e-05, %v6355_v27 }
  0x97   : > { %v6358_v37 = vmul.f32 %v1637_v47, %v1301_v54  ;;  %v1333_v54 = vmul.f32 %v1332_v2, %v6310_v3  ;;  %v1571_v25 = vmul.f32 %v1570_v51, %v6336_v23  ;;  %v1410_v57 = vadd.f32 0.001143296, %v1409_v41 }
  0x98   : > { %750 = vperm.xlu2 %5460, %v6134_v34   ;;  %v1623_v63 = vadd.f32 %v5538_v4, %v1622_v13  ;;  %v2411_v8 = vmul.f32 %v2410_v16, %v6211_v49  ;;  %vm2427_vm12 = vweird.f32 %v6345_v14  ;;  %v2431_v46 = vand.u32 2147483647, %v6345_v14 }
  0x99   : > { %v1334_v6 = vadd.f32 0.112945676, %v1333_v54  ;;  %v1572_v60 = vadd.f32 0.014752088, %v1571_v25  ;;  %v1411_v55 = vmul.f32 %v1410_v57, %v6349_v44  ;;  %v1450_v48 = vadd.f32 0.001143296, %v1449_v19 }
  0x9a   : > { %v5540_v62 = vpop.eup %5539  ;;  %v1627_v52 = vsel %vm6364_vm10, %v5538_v4, %v1623_v63  ;;  %v2433_v11 = vand.u32 2147483648, %v6345_v14  ;;  %v1318_v12 = vmul.f32 2.1237322e-06, %v6310_v3  ;;  %vm2432_vm15 = vcmp.eq.f32.partialorder %v2431_v46, 8.507059e+37 }
  0x9b   : > { %1761 = vperm.xlu0 %5471, %v6358_v37   ;;  %v1632_v49 = vsel %vm6368_vm11, %v1631_v53, %v1627_v52  ;;  %v2423_v10 = vmul.f32 %v5540_v62, %v6345_v14  ;;  %v1335_v15 = vmul.f32 %v1334_v6, %v6310_v3  ;;  %v1573_v4 = vmul.f32 %v1572_v60, %v6336_v23 }
  0x9c   : > { %5464 = vset.pattern.permute.xlu1 %v9748_v29  ;;  %v1633_v20 = vmul.f32 %v1632_v49, %v1608_v9  ;;  %v1412_v28 = vadd.f32 0.014752088, %v1411_v55  ;;  %vm2428_vm13 = vweird.f32 %v5540_v62  ;;  %v1319_v45 = vadd.f32 0.00028619796, %v1318_v12 }
  0x9d   : > { %795 = vperm.xlu1 %5464, %v6018_v30   ;;  %v2424_v18 = vsub.f32 1.0, %v2423_v10  ;;  %v1451_v5 = vmul.f32 %v1450_v48, %v6355_v27  ;;  %v1336_v47 = vadd.f32 0.4994258, %v1335_v15  ;;  %v1574_v35 = vadd.f32 0.112945676, %v1573_v4  ;;  %vm6397_vm14 = vmor %vm2427_vm12, %vm2428_vm13  ;;  %v6420_v15 = vld [vmem:[%s6003_s17 + $0x20] sm:$0xff]  ;;  %s298_s17 = sadd.s32 %s5308_s15, %s5307_s14 }
  0x9e   : > { %v5345_v40 = vclamps-f32 %v1633_v20, 1.0  ;;  %v1413_v16 = vmul.f32 %v1412_v28, %v6349_v44  ;;  %v2434_v13 = vor.u32 1.1754944e-38, %v2433_v11  ;;  %v1320_v51 = vmul.f32 %v1319_v45, %v6310_v3  ;;  %s5309_s19 = sshll.u32 %s298_s17, 3 }
  0x9f   : > { %v2425_v2 = vmul.f32 %v5540_v62, %v2424_v18  ;;  %v1452_v41 = vadd.f32 0.014752088, %v1451_v5  ;;  %v1337_v7 = vmul.f32 %v1336_v47, %v6310_v3  ;;  %v1575_v53 = vmul.f32 %v1574_v35, %v6336_v23  ;;  %s9685_s12 = scalar_lea.vmem %s9741_s7, %s5309_s19 }
  0xa0   : > { %758 = vperm.xlu2 %5460, %v6078_v33   ;;  %v1643_v9 = vadd.f32 1.0, %v5345_v40  ;;  %v1414_v54 = vadd.f32 0.112945676, %v1413_v16  ;;  %v1321_v25 = vadd.f32 0.0036580483, %v1320_v51  ;;  %v2266_v4 = vmul.f32 0.5, %v6197_v32 }
  0xa1   : > { %v2426_v63 = vadd.f32 %v5540_v62, %v2425_v2  ;;  %v1558_v57 = vmul.f32 2.1237322e-06, %v6336_v23  ;;  %v6406_v6 = vadd.f32 1.0, %v1337_v7  ;;  %v1576_v52 = vadd.f32 0.4994258, %v1575_v53 }
  0xa2   : > { %v6404_v19 = vmul.f32 %v1643_v9, %v1307_v42  ;;  %v1415_v14 = vmul.f32 %v1414_v54, %v6349_v44  ;;  %v1398_v48 = vmul.f32 2.1237322e-06, %v6349_v44  ;;  %v1453_v46 = vmul.f32 %v1452_v41, %v6355_v27 }
  0xa3   : > { %v2430_v60 = vsel %vm6397_vm14, %v5540_v62, %v2426_v63  ;;  %v1559_v55 = vadd.f32 0.00028619796, %v1558_v57  ;;  %v1322_v49 = vmul.f32 %v1321_v25, %v6310_v3  ;;  %v1577_v10 = vmul.f32 %v1576_v52, %v6336_v23 }
  0xa4   : > { %1785 = vperm.xlu0 %5471, %v6404_v19   ;;  %v2435_v42 = vsel %vm2432_vm15, %v2434_v13, %v2430_v60  ;;  %v1416_v11 = vadd.f32 0.4994258, %v1415_v14  ;;  %5541 = vrcp.f32 %v6406_v6  ;;  %v1399_v20 = vadd.f32 0.00028619796, %v1398_v48 }
  0xa5   : > { %803 = vperm.xlu1 %5464, %v6010_v24   ;;  %v2436_v12 = vmul.f32 %v2435_v42, %v2411_v8  ;;  %v1560_v62 = vmul.f32 %v1559_v55, %v6336_v23  ;;  %v6424_v28 = vadd.f32 1.0, %v1577_v10  ;;  %v1438_v45 = vmul.f32 2.1237322e-06, %v6355_v27 }
  0xa6   : > { %v1417_v18 = vmul.f32 %v1416_v11, %v6349_v44  ;;  %v1400_v40 = vmul.f32 %v1399_v20, %v6349_v44  ;;  %v1454_v47 = vadd.f32 0.112945676, %v1453_v46  ;;  %v6434_v32 = vmul.f32 0.70710677, %v6420_v15 }
  0xa7   : > { %v5363_v8 = vclamps-f32 %v2436_v12, 1.0  ;;  %v1561_v5 = vadd.f32 0.0036580483, %v1560_v62  ;;  %5543 = vrcp.f32 %v6424_v28  ;;  %v1439_v16 = vadd.f32 0.00028619796, %v1438_v45 }
  0xa8   : > { %5463 = vset.pattern.permute.xlu2 %v9748_v29  ;;  %v6431_v35 = vadd.f32 1.0, %v1417_v18  ;;  %v1323_v13 = vadd.f32 0.05243302, %v1322_v49  ;;  %v1401_v51 = vadd.f32 0.0036580483, %v1400_v40  ;;  %v1455_v7 = vmul.f32 %v1454_v47, %v6355_v27 }
  0xa9   : > { %787 = vperm.xlu2 %5463, %v6307_v17   ;;  %v2602_v2 = vadd.f32 1.0, %v5363_v8  ;;  %v1562_v41 = vmul.f32 %v1561_v5, %v6336_v23  ;;  %v1440_v54 = vmul.f32 %v1439_v16, %v6355_v27  ;;  %v1476_v25 = vmul.f32 %v6434_v32, %v6434_v32 }
  0xaa   : > { %5545 = vrcp.f32 %v6431_v35  ;;  %v6438_v9 = vpop.eup %5541  ;;  %v1402_v53 = vmul.f32 %v1401_v51, %v6349_v44  ;;  %v1324_v63 = vmul.f32 %v1323_v13, %v6310_v3  ;;  %v1456_v48 = vadd.f32 0.4994258, %v1455_v7 }
  0xab   : > { %v6440_v58 = vmul.f32 %v2602_v2, %v2266_v4  ;;  %v1340_v52 = vmul.f32 %v6438_v9, %v6406_v6  ;;  %v1563_v14 = vadd.f32 0.05243302, %v1562_v41  ;;  %v1441_v49 = vadd.f32 0.0036580483, %v1440_v54 }
  0xac   : > { %v1403_v60 = vadd.f32 0.05243302, %v1402_v53  ;;  %v1325_v10 = vadd.f32 0.18741608, %v1324_v63  ;;  %v6460_v11 = vmin.f32 %v1476_v25, 16.0  ;;  %v9744_v18 = vmov 3  }
  0xad   : > { %815 = vperm.xlu1 %5464, %v6234_v56   ;;  %2732 = vperm.xlu0 %5471, %v6440_v58   ;;  %v6450_v57 = vpop.eup %5543  ;;  %v1341_v12 = vsub.f32 1.0, %v1340_v52  ;;  %v1564_v62 = vmul.f32 %v1563_v14, %v6336_v23  ;;  %v1457_v8 = vmul.f32 %v1456_v48, %v6355_v27  ;;  %v1442_v5 = vmul.f32 %v1441_v49, %v6355_v27 }
  0xae   : > { %v1580_v55 = vmul.f32 %v6450_v57, %v6424_v28  ;;  %v1404_v42 = vmul.f32 %v1403_v60, %v6349_v44  ;;  %v1326_v40 = vmul.f32 %v1325_v10, %v6310_v3  ;;  %vm1344_vm0 = vweird.f32 %v6406_v6 }
  0xaf   : > { %vm1345_vm1 = vweird.f32 %v6438_v9  ;;  %v1489_v47 = vmul.f32 3.8918573e-05, %v6460_v11  ;;  %v1342_v16 = vmul.f32 %v6438_v9, %v1341_v12  ;;  %v1565_v2 = vadd.f32 0.18741608, %v1564_v62 }
  0xb0   : > { %v6457_v46 = vpop.eup %5545  ;;  %v1405_v20 = vadd.f32 0.18741608, %v1404_v42  ;;  %v1581_v45 = vsub.f32 1.0, %v1580_v55  ;;  %vm1424_vm2 = vweird.f32 %v6431_v35  ;;  %v6481_v3 = vadd.f32 1.0, %v1457_v8  ;;  %vm6501_vm7 = vmor %vm1344_vm0, %vm1345_vm1 }
  0xb1   : > { %799 = vperm.xlu2 %5463, %v6134_v34   ;;  %v1420_v4 = vmul.f32 %v6457_v46, %v6431_v35  ;;  %vm1425_vm3 = vweird.f32 %v6457_v46  ;;  %v1428_v53 = vand.u32 2147483647, %v6431_v35  ;;  %v1443_v54 = vadd.f32 0.05243302, %v1442_v5 }
  0xb2   : > { %v1406_v13 = vmul.f32 %v1405_v20, %v6349_v44  ;;  %v1582_v51 = vmul.f32 %v6450_v57, %v1581_v45  ;;  %v1348_v63 = vand.u32 2147483647, %v6406_v6  ;;  %v1350_v44 = vand.u32 2147483648, %v6406_v6  ;;  %vm6489_vm6 = vmor %vm1424_vm2, %vm1425_vm3 }
  0xb3   : > { %vm1584_vm4 = vweird.f32 %v6424_v28  ;;  %vm1585_vm5 = vweird.f32 %v6450_v57  ;;  %v1343_v52 = vadd.f32 %v6438_v9, %v1342_v16  ;;  %v1566_v14 = vmul.f32 %v1565_v2, %v6336_v23 }
  0xb4   : > { %v1407_v41 = vadd.f32 1.1283791, %v1406_v13  ;;  %v1590_v60 = vand.u32 2147483648, %v6424_v28  ;;  %v1583_v42 = vadd.f32 %v6450_v57, %v1582_v51  ;;  %v1588_v49 = vand.u32 2147483647, %v6424_v28  ;;  %vm6510_vm8 = vmor %vm1584_vm4, %vm1585_vm5 }
  0xb5   : > { %5466 = vset.pattern.permute.xlu1 %v9744_v18  ;;  %5492 = vset.pattern.permute.xlu0 %v9742_v1  ;;  %v1430_v23 = vand.u32 2147483648, %v6431_v35  ;;  %vm6517_vm9 = vcmp.eq.f32.partialorder %v1428_v53, 8.507059e+37  ;;  %v1444_v28 = vmul.f32 %v1443_v54, %v6355_v27  ;;  %5547 = vrcp.f32 %v6481_v3 }
  0xb6   : > { %844 = vperm.xlu1 %5466, %v6018_v30   ;;  %682 = vperm.xlu0 %5492, %v6307_v17   ;;  %v1421_v30 = vsub.f32 1.0, %v1420_v4  ;;  %v1408_v10 = vmul.f32 %v1407_v41, %v6322_v50  ;;  %v1327_v50 = vadd.f32 1.1283791, %v1326_v40  ;;  %vm6523_vm10 = vcmp.eq.f32.partialorder %v1348_v63, 8.507059e+37  ;;  %v6528_v4 = vld [vmem:[%s6183_s21 + $0x8] sm:$0xff] }
  0xb7   : > { %v1431_v20 = vor.u32 1.1754944e-38, %v1430_v23  ;;  %v1567_v45 = vadd.f32 1.1283791, %v1566_v14  ;;  %v1478_v8 = vmul.f32 2.1237322e-06, %v6460_v11  ;;  %v1587_v40 = vsel %vm6510_vm8, %v6450_v57, %v1583_v42 }
  0xb8   : > { %v1422_v7 = vmul.f32 %v6457_v46, %v1421_v30  ;;  %v1490_v5 = vadd.f32 0.001143296, %v1489_v47  ;;  %vm6539_vm11 = vcmp.eq.f32.partialorder %v1588_v49, 8.507059e+37  ;;  %v1591_v2 = vor.u32 1.1754944e-38, %v1590_v60 }
  0xb9   : > { %807 = vperm.xlu2 %5463, %v6078_v33   ;;  %v1445_v30 = vadd.f32 0.18741608, %v1444_v28  ;;  %v1479_v51 = vadd.f32 0.00028619796, %v1478_v8  ;;  %v1328_v41 = vmul.f32 %v1327_v50, %v6283_v43  ;;  %v1568_v54 = vmul.f32 %v1567_v45, %v6313_v36 }
  0xba   : > { %v1423_v55 = vadd.f32 %v6457_v46, %v1422_v7  ;;  %v1491_v47 = vmul.f32 %v1490_v5, %v6460_v11  ;;  %v6551_v7 = vmul.f32 0.70710677, %v6528_v4  ;;  %v1592_v25 = vsel %vm6539_vm11, %v1591_v2, %v1587_v40 }
  0xbb   : > { %v5548_v53 = vpop.eup %5547  ;;  %v1446_v60 = vmul.f32 %v1445_v30, %v6355_v27  ;;  %vm1464_vm12 = vweird.f32 %v6481_v3  ;;  %v1468_v27 = vand.u32 2147483647, %v6481_v3 }
  0xbc   : > { %v1427_v6 = vsel %vm6489_vm6, %v6457_v46, %v1423_v55  ;;  %v1347_v46 = vsel %vm6501_vm7, %v6438_v9, %v1343_v52  ;;  %v1302_v52 = vmul.f32 0.5, %v6316_v61  ;;  %v1460_v43 = vmul.f32 %v5548_v53, %v6481_v3 }
  0xbd   : > { %v1432_v13 = vsel %vm6517_vm9, %v1431_v20, %v1427_v6  ;;  %v2319_v14 = vmul.f32 %v6551_v7, %v6551_v7  ;;  %vm1465_vm13 = vweird.f32 %v5548_v53  ;;  %v1593_v61 = vmul.f32 %v1592_v25, %v1568_v54 }
  0xbe   : > { %852 = vperm.xlu1 %5466, %v6010_v24   ;;  %v1351_v24 = vor.u32 1.1754944e-38, %v1350_v44  ;;  %687 = vperm.xlu0 %5492, %v6038_v39   ;;  %v1433_v9 = vmul.f32 %v1432_v13, %v1408_v10  ;;  %v1480_v44 = vmul.f32 %v1479_v51, %v6460_v11  ;;  %v1461_v42 = vsub.f32 1.0, %v1460_v43  ;;  %vm6576_vm14 = vmor %vm1464_vm12, %vm1465_vm13 }
  0xbf   : > { %v6565_v49 = vmin.f32 %v2319_v14, 16.0  ;;  %v1470_v10 = vand.u32 2147483648, %v6481_v3  ;;  %v1447_v50 = vadd.f32 1.1283791, %v1446_v60  ;;  %v5344_v40 = vclamps-f32 %v1593_v61, 1.0 }
  0xc0   : > { %v1352_v57 = vsel %vm6523_vm10, %v1351_v24, %v1347_v46  ;;  %v5340_v63 = vclamps-f32 %v1433_v9, 1.0  ;;  %v1481_v36 = vadd.f32 0.0036580483, %v1480_v44  ;;  %v1462_v12 = vmul.f32 %v5548_v53, %v1461_v42 }
  0xc1   : > { %5465 = vset.pattern.permute.xlu2 %v9744_v18  ;;  %v2321_v6 = vmul.f32 2.1237322e-06, %v6565_v49  ;;  %v2332_v62 = vmul.f32 3.8918573e-05, %v6565_v49  ;;  %v1353_v28 = vmul.f32 %v1352_v57, %v1328_v41  ;;  %v1471_v16 = vor.u32 1.1754944e-38, %v1470_v10 }
  0xc2   : > { %836 = vperm.xlu2 %5465, %v6307_v17   ;;  %v1492_v17 = vadd.f32 0.014752088, %v1491_v47  ;;  %v1638_v48 = vadd.f32 1.0, %v5340_v63  ;;  %v1482_v23 = vmul.f32 %v1481_v36, %v6460_v11  ;;  %v1463_v45 = vadd.f32 %v5548_v53, %v1462_v12  ;;  %v6608_v12 = vpop.permute.xlu1 %692 }
  0xc3   : > { %v2322_v8 = vadd.f32 0.00028619796, %v2321_v6  ;;  %v2333_v5 = vadd.f32 0.001143296, %v2332_v62  ;;  %vm1469_vm15 = vcmp.eq.f32.partialorder %v1468_v27, 8.507059e+37  ;;  %v5338_v51 = vclamps-f32 %v1353_v28, 1.0 }
  0xc4   : > { %v1493_v55 = vmul.f32 %v1492_v17, %v6460_v11  ;;  %v1483_v24 = vadd.f32 0.05243302, %v1482_v23  ;;  %v6581_v46 = vmul.f32 %v1638_v48, %v1302_v52  ;;  %v1448_v47 = vmul.f32 %v1447_v50, %v6339_v26  ;;  %v6601_v48 = vpop.permute.xlu2 %702 }
  0xc5   : > { %v2323_v3 = vmul.f32 %v2322_v8, %v6565_v49  ;;  %v2334_v13 = vmul.f32 %v2333_v5, %v6565_v49  ;;  %v1642_v54 = vadd.f32 1.0, %v5344_v40  ;;  %v1300_v43 = vmul.f32 0.5, %v6274_v31 }
  0xc6   : > { %864 = vperm.xlu1 %5466, %v6234_v56   ;;  %712 = vperm.xlu0 %5492, %v6202_v22   ;;  %v1494_v56 = vadd.f32 0.112945676, %v1493_v55  ;;  %v1484_v9 = vmul.f32 %v1483_v24, %v6460_v11  ;;  %v1636_v26 = vadd.f32 1.0, %v5338_v51  ;;  %v1303_v31 = vmul.f32 0.5, %v6329_v21 }
  0xc7   : > { %v2324_v41 = vadd.f32 0.0036580483, %v2323_v3  ;;  %v2335_v57 = vadd.f32 0.014752088, %v2334_v13  ;;  %v6621_v3 = vpop.permute.xlu0 %742  ;;  %vm1248_vm10 = vcmask 261120   ;;  %vm1257_vm13 = vcmask 253952  }
  0xc8   : > { %v1495_v20 = vmul.f32 %v1494_v56, %v6460_v11  ;;  %v1485_v52 = vadd.f32 0.18741608, %v1484_v9  ;;  %v6604_v61 = vmul.f32 %v1636_v26, %v1300_v43 }
  0xc9   : > { %v2325_v17 = vmul.f32 %v2324_v41, %v6565_v49  ;;  %v2336_v25 = vmul.f32 %v2335_v57, %v6565_v49 }
  0xca   : > { %848 = vperm.xlu2 %5465, %v6134_v34   ;;  %v1496_v2 = vadd.f32 0.4994258, %v1495_v20  ;;  %v1467_v34 = vsel %vm6576_vm14, %v5548_v53, %v1463_v45  ;;  %v1306_v53 = vmul.f32 0.5, %v6305_v59  ;;  %v1486_v42 = vmul.f32 %v1485_v52, %v6460_v11 }
  0xcb   : > { %v1472_v63 = vsel %vm1469_vm15, %v1471_v16, %v1467_v34  ;;  %v2337_v60 = vadd.f32 0.112945676, %v2336_v25  ;;  %v2326_v55 = vadd.f32 0.05243302, %v2325_v17  ;;  %vm1266_vm14 = vcmask 261127  }
  0xcc   : > { %v1497_v30 = vmul.f32 %v1496_v2, %v6460_v11  ;;  %v1473_v14 = vmul.f32 %v1472_v63, %v1448_v47  ;;  %v6598_v36 = vmul.f32 %v1642_v54, %v1306_v53  ;;  %v1487_v62 = vadd.f32 1.1283791, %v1486_v42  ;;  %v6617_v16 = vpop.permute.xlu2 %707 }
  0xcd   : > { %v2338_v59 = vmul.f32 %v2337_v60, %v6565_v49  ;;  %v2327_v27 = vmul.f32 %v2326_v55, %v6565_v49  ;;  %v2264_v42 = vmul.f32 0.5, %v6528_v4  ;;  %v301_v4 = vld [vmem:[%s9735_s1] sm:$0xf] }
  0xce   : > { %5468 = vset.pattern.permute.xlu1 %v9742_v1  ;;  %1659 = vperm.xlu0 %5492, %v6358_v37   ;;  %v1498_v44 = vadd.f32 1.0, %v1497_v30  ;;  %v5341_v10 = vclamps-f32 %v1473_v14, 1.0  ;;  %v1488_v5 = vmul.f32 %v1487_v62, %v6434_v32  ;;  %v1304_v32 = vmul.f32 0.5, %v6420_v15 }
  0xcf   : > { %1664 = vperm.xlu1 %5468, %v6581_v46   ;;  %v2328_v20 = vadd.f32 0.18741608, %v2327_v27  ;;  %v6653_v62 = vperm.slane %v301_v4, 1 }
  0xd0   : > { %5549 = vrcp.f32 %v1498_v44  ;;  %vm1504_vm0 = vweird.f32 %v1498_v44  ;;  %v1508_v11 = vand.u32 2147483647, %v1498_v44  ;;  %v1510_v28 = vand.u32 2147483648, %v1498_v44 }
  0xd1   : > { %v1639_v50 = vadd.f32 1.0, %v5341_v10  ;;  %v2329_v34 = vmul.f32 %v2328_v20, %v6565_v49 }
  0xd2   : > { %856 = vperm.xlu2 %5465, %v6078_v33   ;;  %v2339_v33 = vadd.f32 0.4994258, %v2338_v59  ;;  %v1511_v45 = vor.u32 1.1754944e-38, %v1510_v28  ;;  %vm1509_vm3 = vcmp.eq.f32.partialorder %v1508_v11, 8.507059e+37 }
  0xd3   : > { %v6614_v8 = vmul.f32 %v1639_v50, %v1303_v31  ;;  %v2330_v57 = vadd.f32 1.1283791, %v2329_v34 }
  0xd4   : > { %v2340_v6 = vmul.f32 %v2339_v33, %v6565_v49 }
  0xd5   : > { %v2331_v43 = vmul.f32 %v2330_v57, %v6551_v7 }
  0xd6   : > { %v5550_v23 = vpop.eup %5549  ;;  %1684 = vperm.xlu0 %5492, %v6598_v36   ;;  %v2341_v24 = vadd.f32 1.0, %v2340_v6  ;;  %v6649_v6 = vperm.slane %v301_v4, 0 }
  0xd7   : > { %v1500_v56 = vmul.f32 %v5550_v23, %v1498_v44  ;;  %vm1505_vm1 = vweird.f32 %v5550_v23  ;;  %v6624_v51 = vpop.permute.xlu1 %697 }
  0xd8   : > { %5551 = vrcp.f32 %v2341_v24  ;;  %vm1506_vm2 = vmor %vm1504_vm0, %vm1505_vm1  ;;  %v2353_v53 = vand.u32 2147483648, %v2341_v24  ;;  %vm2347_vm4 = vweird.f32 %v2341_v24  ;;  %v2351_v63 = vand.u32 2147483647, %v2341_v24 }
  0xd9   : > { %v1501_v35 = vsub.f32 1.0, %v1500_v56  ;;  %v725_v50 = vmul.f32 %v6649_v6, %v6601_v48 }
  0xda   : > { %5467 = vset.pattern.permute.xlu2 %v9742_v1  ;;  %v2354_v25 = vor.u32 1.1754944e-38, %v2353_v53  ;;  %vm2352_vm7 = vcmp.eq.f32.partialorder %v2351_v63, 8.507059e+37  ;;  %v723_v63 = vmul.f32 %v6649_v6, %v6608_v12 }
  0xdb   : > { %1654 = vperm.xlu2 %5467, %v6604_v61   ;;  %v1502_v21 = vmul.f32 %v5550_v23, %v1501_v35 }
  0xdd   : > { %v1503_v40 = vadd.f32 %v5550_v23, %v1502_v21 }
  0xde   : > { %2632 = vperm.xlu0 %5492, %v6440_v58   ;;  %v5552_v9 = vpop.eup %5551 }
  0xdf   : > { %v1507_v2 = vsel %vm1506_vm2, %v5550_v23, %v1503_v40  ;;  %v2343_v47 = vmul.f32 %v5552_v9, %v2341_v24  ;;  %vm2348_vm5 = vweird.f32 %v5552_v9 }
  0xe0   : > { %v1512_v13 = vsel %vm1509_vm3, %v1511_v45, %v1507_v2  ;;  %vm2349_vm6 = vmor %vm2347_vm4, %vm2348_vm5 }
  0xe1   : > { %v1513_v30 = vmul.f32 %v1512_v13, %v1488_v5  ;;  %v2344_v54 = vsub.f32 1.0, %v2343_v47 }
  0xe3   : > { %1669 = vperm.xlu2 %5467, %v6614_v8   ;;  %v5342_v41 = vclamps-f32 %v1513_v30, 1.0  ;;  %v2345_v44 = vmul.f32 %v5552_v9, %v2344_v54  ;;  %v724_v30 = vmul.f32 %v6649_v6, %v6624_v51 }
  0xe4   : > { %v6634_v15 = vpop.permute.xlu0 %762 }
  0xe5   : > { %v1640_v49 = vadd.f32 1.0, %v5342_v41  ;;  %v2346_v26 = vadd.f32 %v5552_v9, %v2345_v44  ;;  %v6704_v41 = vperm.slane %v301_v4, 3 }
  0xe7   : > { %v6627_v17 = vmul.f32 %v1640_v49, %v1304_v32  ;;  %v2350_v14 = vsel %vm2349_vm6, %v5552_v9, %v2346_v26  ;;  %v6693_v9 = vperm.slane %v301_v4, 2 }
  0xe8   : > { %v2355_v60 = vsel %vm2352_vm7, %v2354_v25, %v2350_v14  ;;  %v6716_v25 = vld [vmem:[%s9736_s2] ss:$0 sm:$0xff] }
  0xe9   : > { %1674 = vperm.xlu1 %5468, %v6627_v17   ;;  %v2356_v59 = vmul.f32 %v2355_v60, %v2331_v43  ;;  %v726_v60 = vmul.f32 %v6649_v6, %v6617_v16 }
  0xea   : > { %v6629_v52 = vpop.permute.xlu2 %738 }
  0xeb   : > { %1679 = vperm.xlu2 %5467, %v6253_v38   ;;  %v5361_v10 = vclamps-f32 %v2356_v59, 1.0  ;;  %v770_v16 = vmul.f32 %v6653_v62, %v6629_v52 }
  0xed   : > { %v718_v55 = vpop.permute.xlu1 %717  ;;  %v2600_v33 = vadd.f32 1.0, %v5361_v10 }
  0xee   : > { %v728_v5 = vmul.f32 %v6649_v6, %v718_v55 }
  0xef   : > { %v6639_v7 = vmul.f32 %v2600_v33, %v2264_v42 }
  0xf1   : > { %5469 = vset.pattern.permute.xlu1 %v9746_v0  ;;  %2622 = vperm.xlu0 %5492, %v6639_v7  }
  0xf2   : > { %v751_v23 = vpop.permute.xlu2 %750  ;;  %1709 = vperm.xlu1 %5469, %v6604_v61  }
  0xf3   : > { %5470 = vset.pattern.permute.xlu2 %v9746_v0 }
  0xf4   : > { %1721 = vperm.xlu2 %5470, %v6614_v8   ;;  %v6643_v31 = vpop.permute.xlu0 %1729 }
  0xf6   : > { %v747_v56 = vpop.permute.xlu1 %746 }
  0xf7   : > { %v772_v54 = vmul.f32 %v6653_v62, %v747_v56 }
  0xf9   : > { %5496 = vset.pattern.permute.xlu0 %v9744_v18  ;;  %v780_v26 = vadd.f32 %v772_v54, %v723_v63 }
  0xfa   : > { %v759_v27 = vpop.permute.xlu2 %758  ;;  %5472 = vset.pattern.permute.xlu1 %v9748_v29  ;;  %840 = vperm.xlu0 %5496, %v6038_v39  }
  0xfb   : > { %1757 = vperm.xlu1 %5472, %v6604_v61  }
  0xfc   : > { %5473 = vset.pattern.permute.xlu2 %v9748_v29 }
  0xfd   : > { %1769 = vperm.xlu2 %5473, %v6614_v8   ;;  %v6658_v11 = vpop.permute.xlu0 %791 }
  0xfe   : > { %v755_v28 = vpop.permute.xlu1 %754 }
  0xff   : > { %v774_v35 = vmul.f32 %v6653_v62, %v755_v28 }
 0x101   : > { %v6664_v24 = vadd.f32 %v774_v35, %v725_v50 }
 0x102   : > { %860 = vperm.xlu0 %5496, %v6202_v22  }
 0x103   : > { %v6666_v21 = vpop.permute.xlu2 %787  ;;  %1777 = vperm.xlu1 %5472, %v6253_v38  }
 0x104   : > { %v819_v28 = vmul.f32 %v6693_v9, %v6666_v21 }
 0x105   : > { %5474 = vset.pattern.permute.xlu2 %v9744_v18  ;;  %v6671_v20 = vpop.permute.xlu0 %811 }
 0x106   : > { %1805 = vperm.xlu2 %5474, %v6604_v61   ;;  %v767_v45 = vpop.permute.xlu1 %766 }
 0x107   : > { %v777_v39 = vmul.f32 %v6653_v62, %v767_v45 }
 0x109   : > { %v6676_v48 = vadd.f32 %v777_v39, %v728_v5 }
 0x10a   : > { %1817 = vperm.xlu0 %5496, %v6614_v8   ;;  %v773_v8 = vmul.f32 %v6653_v62, %v751_v23 }
 0x10b   : > { %v800_v40 = vpop.permute.xlu2 %799  ;;  %5475 = vset.pattern.permute.xlu1 %v9744_v18 }
 0x10c   : > { %1825 = vperm.xlu1 %5475, %v6253_v38   ;;  %v822_v32 = vmul.f32 %v6693_v9, %v800_v40  ;;  %v781_v53 = vadd.f32 %v773_v8, %v724_v30 }
 0x10d   : > { %v6681_v2 = vpop.permute.xlu0 %1761 }
 0x10e   : > { %5476 = vset.pattern.permute.xlu2 %v9746_v0  ;;  %v830_v49 = vadd.f32 %v822_v32, %v781_v53 }
 0x10f   : > { %1713 = vperm.xlu2 %5476, %v6358_v37   ;;  %v796_v61 = vpop.permute.xlu1 %795 }
 0x110   : > { %v821_v44 = vmul.f32 %v6693_v9, %v796_v61 }
 0x112   : > { %1829 = vperm.xlu0 %5496, %v6598_v36   ;;  %v829_v59 = vadd.f32 %v821_v44, %v780_v26 }
 0x113   : > { %v808_v34 = vpop.permute.xlu2 %807 }
 0x114   : > { %5477 = vset.pattern.permute.xlu1 %v9746_v0  ;;  %v824_v55 = vmul.f32 %v6693_v9, %v808_v34 }
 0x115   : > { %1725 = vperm.xlu1 %5477, %v6627_v17  }
 0x116   : > { %v6691_v38 = vpop.permute.xlu0 %1785 }
 0x117   : > { %v6688_v22 = vpop.permute.xlu1 %803  ;;  %1733 = vperm.xlu2 %5476, %v6598_v36  }
 0x11c   : > { %v837_v13 = vpop.permute.xlu2 %836 }
 0x11d   : > { %5478 = vset.pattern.permute.xlu1 %v9748_v29  ;;  %v868_v52 = vmul.f32 %v6704_v41, %v837_v13 }
 0x11e   : > { %1773 = vperm.xlu1 %5478, %v6627_v17  }
 0x11f   : > { %v6699_v47 = vpop.permute.xlu1 %815  ;;  %5479 = vset.pattern.permute.xlu2 %v9748_v29  ;;  %v6707_v57 = vpop.permute.xlu0 %2732 }
 0x120   : > { %1781 = vperm.xlu2 %5479, %v6598_v36   ;;  %v775_v36 = vmul.f32 %v6653_v62, %v759_v27 }
 0x122   : > { %v783_v33 = vadd.f32 %v775_v36, %v726_v60 }
 0x124   : > { %v849_v51 = vpop.permute.xlu2 %848  ;;  %v832_v50 = vadd.f32 %v824_v55, %v783_v33 }
 0x125   : > { %v871_v43 = vmul.f32 %v6704_v41, %v849_v51 }
 0x126   : > { %5480 = vset.pattern.permute.xlu1 %v9744_v18 }
 0x127   : > { %v879_v14 = vadd.f32 %v871_v43, %v830_v49  ;;  %1809 = vperm.xlu1 %5480, %v6358_v37  }
 0x128   : > { %v845_v12 = vpop.permute.xlu1 %844  ;;  %5481 = vset.pattern.permute.xlu2 %v9744_v18  ;;  %v683_v23 = vpop.permute.xlu0 %682 }
 0x129   : > { %v6725_v42 = vadd.f32 %v6716_v25, %v879_v14  ;;  %v870_v10 = vmul.f32 %v6704_v41, %v845_v12  ;;  %1821 = vperm.xlu2 %5481, %v6627_v17   ;;  %v721_v4 = vmul.f32 %v6649_v6, %v683_v23 }
 0x12b   : > { %v6734_v56 = vmul.f32 0.70710677, %v6725_v42  ;;  %v878_v27 = vadd.f32 %v870_v10, %v829_v59  ;;  %v778_v45 = vadd.f32 %v770_v16, %v721_v4 }
 0x12c   : > { %v857_v37 = vpop.permute.xlu2 %856 }
 0x12d   : > { %v1031_v35 = vmul.f32 %v6734_v56, %v6734_v56  ;;  %v873_v17 = vmul.f32 %v6704_v41, %v857_v37  ;;  %v6743_v5 = vadd.f32 %v6716_v25, %v878_v27  ;;  %v827_v61 = vadd.f32 %v819_v28, %v778_v45 }
 0x12f   : > { %v6746_v39 = vmin.f32 %v1031_v35, 16.0  ;;  %v881_v40 = vadd.f32 %v873_v17, %v832_v50  ;;  %v6749_v34 = vmul.f32 0.70710677, %v6743_v5  ;;  %5482 = vset.pattern.permute.xlu1 %v9742_v1  ;;  %v876_v32 = vadd.f32 %v868_v52, %v827_v61 }
 0x130   : > { %1689 = vperm.xlu1 %5482, %v6404_v19  }
 0x131   : > { %v1033_v21 = vmul.f32 2.1237322e-06, %v6746_v39  ;;  %v1044_v8 = vmul.f32 3.8918573e-05, %v6746_v39  ;;  %v6754_v30 = vadd.f32 %v6716_v25, %v881_v40  ;;  %5483 = vset.pattern.permute.xlu2 %v9746_v0  ;;  %v991_v13 = vmul.f32 %v6749_v34, %v6749_v34 }
 0x132   : > { %1717 = vperm.xlu2 %5483, %v6581_v46   ;;  %v6763_v51 = vadd.f32 %v6716_v25, %v876_v32 }
 0x133   : > { %v1034_v53 = vadd.f32 0.00028619796, %v1033_v21  ;;  %v1045_v54 = vadd.f32 0.001143296, %v1044_v8  ;;  %v6766_v63 = vmul.f32 0.70710677, %v6754_v30 }
 0x134   : > { %v6768_v49 = vmin.f32 %v991_v13, 16.0  ;;  %v6773_v36 = vmul.f32 0.70710677, %v6763_v51  ;;  %v823_v13 = vmul.f32 %v6693_v9, %v6688_v22 }
 0x135   : > { %v1035_v44 = vmul.f32 %v1034_v53, %v6746_v39  ;;  %v1046_v43 = vmul.f32 %v1045_v54, %v6746_v39  ;;  %v1111_v26 = vmul.f32 %v6766_v63, %v6766_v63  ;;  %v6789_v37 = vpop.permute.xlu2 %1654 }
 0x136   : > { %v993_v14 = vmul.f32 2.1237322e-06, %v6768_v49  ;;  %v1004_v60 = vmul.f32 3.8918573e-05, %v6768_v49  ;;  %v911_v59 = vmul.f32 %v6773_v36, %v6773_v36 }
 0x137   : > { %v1036_v55 = vadd.f32 0.0036580483, %v1035_v44  ;;  %v1047_v12 = vadd.f32 0.014752088, %v1046_v43  ;;  %v6781_v10 = vmin.f32 %v1111_v26, 16.0 }
 0x138   : > { %v994_v33 = vadd.f32 0.00028619796, %v993_v14  ;;  %v1005_v23 = vadd.f32 0.001143296, %v1004_v60  ;;  %v6785_v27 = vmin.f32 %v911_v59, 16.0  ;;  %5484 = vset.pattern.permute.xlu1 %v9746_v0  ;;  %v853_v60 = vpop.permute.xlu1 %852 }
 0x139   : > { %v1037_v16 = vmul.f32 %v1036_v55, %v6746_v39  ;;  %v1048_v4 = vmul.f32 %v1047_v12, %v6746_v39  ;;  %v1113_v28 = vmul.f32 2.1237322e-06, %v6781_v10  ;;  %v1124_v50 = vmul.f32 3.8918573e-05, %v6781_v10  ;;  %1737 = vperm.xlu1 %5484, %v6404_v19  }
 0x13a   : > { %v995_v35 = vmul.f32 %v994_v33, %v6768_v49  ;;  %v1006_v17 = vmul.f32 %v1005_v23, %v6768_v49  ;;  %v913_v40 = vmul.f32 2.1237322e-06, %v6785_v27  ;;  %5485 = vset.pattern.permute.xlu2 %v9748_v29  ;;  %v924_v8 = vmul.f32 3.8918573e-05, %v6785_v27 }
 0x13b   : > { %v1038_v45 = vadd.f32 0.05243302, %v1037_v16  ;;  %v1049_v52 = vadd.f32 0.112945676, %v1048_v4  ;;  %v1114_v61 = vadd.f32 0.00028619796, %v1113_v28  ;;  %1765 = vperm.xlu2 %5485, %v6581_v46  }
 0x13c   : > { %v1125_v21 = vadd.f32 0.001143296, %v1124_v50  ;;  %v914_v53 = vadd.f32 0.00028619796, %v913_v40  ;;  %v996_v54 = vadd.f32 0.0036580483, %v995_v35 }
 0x13d   : > { %v1050_v32 = vmul.f32 %v1049_v52, %v6746_v39  ;;  %v1115_v44 = vmul.f32 %v1114_v61, %v6781_v10  ;;  %v925_v26 = vadd.f32 0.001143296, %v924_v8  ;;  %v1007_v14 = vadd.f32 0.014752088, %v1006_v17 }
 0x13e   : > { %v1126_v43 = vmul.f32 %v1125_v21, %v6781_v10  ;;  %v1039_v55 = vmul.f32 %v1038_v45, %v6746_v39  ;;  %v915_v59 = vmul.f32 %v914_v53, %v6785_v27  ;;  %v997_v33 = vmul.f32 %v996_v54, %v6768_v49  ;;  %v6820_v54 = vld [vmem:[%s6183_s21] sm:$0xff] }
 0x13f   : > { %v1051_v12 = vadd.f32 0.4994258, %v1050_v32  ;;  %v1116_v23 = vadd.f32 0.0036580483, %v1115_v44  ;;  %v926_v22 = vmul.f32 %v925_v26, %v6785_v27  ;;  %v1008_v4 = vmul.f32 %v1007_v14, %v6768_v49 }
 0x140   : > { %v1127_v16 = vadd.f32 0.014752088, %v1126_v43  ;;  %v916_v50 = vadd.f32 0.0036580483, %v915_v59  ;;  %v998_v35 = vadd.f32 0.05243302, %v997_v33  ;;  %v872_v17 = vmul.f32 %v6704_v41, %v853_v60  ;;  %v6823_v60 = vpop.permute.xlu2 %1669 }
 0x141   : > { %v1052_v28 = vmul.f32 %v1051_v12, %v6746_v39  ;;  %v1117_v45 = vmul.f32 %v1116_v23, %v6781_v10  ;;  %v927_v40 = vadd.f32 0.014752088, %v926_v22  ;;  %v1009_v61 = vadd.f32 0.112945676, %v1008_v4  ;;  %5486 = vset.pattern.permute.xlu1 %v9744_v18 }
 0x142   : > { %v1128_v52 = vmul.f32 %v1127_v16, %v6781_v10  ;;  %v831_v8 = vadd.f32 %v823_v13, %v6664_v24  ;;  %v917_v32 = vmul.f32 %v916_v50, %v6785_v27  ;;  %v999_v53 = vmul.f32 %v998_v35, %v6768_v49  ;;  %1813 = vperm.xlu1 %5486, %v6581_v46  }
 0x143   : > { %v6813_v21 = vadd.f32 1.0, %v1052_v28  ;;  %v1040_v44 = vadd.f32 0.18741608, %v1039_v55  ;;  %v1118_v43 = vadd.f32 0.05243302, %v1117_v45  ;;  %v928_v14 = vmul.f32 %v927_v40, %v6785_v27  ;;  %5487 = vset.pattern.permute.xlu2 %v9744_v18 }
 0x144   : > { %v1129_v26 = vadd.f32 0.112945676, %v1128_v52  ;;  %v1010_v24 = vmul.f32 %v1009_v61, %v6768_v49  ;;  %1833 = vperm.xlu2 %5487, %v6404_v19   ;;  %v918_v12 = vadd.f32 0.05243302, %v917_v32  ;;  %v880_v59 = vadd.f32 %v872_v17, %v831_v8 }
 0x145   : > { %5553 = vrcp.f32 %v6813_v21  ;;  %v1119_v13 = vmul.f32 %v1118_v43, %v6781_v10  ;;  %v929_v33 = vadd.f32 0.112945676, %v928_v14  ;;  %v1000_v23 = vadd.f32 0.18741608, %v999_v53 }
 0x146   : > { %v1130_v55 = vmul.f32 %v1129_v26, %v6781_v10  ;;  %v6833_v16 = vmul.f32 0.70710677, %v6820_v54  ;;  %v1041_v22 = vmul.f32 %v1040_v44, %v6746_v39  ;;  %v919_v28 = vmul.f32 %v918_v12, %v6785_v27 }
 0x147   : > { %v1120_v46 = vadd.f32 0.18741608, %v1119_v13  ;;  %v930_v50 = vmul.f32 %v929_v33, %v6785_v27  ;;  %v1011_v19 = vadd.f32 0.4994258, %v1010_v24  ;;  %v1745_v35 = vmul.f32 %v6643_v31, %v6653_v62 }
 0x148   : > { %v1131_v4 = vadd.f32 0.4994258, %v1130_v55  ;;  %v6842_v17 = vadd.f32 %v6716_v25, %v880_v59  ;;  %v1001_v61 = vmul.f32 %v1000_v23, %v6768_v49  ;;  %v6848_v8 = vmul.f32 %v6833_v16, %v6833_v16 }
 0x149   : > { %v931_v40 = vadd.f32 0.4994258, %v930_v50  ;;  %v1012_v39 = vmul.f32 %v1011_v19, %v6768_v49  ;;  %v1042_v32 = vadd.f32 1.1283791, %v1041_v22  ;;  %v1121_v31 = vmul.f32 %v1120_v46, %v6781_v10 }
 0x14a   : > { %v1132_v45 = vmul.f32 %v1131_v4, %v6781_v10  ;;  %v826_v44 = vmul.f32 %v6693_v9, %v6699_v47  ;;  %5488 = vset.pattern.permute.xlu1 %v9742_v1  ;;  %v1063_v43 = vand.u32 2147483647, %v6813_v21  ;;  %v920_v14 = vadd.f32 0.18741608, %v919_v28  ;;  %v1680_v47 = vpop.permute.xlu2 %1679 }
 0x14b   : > { %v5554_v52 = vpop.eup %5553  ;;  %v932_v49 = vmul.f32 %v931_v40, %v6785_v27  ;;  %v1065_v13 = vand.u32 2147483648, %v6813_v21  ;;  %v6861_v55 = vadd.f32 1.0, %v1012_v39  ;;  %v6864_v10 = vmul.f32 0.70710677, %v6842_v17 }
 0x14c   : > { %v1055_v53 = vmul.f32 %v5554_v52, %v6813_v21  ;;  %v6856_v26 = vadd.f32 1.0, %v1132_v45  ;;  %5489 = vset.pattern.permute.xlu2 %v9746_v0  ;;  %vm1060_vm8 = vweird.f32 %v5554_v52  ;;  %v1002_v12 = vadd.f32 1.1283791, %v1001_v61 }
 0x14d   : > { %v1697_v59 = vmul.f32 %v1680_v47, %v6649_v6  ;;  %v1122_v23 = vadd.f32 1.1283791, %v1121_v31  ;;  %v6868_v22 = vadd.f32 1.0, %v932_v49  ;;  %v898_v46 = vmul.f32 0.5, %v6725_v42 }
 0x14e   : > { %v1056_v24 = vsub.f32 1.0, %v1055_v53  ;;  %5555 = vrcp.f32 %v6856_v26  ;;  %v1145_v4 = vand.u32 2147483648, %v6856_v26  ;;  %v834_v28 = vadd.f32 %v826_v44, %v6676_v48 }
 0x14f   : > { %5557 = vrcp.f32 %v6861_v55  ;;  %v921_v50 = vmul.f32 %v920_v14, %v6785_v27  ;;  %vm1059_vm9 = vweird.f32 %v6813_v21  ;;  %v1143_v45 = vand.u32 2147483647, %v6856_v26 }
 0x150   : > { %v1057_v33 = vmul.f32 %v5554_v52, %v1056_v24  ;;  %5559 = vrcp.f32 %v6868_v22  ;;  %v1043_v40 = vmul.f32 %v1042_v32, %v6734_v56  ;;  %vm1061_vm11 = vmor %vm1059_vm9, %vm1060_vm8  ;;  %vm1064_vm12 = vcmp.eq.f32.partialorder %v1063_v43, 8.507059e+37 }
 0x151   : > { %v1066_v42 = vor.u32 1.1754944e-38, %v1065_v13  ;;  %v6881_v61 = vmul.f32 %v1002_v12, %v6749_v34  ;;  %v1123_v27 = vmul.f32 %v1122_v23, %v6766_v63  ;;  %v1071_v21 = vmul.f32 %v6864_v10, %v6864_v10 }
 0x152   : > { %v1058_v19 = vadd.f32 %v5554_v52, %v1057_v33  ;;  %v6886_v39 = vadd.f32 %v1745_v35, %v1697_v59  ;;  %vm1139_vm15 = vweird.f32 %v6856_v26  ;;  %v1146_v56 = vor.u32 1.1754944e-38, %v1145_v4  ;;  %v865_v33 = vpop.permute.xlu1 %864 }
 0x153   : > { %v922_v32 = vadd.f32 1.1283791, %v921_v50  ;;  %vm6890_vm0 = vcmp.eq.f32.partialorder %v1143_v45, 8.507059e+37  ;;  %vm1019_vm1 = vweird.f32 %v6861_v55  ;;  %v1023_v63 = vand.u32 2147483647, %v6861_v55 }
 0x154   : > { %v1062_v48 = vsel %vm1061_vm11, %v5554_v52, %v1058_v19  ;;  %v5556_v53 = vpop.eup %5555  ;;  %vm939_vm2 = vweird.f32 %v6868_v22  ;;  %v943_v35 = vand.u32 2147483647, %v6868_v22  ;;  %v6899_v49 = vmin.f32 %v1071_v21, 16.0 }
 0x155   : > { %v1067_v31 = vsel %vm1064_vm12, %v1066_v42, %v1062_v48  ;;  %v5558_v44 = vpop.eup %5557  ;;  %v1135_v34 = vmul.f32 %v5556_v53, %v6856_v26  ;;  %v945_v12 = vand.u32 2147483648, %v6868_v22  ;;  %v1025_v59 = vand.u32 2147483648, %v6861_v55 }
 0x156   : > { %v1068_v43 = vmul.f32 %v1067_v31, %v1043_v40  ;;  %v1015_v14 = vmul.f32 %v5558_v44, %v6861_v55  ;;  %v5560_v24 = vpop.eup %5559  ;;  %vm1140_vm3 = vweird.f32 %v5556_v53  ;;  %v1073_v50 = vmul.f32 2.1237322e-06, %v6899_v49 }
 0x157   : > { %v1136_v47 = vsub.f32 1.0, %v1135_v34  ;;  %v935_v23 = vmul.f32 %v5560_v24, %v6868_v22  ;;  %vm1020_vm4 = vweird.f32 %v5558_v44  ;;  %v1084_v40 = vmul.f32 3.8918573e-05, %v6899_v49  ;;  %vm1141_vm6 = vmor %vm1139_vm15, %vm1140_vm3 }
 0x158   : > { %v5327_v13 = vclamps-f32 %v1068_v43, 1.0  ;;  %v1016_v4 = vsub.f32 1.0, %v1015_v14  ;;  %v1074_v21 = vadd.f32 0.00028619796, %v1073_v50  ;;  %v875_v31 = vmul.f32 %v6704_v41, %v865_v33  ;;  %vm1021_vm8 = vmor %vm1019_vm1, %vm1020_vm4 }
 0x159   : > { %v1137_v45 = vmul.f32 %v5556_v53, %v1136_v47  ;;  %v936_v42 = vsub.f32 1.0, %v935_v23  ;;  %vm6907_vm5 = vcmp.eq.f32.partialorder %v1023_v63, 8.507059e+37  ;;  %v1085_v18 = vadd.f32 0.001143296, %v1084_v40 }
 0x15a   : > { %v1234_v19 = vadd.f32 1.0, %v5327_v13  ;;  %v1017_v48 = vmul.f32 %v5558_v44, %v1016_v4  ;;  %vm940_vm7 = vweird.f32 %v5560_v24  ;;  %v883_v47 = vadd.f32 %v875_v31, %v834_v28 }
 0x15b   : > { %v1138_v34 = vadd.f32 %v5556_v53, %v1137_v45  ;;  %v937_v14 = vmul.f32 %v5560_v24, %v936_v42  ;;  %v946_v4 = vor.u32 1.1754944e-38, %v945_v12  ;;  %v1086_v63 = vmul.f32 %v1085_v18, %v6899_v49  ;;  %vm941_vm9 = vmor %vm939_vm2, %vm940_vm7 }
 0x15c   : > { %v1242_v43 = vmul.f32 %v1234_v19, %v898_v46  ;;  %v1018_v13 = vadd.f32 %v5558_v44, %v1017_v48  ;;  %v1026_v46 = vor.u32 1.1754944e-38, %v1025_v59  ;;  %v1075_v28 = vmul.f32 %v1074_v21, %v6899_v49 }
 0x15d   : > { %v1142_v23 = vsel %vm1141_vm6, %v5556_v53, %v1138_v34  ;;  %v938_v33 = vadd.f32 %v5560_v24, %v937_v14  ;;  %v1087_v18 = vadd.f32 0.014752088, %v1086_v63  ;;  %v6930_v12 = vadd.f32 %v6716_v25, %v883_v47 }
 0x15e   : > { %1252 = vst.msk [vmem:[#allocation2 + $0x41] sm:$0xff] %vm1248_vm10, %v1242_v43  ;;  %v1147_v26 = vsel %vm6890_vm0, %v1146_v56, %v1142_v23  ;;  %v1022_v50 = vsel %vm1021_vm8, %v5558_v44, %v1018_v13  ;;  %v923_v56 = vmul.f32 %v922_v32, %v6773_v36  ;;  %vm944_vm11 = vcmp.eq.f32.partialorder %v943_v35, 8.507059e+37 }
 0x15f   : > { %1261 = vst.msk [vmem:[#allocation2 + $0x40] sm:$0x1] %vm1257_vm13, %v1242_v43  ;;  %v1148_v53 = vmul.f32 %v1147_v26, %v1123_v27  ;;  %v1027_v55 = vsel %vm6907_vm5, %v1026_v46, %v1022_v50  ;;  %v942_v52 = vsel %vm941_vm9, %v5560_v24, %v938_v33  ;;  %v1088_v27 = vmul.f32 %v1087_v18, %v6899_v49  ;;  %v6960_v26 = vpop.permute.xlu0 %687  ;;  %v6966_v50 = vld [vmem:[%s6183_s21 + $0x28] sm:$0xff] }
 0x160   : > { %1270 = vst.msk [vmem:[#allocation2 + $0x42] sm:$0x80] %vm1266_vm14, %v1242_v43  ;;  %v1028_v44 = vmul.f32 %v1027_v55, %v6881_v61  ;;  %v947_v19 = vsel %vm944_vm11, %v946_v4, %v942_v52  ;;  %v1076_v40 = vadd.f32 0.0036580483, %v1075_v28  ;;  %v6936_v1 = vmin.f32 %v6848_v8, 16.0 }
 0x161   : > { %v5329_v59 = vclamps-f32 %v1148_v53, 1.0  ;;  %v948_v45 = vmul.f32 %v947_v19, %v923_v56  ;;  %v900_v42 = vmul.f32 0.5, %v6754_v30  ;;  %v1089_v21 = vadd.f32 0.112945676, %v1088_v27 }
 0x162   : > { %v5326_v22 = vclamps-f32 %v1028_v44, 1.0  ;;  %v6940_v36 = vmul.f32 0.70710677, %v6930_v12  ;;  %v2281_v61 = vmul.f32 2.1237322e-06, %v6936_v1  ;;  %v895_v43 = vmul.f32 0.5, %v6763_v51 }
 0x163   : > { %v1236_v48 = vadd.f32 1.0, %v5329_v59  ;;  %v5324_v32 = vclamps-f32 %v948_v45, 1.0  ;;  %v1090_v31 = vmul.f32 %v1089_v21, %v6899_v49  ;;  %v897_v8 = vmul.f32 0.5, %v6743_v5 }
 0x164   : > { %v1233_v24 = vadd.f32 1.0, %v5326_v22  ;;  %v1077_v30 = vmul.f32 %v1076_v40, %v6899_v49  ;;  %v1191_v14 = vmul.f32 %v6940_v36, %v6940_v36  ;;  %v2282_v23 = vadd.f32 0.00028619796, %v2281_v61 }
 0x165   : > { %v1244_v35 = vmul.f32 %v1236_v48, %v900_v42  ;;  %v1231_v34 = vadd.f32 1.0, %v5324_v32  ;;  %v1091_v47 = vadd.f32 0.4994258, %v1090_v31  ;;  %v2292_v56 = vmul.f32 3.8918573e-05, %v6936_v1 }
 0x166   : > { %v1241_v4 = vmul.f32 %v1233_v24, %v897_v8  ;;  %v1078_v5 = vadd.f32 0.05243302, %v1077_v30  ;;  %v6955_v46 = vmin.f32 %v1191_v14, 16.0  ;;  %v2283_v63 = vmul.f32 %v2282_v23, %v6936_v1  ;;  %v6995_v14 = vld [vmem:[%s6183_s21 + $0x20] sm:$0xff] }
 0x167   : > { %1254 = vst.msk [vmem:[#allocation2 + $0x61] sm:$0xff] %vm1248_vm10, %v1244_v35  ;;  %v1239_v13 = vmul.f32 %v1231_v34, %v895_v43  ;;  %v1092_v51 = vmul.f32 %v1091_v47, %v6899_v49  ;;  %v6974_v52 = vmul.f32 0.70710677, %v6966_v50  ;;  %vm1281_vm12 = vcmask 254976   ;;  %v6986_v21 = vpop.permute.xlu0 %712 }
 0x168   : > { %1263 = vst.msk [vmem:[#allocation2 + $0x60] sm:$0x1] %vm1257_vm13, %v1244_v35  ;;  %v1079_v28 = vmul.f32 %v1078_v5, %v6899_v49  ;;  %v1193_v53 = vmul.f32 2.1237322e-06, %v6955_v46  ;;  %v1204_v55 = vmul.f32 3.8918573e-05, %v6955_v46 }
 0x169   : > { %1272 = vst.msk [vmem:[#allocation2 + $0x62] sm:$0x80] %vm1266_vm14, %v1244_v35  ;;  %v6963_v33 = vadd.f32 1.0, %v1092_v51  ;;  %v2284_v18 = vadd.f32 0.0036580483, %v2283_v63  ;;  %v2479_v42 = vmul.f32 %v6974_v52, %v6974_v52 }
 0x16a   : > { %1249 = vst.msk [vmem:[#allocation2 + $0x11] sm:$0xff] %vm1248_vm10, %v1239_v13  ;;  %v1080_v19 = vadd.f32 0.18741608, %v1079_v28  ;;  %v1194_v27 = vadd.f32 0.00028619796, %v1193_v53 }
 0x16b   : > { %1258 = vst.msk [vmem:[#allocation2 + $0x10] sm:$0x1] %vm1257_vm13, %v1239_v13  ;;  %5561 = vrcp.f32 %v6963_v33  ;;  %v1205_v45 = vadd.f32 0.001143296, %v1204_v55  ;;  %v2285_v22 = vmul.f32 %v2284_v18, %v6936_v1  ;;  %v2293_v40 = vadd.f32 0.001143296, %v2292_v56 }
 0x16c   : > { %1267 = vst.msk [vmem:[#allocation2 + $0x12] sm:$0x80] %vm1266_vm14, %v1239_v13  ;;  %v1081_v48 = vmul.f32 %v1080_v19, %v6899_v49  ;;  %v1195_v32 = vmul.f32 %v1194_v27, %v6955_v46  ;;  %v6991_v43 = vmin.f32 %v2479_v42, 16.0  ;;  %v1103_v49 = vand.u32 2147483647, %v6963_v33 }
 0x16d   : > { %1251 = vst.msk [vmem:[#allocation2 + $0x31] sm:$0xff] %vm1248_vm10, %v1241_v4  ;;  %v1206_v35 = vmul.f32 %v1205_v45, %v6955_v46  ;;  %v2286_v24 = vadd.f32 0.05243302, %v2285_v22  ;;  %v2294_v31 = vmul.f32 %v2293_v40, %v6936_v1  ;;  %v1105_v28 = vand.u32 2147483648, %v6963_v33 }
 0x16e   : > { %1260 = vst.msk [vmem:[#allocation2 + $0x30] sm:$0x1] %vm1257_vm13, %v1241_v4  ;;  %v1082_v34 = vadd.f32 1.1283791, %v1081_v48  ;;  %v1196_v30 = vadd.f32 0.0036580483, %v1195_v32  ;;  %vm1099_vm0 = vweird.f32 %v6963_v33 }
 0x16f   : > { %1269 = vst.msk [vmem:[#allocation2 + $0x32] sm:$0x80] %vm1266_vm14, %v1241_v4  ;;  %v1207_v13 = vadd.f32 0.014752088, %v1206_v35  ;;  %v2287_v47 = vmul.f32 %v2286_v24, %v6936_v1  ;;  %v2295_v23 = vadd.f32 0.014752088, %v2294_v31  ;;  %v7009_v42 = vpop.permute.xlu0 %1659 }
 0x170   : > { %v1197_v51 = vmul.f32 %v1196_v30, %v6955_v46  ;;  %v2481_v5 = vmul.f32 2.1237322e-06, %v6991_v43  ;;  %v2492_v63 = vmul.f32 3.8918573e-05, %v6991_v43  ;;  %v7006_v18 = vmul.f32 0.70710677, %v6995_v14 }
 0x171   : > { %v5562_v61 = vpop.eup %5561  ;;  %v1208_v53 = vmul.f32 %v1207_v13, %v6955_v46  ;;  %v2296_v55 = vmul.f32 %v2295_v23, %v6936_v1  ;;  %v1083_v24 = vmul.f32 %v1082_v34, %v6864_v10  ;;  %v1106_v31 = vor.u32 1.1754944e-38, %v1105_v28 }
 0x172   : > { %v6976_v44 = vld [vmem:[#allocation2 + $0x10] sm:$0xff]  ;;  %v1095_v8 = vmul.f32 %v5562_v61, %v6963_v33  ;;  %vm1100_vm15 = vweird.f32 %v5562_v61  ;;  %v2493_v19 = vadd.f32 0.001143296, %v2492_v63  ;;  %v1198_v27 = vadd.f32 0.05243302, %v1197_v51 }
 0x173   : > { %9904 = vst [vmem:[#allocation3_spill] sm:$0xff] %v6976_v44  ;;  %v1276_v59 = vld [vmem:[#allocation2 + $0x18] sm:$0x3]  ;;  %v1209_v45 = vadd.f32 0.112945676, %v1208_v53  ;;  %v2439_v35 = vmul.f32 %v7006_v18, %v7006_v18  ;;  %vm1101_vm1 = vmor %vm1099_vm0, %vm1100_vm15  ;;  %vm1104_vm2 = vcmp.eq.f32.partialorder %v1103_v49, 8.507059e+37 }
 0x174   : > { %1280 = vst.msk [vmem:[#allocation2] sm:$0xff] %vm1248_vm10, %v6976_v44  ;;  %v1096_v4 = vsub.f32 1.0, %v1095_v8  ;;  %v2297_v22 = vadd.f32 0.112945676, %v2296_v55  ;;  %v2494_v32 = vmul.f32 %v2493_v19, %v6991_v43  ;;  %v1199_v51 = vmul.f32 %v1198_v27, %v6955_v46 }
 0x175   : > { %1282 = vst.msk [vmem:[#allocation2 + $0x8] sm:$0x3] %vm1281_vm12, %v1276_v59  ;;  %v2482_v59 = vadd.f32 0.00028619796, %v2481_v5  ;;  %v1210_v8 = vmul.f32 %v1209_v45, %v6955_v46  ;;  %v2288_v19 = vadd.f32 0.18741608, %v2287_v47  ;;  %v771_v47 = vmul.f32 %v6653_v62, %v6621_v3 }
 0x176   : > { %v1097_v56 = vmul.f32 %v5562_v61, %v1096_v4  ;;  %v2298_v33 = vmul.f32 %v2297_v22, %v6936_v1  ;;  %v2495_v23 = vadd.f32 0.014752088, %v2494_v32  ;;  %v1200_v28 = vadd.f32 0.18741608, %v1199_v51 }
 0x177   : > { %v2483_v48 = vmul.f32 %v2482_v59, %v6991_v43  ;;  %v1211_v5 = vadd.f32 0.4994258, %v1210_v8  ;;  %v899_v45 = vmul.f32 0.5, %v6842_v17  ;;  %v722_v17 = vmul.f32 %v6649_v6, %v6960_v26 }
 0x178   : > { %v1098_v40 = vadd.f32 %v5562_v61, %v1097_v56  ;;  %v2299_v63 = vadd.f32 0.4994258, %v2298_v33  ;;  %v2496_v55 = vmul.f32 %v2495_v23, %v6991_v43  ;;  %v7020_v56 = vmin.f32 %v2439_v35, 16.0 }
 0x179   : > { %v2484_v13 = vadd.f32 0.0036580483, %v2483_v48  ;;  %v1212_v10 = vmul.f32 %v1211_v5, %v6955_v46  ;;  %v1201_v8 = vmul.f32 %v1200_v28, %v6955_v46  ;;  %v2289_v33 = vmul.f32 %v2288_v19, %v6936_v1  ;;  %v7053_v46 = vpop.permute.xlu1 %1664 }
 0x17a   : > { %v1102_v30 = vsel %vm1101_vm1, %v5562_v61, %v1098_v40  ;;  %v2300_v34 = vmul.f32 %v2299_v63, %v6936_v1  ;;  %v2497_v40 = vadd.f32 0.112945676, %v2496_v55  ;;  %v2452_v48 = vmul.f32 3.8918573e-05, %v7020_v56 }
 0x17b   : > { %v1107_v4 = vsel %vm1104_vm2, %v1106_v31, %v1102_v30  ;;  %v2485_v61 = vmul.f32 %v2484_v13, %v6991_v43  ;;  %v7025_v59 = vadd.f32 1.0, %v1212_v10  ;;  %v7036_v31 = vld [vmem:[%s6183_s21 + $0x30] sm:$0xff]  ;;  %v2441_v13 = vmul.f32 2.1237322e-06, %v7020_v56 }
 0x17c   : > { %v1108_v53 = vmul.f32 %v1107_v4, %v1083_v24  ;;  %v7027_v27 = vadd.f32 1.0, %v2300_v34  ;;  %v7033_v24 = vpop.permute.xlu0 %1684  ;;  %v2498_v30 = vmul.f32 %v2497_v40, %v6991_v43  ;;  %v2453_v23 = vadd.f32 0.001143296, %v2452_v48 }
 0x17d   : > { %5563 = vrcp.f32 %v7025_v59  ;;  %v2486_v32 = vadd.f32 0.05243302, %v2485_v61  ;;  %v7050_v3 = vmul.f32 0.70710677, %v7036_v31  ;;  %v7057_v51 = vmul.f32 %v6693_v9, %v6658_v11 }
 0x17e   : > { %v5328_v49 = vclamps-f32 %v1108_v53, 1.0  ;;  %5565 = vrcp.f32 %v7027_v27  ;;  %v2499_v26 = vadd.f32 0.4994258, %v2498_v30  ;;  %v7059_v5 = vadd.f32 %v771_v47, %v722_v17 }
 0x17f   : > { %v2487_v4 = vmul.f32 %v2486_v32, %v6991_v43  ;;  %v1202_v63 = vadd.f32 1.1283791, %v1201_v8  ;;  %v2290_v53 = vadd.f32 1.1283791, %v2289_v33  ;;  %v2442_v61 = vadd.f32 0.00028619796, %v2441_v13 }
 0x180   : > { %v1235_v22 = vadd.f32 1.0, %v5328_v49  ;;  %v2500_v34 = vmul.f32 %v2499_v26, %v6991_v43  ;;  %v2454_v49 = vmul.f32 %v2453_v23, %v7020_v56  ;;  %v1223_v28 = vand.u32 2147483647, %v7025_v59 }
 0x181   : > { %v2519_v11 = vmul.f32 %v7050_v3, %v7050_v3  ;;  %v1225_v40 = vand.u32 2147483648, %v7025_v59  ;;  %v2313_v48 = vand.u32 2147483648, %v7027_v27  ;;  %vm2307_vm3 = vweird.f32 %v7027_v27 }
 0x182   : > { %v1243_v35 = vmul.f32 %v1235_v22, %v899_v45  ;;  %v2488_v45 = vadd.f32 0.18741608, %v2487_v4  ;;  %v7070_v32 = vadd.f32 1.0, %v2500_v34  ;;  %v2311_v17 = vand.u32 2147483647, %v7027_v27 }
 0x183   : > { %v5564_v1 = vpop.eup %5563  ;;  %v2443_v33 = vmul.f32 %v2442_v61, %v7020_v56  ;;  %v2455_v30 = vadd.f32 0.014752088, %v2454_v49  ;;  %v7079_v4 = vmin.f32 %v2519_v11, 16.0  ;;  %v1203_v26 = vmul.f32 %v1202_v63, %v6940_v36 }
 0x184   : > { %1253 = vst.msk [vmem:[#allocation2 + $0x51] sm:$0xff] %vm1248_vm10, %v1243_v35  ;;  %v5566_v55 = vpop.eup %5565  ;;  %v1215_v10 = vmul.f32 %v5564_v1, %v7025_v59  ;;  %5567 = vrcp.f32 %v7070_v32  ;;  %vm1220_vm5 = vweird.f32 %v5564_v1  ;;  %v2489_v23 = vmul.f32 %v2488_v45, %v6991_v43  ;;  %v7091_v43 = vpop.permute.xlu2 %1721 }
 0x185   : > { %1262 = vst.msk [vmem:[#allocation2 + $0x50] sm:$0x1] %vm1257_vm13, %v1243_v35  ;;  %v2303_v19 = vmul.f32 %v5566_v55, %v7027_v27  ;;  %vm2308_vm4 = vweird.f32 %v5566_v55  ;;  %v2291_v34 = vmul.f32 %v2290_v53, %v6833_v16  ;;  %vm1219_vm7 = vweird.f32 %v7025_v59 }
 0x186   : > { %1271 = vst.msk [vmem:[#allocation2 + $0x52] sm:$0x80] %vm1266_vm14, %v1243_v35  ;;  %v1216_v22 = vsub.f32 1.0, %v1215_v10  ;;  %v7072_v35 = vpop.permute.xlu0 %2632  ;;  %v2263_v10 = vmul.f32 0.5, %v6820_v54  ;;  %vm7084_vm6 = vmor %vm2307_vm3, %vm2308_vm4  ;;  %vm2312_vm8 = vcmp.eq.f32.partialorder %v2311_v17, 8.507059e+37  ;;  %vm1224_vm11 = vcmp.eq.f32.partialorder %v1223_v28, 8.507059e+37 }
 0x187   : > { %v2304_v47 = vsub.f32 1.0, %v2303_v19  ;;  %v2314_v19 = vor.u32 1.1754944e-38, %v2313_v48  ;;  %vm1221_vm9 = vmor %vm1219_vm7, %vm1220_vm5  ;;  %v1226_v54 = vor.u32 1.1754944e-38, %v1225_v40  ;;  %v2444_v36 = vadd.f32 0.0036580483, %v2443_v33 }
 0x188   : > { %v1217_v8 = vmul.f32 %v5564_v1, %v1216_v22  ;;  %v7088_v22 = vpop.permute.xlu1 %1674  ;;  %v2456_v16 = vmul.f32 %v2455_v30, %v7020_v56  ;;  %v2490_v45 = vadd.f32 1.1283791, %v2489_v23  ;;  %v2532_v11 = vmul.f32 3.8918573e-05, %v7079_v4 }
 0x189   : > { %v2305_v13 = vmul.f32 %v5566_v55, %v2304_v47  ;;  %vm2507_vm15 = vweird.f32 %v7070_v32  ;;  %v2521_v28 = vmul.f32 2.1237322e-06, %v7079_v4  ;;  %v2445_v30 = vmul.f32 %v2444_v36, %v7020_v56 }
 0x18a   : > { %v1218_v61 = vadd.f32 %v5564_v1, %v1217_v8  ;;  %v5568_v48 = vpop.eup %5567 }
 0x18b   : > { %v2306_v49 = vadd.f32 %v5566_v55, %v2305_v13  ;;  %v2503_v33 = vmul.f32 %v5568_v48, %v7070_v32  ;;  %vm2508_vm0 = vweird.f32 %v5568_v48  ;;  %v2457_v13 = vadd.f32 0.112945676, %v2456_v16 }
 0x18c   : > { %v1222_v63 = vsel %vm1221_vm9, %v5564_v1, %v1218_v61  ;;  %v2511_v1 = vand.u32 2147483647, %v7070_v32  ;;  %v2533_v61 = vadd.f32 0.001143296, %v2532_v11  ;;  %v2446_v0 = vadd.f32 0.05243302, %v2445_v30  ;;  %vm7112_vm1 = vmor %vm2507_vm15, %vm2508_vm0 }
 0x18d   : > { %v2310_v53 = vsel %vm7084_vm6, %v5566_v55, %v2306_v49  ;;  %v1227_v59 = vsel %vm1224_vm11, %v1226_v54, %v1222_v63  ;;  %v2513_v55 = vand.u32 2147483648, %v7070_v32  ;;  %v902_v49 = vmul.f32 0.5, %v6930_v12 }
 0x18e   : > { %v2315_v47 = vsel %vm2312_vm8, %v2314_v19, %v2310_v53  ;;  %v7099_v17 = vpop.permute.xlu0 %2622  ;;  %v1228_v40 = vmul.f32 %v1227_v59, %v1203_v26  ;;  %v2504_v19 = vsub.f32 1.0, %v2503_v33  ;;  %v2491_v54 = vmul.f32 %v2490_v45, %v6974_v52 }
 0x18f   : > { %v2316_v8 = vmul.f32 %v2315_v47, %v2291_v34  ;;  %v2458_v26 = vmul.f32 %v2457_v13, %v7020_v56  ;;  %v2522_v34 = vadd.f32 0.00028619796, %v2521_v28  ;;  %vm7116_vm2 = vcmp.eq.f32.partialorder %v2511_v1, 8.507059e+37 }
 0x190   : > { %v5331_v23 = vclamps-f32 %v1228_v40, 1.0  ;;  %v2505_v59 = vmul.f32 %v5568_v48, %v2504_v19  ;;  %v1710_v47 = vpop.permute.xlu1 %1709  ;;  %v2514_v12 = vor.u32 1.1754944e-38, %v2513_v55  ;;  %v828_v52 = vadd.f32 %v7057_v51, %v7059_v5 }
 0x191   : > { %v5360_v27 = vclamps-f32 %v2316_v8, 1.0  ;;  %v2459_v45 = vadd.f32 0.4994258, %v2458_v26  ;;  %v7124_v8 = vpop.permute.xlu2 %1769  ;;  %v2534_v32 = vmul.f32 %v2533_v61, %v7079_v4  ;;  %v2523_v1 = vmul.f32 %v2522_v34, %v7079_v4 }
 0x192   : > { %v1238_v63 = vadd.f32 1.0, %v5331_v23  ;;  %v2506_v40 = vadd.f32 %v5568_v48, %v2505_v59  ;;  %v1740_v13 = vmul.f32 %v1710_v47, %v6653_v62 }
 0x193   : > { %v2599_v53 = vadd.f32 1.0, %v5360_v27  ;;  %v2460_v30 = vmul.f32 %v2459_v45, %v7020_v56  ;;  %v2535_v61 = vadd.f32 0.014752088, %v2534_v32 }
 0x194   : > { %v1246_v11 = vmul.f32 %v1238_v63, %v902_v49  ;;  %v2510_v51 = vsel %vm7112_vm1, %v5568_v48, %v2506_v40  ;;  %v1692_v48 = vmul.f32 %v6789_v37, %v6649_v6  ;;  %v2268_v49 = vmul.f32 0.5, %v6966_v50 }
 0x195   : > { %v7122_v28 = vmul.f32 %v2599_v53, %v2263_v10  ;;  %v2447_v10 = vmul.f32 %v2446_v0, %v7020_v56  ;;  %v2515_v55 = vsel %vm7116_vm2, %v2514_v12, %v2510_v51  ;;  %v7140_v23 = vadd.f32 1.0, %v2460_v30 }
 0x196   : > { %v841_v33 = vpop.permute.xlu0 %840  ;;  %1256 = vst.msk [vmem:[#allocation2 + $0x81] sm:$0xff] %vm1248_vm10, %v1246_v11  ;;  %v2516_v27 = vmul.f32 %v2515_v55, %v2491_v54  ;;  %v2524_v0 = vadd.f32 0.0036580483, %v2523_v1  ;;  %v776_v53 = vmul.f32 %v6653_v62, %v6634_v15  ;;  %v727_v54 = vmul.f32 %v6649_v6, %v6986_v21 }
 0x197   : > { %2617 = vperm.xlu1 %5488, %v7122_v28   ;;  %2672 = vperm.xlu2 %5489, %v7122_v28   ;;  %v869_v5 = vmul.f32 %v6704_v41, %v841_v33  ;;  %1265 = vst.msk [vmem:[#allocation2 + $0x80] sm:$0x1] %vm1257_vm13, %v1246_v11  ;;  %v2448_v63 = vadd.f32 0.18741608, %v2447_v10  ;;  %5569 = vrcp.f32 %v7140_v23  ;;  %v1748_v59 = vadd.f32 %v1740_v13, %v1692_v48 }
 0x198   : > { %1274 = vst.msk [vmem:[#allocation2 + $0x82] sm:$0x80] %vm1266_vm14, %v1246_v11  ;;  %v5365_v26 = vclamps-f32 %v2516_v27, 1.0  ;;  %v1758_v47 = vpop.permute.xlu1 %1757  ;;  %v825_v30 = vmul.f32 %v6693_v9, %v6671_v20  ;;  %v784_v1 = vadd.f32 %v776_v53, %v727_v54  ;;  %vm2467_vm3 = vweird.f32 %v7140_v23 }
 0x199   : > { %v877_v19 = vadd.f32 %v869_v5, %v828_v52  ;;  %v1806_v37 = vpop.permute.xlu2 %1805  ;;  %v1788_v16 = vmul.f32 %v1758_v47, %v6693_v9  ;;  %v2525_v52 = vmul.f32 %v2524_v0, %v7079_v4  ;;  %v2449_v40 = vmul.f32 %v2448_v63, %v7020_v56 }
 0x19a   : > { %v2604_v36 = vadd.f32 1.0, %v5365_v26  ;;  %v1836_v12 = vmul.f32 %v1806_v37, %v6704_v41  ;;  %v2471_v56 = vand.u32 2147483647, %v7140_v23  ;;  %v2473_v0 = vand.u32 2147483648, %v7140_v23 }
 0x19b   : > { %v7147_v34 = vadd.f32 %v6716_v25, %v877_v19  ;;  %v2536_v25 = vmul.f32 %v2535_v61, %v7079_v4  ;;  %v1796_v11 = vadd.f32 %v1788_v16, %v1748_v59  ;;  %v2450_v13 = vadd.f32 1.1283791, %v2449_v40  ;;  %v7184_v61 = vld [vmem:[%s9736_s2] ss:$0 sm:$0xff] }
 0x19c   : > { %v7163_v15 = vmul.f32 %v2604_v36, %v2268_v49  ;;  %v2526_v27 = vadd.f32 0.05243302, %v2525_v52  ;;  %v833_v26 = vadd.f32 %v825_v30, %v784_v1  ;;  %vm7210_vm6 = vcmp.eq.f32.partialorder %v2471_v56, 8.507059e+37 }
 0x19d   : > { %v7155_v50 = vmul.f32 0.70710677, %v7147_v34  ;;  %v5570_v33 = vpop.eup %5569  ;;  %v2537_v51 = vadd.f32 0.112945676, %v2536_v25  ;;  %v1844_v10 = vadd.f32 %v1836_v12, %v1796_v11  ;;  %v2451_v52 = vmul.f32 %v2450_v13, %v7006_v18 }
 0x19e   : > { %v7161_v45 = vld [vmem:[#allocation2 + $0x80] sm:$0xff]  ;;  %v861_v55 = vpop.permute.xlu0 %860  ;;  %v2463_v49 = vmul.f32 %v5570_v33, %v7140_v23  ;;  %vm2468_vm4 = vweird.f32 %v5570_v33  ;;  %v2527_v16 = vmul.f32 %v2526_v27, %v7079_v4  ;;  %v2474_v30 = vor.u32 1.1754944e-38, %v2473_v0 }
 0x19f   : > { %9911 = vst [vmem:[#allocation4_spill] sm:$0xff] %v7161_v45  ;;  %2684 = vperm.xlu2 %5489, %v6440_v58   ;;  %v951_v21 = vmul.f32 %v7155_v50, %v7155_v50  ;;  %v1279_v32 = vld [vmem:[#allocation2 + $0x88] sm:$0x3]  ;;  %2642 = vperm.xlu1 %5488, %v7163_v15   ;;  %v7187_v48 = vadd.f32 %v7184_v61, %v1844_v10  ;;  %vm7206_vm5 = vmor %vm2467_vm3, %vm2468_vm4 }
 0x1a0   : > { %1284 = vst.msk [vmem:[#allocation2 + $0x90] sm:$0xff] %vm1248_vm10, %v7161_v45  ;;  %v874_v63 = vmul.f32 %v6704_v41, %v861_v55  ;;  %v2538_v53 = vmul.f32 %v2537_v51, %v7079_v4  ;;  %v2464_v47 = vsub.f32 1.0, %v2463_v49  ;;  %v9916_v51 = vmov 1  }
 0x1a1   : > { %1285 = vst.msk [vmem:[#allocation2 + $0x98] sm:$0x3] %vm1281_vm12, %v1279_v32  ;;  %v7175_v5 = vmin.f32 %v951_v21, 16.0  ;;  %v7195_v36 = vmul.f32 0.70710677, %v7187_v48  ;;  %v1695_v23 = vmul.f32 %v6823_v60, %v6649_v6  ;;  %v1743_v27 = vmul.f32 %v7091_v43, %v6653_v62  ;;  %v7230_v0 = vpop.permute.xlu2 %1713 }
 0x1a2   : > { %v882_v37 = vadd.f32 %v874_v63, %v833_v26  ;;  %v2465_v21 = vmul.f32 %v5570_v33, %v2464_v47  ;;  %v2539_v13 = vadd.f32 0.4994258, %v2538_v53  ;;  %v2528_v60 = vadd.f32 0.18741608, %v2527_v16 }
 0x1a3   : > { %v953_v19 = vmul.f32 2.1237322e-06, %v7175_v5  ;;  %v964_v20 = vmul.f32 3.8918573e-05, %v7175_v5  ;;  %v1876_v11 = vmul.f32 %v7195_v36, %v7195_v36  ;;  %v9917_v16 = vmov 3  }
 0x1a4   : > { %v7215_v1 = vadd.f32 %v7184_v61, %v882_v37  ;;  %v2466_v55 = vadd.f32 %v5570_v33, %v2465_v21 }
 0x1a5   : > { %v954_v54 = vadd.f32 0.00028619796, %v953_v19  ;;  %v965_v59 = vadd.f32 0.001143296, %v964_v20  ;;  %v7223_v56 = vmin.f32 %v1876_v11, 16.0 }
 0x1a6   : > { %v7226_v19 = vmul.f32 0.70710677, %v7215_v1  ;;  %v2470_v26 = vsel %vm7206_vm5, %v5570_v33, %v2466_v55 }
 0x1a7   : > { %5491 = vset.pattern.permute.xlu2 %v9748_v29  ;;  %v955_v25 = vmul.f32 %v954_v54, %v7175_v5  ;;  %v966_v12 = vmul.f32 %v965_v59, %v7175_v5  ;;  %5490 = vset.pattern.permute.xlu1 %v9916_v51  ;;  %v1878_v63 = vmul.f32 2.1237322e-06, %v7223_v56  ;;  %v1889_v43 = vmul.f32 3.8918573e-05, %v7223_v56 }
 0x1a8   : > { %2720 = vperm.xlu2 %5491, %v7122_v28   ;;  %2692 = vperm.xlu1 %5490, %v7163_v15   ;;  %v2475_v53 = vsel %vm7210_vm6, %v2474_v30, %v2470_v26  ;;  %v1151_v54 = vmul.f32 %v7226_v19, %v7226_v19  ;;  %v2267_v30 = vmul.f32 0.5, %v6995_v14  ;;  %v1791_v14 = vmul.f32 %v7124_v8, %v6693_v9 }
 0x1a9   : > { %v956_v18 = vadd.f32 0.0036580483, %v955_v25  ;;  %v967_v10 = vadd.f32 0.014752088, %v966_v12  ;;  %v2476_v37 = vmul.f32 %v2475_v53, %v2451_v52  ;;  %v2540_v25 = vmul.f32 %v2539_v13, %v7079_v4 }
 0x1aa   : > { %v1751_v12 = vadd.f32 %v1743_v27, %v1695_v23  ;;  %v1879_v21 = vadd.f32 0.00028619796, %v1878_v63  ;;  %v1890_v11 = vadd.f32 0.001143296, %v1889_v43  ;;  %v7241_v33 = vmin.f32 %v1151_v54, 16.0  ;;  %v1778_v63 = vpop.permute.xlu1 %1777 }
 0x1ab   : > { %v957_v20 = vmul.f32 %v956_v18, %v7175_v5  ;;  %v968_v49 = vmul.f32 %v967_v10, %v7175_v5  ;;  %v5364_v18 = vclamps-f32 %v2476_v37, 1.0  ;;  %v1698_v10 = vmul.f32 %v7033_v24, %v6649_v6 }
 0x1ac   : > { %v1880_v52 = vmul.f32 %v1879_v21, %v7223_v56  ;;  %v1891_v55 = vmul.f32 %v1890_v11, %v7223_v56  ;;  %v2529_v13 = vmul.f32 %v2528_v60, %v7079_v4  ;;  %v1164_v53 = vmul.f32 3.8918573e-05, %v7241_v33 }
 0x1ad   : > { %v958_v59 = vadd.f32 0.05243302, %v957_v20  ;;  %v969_v47 = vadd.f32 0.112945676, %v968_v49  ;;  %v2603_v20 = vadd.f32 1.0, %v5364_v18  ;;  %v7253_v49 = vadd.f32 1.0, %v2540_v25  ;;  %v1734_v25 = vpop.permute.xlu2 %1733 }
 0x1ae   : > { %v1881_v26 = vadd.f32 0.0036580483, %v1880_v52  ;;  %v1892_v24 = vadd.f32 0.014752088, %v1891_v55  ;;  %v1165_v37 = vadd.f32 0.001143296, %v1164_v53  ;;  %v1793_v21 = vmul.f32 %v1778_v63, %v6693_v9 }
 0x1af   : > { %v959_v40 = vmul.f32 %v958_v59, %v7175_v5  ;;  %v970_v32 = vmul.f32 %v969_v47, %v7175_v5  ;;  %v7262_v60 = vmul.f32 %v2603_v20, %v2267_v30  ;;  %5571 = vrcp.f32 %v7253_v49 }
 0x1b0   : > { %5494 = vset.pattern.permute.xlu2 %v9917_v16  ;;  %5493 = vset.pattern.permute.xlu1 %v9748_v29  ;;  %v1882_v54 = vmul.f32 %v1881_v26, %v7223_v56  ;;  %v1893_v8 = vmul.f32 %v1892_v24, %v7223_v56  ;;  %v1746_v30 = vmul.f32 %v1734_v25, %v6653_v62  ;;  %v7276_v52 = vmul.f32 0.5, %v7147_v34  ;;  %v1818_v24 = vpop.permute.xlu0 %1817 }
 0x1b1   : > { %2768 = vperm.xlu2 %5494, %v7122_v28   ;;  %v960_v23 = vadd.f32 0.18741608, %v959_v40  ;;  %v971_v27 = vadd.f32 0.4994258, %v970_v32  ;;  %v1153_v28 = vmul.f32 2.1237322e-06, %v7241_v33  ;;  %2740 = vperm.xlu1 %5493, %v7163_v15   ;;  %v1799_v18 = vadd.f32 %v1791_v14, %v1751_v12 }
 0x1b2   : > { %2784 = vperm.xlu0 %5496, %v7262_v60   ;;  %v1883_v11 = vadd.f32 0.05243302, %v1882_v54  ;;  %v1894_v40 = vadd.f32 0.112945676, %v1893_v8  ;;  %v1166_v20 = vmul.f32 %v1165_v37, %v7241_v33  ;;  %v7283_v26 = vmul.f32 0.5, %v7036_v31 }
 0x1b3   : > { %v961_v43 = vmul.f32 %v960_v23, %v7175_v5  ;;  %v972_v4 = vmul.f32 %v971_v27, %v7175_v5  ;;  %v1154_v59 = vadd.f32 0.00028619796, %v1153_v28  ;;  %v2530_v5 = vadd.f32 1.1283791, %v2529_v13 }
 0x1b4   : > { %v1895_v23 = vmul.f32 %v1894_v40, %v7223_v56  ;;  %v1884_v27 = vmul.f32 %v1883_v11, %v7223_v56  ;;  %v7285_v12 = vadd.f32 %v1746_v30, %v1698_v10  ;;  %v1801_v34 = vadd.f32 %v1793_v21, %v6886_v39 }
 0x1b5   : > { %v7268_v47 = vadd.f32 1.0, %v972_v4  ;;  %v1155_v32 = vmul.f32 %v1154_v59, %v7241_v33  ;;  %v962_v55 = vadd.f32 1.1283791, %v961_v43  ;;  %v5572_v28 = vpop.eup %5571  ;;  %v2531_v14 = vmul.f32 %v2530_v5, %v7050_v3 }
 0x1b6   : > { %v1896_v63 = vadd.f32 0.4994258, %v1895_v23  ;;  %v2543_v43 = vmul.f32 %v5572_v28, %v7253_v49  ;;  %vm2547_vm7 = vweird.f32 %v7253_v49  ;;  %v2551_v4 = vand.u32 2147483647, %v7253_v49 }
 0x1b7   : > { %5573 = vrcp.f32 %v7268_v47  ;;  %v1156_v13 = vadd.f32 0.0036580483, %v1155_v32  ;;  %v963_v31 = vmul.f32 %v962_v55, %v7155_v50  ;;  %v2553_v10 = vand.u32 2147483648, %v7253_v49 }
 0x1b8   : > { %v1897_v53 = vmul.f32 %v1896_v63, %v7223_v56  ;;  %v1839_v39 = vmul.f32 %v1818_v24, %v6704_v41  ;;  %v1885_v54 = vadd.f32 0.18741608, %v1884_v27  ;;  %v2544_v37 = vsub.f32 1.0, %v2543_v43 }
 0x1b9   : > { %2788 = vperm.xlu2 %5494, %v7163_v15   ;;  %5495 = vset.pattern.permute.xlu1 %v9917_v16  ;;  %v1167_v15 = vadd.f32 0.014752088, %v1166_v20  ;;  %v1157_v8 = vmul.f32 %v1156_v13, %v7241_v33  ;;  %v983_v50 = vand.u32 2147483647, %v7268_v47  ;;  %vm2548_vm8 = vweird.f32 %v5572_v28 }
 0x1ba   : > { %2780 = vperm.xlu1 %5495, %v6440_v58   ;;  %5504 = vset.pattern.permute.xlu0 %v9916_v51  ;;  %v7303_v21 = vadd.f32 1.0, %v1897_v53  ;;  %v1826_v58 = vpop.permute.xlu1 %1825  ;;  %v985_v5 = vand.u32 2147483648, %v7268_v47  ;;  %v2545_v40 = vmul.f32 %v5572_v28, %v2544_v37  ;;  %v1847_v32 = vadd.f32 %v1839_v39, %v1799_v18  ;;  %vm7316_vm11 = vmor %vm2547_vm7, %vm2548_vm8  ;;  %v1782_v53 = vpop.permute.xlu2 %1781 }
 0x1bb   : > { %v1168_v59 = vmul.f32 %v1167_v15, %v7241_v33  ;;  %vm7307_vm9 = vcmp.eq.f32.partialorder %v2551_v4, 8.507059e+37  ;;  %v2554_v23 = vor.u32 1.1754944e-38, %v2553_v10  ;;  %v9920_v27 = vmov 0   ;;  %v1830_v37 = vpop.permute.xlu0 %1829 }
 0x1bc   : > { %5575 = vrcp.f32 %v7303_v21  ;;  %v1886_v13 = vmul.f32 %v1885_v54, %v7223_v56  ;;  %v1158_v20 = vadd.f32 0.05243302, %v1157_v8  ;;  %v1841_v18 = vmul.f32 %v1826_v58, %v6704_v41 }
 0x1bd   : > { %v5574_v3 = vpop.eup %5573  ;;  %v1169_v11 = vadd.f32 0.112945676, %v1168_v59  ;;  %v2546_v43 = vadd.f32 %v5572_v28, %v2545_v40  ;;  %v7322_v4 = vadd.f32 %v7184_v61, %v1847_v32  ;;  %vm979_vm0 = vweird.f32 %v7268_v47 }
 0x1be   : > { %v975_v25 = vmul.f32 %v5574_v3, %v7268_v47  ;;  %vm980_vm15 = vweird.f32 %v5574_v3  ;;  %vm7325_vm1 = vcmp.eq.f32.partialorder %v983_v50, 8.507059e+37  ;;  %v1794_v10 = vmul.f32 %v1782_v53, %v6693_v9 }
 0x1bf   : > { %v1170_v24 = vmul.f32 %v1169_v11, %v7241_v33  ;;  %v986_v54 = vor.u32 1.1754944e-38, %v985_v5  ;;  %v2550_v8 = vsel %vm7316_vm11, %v5572_v28, %v2546_v43  ;;  %v7334_v59 = vmul.f32 0.70710677, %v7322_v4  ;;  %vm981_vm2 = vmor %vm979_vm0, %vm980_vm15 }
 0x1c0   : > { %v976_v30 = vsub.f32 1.0, %v975_v25  ;;  %v1887_v47 = vadd.f32 1.1283791, %v1886_v13  ;;  %v1159_v25 = vmul.f32 %v1158_v20, %v7241_v33  ;;  %v2555_v58 = vsel %vm7307_vm9, %v2554_v23, %v2550_v8 }
 0x1c1   : > { %5498 = vset.pattern.permute.xlu2 %v9920_v27  ;;  %v1171_v49 = vadd.f32 0.4994258, %v1170_v24  ;;  %v2556_v40 = vmul.f32 %v2555_v58, %v2531_v14  ;;  %v1996_v28 = vmul.f32 %v7334_v59, %v7334_v59  ;;  %v1849_v32 = vadd.f32 %v1841_v18, %v1801_v34 }
 0x1c2   : > { %v977_v15 = vmul.f32 %v5574_v3, %v976_v30  ;;  %5497 = vset.pattern.permute.xlu1 %v9920_v27  ;;  %v5576_v5 = vpop.eup %5575  ;;  %v1802_v20 = vadd.f32 %v1794_v10, %v7285_v12  ;;  %v1842_v24 = vmul.f32 %v1830_v37, %v6704_v41  ;;  %v1910_v34 = vand.u32 2147483648, %v7303_v21  ;;  %v1726_v10 = vpop.permute.xlu1 %1725 }
 0x1c3   : > { %v1172_v50 = vmul.f32 %v1171_v49, %v7241_v33  ;;  %2637 = vperm.xlu1 %5497, %v7262_v60   ;;  %v1900_v13 = vmul.f32 %v5576_v5, %v7303_v21  ;;  %v5366_v63 = vclamps-f32 %v2556_v40, 1.0  ;;  %v1160_v18 = vadd.f32 0.18741608, %v1159_v25 }
 0x1c4   : > { %v978_v39 = vadd.f32 %v5574_v3, %v977_v15  ;;  %v7350_v15 = vmin.f32 %v1996_v28, 16.0  ;;  %vm1905_vm3 = vweird.f32 %v5576_v5  ;;  %v7356_v12 = vadd.f32 %v7184_v61, %v1849_v32 }
 0x1c5   : > { %v7348_v23 = vadd.f32 1.0, %v1172_v50  ;;  %v1901_v14 = vsub.f32 1.0, %v1900_v13  ;;  %v1850_v49 = vadd.f32 %v1842_v24, %v1802_v20  ;;  %vm1904_vm4 = vweird.f32 %v7303_v21 }
 0x1c6   : > { %v982_v11 = vsel %vm981_vm2, %v5574_v3, %v978_v39  ;;  %v1908_v3 = vand.u32 2147483647, %v7303_v21  ;;  %v1998_v56 = vmul.f32 2.1237322e-06, %v7350_v15  ;;  %v2009_v8 = vmul.f32 3.8918573e-05, %v7350_v15  ;;  %vm1906_vm5 = vmor %vm1904_vm4, %vm1905_vm3 }
 0x1c7   : > { %v987_v30 = vsel %vm7325_vm1, %v986_v54, %v982_v11  ;;  %5577 = vrcp.f32 %v7348_v23  ;;  %v1902_v53 = vmul.f32 %v5576_v5, %v1901_v14  ;;  %v1888_v54 = vmul.f32 %v1887_v47, %v7195_v36 }
 0x1c8   : > { %v988_v55 = vmul.f32 %v987_v30, %v963_v31  ;;  %v2605_v31 = vadd.f32 1.0, %v5366_v63  ;;  %v1161_v25 = vmul.f32 %v1160_v18, %v7241_v33  ;;  %v1999_v58 = vadd.f32 0.00028619796, %v1998_v56 }
 0x1c9   : > { %v1903_v37 = vadd.f32 %v5576_v5, %v1902_v53  ;;  %v1911_v40 = vor.u32 1.1754944e-38, %v1910_v34  ;;  %v2010_v28 = vadd.f32 0.001143296, %v2009_v8  ;;  %v7370_v36 = vmul.f32 0.70710677, %v7356_v12 }
 0x1ca   : > { %v5325_v43 = vclamps-f32 %v988_v55, 1.0  ;;  %v7364_v50 = vmul.f32 %v2605_v31, %v7283_v26  ;;  %vm1909_vm6 = vcmp.eq.f32.partialorder %v1908_v3, 8.507059e+37  ;;  %v2000_v33 = vmul.f32 %v1999_v58, %v7350_v15 }
 0x1cb   : > { %5499 = vset.pattern.permute.xlu1 %v9916_v51  ;;  %v1907_v21 = vsel %vm1906_vm5, %v5576_v5, %v1903_v37  ;;  %v7377_v26 = vadd.f32 %v7184_v61, %v1850_v49  ;;  %v2011_v32 = vmul.f32 %v2010_v28, %v7350_v15  ;;  %v2076_v30 = vmul.f32 %v7370_v36, %v7370_v36 }
 0x1cc   : > { %v1232_v39 = vadd.f32 1.0, %v5325_v43  ;;  %2676 = vperm.xlu1 %5499, %v6639_v7   ;;  %2696 = vperm.xlu0 %5504, %v7364_v50   ;;  %v1912_v47 = vsel %vm1909_vm6, %v1911_v40, %v1907_v21  ;;  %v1162_v13 = vadd.f32 1.1283791, %v1161_v25  ;;  %v1860_v24 = vmul.f32 0.5, %v7187_v48 }
 0x1cd   : > { %2647 = vperm.xlu2 %5498, %v7364_v50   ;;  %v1913_v5 = vmul.f32 %v1912_v47, %v1888_v54  ;;  %v2012_v55 = vadd.f32 0.014752088, %v2011_v32  ;;  %v7387_v63 = vmin.f32 %v2076_v30, 16.0  ;;  %v1744_v14 = vmul.f32 %v1726_v10, %v6653_v62  ;;  %v1774_v10 = vpop.permute.xlu1 %1773  ;;  %v7418_v32 = vld [vmem:[%s9737_s3] sm:$0xff] }
 0x1ce   : > { %v1240_v11 = vmul.f32 %v1232_v39, %v7276_v52  ;;  %v5578_v52 = vpop.eup %5577  ;;  %v2001_v18 = vadd.f32 0.0036580483, %v2000_v33  ;;  %v7391_v43 = vmul.f32 0.70710677, %v7377_v26  ;;  %v1183_v53 = vand.u32 2147483647, %v7348_v23 }
 0x1cf   : > { %v1175_v20 = vmul.f32 %v5578_v52, %v7348_v23  ;;  %v5346_v3 = vclamps-f32 %v1913_v5, 1.0  ;;  %v2013_v31 = vmul.f32 %v2012_v55, %v7350_v15  ;;  %v2078_v56 = vmul.f32 2.1237322e-06, %v7387_v63 }
 0x1d0   : > { %1250 = vst.msk [vmem:[#allocation2 + $0x21] sm:$0xff] %vm1248_vm10, %v1240_v11  ;;  %v2089_v49 = vmul.f32 3.8918573e-05, %v7387_v63  ;;  %vm1180_vm7 = vweird.f32 %v5578_v52  ;;  %v1185_v54 = vand.u32 2147483648, %v7348_v23  ;;  %v2116_v58 = vmul.f32 %v7391_v43, %v7391_v43 }
 0x1d1   : > { %1259 = vst.msk [vmem:[#allocation2 + $0x20] sm:$0x1] %vm1257_vm13, %v1240_v11  ;;  %v1176_v34 = vsub.f32 1.0, %v1175_v20  ;;  %v2196_v48 = vadd.f32 1.0, %v5346_v3  ;;  %v2014_v8 = vadd.f32 0.112945676, %v2013_v31  ;;  %vm1179_vm8 = vweird.f32 %v7348_v23 }
 0x1d2   : > { %1268 = vst.msk [vmem:[#allocation2 + $0x22] sm:$0x80] %vm1266_vm14, %v1240_v11  ;;  %v2079_v37 = vadd.f32 0.00028619796, %v2078_v56  ;;  %v2090_v25 = vadd.f32 0.001143296, %v2089_v49  ;;  %v2002_v28 = vmul.f32 %v2001_v18, %v7350_v15  ;;  %v1696_v21 = vmul.f32 %v7088_v22, %v6649_v6  ;;  %vm7408_vm9 = vmor %vm1179_vm8, %vm1180_vm7  ;;  %v1822_v56 = vpop.permute.xlu2 %1821 }
 0x1d3   : > { %v1177_v39 = vmul.f32 %v5578_v52, %v1176_v34  ;;  %v2204_v11 = vmul.f32 %v2196_v48, %v1860_v24  ;;  %v2015_v47 = vmul.f32 %v2014_v8, %v7350_v15  ;;  %v1792_v23 = vmul.f32 %v1774_v10, %v6693_v9 }
 0x1d4   : > { %5501 = vset.pattern.permute.xlu1 %v9748_v29  ;;  %v1186_v30 = vor.u32 1.1754944e-38, %v1185_v54  ;;  %v2080_v5 = vmul.f32 %v2079_v37, %v7387_v63  ;;  %vm1184_vm11 = vcmp.eq.f32.partialorder %v1183_v53, 8.507059e+37  ;;  %v2091_v20 = vmul.f32 %v2090_v25, %v7387_v63 }
 0x1d5   : > { %v1178_v40 = vadd.f32 %v5578_v52, %v1177_v39  ;;  %5500 = vset.pattern.permute.xlu2 %v9916_v51  ;;  %2724 = vperm.xlu1 %5501, %v6639_v7   ;;  %2213 = vst.msk [vmem:[#allocation2 + $0xb1] sm:$0xff] %vm1248_vm10, %v2204_v11  ;;  %v7426_v24 = vmin.f32 %v2116_v58, 16.0  ;;  %v1752_v55 = vadd.f32 %v1744_v14, %v1696_v21  ;;  %v2003_v18 = vadd.f32 0.05243302, %v2002_v28 }
 0x1d6   : > { %2688 = vperm.xlu2 %5500, %v7262_v60   ;;  %2221 = vst.msk [vmem:[#allocation2 + $0xb0] sm:$0x1] %vm1257_vm13, %v2204_v11  ;;  %v1163_v3 = vmul.f32 %v1162_v13, %v7226_v19  ;;  %v2016_v31 = vadd.f32 0.4994258, %v2015_v47  ;;  %v1840_v49 = vmul.f32 %v1822_v56, %v6704_v41  ;;  %v1693_v53 = vmul.f32 %v7009_v42, %v6649_v6 }
 0x1d7   : > { %v1182_v22 = vsel %vm7408_vm9, %v5578_v52, %v1178_v40  ;;  %2229 = vst.msk [vmem:[#allocation2 + $0xb2] sm:$0x80] %vm1266_vm14, %v2204_v11  ;;  %v7431_v52 = vperm.slane %v7418_v32, 1  ;;  %v1800_v48 = vadd.f32 %v1792_v23, %v1752_v55  ;;  %v2081_v54 = vadd.f32 0.0036580483, %v2080_v5 }
 0x1d8   : > { %v1187_v34 = vsel %vm1184_vm11, %v1186_v30, %v1182_v22  ;;  %v2017_v14 = vmul.f32 %v2016_v31, %v7350_v15  ;;  %v1741_v19 = vmul.f32 %v7230_v0, %v6653_v62  ;;  %v2092_v13 = vadd.f32 0.014752088, %v2091_v20 }
 0x1d9   : > { %9927 = vst [vmem:[#allocation5_spill] sm:$0xff] %v7431_v52  ;;  %v1188_v39 = vmul.f32 %v1187_v34, %v1163_v3  ;;  %v2118_v10 = vmul.f32 2.1237322e-06, %v7426_v24  ;;  %v2129_v8 = vmul.f32 3.8918573e-05, %v7426_v24  ;;  %v2004_v25 = vmul.f32 %v2003_v18, %v7350_v15 }
 0x1da   : > { %v7442_v58 = vadd.f32 1.0, %v2017_v14  ;;  %v2082_v11 = vmul.f32 %v2081_v54, %v7387_v63  ;;  %v2093_v42 = vmul.f32 %v2092_v13, %v7387_v63  ;;  %v1848_v21 = vadd.f32 %v1840_v49, %v1800_v48 }
 0x1db   : > { %v5330_v37 = vclamps-f32 %v1188_v39, 1.0  ;;  %v2119_v40 = vadd.f32 0.00028619796, %v2118_v10  ;;  %v2130_v28 = vadd.f32 0.001143296, %v2129_v8  ;;  %v7449_v0 = vperm.slane %v7418_v32, 2 }
 0x1dc   : > { %v901_v47 = vmul.f32 0.5, %v7215_v1  ;;  %5579 = vrcp.f32 %v7442_v58  ;;  %v1789_v22 = vmul.f32 %v6681_v2, %v6693_v9  ;;  %v1749_v30 = vadd.f32 %v1741_v19, %v1693_v53  ;;  %v1810_v19 = vpop.permute.xlu1 %1809  ;;  %v7484_v8 = vld [vmem:[#allocation2 + $0x40] sm:$0xff] }
 0x1dd   : > { %2744 = vperm.xlu1 %5501, %v7364_v50   ;;  %v7451_v33 = vld [vmem:[#allocation2 + $0xb0] sm:$0xff]  ;;  %v1237_v23 = vadd.f32 1.0, %v5330_v37  ;;  %v2120_v20 = vmul.f32 %v2119_v40, %v7426_v24  ;;  %v2131_v55 = vmul.f32 %v2130_v28, %v7426_v24  ;;  %v2005_v3 = vadd.f32 0.18741608, %v2004_v25 }
 0x1de   : > { %5502 = vset.pattern.permute.xlu2 %v9748_v29  ;;  %9928 = vst [vmem:[#allocation6_spill] sm:$0xff] %v7451_v33  ;;  %v2238_v5 = vld [vmem:[#allocation2 + $0xb8] sm:$0x3]  ;;  %v2094_v34 = vadd.f32 0.112945676, %v2093_v42  ;;  %v7464_v18 = vadd.f32 %v7184_v61, %v1848_v21  ;;  %v7467_v56 = vperm.slane %v7418_v32, 4  ;;  %v7479_v39 = vmul.f32 %v6691_v38, %v6693_v9 }
 0x1df   : > { %2736 = vperm.xlu2 %5502, %v7262_v60   ;;  %2243 = vst.msk [vmem:[#allocation2 + $0xa0] sm:$0xff] %vm1248_vm10, %v7451_v33  ;;  %v1245_v1 = vmul.f32 %v1237_v23, %v901_v47  ;;  %v2083_v60 = vadd.f32 0.05243302, %v2082_v11  ;;  %v2121_v31 = vadd.f32 0.0036580483, %v2120_v20  ;;  %v7470_v49 = vperm.slane %v7418_v32, 5 }
 0x1e0   : > { %2244 = vst.msk [vmem:[#allocation2 + $0xa8] sm:$0x3] %vm1281_vm12, %v2238_v5  ;;  %v2132_v2 = vadd.f32 0.014752088, %v2131_v55  ;;  %v2095_v48 = vmul.f32 %v2094_v34, %v7387_v63  ;;  %v7475_v53 = vmul.f32 0.70710677, %v7464_v18  ;;  %v1797_v13 = vadd.f32 %v1789_v22, %v1749_v30 }
 0x1e1   : > { %9929 = vst [vmem:[#allocation7_spill] sm:$0xff] %v7467_v56  ;;  %v2122_v14 = vmul.f32 %v2121_v31, %v7426_v24  ;;  %v7487_v37 = vperm.slane %v7418_v32, 0  ;;  %v2006_v25 = vmul.f32 %v2005_v3, %v7350_v15  ;;  %v3220_v42 = vld [vmem:[#allocation2 + $0x48] sm:$0x3]  ;;  %v7496_v40 = vmul.f32 %v6707_v57, %v6693_v9 }
 0x1e2   : > { %9930 = vst [vmem:[#allocation8_spill] sm:$0xff] %v7470_v49  ;;  %v2133_v54 = vmul.f32 %v2132_v2, %v7426_v24  ;;  %v5580_v10 = vpop.eup %5579  ;;  %v2096_v38 = vadd.f32 0.4994258, %v2095_v48  ;;  %v2036_v11 = vmul.f32 %v7475_v53, %v7475_v53  ;;  %v2084_v21 = vmul.f32 %v2083_v60, %v7387_v63  ;;  %v304_v60 = vld [vmem:[%s9737_s3 + $0x8] sm:$0xff] }
 0x1e3   : > { %1255 = vst.msk [vmem:[#allocation2 + $0x71] sm:$0xff] %vm1248_vm10, %v1245_v1  ;;  %v2020_v28 = vmul.f32 %v5580_v10, %v7442_v58  ;;  %v2123_v47 = vadd.f32 0.05243302, %v2122_v14  ;;  %v7502_v15 = vperm.slane %v7418_v32, 3  ;;  %v1837_v30 = vmul.f32 %v1810_v19, %v6704_v41 }
 0x1e4   : > { %1264 = vst.msk [vmem:[#allocation2 + $0x70] sm:$0x1] %vm1257_vm13, %v1245_v1  ;;  %v2097_v23 = vmul.f32 %v2096_v38, %v7387_v63  ;;  %v2134_v22 = vadd.f32 0.112945676, %v2133_v54  ;;  %v7509_v57 = vmul.f32 %v7431_v52, %v7484_v8  ;;  %v7512_v55 = vmin.f32 %v2036_v11, 16.0 }
 0x1e5   : > { %1273 = vst.msk [vmem:[#allocation2 + $0x72] sm:$0x80] %vm1266_vm14, %v1245_v1  ;;  %5505 = vset.pattern.permute.xlu1 %v9917_v16  ;;  %v2021_v5 = vsub.f32 1.0, %v2020_v28  ;;  %v2124_v20 = vmul.f32 %v2123_v47, %v7426_v24  ;;  %v2007_v1 = vadd.f32 1.1283791, %v2006_v25  ;;  %vm2025_vm15 = vweird.f32 %v5580_v10 }
 0x1e6   : > { %2792 = vperm.xlu1 %5505, %v7364_v50   ;;  %9931 = vst [vmem:[#allocation9_spill] sm:$0xff] %v7502_v15  ;;  %v7516_v50 = vmul.f32 %v7431_v52, %v3220_v42  ;;  %v7518_v3 = vadd.f32 1.0, %v2097_v23  ;;  %v2135_v34 = vmul.f32 %v2134_v22, %v7426_v24  ;;  %v2030_v2 = vand.u32 2147483648, %v7442_v58 }
 0x1e7   : > { %5503 = vset.pattern.permute.xlu2 %v9917_v16  ;;  %v2022_v31 = vmul.f32 %v5580_v10, %v2021_v5  ;;  %v2085_v48 = vadd.f32 0.18741608, %v2084_v21  ;;  %vm2024_vm0 = vweird.f32 %v7442_v58  ;;  %v1845_v14 = vadd.f32 %v1837_v30, %v1797_v13  ;;  %v7542_v30 = vld [vmem:[%s6183_s21 + $0x38] sm:$0xff] }
 0x1e8   : > { %2772 = vperm.xlu2 %5503, %v6639_v7   ;;  %v2028_v7 = vand.u32 2147483647, %v7442_v58  ;;  %5581 = vrcp.f32 %v7518_v3  ;;  %v2125_v19 = vadd.f32 0.18741608, %v2124_v20  ;;  %v2136_v25 = vadd.f32 0.4994258, %v2135_v34  ;;  %vm2026_vm1 = vmor %vm2024_vm0, %vm2025_vm15 }
 0x1e9   : > { %v2023_v54 = vadd.f32 %v5580_v10, %v2022_v31  ;;  %v2038_v38 = vmul.f32 2.1237322e-06, %v7512_v55  ;;  %v7530_v11 = vmul.f32 %v7449_v0, %v3220_v42  ;;  %v7533_v28 = vperm.slane %v7418_v32, 7 }
 0x1ea   : > { %v7535_v21 = vperm.slane %v304_v60, 0  ;;  %v2049_v58 = vmul.f32 3.8918573e-05, %v7512_v55  ;;  %v2031_v13 = vor.u32 1.1754944e-38, %v2030_v2  ;;  %v2086_v22 = vmul.f32 %v2085_v48, %v7387_v63 }
 0x1eb   : > { %9932 = vst [vmem:[#allocation10_spill] sm:$0xff] %v7533_v28  ;;  %v2027_v23 = vsel %vm2026_vm1, %v5580_v10, %v2023_v54  ;;  %v2008_v32 = vmul.f32 %v2007_v1, %v7334_v59  ;;  %vm2029_vm2 = vcmp.eq.f32.partialorder %v2028_v7, 8.507059e+37  ;;  %v7547_v5 = vadd.f32 %v7184_v61, %v1845_v14 }
 0x1ec   : > { %9933 = vst [vmem:[#allocation11_spill] sm:$0xff] %v7535_v21  ;;  %v2032_v20 = vsel %vm2029_vm2, %v2031_v13, %v2027_v23  ;;  %v2126_v34 = vmul.f32 %v2125_v19, %v7426_v24  ;;  %v2137_v10 = vmul.f32 %v2136_v25, %v7426_v24  ;;  %v2039_v60 = vadd.f32 0.00028619796, %v2038_v38 }
 0x1ed   : > { %v1863_v31 = vmul.f32 0.5, %v7322_v4  ;;  %v2033_v2 = vmul.f32 %v2032_v20, %v2008_v32  ;;  %v2050_v48 = vadd.f32 0.001143296, %v2049_v58  ;;  %v7554_v54 = vmul.f32 0.70710677, %v7542_v30 }
 0x1ee   : > { %5507 = vset.pattern.permute.xlu1 %v9920_v27  ;;  %v5582_v63 = vpop.eup %5581  ;;  %v2087_v59 = vadd.f32 1.1283791, %v2086_v22  ;;  %v2108_v1 = vand.u32 2147483647, %v7518_v3  ;;  %v7558_v7 = vadd.f32 1.0, %v2137_v10  ;;  %v2040_v24 = vmul.f32 %v2039_v60, %v7512_v55  ;;  %v7572_v60 = vld [vmem:[%s6183_s21 + $0x10] sm:$0xff] }
 0x1ef   : > { %v2100_v61 = vmul.f32 %v5582_v63, %v7518_v3  ;;  %v5349_v14 = vclamps-f32 %v2033_v2, 1.0  ;;  %v7563_v4 = vmul.f32 0.70710677, %v7547_v5  ;;  %v2110_v25 = vand.u32 2147483648, %v7518_v3 }
 0x1f0   : > { %5506 = vset.pattern.permute.xlu2 %v9920_v27  ;;  %v2051_v27 = vmul.f32 %v2050_v48, %v7512_v55  ;;  %v2127_v38 = vadd.f32 1.1283791, %v2126_v34  ;;  %5583 = vrcp.f32 %v7558_v7  ;;  %v1865_v23 = vmul.f32 0.5, %v7356_v12 }
 0x1f1   : > { %v2101_v19 = vsub.f32 1.0, %v2100_v61  ;;  %v2199_v58 = vadd.f32 1.0, %v5349_v14  ;;  %v2041_v13 = vadd.f32 0.0036580483, %v2040_v24  ;;  %v2088_v32 = vmul.f32 %v2087_v59, %v7370_v36 }
 0x1f2   : > { %v2052_v22 = vadd.f32 0.014752088, %v2051_v27  ;;  %vm2105_vm3 = vweird.f32 %v5582_v63  ;;  %v1916_v10 = vmul.f32 %v7563_v4, %v7563_v4  ;;  %vm2104_vm4 = vweird.f32 %v7518_v3 }
 0x1f3   : > { %v2102_v20 = vmul.f32 %v5582_v63, %v2101_v19  ;;  %v2207_v2 = vmul.f32 %v2199_v58, %v1863_v31  ;;  %vm7575_vm5 = vcmp.eq.f32.partialorder %v2108_v1, 8.507059e+37  ;;  %v2111_v61 = vor.u32 1.1754944e-38, %v2110_v25  ;;  %vm2106_vm6 = vmor %vm2104_vm4, %vm2105_vm3 }
 0x1f4   : > { %v2053_v12 = vmul.f32 %v2052_v22, %v7512_v55  ;;  %v7581_v36 = vmul.f32 %v2127_v38, %v7391_v43  ;;  %v7583_v59 = vmin.f32 %v1916_v10, 16.0  ;;  %v2042_v31 = vmul.f32 %v2041_v13, %v7512_v55 }
 0x1f5   : > { %v2103_v48 = vadd.f32 %v5582_v63, %v2102_v20  ;;  %2216 = vst.msk [vmem:[#allocation2 + $0xe1] sm:$0xff] %vm1248_vm10, %v2207_v2  ;;  %v2559_v3 = vmul.f32 %v7554_v54, %v7554_v54  ;;  %v7590_v1 = vmul.f32 0.70710677, %v7572_v60  ;;  %vm3281_vm7 = vcmask 1046528  }
 0x1f6   : > { %v2054_v14 = vadd.f32 0.112945676, %v2053_v12  ;;  %v5584_v24 = vpop.eup %5583  ;;  %2224 = vst.msk [vmem:[#allocation2 + $0xe0] sm:$0x1] %vm1257_vm13, %v2207_v2  ;;  %vm2144_vm8 = vweird.f32 %v7558_v7  ;;  %v1918_v27 = vmul.f32 2.1237322e-06, %v7583_v59 }
 0x1f7   : > { %v2107_v43 = vsel %vm2106_vm6, %v5582_v63, %v2103_v48  ;;  %v1929_v19 = vmul.f32 3.8918573e-05, %v7583_v59  ;;  %2232 = vst.msk [vmem:[#allocation2 + $0xe2] sm:$0x80] %vm1266_vm14, %v2207_v2  ;;  %v2140_v38 = vmul.f32 %v5584_v24, %v7558_v7  ;;  %v2148_v58 = vand.u32 2147483647, %v7558_v7  ;;  %v7603_v48 = vpop.permute.xlu2 %1717 }
 0x1f8   : > { %v2112_v25 = vsel %vm7575_vm5, %v2111_v61, %v2107_v43  ;;  %v2150_v13 = vand.u32 2147483648, %v7558_v7  ;;  %v2055_v63 = vmul.f32 %v2054_v14, %v7512_v55  ;;  %v1919_v20 = vadd.f32 0.00028619796, %v1918_v27 }
 0x1f9   : > { %v2113_v22 = vmul.f32 %v2112_v25, %v2088_v32  ;;  %v1930_v10 = vadd.f32 0.001143296, %v1929_v19  ;;  %v2141_v12 = vsub.f32 1.0, %v2140_v38  ;;  %v2043_v29 = vadd.f32 0.05243302, %v2042_v31 }
 0x1fa   : > { %v7605_v47 = vmin.f32 %v2559_v3, 16.0  ;;  %v2359_v2 = vmul.f32 %v7590_v1, %v7590_v1  ;;  %v2056_v61 = vadd.f32 0.4994258, %v2055_v63  ;;  %v1920_v43 = vmul.f32 %v1919_v20, %v7583_v59 }
 0x1fb   : > { %v5351_v34 = vclamps-f32 %v2113_v22, 1.0  ;;  %v1931_v42 = vmul.f32 %v1930_v10, %v7583_v59  ;;  %v2142_v32 = vmul.f32 %v5584_v24, %v2141_v12  ;;  %vm2145_vm9 = vweird.f32 %v5584_v24 }
 0x1fc   : > { %v2561_v14 = vmul.f32 2.1237322e-06, %v7605_v47  ;;  %v2572_v27 = vmul.f32 3.8918573e-05, %v7605_v47  ;;  %v2057_v31 = vmul.f32 %v2056_v61, %v7512_v55  ;;  %v1921_v3 = vadd.f32 0.0036580483, %v1920_v43  ;;  %vm2146_vm15 = vmor %vm2144_vm8, %vm2145_vm9 }
 0x1fd   : > { %v2201_v19 = vadd.f32 1.0, %v5351_v34  ;;  %v1932_v25 = vadd.f32 0.014752088, %v1931_v42  ;;  %v2143_v38 = vadd.f32 %v5584_v24, %v2142_v32  ;;  %vm7614_vm11 = vcmp.eq.f32.partialorder %v2148_v58, 8.507059e+37  ;;  %v7624_v61 = vld [vmem:[#allocation2 + $0x60] sm:$0xff] }
 0x1fe   : > { %v2044_v22 = vmul.f32 %v2043_v29, %v7512_v55  ;;  %v2562_v63 = vadd.f32 0.00028619796, %v2561_v14  ;;  %v2151_v10 = vor.u32 1.1754944e-38, %v2150_v13  ;;  %v7621_v12 = vadd.f32 1.0, %v2057_v31  ;;  %9938 = vst [vmem:[#allocation12_spill] sm:$0xff] %v7624_v61 }
 0x1ff   : > { %v2209_v20 = vmul.f32 %v2201_v19, %v1865_v23  ;;  %v1933_v34 = vmul.f32 %v1932_v25, %v7583_v59  ;;  %v7626_v42 = vld [vmem:[#allocation2 + $0x68] sm:$0x3]  ;;  %v2147_v58 = vsel %vm2146_vm15, %v5584_v24, %v2143_v38  ;;  %v1922_v43 = vmul.f32 %v1921_v3, %v7583_v59  ;;  %v7664_v38 = vpop.permute.xlu2 %1765 }
 0x200   : > { %9939 = vst [vmem:[#allocation13_spill] sm:$0xff] %v7626_v42  ;;  %v2563_v32 = vmul.f32 %v2562_v63, %v7605_v47  ;;  %v2573_v29 = vadd.f32 0.001143296, %v2572_v27  ;;  %v2152_v7 = vsel %vm7614_vm11, %v2151_v10, %v2147_v58  ;;  %5585 = vrcp.f32 %v7621_v12 }
 0x201   : > { %2218 = vst.msk [vmem:[#allocation2 + $0x101] sm:$0xff] %vm1248_vm10, %v2209_v20  ;;  %v7635_v13 = vmin.f32 %v2359_v2, 16.0  ;;  %v9940_v14 = vrot.slane %v7516_v50, 1  ;;  %v9941_v24 = vrot.slane %v7509_v57, 1  ;;  %v2153_v27 = vmul.f32 %v2152_v7, %v7581_v36 }
 0x202   : > { %2226 = vst.msk [vmem:[#allocation2 + $0x100] sm:$0x1] %vm1257_vm13, %v2209_v20  ;;  %v2045_v31 = vadd.f32 0.18741608, %v2044_v22  ;;  %v2574_v3 = vmul.f32 %v2573_v29, %v7605_v47  ;;  %v7649_v33 = vmul.f32 %v7431_v52, %v7624_v61  ;;  %v7653_v2 = vmul.f32 %v7431_v52, %v7626_v42 }
 0x203   : > { %v7642_v19 = vsel %vm3281_vm7, %v9941_v24, %v9940_v14  ;;  %v7657_v57 = vmul.f32 %v7449_v0, %v7626_v42  ;;  %2234 = vst.msk [vmem:[#allocation2 + $0x102] sm:$0x80] %vm1266_vm14, %v2209_v20  ;;  %v1934_v50 = vadd.f32 0.112945676, %v1933_v34  ;;  %v7662_v36 = vmul.f32 %v7467_v56, %v7626_v42 }
 0x204   : > { %v5352_v25 = vclamps-f32 %v2153_v27, 1.0  ;;  %v1923_v22 = vadd.f32 0.05243302, %v1922_v43  ;;  %v2564_v63 = vadd.f32 0.0036580483, %v2563_v32  ;;  %v1866_v14 = vmul.f32 0.5, %v7377_v26 }
 0x205   : > { %9942 = vst [vmem:[#allocation14_spill] sm:$0xff] %v7657_v57  ;;  %v1935_v10 = vmul.f32 %v1934_v50, %v7583_v59  ;;  %v2575_v58 = vadd.f32 0.014752088, %v2574_v3  ;;  %v2361_v29 = vmul.f32 2.1237322e-06, %v7635_v13  ;;  %v2046_v34 = vmul.f32 %v2045_v31, %v7512_v55 }
 0x206   : > { %9943 = vst [vmem:[#allocation15_spill] sm:$0xff] %v7662_v36  ;;  %v2372_v7 = vmul.f32 3.8918573e-05, %v7635_v13  ;;  %v2202_v20 = vadd.f32 1.0, %v5352_v25  ;;  %v2565_v24 = vmul.f32 %v2564_v63, %v7605_v47  ;;  %v5586_v23 = vpop.eup %5585  ;;  %v3300_v50 = vrot.slane %v7649_v33, 1 }
 0x207   : > { %v1936_v27 = vadd.f32 0.4994258, %v1935_v10  ;;  %v2576_v61 = vmul.f32 %v2575_v58, %v7605_v47  ;;  %v2362_v43 = vadd.f32 0.00028619796, %v2361_v29  ;;  %v7676_v3 = vmul.f32 %v7470_v49, %v7626_v42 }
 0x208   : > { %v2373_v32 = vadd.f32 0.001143296, %v2372_v7  ;;  %v2210_v51 = vmul.f32 %v2202_v20, %v1866_v14  ;;  %v2060_v26 = vmul.f32 %v5586_v23, %v7621_v12  ;;  %v1924_v25 = vmul.f32 %v1923_v22, %v7583_v59 }
 0x209   : > { %9944 = vst [vmem:[#allocation16_spill] sm:$0xff] %v7676_v3  ;;  %v1937_v55 = vmul.f32 %v1936_v27, %v7583_v59  ;;  %v2577_v31 = vadd.f32 0.112945676, %v2576_v61  ;;  %v2363_v63 = vmul.f32 %v2362_v43, %v7635_v13  ;;  %v2047_v10 = vadd.f32 1.1283791, %v2046_v34  ;;  %v1834_v27 = vpop.permute.xlu2 %1833  ;;  %v1690_v34 = vpop.permute.xlu1 %1689 }
 0x20a   : > { %2219 = vst.msk [vmem:[#allocation2 + $0x111] sm:$0xff] %vm1248_vm10, %v2210_v51  ;;  %v2061_v58 = vsub.f32 1.0, %v2060_v26  ;;  %v2068_v33 = vand.u32 2147483647, %v7621_v12  ;;  %v2374_v29 = vmul.f32 %v2373_v32, %v7635_v13  ;;  %v2070_v7 = vand.u32 2147483648, %v7621_v12 }
 0x20b   : > { %2227 = vst.msk [vmem:[#allocation2 + $0x110] sm:$0x1] %vm1257_vm13, %v2210_v51  ;;  %v7687_v14 = vadd.f32 1.0, %v1937_v55  ;;  %v2566_v22 = vadd.f32 0.05243302, %v2565_v24  ;;  %v2578_v20 = vmul.f32 %v2577_v31, %v7605_v47  ;;  %vm2065_vm0 = vweird.f32 %v5586_v23 }
 0x20c   : > { %2235 = vst.msk [vmem:[#allocation2 + $0x112] sm:$0x80] %vm1266_vm14, %v2210_v51  ;;  %v2062_v61 = vmul.f32 %v5586_v23, %v2061_v58  ;;  %v2364_v43 = vadd.f32 0.0036580483, %v2363_v63  ;;  %v2375_v26 = vadd.f32 0.014752088, %v2374_v29  ;;  %v7696_v24 = vmul.f32 %v7467_v56, %v6976_v44 }
 0x20d   : > { %v3301_v42 = vrot.slane %v7653_v2, 1  ;;  %v1925_v21 = vadd.f32 0.18741608, %v1924_v25  ;;  %5587 = vrcp.f32 %v7687_v14  ;;  %vm2064_vm1 = vweird.f32 %v7621_v12  ;;  %v3214_v29 = vld [vmem:[#allocation2 + $0x18] sm:$0x3] }
 0x20e   : > { %v2063_v55 = vadd.f32 %v5586_v23, %v2062_v61  ;;  %v2579_v51 = vadd.f32 0.4994258, %v2578_v20  ;;  %vm2066_vm2 = vmor %vm2064_vm1, %vm2065_vm0  ;;  %v2071_v31 = vor.u32 1.1754944e-38, %v2070_v7  ;;  %v2567_v63 = vmul.f32 %v2566_v22, %v7605_v47 }
 0x20f   : > { %v2365_v58 = vmul.f32 %v2364_v43, %v7635_v13  ;;  %v2376_v2 = vmul.f32 %v2375_v26, %v7635_v13  ;;  %v2048_v25 = vmul.f32 %v2047_v10, %v7475_v53  ;;  %vm2069_vm3 = vcmp.eq.f32.partialorder %v2068_v33, 8.507059e+37 }
 0x210   : > { %v2067_v32 = vsel %vm2066_vm2, %v5586_v23, %v2063_v55  ;;  %v2580_v57 = vmul.f32 %v2579_v51, %v7605_v47  ;;  %v1926_v12 = vmul.f32 %v1925_v21, %v7583_v59  ;;  %v7707_v7 = vsel %vm3281_vm7, %v3300_v50, %v3301_v42 }
 0x211   : > { %v2072_v44 = vsel %vm2069_vm3, %v2071_v31, %v2067_v32  ;;  %v2377_v20 = vadd.f32 0.112945676, %v2376_v2  ;;  %9945 = vst [vmem:[#allocation17_spill] sm:$0xff] %v7707_v7  ;;  %v7713_v53 = vmul.f32 %v7467_v56, %v3214_v29  ;;  %v2568_v23 = vadd.f32 0.18741608, %v2567_v63  ;;  %v1738_v2 = vpop.permute.xlu1 %1737 }
 0x212   : > { %v2073_v43 = vmul.f32 %v2072_v44, %v2048_v25  ;;  %v7710_v26 = vadd.f32 1.0, %v2580_v57  ;;  %v2366_v10 = vadd.f32 0.05243302, %v2365_v58  ;;  %v7718_v21 = vmul.f32 %v7470_v49, %v3214_v29  ;;  %v7725_v58 = vpop.permute.xlu2 %2672 }
 0x213   : > { %v5588_v28 = vpop.eup %5587  ;;  %v2378_v33 = vmul.f32 %v2377_v20, %v7635_v13  ;;  %v1864_v44 = vmul.f32 0.5, %v7464_v18  ;;  %v1927_v57 = vadd.f32 1.1283791, %v1926_v12  ;;  %v1699_v50 = vmul.f32 %v1690_v34, %v6649_v6 }
 0x214   : > { %v5350_v59 = vclamps-f32 %v2073_v43, 1.0  ;;  %v1940_v42 = vmul.f32 %v5588_v28, %v7687_v14  ;;  %5589 = vrcp.f32 %v7710_v26  ;;  %v1948_v31 = vand.u32 2147483647, %v7687_v14 }
 0x215   : > { %v2379_v63 = vadd.f32 0.4994258, %v2378_v33  ;;  %v1950_v29 = vand.u32 2147483648, %v7687_v14  ;;  %v2569_v25 = vmul.f32 %v2568_v23, %v7605_v47  ;;  %v2367_v20 = vmul.f32 %v2366_v10, %v7635_v13 }
 0x216   : > { %v2200_v55 = vadd.f32 1.0, %v5350_v59  ;;  %v1941_v51 = vsub.f32 1.0, %v1940_v42  ;;  %v1747_v18 = vmul.f32 %v1738_v2, %v6653_v62  ;;  %vm1945_vm4 = vweird.f32 %v5588_v28  ;;  %v9958_v59 = vld [vmem:[#allocation10_spill] sm:$0xff] }
 0x217   : > { %v2380_v43 = vmul.f32 %v2379_v63, %v7635_v13  ;;  %v1694_v33 = vmul.f32 %v7053_v46, %v6649_v6  ;;  %v1843_v42 = vmul.f32 %v1834_v27, %v6704_v41  ;;  %v1928_v47 = vmul.f32 %v1927_v57, %v7563_v4  ;;  %v7743_v27 = vld [vmem:[#allocation2 + $0x50] sm:$0xff] }
 0x218   : > { %v2208_v12 = vmul.f32 %v2200_v55, %v1864_v44  ;;  %v1942_v34 = vmul.f32 %v5588_v28, %v1941_v51  ;;  %v1755_v22 = vadd.f32 %v1747_v18, %v1699_v50  ;;  %vm1944_vm5 = vweird.f32 %v7687_v14  ;;  %v7748_v14 = vld [vmem:[#allocation2 + $0x58] sm:$0x3] }
 0x219   : > { %v7739_v10 = vadd.f32 1.0, %v2380_v43  ;;  %vm1946_vm6 = vmor %vm1944_vm5, %vm1945_vm4  ;;  %vm1949_vm8 = vcmp.eq.f32.partialorder %v1948_v31, 8.507059e+37  ;;  %v1951_v55 = vor.u32 1.1754944e-38, %v1950_v29  ;;  %v2368_v51 = vadd.f32 0.18741608, %v2367_v20 }
 0x21a   : > { %2217 = vst.msk [vmem:[#allocation2 + $0xf1] sm:$0xff] %vm1248_vm10, %v2208_v12  ;;  %v1943_v23 = vadd.f32 %v5588_v28, %v1942_v34  ;;  %v5590_v44 = vpop.eup %5589  ;;  %v1803_v46 = vadd.f32 %v7479_v39, %v1755_v22  ;;  %v2570_v4 = vadd.f32 1.1283791, %v2569_v25  ;;  %vm2587_vm9 = vweird.f32 %v7710_v26 }
 0x21b   : > { %2225 = vst.msk [vmem:[#allocation2 + $0xf0] sm:$0x1] %vm1257_vm13, %v2208_v12  ;;  %v2583_v57 = vmul.f32 %v5590_v44, %v7710_v26  ;;  %v2591_v2 = vand.u32 2147483647, %v7710_v26  ;;  %v2593_v31 = vand.u32 2147483648, %v7710_v26  ;;  %5591 = vrcp.f32 %v7739_v10 }
 0x21c   : > { %2233 = vst.msk [vmem:[#allocation2 + $0xf2] sm:$0x80] %vm1266_vm14, %v2208_v12  ;;  %v1947_v50 = vsel %vm1946_vm6, %v5588_v28, %v1943_v23  ;;  %vm2588_vm11 = vweird.f32 %v5590_v44  ;;  %v1851_v29 = vadd.f32 %v1843_v42, %v1803_v46  ;;  %v7755_v28 = vmul.f32 %v7431_v52, %v7743_v27  ;;  %v2685_v12 = vpop.permute.xlu2 %2684  ;;  %v7769_v42 = vld [vmem:[%s9736_s2] ss:$0 sm:$0xff] }
 0x21d   : > { %v1952_v63 = vsel %vm1949_vm8, %v1951_v55, %v1947_v50  ;;  %v2584_v22 = vsub.f32 1.0, %v2583_v57  ;;  %v2658_v25 = vmul.f32 %v7072_v35, %v6649_v6  ;;  %v1742_v20 = vmul.f32 %v7603_v48, %v6653_v62  ;;  %vm7778_vm15 = vmor %vm2587_vm9, %vm2588_vm11 }
 0x21e   : > { %v1953_v39 = vmul.f32 %v1952_v63, %v1928_v47  ;;  %v2369_v18 = vmul.f32 %v2368_v51, %v7635_v13  ;;  %v7764_v34 = vmul.f32 %v7431_v52, %v7748_v14  ;;  %v7772_v23 = vadd.f32 %v7769_v42, %v1851_v29 }
 0x21f   : > { %v2585_v47 = vmul.f32 %v5590_v44, %v2584_v22  ;;  %v1861_v35 = vmul.f32 0.5, %v7547_v5  ;;  %v2571_v48 = vmul.f32 %v2570_v4, %v7554_v54  ;;  %v2594_v55 = vor.u32 1.1754944e-38, %v2593_v31 }
 0x220   : > { %v5347_v43 = vclamps-f32 %v1953_v39, 1.0  ;;  %v2706_v51 = vmul.f32 %v2685_v12, %v6653_v62  ;;  %vm2592_vm0 = vcmp.eq.f32.partialorder %v2591_v2, 8.507059e+37  ;;  %v7784_v57 = vmul.f32 0.70710677, %v7772_v23 }
 0x221   : > { %v2586_v50 = vadd.f32 %v5590_v44, %v2585_v47  ;;  %v5592_v63 = vpop.eup %5591  ;;  %v1750_v39 = vadd.f32 %v1742_v20, %v1694_v33  ;;  %v1790_v5 = vmul.f32 %v7664_v38, %v6693_v9  ;;  %v2370_v54 = vadd.f32 1.1283791, %v2369_v18  ;;  %v1814_v20 = vpop.permute.xlu1 %1813 }
 0x222   : > { %v2197_v46 = vadd.f32 1.0, %v5347_v43  ;;  %v2714_v26 = vadd.f32 %v2706_v51, %v2658_v25  ;;  %v2383_v31 = vmul.f32 %v5592_v63, %v7739_v10  ;;  %vm2387_vm1 = vweird.f32 %v7739_v10 }
 0x223   : > { %v2590_v22 = vsel %vm7778_vm15, %v5590_v44, %v2586_v50  ;;  %v2393_v2 = vand.u32 2147483648, %v7739_v10  ;;  %v2156_v12 = vmul.f32 %v7784_v57, %v7784_v57  ;;  %vm2388_vm2 = vweird.f32 %v5592_v63 }
 0x224   : > { %v2205_v4 = vmul.f32 %v2197_v46, %v1861_v35  ;;  %v2595_v29 = vsel %vm2592_vm0, %v2594_v55, %v2590_v22  ;;  %v7796_v33 = vadd.f32 %v7496_v40, %v2714_v26  ;;  %v2384_v25 = vsub.f32 1.0, %v2383_v31  ;;  %vm7816_vm3 = vmor %vm2387_vm1, %vm2388_vm2 }
 0x225   : > { %v2596_v38 = vmul.f32 %v2595_v29, %v2571_v48  ;;  %v2391_v44 = vand.u32 2147483647, %v7739_v10  ;;  %v7802_v18 = vmul.f32 %v7449_v0, %v7748_v14  ;;  %v1798_v43 = vadd.f32 %v1790_v5, %v1750_v39 }
 0x226   : > { %2214 = vst.msk [vmem:[#allocation2 + $0xc1] sm:$0xff] %vm1248_vm10, %v2205_v4  ;;  %v7805_v47 = vmin.f32 %v2156_v12, 16.0  ;;  %v1838_v40 = vmul.f32 %v1814_v20, %v6704_v41  ;;  %v7810_v35 = vmul.f32 %v7467_v56, %v7748_v14  ;;  %v2270_v48 = vmul.f32 0.5, %v7542_v30 }
 0x227   : > { %9948 = vst [vmem:[#allocation18_spill] sm:$0xff] %v7802_v18  ;;  %v5367_v13 = vclamps-f32 %v2596_v38, 1.0  ;;  %v2385_v55 = vmul.f32 %v5592_v63, %v2384_v25  ;;  %v2394_v46 = vor.u32 1.1754944e-38, %v2393_v2  ;;  %v2371_v22 = vmul.f32 %v2370_v54, %v7590_v1  ;;  %v2721_v2 = vpop.permute.xlu2 %2720 }
 0x228   : > { %2222 = vst.msk [vmem:[#allocation2 + $0xc0] sm:$0x1] %vm1257_vm13, %v2205_v4  ;;  %v2158_v50 = vmul.f32 2.1237322e-06, %v7805_v47  ;;  %v2169_v39 = vmul.f32 3.8918573e-05, %v7805_v47  ;;  %v1846_v5 = vadd.f32 %v1838_v40, %v1798_v43  ;;  %v7825_v30 = vmul.f32 %v7470_v49, %v7748_v14 }
 0x229   : > { %2230 = vst.msk [vmem:[#allocation2 + $0xc2] sm:$0x80] %vm1266_vm14, %v2205_v4  ;;  %v2606_v26 = vadd.f32 1.0, %v5367_v13  ;;  %v2386_v4 = vadd.f32 %v5592_v63, %v2385_v55  ;;  %vm2392_vm4 = vcmp.eq.f32.partialorder %v2391_v44, 8.507059e+37  ;;  %v3297_v38 = vrot.slane %v7755_v28, 1  ;;  %v2618_v51 = vpop.permute.xlu1 %2617 }
 0x22a   : > { %v2159_v10 = vadd.f32 0.00028619796, %v2158_v50  ;;  %v2170_v31 = vadd.f32 0.001143296, %v2169_v39  ;;  %v7828_v29 = vadd.f32 %v7769_v42, %v1846_v5  ;;  %v3298_v54 = vrot.slane %v7764_v34, 1 }
 0x22b   : > { %v7832_v25 = vmul.f32 %v2606_v26, %v2270_v48  ;;  %v2390_v1 = vsel %vm7816_vm3, %v5592_v63, %v2386_v4  ;;  %vm3355_vm5 = vcmask 1045504   ;;  %v2703_v40 = vmul.f32 %v7725_v58, %v6653_v62 }
 0x22c   : > { %v2395_v44 = vsel %vm2392_vm4, %v2394_v46, %v2390_v1  ;;  %v2160_v14 = vmul.f32 %v2159_v10, %v7805_v47  ;;  %v2171_v20 = vmul.f32 %v2170_v31, %v7805_v47  ;;  %v7845_v63 = vmul.f32 0.70710677, %v7828_v29 }
 0x22d   : > { %2652 = vperm.xlu1 %5507, %v7832_v25   ;;  %2700 = vperm.xlu0 %5504, %v7832_v25   ;;  %v2396_v28 = vmul.f32 %v2395_v44, %v2371_v22  ;;  %v3459_v34 = vrot.slane %v7810_v35, 1  ;;  %v2265_v46 = vmul.f32 0.5, %v7572_v60  ;;  %v2655_v5 = vmul.f32 %v2618_v51, %v6649_v6 }
 0x22e   : > { %v2161_v13 = vadd.f32 0.0036580483, %v2160_v14  ;;  %v2172_v55 = vadd.f32 0.014752088, %v2171_v20  ;;  %v1956_v39 = vmul.f32 %v7845_v63, %v7845_v63  ;;  %v7854_v58 = vsel %vm3281_vm7, %v3297_v38, %v3298_v54 }
 0x22f   : > { %v5362_v50 = vclamps-f32 %v2396_v28, 1.0  ;;  %9951 = vst [vmem:[#allocation19_spill] sm:$0xff] %v7854_v58  ;;  %v3331_v4 = vmul.f32 %v7449_v0, %v7484_v8  ;;  %v2751_v60 = vmul.f32 %v2721_v2, %v6693_v9  ;;  %v2711_v1 = vadd.f32 %v2703_v40, %v2655_v5  ;;  %v2769_v14 = vpop.permute.xlu2 %2768  ;;  %v3228_v28 = vld [vmem:[#allocation2 + $0x88] sm:$0x3] }
 0x230   : > { %v2162_v26 = vmul.f32 %v2161_v13, %v7805_v47  ;;  %v2173_v22 = vmul.f32 %v2172_v55, %v7805_v47  ;;  %v7860_v31 = vmin.f32 %v1956_v39, 16.0  ;;  %v7865_v44 = vmul.f32 %v7467_v56, %v7161_v45 }
 0x231   : > { %v2601_v10 = vadd.f32 1.0, %v5362_v50  ;;  %v7869_v38 = vmul.f32 %v7099_v17, %v6649_v6  ;;  %v3236_v20 = vmul.f32 %v7487_v37, %v7484_v8  ;;  %v2759_v40 = vadd.f32 %v2751_v60, %v2711_v1 }
 0x232   : > { %9952 = vst [vmem:[#allocation20_spill] sm:$0xff] %v7865_v44  ;;  %v2174_v54 = vadd.f32 0.112945676, %v2173_v22  ;;  %v1958_v55 = vmul.f32 2.1237322e-06, %v7860_v31  ;;  %v2799_v50 = vmul.f32 %v2769_v14, %v6704_v41  ;;  %v3368_v39 = vrot.slane %v3331_v4, 2 }
 0x233   : > { %v2609_v13 = vmul.f32 %v2601_v10, %v2265_v46  ;;  %v1969_v2 = vmul.f32 3.8918573e-05, %v7860_v31  ;;  %v3422_v17 = vmul.f32 %v7467_v56, %v7743_v27  ;;  %v9953_v5 = vmov 2  }
 0x234   : > { %v2175_v51 = vmul.f32 %v2174_v54, %v7805_v47  ;;  %v2163_v22 = vadd.f32 0.05243302, %v2162_v26  ;;  %v1959_v8 = vadd.f32 0.00028619796, %v1958_v55  ;;  %v3318_v46 = vadd.f32 %v7642_v19, %v3236_v20  ;;  %v7888_v54 = vpop.permute.xlu1 %2642 }
 0x235   : > { %2627 = vperm.xlu2 %5506, %v2609_v13   ;;  %5509 = vset.pattern.permute.xlu1 %v9953_v5  ;;  %v1970_v61 = vadd.f32 0.001143296, %v1969_v2  ;;  %v7882_v10 = vmul.f32 %v7467_v56, %v3228_v28  ;;  %v7886_v60 = vmul.f32 %v7470_v49, %v7161_v45  ;;  %v2807_v4 = vadd.f32 %v2799_v50, %v2759_v40 }
 0x236   : > { %v2176_v1 = vadd.f32 0.4994258, %v2175_v51  ;;  %2728 = vperm.xlu1 %5509, %v2609_v13   ;;  %5513 = vset.pattern.permute.xlu0 %v9917_v16  ;;  %v7892_v26 = vmul.f32 %v7470_v49, %v3228_v28  ;;  %v1960_v14 = vmul.f32 %v1959_v8, %v7860_v31  ;;  %v3401_v20 = vmul.f32 %v7502_v15, %v7743_v27 }
 0x237   : > { %9954 = vst [vmem:[#allocation21_spill] sm:$0xff] %v7882_v10  ;;  %v1971_v19 = vmul.f32 %v1970_v61, %v7860_v31  ;;  %v7900_v2 = vadd.f32 %v7769_v42, %v2807_v4  ;;  %v9957_v40 = vrot.slane %v7530_v11, 2  ;;  %v3458_v50 = vrot.slane %v3422_v17, 1  ;;  %v2789_v36 = vpop.permute.xlu2 %2788 }
 0x238   : > { %9955 = vst [vmem:[#allocation22_spill] sm:$0xff] %v7886_v60  ;;  %v2177_v55 = vmul.f32 %v2176_v1, %v7805_v47  ;;  %v2164_v43 = vmul.f32 %v2163_v22, %v7805_v47  ;;  %v1961_v12 = vadd.f32 0.0036580483, %v1960_v14  ;;  %v7907_v61 = vmul.f32 %v9958_v59, %v3228_v28 }
 0x239   : > { %9956 = vst [vmem:[#allocation23_spill] sm:$0xff] %v7892_v26  ;;  %v3370_v51 = vsel %vm3355_vm5, %v3368_v39, %v9957_v40  ;;  %v1972_v32 = vadd.f32 0.014752088, %v1971_v19  ;;  %v7912_v1 = vmul.f32 0.70710677, %v7900_v2  ;;  %v3495_v4 = vmul.f32 %v7470_v49, %v7743_v27  ;;  %v9960_v39 = vld [vmem:[#allocation11_spill] sm:$0xff] }
 0x23a   : > { %v3392_v8 = vadd.f32 %v3370_v51, %v3318_v46  ;;  %9959 = vst [vmem:[#allocation24_spill] sm:$0xff] %v7907_v61  ;;  %v7909_v48 = vadd.f32 1.0, %v2177_v55  ;;  %v7918_v17 = vmul.f32 %v9960_v39, %v3228_v28  ;;  %v3225_v19 = vld [vmem:[#allocation2 + $0x70] sm:$0xff]  ;;  %v1962_v55 = vmul.f32 %v1961_v12, %v7860_v31  ;;  %v7931_v28 = vld [vmem:[#allocation2 + $0x78] sm:$0x3]  ;;  %v9965_v46 = vld [vmem:[#allocation12_spill] sm:$0xff] }
 0x23b   : > { %v1973_v22 = vmul.f32 %v1972_v32, %v7860_v31  ;;  %v3460_v40 = vsel %vm3281_vm7, %v3458_v50, %v3459_v34  ;;  %v7929_v27 = vmul.f32 %v7502_v15, %v7161_v45  ;;  %v2165_v51 = vadd.f32 0.18741608, %v2164_v43  ;;  %v5631_v26 = vld [vmem:[%s9737_s3] sm:$0xff]  ;;  %v9970_v61 = vld [vmem:[#allocation13_spill] sm:$0xff] }
 0x23c   : > { %9961 = vst [vmem:[#allocation11_spill] sm:$0xff] %v7918_v17  ;;  %v3409_v14 = vadd.f32 %v3401_v20, %v3392_v8  ;;  %5593 = vrcp.f32 %v7909_v48  ;;  %v9963_v32 = vmov 1   ;;  %v2839_v8 = vmul.f32 %v7912_v1, %v7912_v1 }
 0x23d   : > { %9962 = vst [vmem:[#allocation25_spill] sm:$0xff] %v7929_v27  ;;  %5508 = vset.pattern.permute.xlu2 %v9963_v32  ;;  %v1974_v20 = vadd.f32 0.112945676, %v1973_v22  ;;  %v3531_v34 = vrot.slane %v3495_v4, 2  ;;  %v2693_v22 = vpop.permute.xlu1 %2692  ;;  %v7945_v27 = vmul.f32 %v7431_v52, %v3225_v19  ;;  %v7949_v12 = vmul.f32 %v7431_v52, %v7931_v28 }
 0x23e   : > { %2680 = vperm.xlu2 %5508, %v2609_v13   ;;  %5511 = vset.pattern.permute.xlu1 %v9917_v16  ;;  %v7942_v32 = vmin.f32 %v2839_v8, 16.0  ;;  %v3482_v11 = vadd.f32 %v3460_v40, %v3409_v14  ;;  %v1963_v35 = vadd.f32 0.05243302, %v1962_v55  ;;  %v7953_v4 = vmul.f32 %v9958_v59, %v9965_v46 }
 0x23f   : > { %v1975_v43 = vmul.f32 %v1974_v20, %v7860_v31  ;;  %2776 = vperm.xlu1 %5511, %v2609_v13   ;;  %9964 = vst [vmem:[#allocation26_spill] sm:$0xff] %v7945_v27  ;;  %v7957_v20 = vmul.f32 %v7449_v0, %v7931_v28  ;;  %v2166_v13 = vmul.f32 %v2165_v51, %v7805_v47  ;;  %v9968_v50 = vrot.slane %v7825_v30, 2 }
 0x240   : > { %v2841_v14 = vmul.f32 2.1237322e-06, %v7942_v32  ;;  %v7963_v40 = vmul.f32 %v7467_v56, %v7931_v28  ;;  %v2852_v55 = vmul.f32 3.8918573e-05, %v7942_v32  ;;  %v7972_v17 = vperm.slane %v5631_v26, 6 }
 0x241   : > { %9966 = vst [vmem:[#allocation12_spill] sm:$0xff] %v7957_v20  ;;  %v1976_v8 = vadd.f32 0.4994258, %v1975_v43  ;;  %v3533_v60 = vsel %vm3355_vm5, %v3531_v34, %v9968_v50  ;;  %v3586_v7 = vmul.f32 %v9958_v59, %v9970_v61  ;;  %v1964_v45 = vmul.f32 %v1963_v35, %v7860_v31 }
 0x242   : > { %v5594_v19 = vpop.eup %5593  ;;  %9967 = vst [vmem:[#allocation27_spill] sm:$0xff] %v7963_v40  ;;  %v3555_v43 = vadd.f32 %v3533_v60, %v3482_v11  ;;  %v2842_v3 = vadd.f32 0.00028619796, %v2841_v14  ;;  %v2853_v30 = vadd.f32 0.001143296, %v2852_v55  ;;  %v3621_v34 = vrot.slane %v7953_v4, 1 }
 0x243   : > { %9969 = vst [vmem:[#allocation28_spill] sm:$0xff] %v7972_v17  ;;  %v2180_v47 = vmul.f32 %v5594_v19, %v7909_v48  ;;  %v1977_v51 = vmul.f32 %v1976_v8, %v7860_v31  ;;  %v2167_v50 = vadd.f32 1.1283791, %v2166_v13  ;;  %v2708_v26 = vmul.f32 %v2693_v22, %v6653_v62 }
 0x244   : > { %v2188_v58 = vand.u32 2147483647, %v7909_v48  ;;  %v2190_v60 = vand.u32 2147483648, %v7909_v48  ;;  %v2843_v11 = vmul.f32 %v2842_v3, %v7942_v32  ;;  %v2854_v35 = vmul.f32 %v2853_v30, %v7942_v32 }
 0x245   : > { %v2181_v18 = vsub.f32 1.0, %v2180_v47  ;;  %v7980_v56 = vadd.f32 1.0, %v1977_v51  ;;  %vm2185_vm6 = vweird.f32 %v5594_v19  ;;  %v2660_v4 = vmul.f32 %v7888_v54, %v6649_v6  ;;  %v2741_v14 = vpop.permute.xlu1 %2740 }
 0x246   : > { %5510 = vset.pattern.permute.xlu2 %v9953_v5  ;;  %vm2184_vm8 = vweird.f32 %v7909_v48  ;;  %v1965_v22 = vadd.f32 0.18741608, %v1964_v45  ;;  %v2844_v13 = vadd.f32 0.0036580483, %v2843_v11  ;;  %v3622_v55 = vrot.slane %v3586_v7, 1 }
 0x247   : > { %v2182_v8 = vmul.f32 %v5594_v19, %v2181_v18  ;;  %5595 = vrcp.f32 %v7980_v56  ;;  %2748 = vperm.xlu2 %5510, %v7832_v25   ;;  %v2855_v47 = vadd.f32 0.014752088, %v2854_v35  ;;  %v2716_v3 = vadd.f32 %v2708_v26, %v2660_v4  ;;  %vm2186_vm9 = vmor %vm2184_vm8, %vm2185_vm6  ;;  %v8003_v35 = vpop.permute.xlu2 %2647 }
 0x248   : > { %v2756_v51 = vmul.f32 %v2741_v14, %v6693_v9  ;;  %v2168_v18 = vmul.f32 %v2167_v50, %v7784_v57  ;;  %vm2189_vm11 = vcmp.eq.f32.partialorder %v2188_v58, 8.507059e+37  ;;  %v2191_v30 = vor.u32 1.1754944e-38, %v2190_v60 }
 0x249   : > { %v2183_v5 = vadd.f32 %v5594_v19, %v2182_v8  ;;  %v2845_v44 = vmul.f32 %v2844_v13, %v7942_v32  ;;  %v2856_v54 = vmul.f32 %v2855_v47, %v7942_v32  ;;  %v2804_v45 = vmul.f32 %v2789_v36, %v6704_v41 }
 0x24a   : > { %v2764_v48 = vadd.f32 %v2756_v51, %v2716_v3  ;;  %v8000_v7 = vmul.f32 %v7470_v49, %v7931_v28  ;;  %v1966_v11 = vmul.f32 %v1965_v22, %v7860_v31  ;;  %v3564_v57 = vmul.f32 %v7972_v17, %v9965_v46 }
 0x24b   : > { %v2187_v10 = vsel %vm2186_vm9, %v5594_v19, %v2183_v5  ;;  %v2846_v19 = vadd.f32 0.05243302, %v2845_v44  ;;  %v2857_v60 = vadd.f32 0.112945676, %v2856_v54  ;;  %v3623_v13 = vsel %vm3281_vm7, %v3621_v34, %v3622_v55 }
 0x24c   : > { %9971 = vst [vmem:[#allocation13_spill] sm:$0xff] %v8000_v7  ;;  %v2192_v26 = vsel %vm2189_vm11, %v2191_v30, %v2187_v10  ;;  %v2812_v8 = vadd.f32 %v2804_v45, %v2764_v48  ;;  %v3572_v4 = vadd.f32 %v3564_v57, %v3555_v43  ;;  %v3658_v10 = vmul.f32 %v9960_v39, %v9965_v46  ;;  %v309_v7 = vld [vmem:[%s9739_s5 + $0x8] sm:$0xff] }
 0x24d   : > { %v5596_v58 = vpop.eup %5595  ;;  %v2193_v50 = vmul.f32 %v2192_v26, %v2168_v18  ;;  %v2858_v31 = vmul.f32 %v2857_v60, %v7942_v32  ;;  %v3659_v44 = vmul.f32 %v9960_v39, %v9970_v61  ;;  %v1867_v14 = vmul.f32 0.5, %v7772_v23  ;;  %v2781_v3 = vpop.permute.xlu1 %2780 }
 0x24e   : > { %v1980_v36 = vmul.f32 %v5596_v58, %v7980_v56  ;;  %v8014_v22 = vadd.f32 %v7769_v42, %v2812_v8  ;;  %v1967_v5 = vadd.f32 1.1283791, %v1966_v11  ;;  %v1990_v34 = vand.u32 2147483648, %v7980_v56 }
 0x24f   : > { %v5353_v28 = vclamps-f32 %v2193_v50, 1.0  ;;  %5512 = vset.pattern.permute.xlu2 %v9917_v16  ;;  %v2847_v55 = vmul.f32 %v2846_v19, %v7942_v32  ;;  %v2859_v16 = vadd.f32 0.4994258, %v2858_v31  ;;  %vm1985_vm15 = vweird.f32 %v5596_v58  ;;  %v2689_v26 = vpop.permute.xlu2 %2688 }
 0x250   : > { %v1981_v43 = vsub.f32 1.0, %v1980_v36  ;;  %2796 = vperm.xlu2 %5512, %v7832_v25   ;;  %v8023_v47 = vmul.f32 0.70710677, %v8014_v22  ;;  %v1988_v61 = vand.u32 2147483647, %v7980_v56  ;;  %v2802_v23 = vmul.f32 %v2781_v3, %v6704_v41 }
 0x251   : > { %v2203_v46 = vadd.f32 1.0, %v5353_v28  ;;  %v2860_v30 = vmul.f32 %v2859_v16, %v7942_v32  ;;  %v3694_v54 = vrot.slane %v3658_v10, 2  ;;  %vm1984_vm0 = vweird.f32 %v7980_v56 }
 0x252   : > { %v1982_v51 = vmul.f32 %v5596_v58, %v1981_v43  ;;  %v3039_v25 = vmul.f32 %v8023_v47, %v8023_v47  ;;  %v2810_v48 = vadd.f32 %v2802_v23, %v7796_v33  ;;  %v3695_v11 = vrot.slane %v3659_v44, 2  ;;  %vm1986_vm1 = vmor %vm1984_vm0, %vm1985_vm15 }
 0x253   : > { %v2211_v18 = vmul.f32 %v2203_v46, %v1867_v14  ;;  %v1991_v57 = vor.u32 1.1754944e-38, %v1990_v34  ;;  %v2848_v50 = vadd.f32 0.18741608, %v2847_v55  ;;  %v8033_v19 = vadd.f32 1.0, %v2860_v30 }
 0x254   : > { %v1983_v45 = vadd.f32 %v5596_v58, %v1982_v51  ;;  %v8035_v60 = vmin.f32 %v3039_v25, 16.0  ;;  %v1968_v8 = vmul.f32 %v1967_v5, %v7845_v63  ;;  %vm1989_vm2 = vcmp.eq.f32.partialorder %v1988_v61, 8.507059e+37 }
 0x255   : > { %2220 = vst.msk [vmem:[#allocation2 + $0x121] sm:$0xff] %vm1248_vm10, %v2211_v18  ;;  %v8040_v56 = vadd.f32 %v7769_v42, %v2810_v48  ;;  %5597 = vrcp.f32 %v8033_v19  ;;  %v3645_v28 = vadd.f32 %v3623_v13, %v3572_v4  ;;  %v2849_v43 = vmul.f32 %v2848_v50, %v7942_v32  ;;  %v2638_v4 = vpop.permute.xlu1 %2637 }
 0x256   : > { %2228 = vst.msk [vmem:[#allocation2 + $0x120] sm:$0x1] %vm1257_vm13, %v2211_v18  ;;  %v1987_v36 = vsel %vm1986_vm1, %v5596_v58, %v1983_v45  ;;  %v3041_v14 = vmul.f32 2.1237322e-06, %v8035_v60  ;;  %v3052_v63 = vmul.f32 3.8918573e-05, %v8035_v60  ;;  %v3696_v13 = vsel %vm3355_vm5, %v3694_v54, %v3695_v11 }
 0x257   : > { %2236 = vst.msk [vmem:[#allocation2 + $0x122] sm:$0x80] %vm1266_vm14, %v2211_v18  ;;  %v1992_v10 = vsel %vm1989_vm2, %v1991_v57, %v1987_v36  ;;  %v8052_v34 = vmul.f32 0.70710677, %v8040_v56  ;;  %v1862_v3 = vmul.f32 0.5, %v7828_v29  ;;  %v2707_v61 = vmul.f32 %v2689_v26, %v6653_v62  ;;  %v8061_v18 = vld [vmem:[#allocation2] sm:$0xff]  ;;  %v2737_v48 = vpop.permute.xlu2 %2736 }
 0x258   : > { %v1993_v44 = vmul.f32 %v1992_v10, %v1968_v8  ;;  %v3042_v55 = vadd.f32 0.00028619796, %v3041_v14  ;;  %v3053_v16 = vadd.f32 0.001143296, %v3052_v63  ;;  %v8059_v23 = vadd.f32 %v3696_v13, %v3645_v28  ;;  %v3212_v26 = vld [vmem:[#allocation2 + $0x8] sm:$0x3]  ;;  %v2785_v63 = vpop.permute.xlu0 %2784 }
 0x259   : > { %v2959_v51 = vmul.f32 %v8052_v34, %v8052_v34  ;;  %v2659_v45 = vmul.f32 %v2638_v4, %v6649_v6  ;;  %v2850_v29 = vadd.f32 1.1283791, %v2849_v43  ;;  %v2755_v50 = vmul.f32 %v2737_v48, %v6693_v9  ;;  %v9972_v8 = vld [vmem:[#allocation3_spill] sm:$0xff] }
 0x25a   : > { %v5348_v46 = vclamps-f32 %v1993_v44, 1.0  ;;  %v3043_v30 = vmul.f32 %v3042_v55, %v8035_v60  ;;  %v3054_v25 = vmul.f32 %v3053_v16, %v8035_v60  ;;  %v8071_v36 = vmul.f32 %v7470_v49, %v9972_v8 }
 0x25b   : > { %v5598_v54 = vpop.eup %5597  ;;  %v8066_v57 = vmin.f32 %v2959_v51, 16.0  ;;  %v3249_v43 = vmul.f32 %v7431_v52, %v8061_v18  ;;  %v2803_v16 = vmul.f32 %v2785_v63, %v6704_v41  ;;  %v2715_v4 = vadd.f32 %v2707_v61, %v2659_v45 }
 0x25c   : > { %v2198_v32 = vadd.f32 1.0, %v5348_v46  ;;  %v2863_v44 = vmul.f32 %v5598_v54, %v8033_v19  ;;  %v3044_v14 = vadd.f32 0.0036580483, %v3043_v30  ;;  %v3055_v46 = vadd.f32 0.014752088, %v3054_v25 }
 0x25d   : > { %v2240_v11 = vld [vmem:[#allocation2 + $0x120] sm:$0xff]  ;;  %v2961_v55 = vmul.f32 2.1237322e-06, %v8066_v57  ;;  %v2972_v51 = vmul.f32 3.8918573e-05, %v8066_v57  ;;  %vm2868_vm3 = vweird.f32 %v5598_v54  ;;  %v2677_v5 = vpop.permute.xlu1 %2676  ;;  %v3282_v33 = vrot.slane %v3249_v43, 1 }
 0x25e   : > { %v2241_v10 = vld [vmem:[#allocation2 + $0x128] sm:$0x3]  ;;  %2246 = vst.msk [vmem:[#allocation2 + $0x130] sm:$0xff] %vm1248_vm10, %v2240_v11  ;;  %v2206_v28 = vmul.f32 %v2198_v32, %v1862_v3  ;;  %v2864_v13 = vsub.f32 1.0, %v2863_v44  ;;  %v2873_v3 = vand.u32 2147483648, %v8033_v19  ;;  %v3250_v32 = vmul.f32 %v7431_v52, %v3212_v26 }
 0x25f   : > { %2247 = vst.msk [vmem:[#allocation2 + $0x138] sm:$0x3] %vm1281_vm12, %v2241_v10  ;;  %v3045_v30 = vmul.f32 %v3044_v14, %v8035_v60  ;;  %v3056_v25 = vmul.f32 %v3055_v46, %v8035_v60  ;;  %v2962_v48 = vadd.f32 0.00028619796, %v2961_v55  ;;  %v2763_v11 = vadd.f32 %v2755_v50, %v2715_v4 }
 0x260   : > { %2215 = vst.msk [vmem:[#allocation2 + $0xd1] sm:$0xff] %vm1248_vm10, %v2206_v28  ;;  %v2865_v61 = vmul.f32 %v5598_v54, %v2864_v13  ;;  %v2871_v45 = vand.u32 2147483647, %v8033_v19  ;;  %v2973_v10 = vadd.f32 0.001143296, %v2972_v51  ;;  %vm2867_vm4 = vweird.f32 %v8033_v19 }
 0x261   : > { %2223 = vst.msk [vmem:[#allocation2 + $0xd0] sm:$0x1] %vm1257_vm13, %v2206_v28  ;;  %v3057_v44 = vadd.f32 0.112945676, %v3056_v25  ;;  %v2963_v63 = vmul.f32 %v2962_v48, %v8066_v57  ;;  %v2811_v58 = vadd.f32 %v2803_v16, %v2763_v11  ;;  %v2874_v14 = vor.u32 1.1754944e-38, %v2873_v3  ;;  %vm2869_vm6 = vmor %vm2867_vm4, %vm2868_vm3 }
 0x262   : > { %2231 = vst.msk [vmem:[#allocation2 + $0xd2] sm:$0x80] %vm1266_vm14, %v2206_v28  ;;  %v2866_v31 = vadd.f32 %v5598_v54, %v2865_v61  ;;  %v2974_v46 = vmul.f32 %v2973_v10, %v8066_v57  ;;  %v3046_v50 = vadd.f32 0.05243302, %v3045_v30  ;;  %v2851_v13 = vmul.f32 %v2850_v29, %v7912_v1 }
 0x263   : > { %v3058_v28 = vmul.f32 %v3057_v44, %v8035_v60  ;;  %v2964_v55 = vadd.f32 0.0036580483, %v2963_v63  ;;  %v8094_v4 = vadd.f32 %v7769_v42, %v2811_v58  ;;  %vm2872_vm8 = vcmp.eq.f32.partialorder %v2871_v45, 8.507059e+37 }
 0x264   : > { %v2870_v51 = vsel %vm2869_vm6, %v5598_v54, %v2866_v31  ;;  %v2975_v16 = vadd.f32 0.014752088, %v2974_v46  ;;  %v3283_v3 = vrot.slane %v3250_v32, 1  ;;  %v3323_v58 = vmul.f32 %v7449_v0, %v8061_v18 }
 0x265   : > { %v2875_v43 = vsel %vm2872_vm8, %v2874_v14, %v2870_v51  ;;  %v3059_v25 = vadd.f32 0.4994258, %v3058_v28  ;;  %v2965_v19 = vmul.f32 %v2964_v55, %v8066_v57  ;;  %v8100_v30 = vmul.f32 0.70710677, %v8094_v4 }
 0x266   : > { %v2876_v48 = vmul.f32 %v2875_v43, %v2851_v13  ;;  %v2976_v11 = vmul.f32 %v2975_v16, %v8066_v57  ;;  %v3047_v61 = vmul.f32 %v3046_v50, %v8035_v60  ;;  %v3324_v54 = vmul.f32 %v7449_v0, %v3212_v26  ;;  %v2725_v13 = vpop.permute.xlu1 %2724 }
 0x267   : > { %v3060_v1 = vmul.f32 %v3059_v25, %v8035_v60  ;;  %v2966_v31 = vadd.f32 0.05243302, %v2965_v19  ;;  %v2999_v32 = vmul.f32 %v8100_v30, %v8100_v30  ;;  %v3232_v10 = vmul.f32 %v7487_v37, %v8061_v18 }
 0x268   : > { %v5368_v29 = vclamps-f32 %v2876_v48, 1.0  ;;  %v2977_v45 = vadd.f32 0.112945676, %v2976_v11  ;;  %v2823_v44 = vmul.f32 0.5, %v7900_v2  ;;  %v3284_v46 = vsel %vm3281_vm7, %v3282_v33, %v3283_v3 }
 0x269   : > { %v8112_v63 = vadd.f32 1.0, %v3060_v1  ;;  %v2967_v14 = vmul.f32 %v2966_v31, %v8066_v57  ;;  %v8117_v26 = vmin.f32 %v2999_v32, 16.0  ;;  %v2704_v55 = vmul.f32 %v2677_v5, %v6653_v62 }
 0x26a   : > { %v3159_v50 = vadd.f32 1.0, %v5368_v29  ;;  %v2978_v28 = vmul.f32 %v2977_v45, %v8066_v57  ;;  %v3048_v51 = vadd.f32 0.18741608, %v3047_v61  ;;  %v3356_v18 = vrot.slane %v3323_v58, 2 }
 0x26b   : > { %5599 = vrcp.f32 %v8112_v63  ;;  %v3357_v16 = vrot.slane %v3324_v54, 2  ;;  %v3001_v25 = vmul.f32 2.1237322e-06, %v8117_v26  ;;  %v8124_v33 = vmul.f32 %v7502_v15, %v9972_v8 }
 0x26c   : > { %v3167_v2 = vmul.f32 %v3159_v50, %v2823_v44  ;;  %v2979_v43 = vadd.f32 0.4994258, %v2978_v28  ;;  %v2968_v19 = vadd.f32 0.18741608, %v2967_v14  ;;  %v3012_v3 = vmul.f32 3.8918573e-05, %v8117_v26  ;;  %v2697_v44 = vpop.permute.xlu0 %2696 }
 0x26d   : > { %v3314_v48 = vadd.f32 %v3284_v46, %v3232_v10  ;;  %v9973_v5 = vrot.slane %v7713_v53, 1  ;;  %v9974_v11 = vrot.slane %v7696_v24, 1  ;;  %v3002_v1 = vadd.f32 0.00028619796, %v3001_v25  ;;  %v2773_v53 = vpop.permute.xlu2 %2772  ;;  %v8147_v28 = vld [vmem:[#allocation2 + $0xe0] sm:$0xff] }
 0x26e   : > { %3176 = vst.msk [vmem:[#allocation2 + $0x151] sm:$0xff] %vm1248_vm10, %v3167_v2  ;;  %v2980_v58 = vmul.f32 %v2979_v43, %v8066_v57  ;;  %v2712_v31 = vadd.f32 %v2704_v55, %v7869_v38  ;;  %v2752_v54 = vmul.f32 %v2725_v13, %v6693_v9  ;;  %v3049_v29 = vmul.f32 %v3048_v51, %v8035_v60  ;;  %v8154_v13 = vld [vmem:[%s9737_s3 + $0x8] sm:$0xff] }
 0x26f   : > { %v8132_v61 = vsel %vm3281_vm7, %v9974_v11, %v9973_v5  ;;  %3184 = vst.msk [vmem:[#allocation2 + $0x150] sm:$0x1] %vm1257_vm13, %v3167_v2  ;;  %v3013_v45 = vadd.f32 0.001143296, %v3012_v3  ;;  %v3358_v24 = vsel %vm3355_vm5, %v3356_v18, %v3357_v16  ;;  %v3003_v14 = vmul.f32 %v3002_v1, %v8117_v26 }
 0x270   : > { %3192 = vst.msk [vmem:[#allocation2 + $0x152] sm:$0x80] %vm1266_vm14, %v3167_v2  ;;  %v8143_v10 = vadd.f32 1.0, %v2980_v58  ;;  %v2800_v38 = vmul.f32 %v2773_v53, %v6704_v41  ;;  %v2760_v46 = vadd.f32 %v2752_v54, %v2712_v31  ;;  %v2969_v60 = vmul.f32 %v2968_v19, %v8066_v57  ;;  %v2745_v2 = vpop.permute.xlu1 %2744 }
 0x271   : > { %v5600_v50 = vpop.eup %5599  ;;  %v3014_v55 = vmul.f32 %v3013_v45, %v8117_v26  ;;  %v8157_v51 = vperm.slane %v8154_v13, 1  ;;  %v8159_v18 = vadd.f32 %v3358_v24, %v3314_v48  ;;  %v8164_v43 = vperm.slane %v8154_v13, 2  ;;  %v8172_v48 = vld [vmem:[#allocation2 + $0xe8] sm:$0x3] }
 0x272   : > { %v3063_v16 = vmul.f32 %v5600_v50, %v8112_v63  ;;  %5601 = vrcp.f32 %v8143_v10  ;;  %v8167_v57 = vperm.slane %v8154_v13, 3  ;;  %v3050_v25 = vadd.f32 1.1283791, %v3049_v29 }
 0x273   : > { %9975 = vst [vmem:[#allocation29_spill] sm:$0xff] %v8157_v51  ;;  %v2661_v19 = vmul.f32 %v8003_v35, %v6649_v6  ;;  %v2709_v3 = vmul.f32 %v2697_v44, %v6653_v62  ;;  %v3004_v5 = vadd.f32 0.0036580483, %v3003_v14  ;;  %v3015_v58 = vadd.f32 0.014752088, %v3014_v55 }
 0x274   : > { %9976 = vst [vmem:[#allocation30_spill] sm:$0xff] %v8164_v43  ;;  %v3064_v11 = vsub.f32 1.0, %v3063_v16  ;;  %v2808_v1 = vadd.f32 %v2800_v38, %v2760_v46  ;;  %v8176_v31 = vmul.f32 %v8164_v43, %v8147_v28  ;;  %vm3068_vm9 = vweird.f32 %v5600_v50 }
 0x275   : > { %9977 = vst [vmem:[#allocation31_spill] sm:$0xff] %v8167_v57  ;;  %v3071_v54 = vand.u32 2147483647, %v8112_v63  ;;  %v3073_v29 = vand.u32 2147483648, %v8112_v63  ;;  %v2970_v45 = vadd.f32 1.1283791, %v2969_v60  ;;  %v3005_v24 = vmul.f32 %v3004_v5, %v8117_v26 }
 0x276   : > { %v3200_v53 = vld [vmem:[#allocation2 + $0x150] sm:$0xff]  ;;  %v3065_v35 = vmul.f32 %v5600_v50, %v3064_v11  ;;  %v3016_v44 = vmul.f32 %v3015_v58, %v8117_v26  ;;  %v8183_v14 = vadd.f32 %v7769_v42, %v2808_v1  ;;  %v2828_v46 = vmul.f32 0.5, %v8014_v22 }
 0x277   : > { %v3201_v38 = vld [vmem:[#allocation2 + $0x158] sm:$0x3]  ;;  %3206 = vst.msk [vmem:[#allocation2 + $0x140] sm:$0xff] %vm1248_vm10, %v3200_v53  ;;  %v3051_v55 = vmul.f32 %v3050_v25, %v8023_v47  ;;  %v2717_v16 = vadd.f32 %v2709_v3, %v2661_v19  ;;  %v8190_v60 = vmul.f32 %v8164_v43, %v8172_v48  ;;  %vm3067_vm11 = vweird.f32 %v8112_v63 }
 0x278   : > { %v5602_v11 = vpop.eup %5601  ;;  %3207 = vst.msk [vmem:[#allocation2 + $0x148] sm:$0x3] %vm1281_vm12, %v3201_v38  ;;  %v3066_v5 = vadd.f32 %v5600_v50, %v3065_v35  ;;  %v3017_v58 = vadd.f32 0.112945676, %v3016_v44  ;;  %v2757_v1 = vmul.f32 %v2745_v2, %v6693_v9  ;;  %vm3069_vm15 = vmor %vm3067_vm11, %vm3068_vm9  ;;  %vm3072_vm0 = vcmp.eq.f32.partialorder %v3071_v54, 8.507059e+37  ;;  %v2793_v54 = vpop.permute.xlu1 %2792 }
 0x279   : > { %v3074_v22 = vor.u32 1.1754944e-38, %v3073_v29  ;;  %v2983_v47 = vmul.f32 %v5602_v11, %v8143_v10  ;;  %v8198_v25 = vmul.f32 0.70710677, %v8183_v14  ;;  %v2971_v3 = vmul.f32 %v2970_v45, %v8052_v34 }
 0x27a   : > { %v3070_v19 = vsel %vm3069_vm15, %v5600_v50, %v3066_v5  ;;  %v3006_v53 = vadd.f32 0.05243302, %v3005_v24  ;;  %v3018_v35 = vmul.f32 %v3017_v58, %v8117_v26  ;;  %v2993_v44 = vand.u32 2147483648, %v8143_v10 }
 0x27b   : > { %v3075_v38 = vsel %vm3072_vm0, %v3074_v22, %v3070_v19  ;;  %v2984_v63 = vsub.f32 1.0, %v2983_v47  ;;  %v2879_v2 = vmul.f32 %v8198_v25, %v8198_v25  ;;  %v2765_v52 = vadd.f32 %v2757_v1, %v2717_v16 }
 0x27c   : > { %v3076_v29 = vmul.f32 %v3075_v38, %v3051_v55  ;;  %v3019_v32 = vadd.f32 0.4994258, %v3018_v35  ;;  %v2805_v8 = vmul.f32 %v2793_v54, %v6704_v41  ;;  %vm2988_vm1 = vweird.f32 %v5602_v11 }
 0x27d   : > { %v2985_v20 = vmul.f32 %v5602_v11, %v2984_v63  ;;  %v2991_v34 = vand.u32 2147483647, %v8143_v10  ;;  %v8207_v50 = vmin.f32 %v2879_v2, 16.0  ;;  %v3007_v24 = vmul.f32 %v3006_v53, %v8117_v26 }
 0x27e   : > { %v5373_v45 = vclamps-f32 %v3076_v29, 1.0  ;;  %v3020_v5 = vmul.f32 %v3019_v32, %v8117_v26  ;;  %v2813_v58 = vadd.f32 %v2805_v8, %v2765_v52  ;;  %vm2987_vm2 = vweird.f32 %v8143_v10 }
 0x27f   : > { %v2986_v22 = vadd.f32 %v5602_v11, %v2985_v20  ;;  %v2881_v55 = vmul.f32 2.1237322e-06, %v8207_v50  ;;  %v2892_v16 = vmul.f32 3.8918573e-05, %v8207_v50  ;;  %vm2989_vm3 = vmor %vm2987_vm2, %vm2988_vm1  ;;  %v2994_v47 = vor.u32 1.1754944e-38, %v2993_v44 }
 0x280   : > { %v3164_v1 = vadd.f32 1.0, %v5373_v45  ;;  %v8214_v19 = vadd.f32 1.0, %v3020_v5  ;;  %v8217_v35 = vadd.f32 %v7769_v42, %v2813_v58  ;;  %vm2992_vm4 = vcmp.eq.f32.partialorder %v2991_v34, 8.507059e+37 }
 0x281   : > { %v2990_v38 = vsel %vm2989_vm3, %v5602_v11, %v2986_v22  ;;  %v2882_v53 = vadd.f32 0.00028619796, %v2881_v55  ;;  %v2893_v32 = vadd.f32 0.001143296, %v2892_v16  ;;  %v3008_v8 = vadd.f32 0.18741608, %v3007_v24 }
 0x282   : > { %v3172_v52 = vmul.f32 %v3164_v1, %v2828_v46  ;;  %v2995_v20 = vsel %vm2992_vm4, %v2994_v47, %v2990_v38  ;;  %5603 = vrcp.f32 %v8214_v19  ;;  %v3747_v44 = vmul.f32 %v8157_v51, %v8147_v28  ;;  %v3732_v38 = vld [vmem:[#allocation2 + $0xf0] sm:$0xff] }
 0x283   : > { %v2996_v10 = vmul.f32 %v2995_v20, %v2971_v3  ;;  %v2883_v63 = vmul.f32 %v2882_v53, %v8207_v50  ;;  %v3804_v2 = vrot.slane %v8176_v31, 1  ;;  %v2894_v42 = vmul.f32 %v2893_v32, %v8207_v50  ;;  %v3733_v20 = vld [vmem:[#allocation2 + $0xf8] sm:$0x3] }
 0x284   : > { %3181 = vst.msk [vmem:[#allocation2 + $0x1a1] sm:$0xff] %vm1248_vm10, %v3172_v52  ;;  %v8227_v11 = vmul.f32 0.70710677, %v8217_v35  ;;  %v3805_v46 = vrot.slane %v8190_v60, 1  ;;  %v3841_v54 = vmul.f32 %v8167_v57, %v8147_v28  ;;  %v3842_v29 = vmul.f32 %v8167_v57, %v8172_v48 }
 0x285   : > { %3189 = vst.msk [vmem:[#allocation2 + $0x1a0] sm:$0x1] %vm1257_vm13, %v3172_v52  ;;  %v5371_v3 = vclamps-f32 %v2996_v10, 1.0  ;;  %v8236_v31 = vperm.slane %v8154_v13, 4  ;;  %v8239_v34 = vperm.slane %v8154_v13, 5  ;;  %v3009_v45 = vmul.f32 %v3008_v8, %v8117_v26 }
 0x286   : > { %3197 = vst.msk [vmem:[#allocation2 + $0x1a2] sm:$0x80] %vm1266_vm14, %v3172_v52  ;;  %v2884_v60 = vadd.f32 0.0036580483, %v2883_v63  ;;  %v2895_v24 = vadd.f32 0.014752088, %v2894_v42  ;;  %v3079_v28 = vmul.f32 %v8227_v11, %v8227_v11  ;;  %v3755_v48 = vadd.f32 %v3747_v44, %v8059_v23 }
 0x287   : > { %9978 = vst [vmem:[#allocation32_spill] sm:$0xff] %v8236_v31  ;;  %v2826_v5 = vmul.f32 0.5, %v8040_v56  ;;  %v3162_v58 = vadd.f32 1.0, %v5371_v3  ;;  %v8248_v22 = vperm.slane %v8154_v13, 6  ;;  %v3806_v26 = vsel %vm3281_vm7, %v3804_v2, %v3805_v46 }
 0x288   : > { %9979 = vst [vmem:[#allocation33_spill] sm:$0xff] %v8239_v34  ;;  %v5604_v55 = vpop.eup %5603  ;;  %v2896_v16 = vmul.f32 %v2895_v24, %v8207_v50  ;;  %v8251_v1 = vmin.f32 %v3079_v28, 16.0  ;;  %v3877_v47 = vrot.slane %v3841_v54, 2  ;;  %v2885_v56 = vmul.f32 %v2884_v60, %v8207_v50 }
 0x289   : > { %9980 = vst [vmem:[#allocation34_spill] sm:$0xff] %v8248_v22  ;;  %v3170_v53 = vmul.f32 %v3162_v58, %v2826_v5  ;;  %v3023_v32 = vmul.f32 %v5604_v55, %v8214_v19  ;;  %v3878_v52 = vrot.slane %v3842_v29, 2  ;;  %v3010_v23 = vadd.f32 1.1283791, %v3009_v45 }
 0x28a   : > { %v2897_v8 = vadd.f32 0.112945676, %v2896_v16  ;;  %v3081_v10 = vmul.f32 2.1237322e-06, %v8251_v1  ;;  %v9981_v63 = vrot.slane %v7718_v21, 2  ;;  %v9982_v44 = vrot.slane %v8071_v36, 2 }
 0x28b   : > { %3179 = vst.msk [vmem:[#allocation2 + $0x181] sm:$0xff] %vm1248_vm10, %v3170_v53  ;;  %v3024_v2 = vsub.f32 1.0, %v3023_v32  ;;  %v3031_v46 = vand.u32 2147483647, %v8214_v19  ;;  %v3092_v54 = vmul.f32 3.8918573e-05, %v8251_v1  ;;  %v3405_v3 = vadd.f32 %v8124_v33, %v8159_v18 }
 0x28c   : > { %v8262_v42 = vsel %vm3355_vm5, %v9982_v44, %v9981_v63  ;;  %3187 = vst.msk [vmem:[#allocation2 + $0x180] sm:$0x1] %vm1257_vm13, %v3170_v53  ;;  %v3033_v29 = vand.u32 2147483648, %v8214_v19  ;;  %v2898_v21 = vmul.f32 %v2897_v8, %v8207_v50  ;;  %v3082_v36 = vadd.f32 0.00028619796, %v3081_v10  ;;  %v3215_v63 = vld [vmem:[#allocation2 + $0x20] sm:$0xff] }
 0x28d   : > { %v3828_v45 = vadd.f32 %v3806_v26, %v3755_v48  ;;  %3195 = vst.msk [vmem:[#allocation2 + $0x182] sm:$0x80] %vm1266_vm14, %v3170_v53  ;;  %v3025_v60 = vmul.f32 %v5604_v55, %v3024_v2  ;;  %vm3028_vm6 = vweird.f32 %v5604_v55  ;;  %v2886_v24 = vadd.f32 0.05243302, %v2885_v56  ;;  %v3216_v2 = vld [vmem:[#allocation2 + $0x28] sm:$0x3] }
 0x28e   : > { %v3093_v5 = vadd.f32 0.001143296, %v3092_v54  ;;  %v2899_v58 = vadd.f32 0.4994258, %v2898_v21  ;;  %v3083_v16 = vmul.f32 %v3082_v36, %v8251_v1  ;;  %v3879_v33 = vsel %vm3355_vm5, %v3877_v47, %v3878_v52 }
 0x28f   : > { %v8273_v28 = vpop.permute.xlu2 %2627  ;;  %v3931_v18 = vmul.f32 %v8239_v34, %v3732_v38  ;;  %v3026_v32 = vadd.f32 %v5604_v55, %v3025_v60  ;;  %vm3027_vm8 = vweird.f32 %v8214_v19  ;;  %v3932_v26 = vmul.f32 %v8239_v34, %v3733_v20 }
 0x290   : > { %v3094_v48 = vmul.f32 %v3093_v5, %v8251_v1  ;;  %v3011_v53 = vmul.f32 %v3010_v23, %v8100_v30  ;;  %vm3029_vm9 = vmor %vm3027_vm8, %vm3028_vm6  ;;  %v3034_v56 = vor.u32 1.1754944e-38, %v3033_v29  ;;  %v2900_v8 = vmul.f32 %v2899_v58, %v8207_v50  ;;  %v8291_v23 = vld [vmem:[%s9737_s3 + $0x10] sm:$0xff] }
 0x291   : > { %v3901_v10 = vadd.f32 %v3879_v33, %v3828_v45  ;;  %v3030_v44 = vsel %vm3029_vm9, %v5604_v55, %v3026_v32  ;;  %vm3032_vm11 = vcmp.eq.f32.partialorder %v3031_v46, 8.507059e+37  ;;  %v2887_v47 = vmul.f32 %v2886_v24, %v8207_v50 }
 0x292   : > { %v3095_v52 = vadd.f32 0.014752088, %v3094_v48  ;;  %v3035_v54 = vsel %vm3032_vm11, %v3034_v56, %v3030_v44  ;;  %v8284_v19 = vadd.f32 1.0, %v2900_v8  ;;  %v3084_v21 = vadd.f32 0.0036580483, %v3083_v16 }
 0x293   : > { %v3910_v36 = vmul.f32 %v8236_v31, %v3732_v38  ;;  %v3036_v60 = vmul.f32 %v3035_v54, %v3011_v53  ;;  %v3967_v55 = vrot.slane %v3931_v18, 1  ;;  %v3968_v46 = vrot.slane %v3932_v26, 1 }
 0x294   : > { %v3096_v30 = vmul.f32 %v3095_v52, %v8251_v1  ;;  %5605 = vrcp.f32 %v8284_v19  ;;  %v4004_v29 = vmul.f32 %v8248_v22, %v3732_v38  ;;  %v4005_v45 = vmul.f32 %v8248_v22, %v3733_v20  ;;  %v8308_v20 = vld [vmem:[#allocation2 + $0x100] sm:$0xff]  ;;  %v8313_v52 = vld [vmem:[#allocation2 + $0x108] sm:$0x3] }
 0x295   : > { %v3577_v24 = vmul.f32 %v9958_v59, %v3215_v63  ;;  %v5372_v5 = vclamps-f32 %v3036_v60, 1.0  ;;  %v2888_v58 = vadd.f32 0.18741608, %v2887_v47  ;;  %v3578_v33 = vmul.f32 %v9958_v59, %v3216_v2 }
 0x296   : > { %v3097_v16 = vadd.f32 0.112945676, %v3096_v30  ;;  %v3085_v48 = vmul.f32 %v3084_v21, %v8251_v1  ;;  %v8302_v18 = vperm.slane %v8154_v13, 7  ;;  %v8305_v26 = vperm.slane %v8291_v23, 0 }
 0x297   : > { %v3478_v38 = vadd.f32 %v8132_v61, %v3405_v3  ;;  %v2827_v53 = vmul.f32 0.5, %v8094_v4  ;;  %v3163_v56 = vadd.f32 1.0, %v5372_v5  ;;  %v3918_v8 = vadd.f32 %v3910_v36, %v3901_v10 }
 0x298   : > { %v8298_v32 = vpop.permute.xlu2 %2680  ;;  %9983 = vst [vmem:[#allocation35_spill] sm:$0xff] %v8302_v18  ;;  %v3969_v44 = vsel %vm3281_vm7, %v3967_v55, %v3968_v46  ;;  %v3098_v47 = vmul.f32 %v3097_v16, %v8251_v1  ;;  %v4040_v54 = vrot.slane %v4004_v29, 2  ;;  %v4041_v13 = vrot.slane %v4005_v45, 2 }
 0x299   : > { %9984 = vst [vmem:[#allocation36_spill] sm:$0xff] %v8305_v26  ;;  %v3560_v21 = vmul.f32 %v7972_v17, %v3215_v63  ;;  %v3171_v60 = vmul.f32 %v3163_v56, %v2827_v53  ;;  %v2889_v30 = vmul.f32 %v2888_v58, %v8207_v50  ;;  %v3609_v61 = vrot.slane %v3577_v24, 1 }
 0x29a   : > { %v3610_v3 = vrot.slane %v3578_v33, 1  ;;  %v5606_v40 = vpop.eup %5605  ;;  %v3086_v27 = vadd.f32 0.05243302, %v3085_v48  ;;  %v3099_v4 = vadd.f32 0.4994258, %v3098_v47  ;;  %v8319_v10 = vmul.f32 %v8302_v18, %v8308_v20 }
 0x29b   : > { %v3551_v36 = vadd.f32 %v8262_v42, %v3478_v38  ;;  %3180 = vst.msk [vmem:[#allocation2 + $0x191] sm:$0xff] %vm1248_vm10, %v3171_v60  ;;  %v2903_v55 = vmul.f32 %v5606_v40, %v8284_v19  ;;  %v3991_v46 = vadd.f32 %v3969_v44, %v3918_v8  ;;  %v8326_v29 = vmul.f32 %v8305_v26, %v8308_v20 }
 0x29c   : > { %v8330_v50 = vmul.f32 %v8305_v26, %v8313_v52  ;;  %3188 = vst.msk [vmem:[#allocation2 + $0x190] sm:$0x1] %vm1257_vm13, %v3171_v60  ;;  %v3100_v45 = vmul.f32 %v3099_v4, %v8251_v1  ;;  %v4042_v24 = vsel %vm3355_vm5, %v4040_v54, %v4041_v13  ;;  %v3650_v5 = vmul.f32 %v9960_v39, %v3215_v63 }
 0x29d   : > { %v3568_v42 = vadd.f32 %v3560_v21, %v3551_v36  ;;  %3196 = vst.msk [vmem:[#allocation2 + $0x192] sm:$0x80] %vm1266_vm14, %v3171_v60  ;;  %v2890_v58 = vadd.f32 1.1283791, %v2889_v30  ;;  %v2904_v16 = vsub.f32 1.0, %v2903_v55  ;;  %v3611_v38 = vsel %vm3281_vm7, %v3609_v61, %v3610_v3  ;;  %v3722_v60 = vld [vmem:[#allocation2 + $0xa0] sm:$0xff] }
 0x29e   : > { %v3651_v53 = vmul.f32 %v9960_v39, %v3216_v2  ;;  %v2911_v56 = vand.u32 2147483647, %v8284_v19  ;;  %v2913_v8 = vand.u32 2147483648, %v8284_v19  ;;  %v3087_v44 = vmul.f32 %v3086_v27, %v8251_v1  ;;  %v3723_v30 = vld [vmem:[#allocation2 + $0xa8] sm:$0x3] }
 0x29f   : > { %v2653_v33 = vpop.permute.xlu1 %2652  ;;  %v2701_v48 = vpop.permute.xlu0 %2700  ;;  %v8342_v47 = vadd.f32 1.0, %v3100_v45  ;;  %v2905_v54 = vmul.f32 %v5606_v40, %v2904_v16  ;;  %vm2908_vm15 = vweird.f32 %v5606_v40  ;;  %v4064_v2 = vadd.f32 %v4042_v24, %v3991_v46 }
 0x2a0   : > { %v2662_v13 = vmul.f32 %v2653_v33, %v6649_v6  ;;  %v2710_v21 = vmul.f32 %v2701_v48, %v6653_v62  ;;  %v3641_v61 = vadd.f32 %v3611_v38, %v3568_v42  ;;  %v3682_v3 = vrot.slane %v3650_v5, 2 }
 0x2a1   : > { %v2749_v63 = vpop.permute.xlu2 %2748  ;;  %5607 = vrcp.f32 %v8342_v47  ;;  %v2891_v4 = vmul.f32 %v2890_v58, %v8198_v25  ;;  %v2906_v36 = vadd.f32 %v5606_v40, %v2905_v54  ;;  %vm2907_vm0 = vweird.f32 %v8284_v19 }
 0x2a2   : > { %v3683_v27 = vrot.slane %v3651_v53, 2  ;;  %vm2909_vm1 = vmor %vm2907_vm0, %vm2908_vm15  ;;  %v2914_v55 = vor.u32 1.1754944e-38, %v2913_v8  ;;  %v3088_v45 = vadd.f32 0.18741608, %v3087_v44  ;;  %v3760_v16 = vmul.f32 %v8164_v43, %v3722_v60 }
 0x2a3   : > { %v3761_v33 = vmul.f32 %v8164_v43, %v3723_v30  ;;  %v2910_v48 = vsel %vm2909_vm1, %v5606_v40, %v2906_v36  ;;  %vm2912_vm2 = vcmp.eq.f32.partialorder %v2911_v56, 8.507059e+37  ;;  %v2758_v17 = vmul.f32 %v2749_v63, %v6693_v9 }
 0x2a4   : > { %v2718_v46 = vadd.f32 %v2710_v21, %v2662_v13  ;;  %v2824_v24 = vmul.f32 0.5, %v8183_v14  ;;  %v2915_v42 = vsel %vm2912_vm2, %v2914_v55, %v2910_v48  ;;  %v8354_v25 = vperm.slane %v8291_v23, 1 }
 0x2a5   : > { %v3743_v19 = vmul.f32 %v8157_v51, %v3722_v60  ;;  %v2916_v5 = vmul.f32 %v2915_v42, %v2891_v4  ;;  %v4130_v58 = vrot.slane %v8326_v29, 1  ;;  %v4131_v38 = vrot.slane %v8330_v50, 1 }
 0x2a6   : > { %9985 = vst [vmem:[#allocation37_spill] sm:$0xff] %v8354_v25  ;;  %v3684_v53 = vsel %vm3355_vm5, %v3682_v3, %v3683_v27  ;;  %v3089_v56 = vmul.f32 %v3088_v45, %v8251_v1  ;;  %v3792_v54 = vrot.slane %v3760_v16, 1  ;;  %v3793_v14 = vrot.slane %v3761_v33, 1 }
 0x2a7   : > { %v5608_v40 = vpop.eup %5607  ;;  %v3714_v44 = vadd.f32 %v3684_v53, %v3641_v61  ;;  %v5369_v63 = vclamps-f32 %v2916_v5, 1.0  ;;  %v2766_v21 = vadd.f32 %v2758_v17, %v2718_v46  ;;  %v8363_v36 = vadd.f32 %v8319_v10, %v4064_v2  ;;  %v5633_v46 = vld [vmem:[%s9736_s2] ss:$0 sm:$0xff] }
 0x2a8   : > { %v2729_v8 = vpop.permute.xlu1 %2728  ;;  %v3103_v13 = vmul.f32 %v5608_v40, %v8342_v47  ;;  %v2657_v29 = vmul.f32 %v8273_v28, %v6649_v6  ;;  %v2705_v50 = vmul.f32 %v8298_v32, %v6653_v62  ;;  %v3833_v1 = vmul.f32 %v8167_v57, %v3722_v60 }
 0x2a9   : > { %v3751_v4 = vadd.f32 %v3743_v19, %v3714_v44  ;;  %v3160_v61 = vadd.f32 1.0, %v5369_v63  ;;  %v3834_v45 = vmul.f32 %v8167_v57, %v3723_v30  ;;  %v3090_v17 = vadd.f32 1.1283791, %v3089_v56  ;;  %v9986_v63 = vld [vmem:[#allocation6_spill] sm:$0xff] }
 0x2aa   : > { %v2797_v3 = vpop.permute.xlu2 %2796  ;;  %v3104_v27 = vsub.f32 1.0, %v3103_v13  ;;  %v3111_v10 = vand.u32 2147483647, %v8342_v47  ;;  %v3113_v2 = vand.u32 2147483648, %v8342_v47  ;;  %v3794_v6 = vsel %vm3281_vm7, %v3792_v54, %v3793_v14 }
 0x2ab   : > { %v2806_v55 = vmul.f32 %v2797_v3, %v6704_v41  ;;  %v3168_v28 = vmul.f32 %v3160_v61, %v2824_v24  ;;  %vm3108_vm3 = vweird.f32 %v5608_v40  ;;  %v2753_v32 = vmul.f32 %v2729_v8, %v6693_v9 }
 0x2ac   : > { %v3105_v16 = vmul.f32 %v5608_v40, %v3104_v27  ;;  %v4132_v60 = vsel %vm3281_vm7, %v4130_v58, %v4131_v38  ;;  %v4167_v33 = vmul.f32 %v8354_v25, %v8308_v20  ;;  %v3865_v48 = vrot.slane %v3833_v1, 2  ;;  %v3725_v58 = vld [vmem:[#allocation2 + $0xb8] sm:$0x3] }
 0x2ad   : > { %v2814_v62 = vadd.f32 %v2806_v55, %v2766_v21  ;;  %3177 = vst.msk [vmem:[#allocation2 + $0x161] sm:$0xff] %vm1248_vm10, %v3168_v28  ;;  %vm3107_vm4 = vweird.f32 %v8342_v47  ;;  %v3866_v42 = vrot.slane %v3834_v45, 2  ;;  %v2713_v9 = vadd.f32 %v2705_v50, %v2657_v29 }
 0x2ae   : > { %v3106_v30 = vadd.f32 %v5608_v40, %v3105_v16  ;;  %3185 = vst.msk [vmem:[#allocation2 + $0x160] sm:$0x1] %vm1257_vm13, %v3168_v28  ;;  %vm3109_vm6 = vmor %vm3107_vm4, %vm3108_vm3  ;;  %v3114_v19 = vor.u32 1.1754944e-38, %v3113_v2  ;;  %v4168_v5 = vmul.f32 %v8354_v25, %v8313_v52  ;;  %v3824_v38 = vadd.f32 %v3794_v6, %v3751_v4 }
 0x2af   : > { %v8384_v24 = vadd.f32 %v5633_v46, %v2814_v62  ;;  %3193 = vst.msk [vmem:[#allocation2 + $0x162] sm:$0x80] %vm1266_vm14, %v3168_v28  ;;  %v3091_v47 = vmul.f32 %v3090_v17, %v8227_v11  ;;  %vm3112_vm8 = vcmp.eq.f32.partialorder %v3111_v10, 8.507059e+37  ;;  %v2761_v54 = vadd.f32 %v2753_v32, %v2713_v9 }
 0x2b0   : > { %v3110_v53 = vsel %vm3109_vm6, %v5608_v40, %v3106_v30  ;;  %v3923_v13 = vmul.f32 %v8239_v34, %v9986_v63  ;;  %v3867_v50 = vsel %vm3355_vm5, %v3865_v48, %v3866_v42  ;;  %v3924_v11 = vmul.f32 %v8239_v34, %v3725_v58 }
 0x2b1   : > { %v8392_v56 = vmul.f32 0.70710677, %v8384_v24  ;;  %v2777_v8 = vpop.permute.xlu1 %2776  ;;  %v3115_v44 = vsel %vm3112_vm8, %v3114_v19, %v3110_v53  ;;  %v2829_v40 = vmul.f32 0.5, %v8217_v35  ;;  %v4203_v4 = vrot.slane %v4167_v33, 2 }
 0x2b2   : > { %v2801_v14 = vmul.f32 %v2777_v8, %v6704_v41  ;;  %v3116_v21 = vmul.f32 %v3115_v44, %v3091_v47  ;;  %v3897_v1 = vadd.f32 %v3867_v50, %v3824_v38  ;;  %v4204_v41 = vrot.slane %v4168_v5, 2  ;;  %v5634_v38 = vld [vmem:[#allocation2 + $0x50] sm:$0xff] }
 0x2b3   : > { %v3119_v29 = vmul.f32 %v8392_v56, %v8392_v56  ;;  %v3906_v55 = vmul.f32 %v8236_v31, %v9986_v63  ;;  %v3955_v17 = vrot.slane %v3923_v13, 1  ;;  %v3996_v10 = vmul.f32 %v8248_v22, %v9986_v63  ;;  %v9987_v44 = vld [vmem:[#allocation21_spill] sm:$0xff]  ;;  %v8522_v63 = vld [vmem:[#allocation2 + $0x1a8] sm:$0x3] }
 0x2b4   : > { %v2809_v3 = vadd.f32 %v2801_v14, %v2761_v54  ;;  %v5374_v61 = vclamps-f32 %v3116_v21, 1.0  ;;  %v3997_v2 = vmul.f32 %v8248_v22, %v3725_v58  ;;  %v3956_v16 = vrot.slane %v3924_v11, 1  ;;  %v9989_v14 = vld [vmem:[#allocation20_spill] sm:$0xff] }
 0x2b5   : > { %v8402_v27 = vmin.f32 %v3119_v29, 16.0  ;;  %v4154_v33 = vadd.f32 %v4132_v60, %v8363_v36  ;;  %v3914_v48 = vadd.f32 %v3906_v55, %v3897_v1  ;;  %v4205_v9 = vsel %vm3355_vm5, %v4203_v4, %v4204_v41  ;;  %v3726_v29 = vld [vmem:[#allocation2 + $0xc0] sm:$0xff] }
 0x2b6   : > { %v8406_v45 = vadd.f32 %v5633_v46, %v2809_v3  ;;  %v3165_v6 = vadd.f32 1.0, %v5374_v61  ;;  %v4028_v5 = vrot.slane %v3996_v10, 2  ;;  %v4029_v58 = vrot.slane %v3997_v2, 2  ;;  %v9992_v61 = vld [vmem:[#allocation19_spill] sm:$0xff] }
 0x2b7   : > { %v3121_v35 = vmul.f32 2.1237322e-06, %v8402_v27  ;;  %v3132_v28 = vmul.f32 3.8918573e-05, %v8402_v27  ;;  %v3333_v47 = vmul.f32 %v5634_v38, %v7449_v0  ;;  %v3957_v60 = vsel %vm3281_vm7, %v3955_v17, %v3956_v16  ;;  %v8441_v55 = vld [vmem:[#allocation2 + $0x60] sm:$0xff] }
 0x2b8   : > { %v8415_v32 = vmul.f32 0.70710677, %v8406_v45  ;;  %v3173_v30 = vmul.f32 %v3165_v6, %v2829_v40  ;;  %v3237_v8 = vmul.f32 %v5634_v38, %v7487_v37  ;;  %v9988_v54 = vrot.slane %v9987_v44, 1  ;;  %v3727_v40 = vld [vmem:[#allocation2 + $0xc8] sm:$0x3] }
 0x2b9   : > { %v3122_v46 = vadd.f32 0.00028619796, %v3121_v35  ;;  %v3133_v42 = vadd.f32 0.001143296, %v3132_v28  ;;  %v9990_v13 = vrot.slane %v9989_v14, 1  ;;  %v8437_v11 = vadd.f32 %v4205_v9, %v4154_v33 }
 0x2ba   : > { %v2919_v19 = vmul.f32 %v8415_v32, %v8415_v32  ;;  %3182 = vst.msk [vmem:[#allocation2 + $0x1b1] sm:$0xff] %vm1248_vm10, %v3173_v30  ;;  %v3987_v3 = vadd.f32 %v3957_v60, %v3914_v48  ;;  %v3319_v41 = vadd.f32 %v9992_v61, %v3237_v8  ;;  %v3402_v17 = vmul.f32 %v8441_v55, %v7502_v15  ;;  %v9996_v8 = vld [vmem:[#allocation18_spill] sm:$0xff] }
 0x2bb   : > { %v3123_v53 = vmul.f32 %v3122_v46, %v8402_v27  ;;  %v3134_v36 = vmul.f32 %v3133_v42, %v8402_v27  ;;  %v8432_v21 = vsel %vm3281_vm7, %v9990_v13, %v9988_v54  ;;  %3190 = vst.msk [vmem:[#allocation2 + $0x1b0] sm:$0x1] %vm1257_vm13, %v3173_v30  ;;  %v4030_v6 = vsel %vm3355_vm5, %v4028_v5, %v4029_v58  ;;  %v9993_v42 = vld [vmem:[#allocation7_spill] sm:$0xff] }
 0x2bc   : > { %9991 = vst [vmem:[#allocation21_spill] sm:$0xff] %v8432_v21  ;;  %v8435_v50 = vmin.f32 %v2919_v19, 16.0  ;;  %v3371_v35 = vrot.slane %v3333_v47, 2  ;;  %v4086_v33 = vmul.f32 %v8305_v26, %v3726_v29  ;;  %v4087_v48 = vmul.f32 %v8305_v26, %v3727_v40  ;;  %v8548_v21 = vld [vmem:[#allocation2 + $0x190] sm:$0xff] }
 0x2bd   : > { %3198 = vst.msk [vmem:[#allocation2 + $0x1b2] sm:$0x80] %vm1266_vm14, %v3173_v30  ;;  %v3124_v4 = vadd.f32 0.0036580483, %v3123_v53  ;;  %v3135_v1 = vadd.f32 0.014752088, %v3134_v36  ;;  %v3424_v9 = vmul.f32 %v8441_v55, %v9993_v42  ;;  %v8456_v19 = vmul.f32 %v8441_v55, %v7470_v49 }
 0x2be   : > { %v2921_v10 = vmul.f32 2.1237322e-06, %v8435_v50  ;;  %v2932_v2 = vmul.f32 3.8918573e-05, %v8435_v50  ;;  %v8459_v5 = vperm.slane %v8291_v23, 2  ;;  %v8462_v58 = vperm.slane %v8291_v23, 3 }
 0x2bf   : > { %v3125_v28 = vmul.f32 %v3124_v4, %v8402_v27  ;;  %v3136_v16 = vmul.f32 %v3135_v1, %v8402_v27  ;;  %v4060_v47 = vadd.f32 %v4030_v6, %v3987_v3  ;;  %v4069_v60 = vmul.f32 %v8302_v18, %v3726_v29  ;;  %10009 = vst [vmem:[#allocation45_spill] sm:$0xff] %v8548_v21 }
 0x2c0   : > { %v2922_v30 = vadd.f32 0.00028619796, %v2921_v10  ;;  %v2933_v46 = vadd.f32 0.001143296, %v2932_v2  ;;  %9994 = vst [vmem:[#allocation20_spill] sm:$0xff] %v8459_v5  ;;  %v9997_v44 = vrot.slane %v9996_v8, 2  ;;  %v4159_v2 = vmul.f32 %v8354_v25, %v3726_v29 }
 0x2c1   : > { %v3137_v38 = vadd.f32 0.112945676, %v3136_v16  ;;  %9995 = vst [vmem:[#allocation19_spill] sm:$0xff] %v8462_v58  ;;  %v3126_v14 = vadd.f32 0.05243302, %v3125_v28  ;;  %v4118_v4 = vrot.slane %v4086_v33, 1  ;;  %v4160_v3 = vmul.f32 %v8354_v25, %v3727_v40 }
 0x2c2   : > { %v2923_v53 = vmul.f32 %v2922_v30, %v8435_v50  ;;  %v2934_v36 = vmul.f32 %v2933_v46, %v8435_v50  ;;  %v3373_v54 = vsel %vm3355_vm5, %v3371_v35, %v9997_v44  ;;  %v4119_v1 = vrot.slane %v4087_v48, 1  ;;  %v306_v28 = vld [vmem:[%s9737_s3 + $0x18] sm:$0x7]  ;;  %v4239_v48 = vld [vmem:[#allocation2 + $0x180] sm:$0xff] }
 0x2c3   : > { %v3138_v13 = vmul.f32 %v3137_v38, %v8402_v27  ;;  %v8474_v16 = vperm.slane %v8291_v23, 4  ;;  %v8477_v30 = vperm.slane %v8291_v23, 5  ;;  %v3393_v46 = vadd.f32 %v3373_v54, %v3319_v41  ;;  %v8557_v25 = vld [vmem:[#allocation2 + $0x198] sm:$0x3] }
 0x2c4   : > { %v2924_v61 = vadd.f32 0.0036580483, %v2923_v53  ;;  %v2935_v10 = vadd.f32 0.014752088, %v2934_v36  ;;  %v8484_v33 = vperm.slane %v8291_v23, 6  ;;  %v8487_v29 = vperm.slane %v8291_v23, 7 }
 0x2c5   : > { %v3139_v6 = vadd.f32 0.4994258, %v3138_v13  ;;  %9998 = vst [vmem:[#allocation18_spill] sm:$0xff] %v8474_v16  ;;  %v4077_v40 = vadd.f32 %v4069_v60, %v4060_v47  ;;  %v3127_v38 = vmul.f32 %v3126_v14, %v8402_v27  ;;  %v4120_v36 = vsel %vm3281_vm7, %v4118_v4, %v4119_v1  ;;  %v4240_v14 = vld [vmem:[#allocation2 + $0x188] sm:$0x3] }
 0x2c6   : > { %9999 = vst [vmem:[#allocation38_spill] sm:$0xff] %v8477_v30  ;;  %v2936_v35 = vmul.f32 %v2935_v10, %v8435_v50  ;;  %v2925_v41 = vmul.f32 %v2924_v61, %v8435_v50  ;;  %v4191_v44 = vrot.slane %v4159_v2, 2  ;;  %v4192_v54 = vrot.slane %v4160_v3, 2 }
 0x2c7   : > { %10000 = vst [vmem:[#allocation39_spill] sm:$0xff] %v8484_v33  ;;  %v3140_v53 = vmul.f32 %v3139_v6, %v8402_v27  ;;  %v3461_v13 = vrot.slane %v3424_v9, 1  ;;  %v8494_v10 = vmul.f32 0.5, %v8384_v24  ;;  %v8498_v23 = vperm.slane %v306_v28, 1  ;;  %v8503_v6 = vld [vmem:[#allocation2 + $0x1a0] sm:$0xff] }
 0x2c8   : > { %10001 = vst [vmem:[#allocation40_spill] sm:$0xff] %v8487_v29  ;;  %v2937_v8 = vadd.f32 0.112945676, %v2936_v35  ;;  %v8500_v47 = vadd.f32 %v3402_v17, %v3393_v46  ;;  %v4277_v4 = vmul.f32 %v8462_v58, %v4239_v48  ;;  %v8506_v1 = vperm.slane %v306_v28, 0  ;;  %v10006_v35 = vld [vmem:[#allocation15_spill] sm:$0xff] }
 0x2c9   : > { %v8496_v62 = vadd.f32 1.0, %v3140_v53  ;;  %10002 = vst [vmem:[#allocation41_spill] sm:$0xff] %v8498_v23  ;;  %v8508_v61 = vadd.f32 %v4120_v36, %v4077_v40  ;;  %v3128_v9 = vadd.f32 0.18741608, %v3127_v38  ;;  %v2926_v24 = vadd.f32 0.05243302, %v2925_v41 }
 0x2ca   : > { %v2938_v60 = vmul.f32 %v2937_v8, %v8435_v50  ;;  %10003 = vst [vmem:[#allocation42_spill] sm:$0xff] %v8503_v6  ;;  %v4256_v2 = vmul.f32 %v8459_v5, %v4239_v48  ;;  %v8512_v17 = vperm.slane %v306_v28, 2  ;;  %v8515_v46 = vsel %vm3355_vm5, %v4191_v44, %v4192_v54 }
 0x2cb   : > { %10004 = vst [vmem:[#allocation43_spill] sm:$0xff] %v8506_v1  ;;  %5609 = vrcp.f32 %v8496_v62  ;;  %v10007_v53 = vrot.slane %v10006_v35, 1  ;;  %v4278_v40 = vmul.f32 %v8462_v58, %v4240_v14  ;;  %v4313_v38 = vrot.slane %v4277_v4, 1 }
 0x2cc   : > { %v2939_v3 = vadd.f32 0.4994258, %v2938_v60  ;;  %10005 = vst [vmem:[#allocation44_spill] sm:$0xff] %v8512_v17  ;;  %v4350_v41 = vmul.f32 %v8474_v16, %v4239_v48  ;;  %v8528_v36 = vmul.f32 %v8498_v23, %v8503_v6  ;;  %v4351_v44 = vmul.f32 %v8474_v16, %v4240_v14  ;;  %v311_v48 = vld [vmem:[%s9739_s5 + $0x18] sm:$0xff] }
 0x2cd   : > { %v8520_v8 = vsel %vm3281_vm7, %v3461_v13, %v10007_v53  ;;  %10008 = vst [vmem:[#allocation15_spill] sm:$0xff] %v8522_v63  ;;  %v8534_v54 = vmul.f32 %v8506_v1, %v8503_v6  ;;  %v3129_v60 = vmul.f32 %v3128_v9, %v8402_v27  ;;  %v2927_v4 = vmul.f32 %v2926_v24, %v8435_v50 }
 0x2ce   : > { %v2940_v28 = vmul.f32 %v2939_v3, %v8435_v50  ;;  %v310_v3 = vld [vmem:[%s9739_s5 + $0x10] sm:$0xff]  ;;  %v4264_v14 = vadd.f32 %v4256_v2, %v8437_v11  ;;  %v4314_v35 = vrot.slane %v4278_v40, 1  ;;  %5403 = vmatpush.msra.mxu2 %v311_v48  ;;  %v4386_v13 = vrot.slane %v4350_v41, 2  ;;  %5139 = vmatpush.msra.mxu0 %v311_v48 }
 0x2cf   : > { %v4387_v27 = vrot.slane %v4351_v44, 2  ;;  %v8552_v9 = vmul.f32 %v8498_v23, %v8522_v63  ;;  %v4440_v2 = vmul.f32 %v8484_v33, %v8548_v21  ;;  %v8565_v41 = vmul.f32 %v8512_v17, %v8503_v6  ;;  %5404 = vmatpush.msra.mxu3 %v311_v48  ;;  %v308_v6 = vld [vmem:[%s9739_s5] sm:$0xff]  ;;  %5402 = vmatpush.msra.mxu1 %v311_v48 }
 0x2d0   : > { %v8546_v53 = vadd.f32 1.0, %v2940_v28  ;;  %v4315_v11 = vsel %vm3281_vm7, %v4313_v38, %v4314_v35  ;;  %5406 = vmatpush.msra.mxu2 %v310_v3  ;;  %v4513_v44 = vmul.f32 %v8487_v29, %v8548_v21  ;;  %v8573_v38 = vmul.f32 %v8512_v17, %v8522_v63  ;;  %5140 = vmatpush.msra.mxu0 %v310_v3 }
 0x2d1   : > { %v5610_v24 = vpop.eup %5609  ;;  %v3130_v35 = vadd.f32 1.1283791, %v3129_v60  ;;  %v2928_v40 = vadd.f32 0.18741608, %v2927_v4  ;;  %v4337_v26 = vadd.f32 %v4315_v11, %v4264_v14  ;;  %v4419_v57 = vmul.f32 %v8477_v30, %v8548_v21  ;;  %5407 = vmatpush.msra.mxu3 %v310_v3  ;;  %5405 = vmatpush.msra.mxu1 %v310_v3 }
 0x2d2   : > { %v3143_v28 = vmul.f32 %v5610_v24, %v8496_v62  ;;  %5611 = vrcp.f32 %v8546_v53  ;;  %5409 = vmatpush.msra.mxu2 %v309_v7  ;;  %v4388_v49 = vsel %vm3355_vm5, %v4386_v13, %v4387_v27  ;;  %v4441_v63 = vmul.f32 %v8484_v33, %v8557_v25  ;;  %5141 = vmatpush.msra.mxu0 %v309_v7 }
 0x2d3   : > { %v4476_v51 = vrot.slane %v4440_v2, 1  ;;  %v3151_v60 = vand.u32 2147483647, %v8496_v62  ;;  %v3153_v4 = vand.u32 2147483648, %v8496_v62  ;;  %v4410_v17 = vadd.f32 %v4388_v49, %v4337_v26  ;;  %5410 = vmatpush.msra.mxu3 %v309_v7  ;;  %5408 = vmatpush.msra.mxu1 %v309_v7 }
 0x2d4   : > { %v3144_v43 = vsub.f32 1.0, %v3143_v28  ;;  %v4514_v14 = vmul.f32 %v8487_v29, %v8557_v25  ;;  %vm3148_vm9 = vweird.f32 %v5610_v24  ;;  %5412 = vmatpush.msra.mxu2 %v308_v6  ;;  %v4477_v11 = vrot.slane %v4441_v63, 1  ;;  %5142 = vmatpush.msra.mxu0 %v308_v6 }
 0x2d5   : > { %v4549_v13 = vrot.slane %v4513_v44, 2  ;;  %v2929_v27 = vmul.f32 %v2928_v40, %v8435_v50  ;;  %v4427_v2 = vadd.f32 %v4419_v57, %v4410_v17  ;;  %v4640_v21 = vrot.slane %v8552_v9, 1  ;;  %5413 = vmatpush.msra.mxu3 %v308_v6  ;;  %5411 = vmatpush.msra.mxu1 %v308_v6 }
 0x2d6   : > { %v3145_v48 = vmul.f32 %v5610_v24, %v3144_v43  ;;  %v4550_v28 = vrot.slane %v4514_v14, 2  ;;  %vm3147_vm11 = vweird.f32 %v8496_v62  ;;  %v4478_v3 = vsel %vm3281_vm7, %v4476_v51, %v4477_v11 }
 0x2d7   : > { %v4712_v43 = vrot.slane %v8565_v41, 2  ;;  %vm3149_vm15 = vmor %vm3147_vm11, %vm3148_vm9  ;;  %v3154_v63 = vor.u32 1.1754944e-38, %v3153_v4  ;;  %v4500_v50 = vadd.f32 %v4478_v3, %v4427_v2  ;;  %v4713_v57 = vrot.slane %v8573_v38, 2 }
 0x2d8   : > { %v5612_v49 = vpop.eup %5611  ;;  %v3146_v26 = vadd.f32 %v5610_v24, %v3145_v48  ;;  %v3131_v17 = vmul.f32 %v3130_v35, %v8392_v56  ;;  %vm3152_vm0 = vcmp.eq.f32.partialorder %v3151_v60, 8.507059e+37  ;;  %v4551_v9 = vsel %vm3355_vm5, %v4549_v13, %v4550_v28  ;;  %v4231_v35 = vld [vmem:[#allocation2 + $0x140] sm:$0xff]  ;;  %v4232_v60 = vld [vmem:[#allocation2 + $0x148] sm:$0x3] }
 0x2d9   : > { %v2943_v44 = vmul.f32 %v5612_v49, %v8546_v53  ;;  %v2930_v40 = vadd.f32 1.1283791, %v2929_v27  ;;  %v4573_v14 = vadd.f32 %v4551_v9, %v4500_v50  ;;  %v2951_v48 = vand.u32 2147483647, %v8546_v53 }
 0x2da   : > { %v3150_v7 = vsel %vm3149_vm15, %v5610_v24, %v3146_v26  ;;  %v2953_v4 = vand.u32 2147483648, %v8546_v53  ;;  %v8601_v11 = vmul.f32 %v8441_v55, %v7449_v0  ;;  %vm2948_vm1 = vweird.f32 %v5612_v49 }
 0x2db   : > { %v3155_v62 = vsel %vm3152_vm0, %v3154_v63, %v3150_v7  ;;  %v2944_v51 = vsub.f32 1.0, %v2943_v44  ;;  %v4590_v56 = vadd.f32 %v8534_v54, %v4573_v14  ;;  %v10010_v24 = vrot.slane %v8528_v36, 1  ;;  %v8615_v36 = vld [vmem:[%s9738_s4] ss:$0 sm:$0xff] }
 0x2dc   : > { %v3156_v41 = vmul.f32 %v3155_v62, %v3131_v17  ;;  %v4714_v27 = vsel %vm3355_vm5, %v4712_v43, %v4713_v57  ;;  %v4269_v2 = vmul.f32 %v8462_v58, %v4231_v35  ;;  %v4270_v28 = vmul.f32 %v8462_v58, %v4232_v60 }
 0x2dd   : > { %v2945_v6 = vmul.f32 %v5612_v49, %v2944_v51  ;;  %v4641_v38 = vsel %vm3281_vm7, %v10010_v24, %v4640_v21  ;;  %v2931_v26 = vmul.f32 %v2930_v40, %v8415_v32  ;;  %vm2947_vm2 = vweird.f32 %v8546_v53 }
 0x2de   : > { %v5375_v13 = vclamps-f32 %v3156_v41, 1.0  ;;  %v4663_v63 = vadd.f32 %v4641_v38, %v4590_v56  ;;  %vm2949_vm3 = vmor %vm2947_vm2, %vm2948_vm1  ;;  %vm2952_vm4 = vcmp.eq.f32.partialorder %v2951_v48, 8.507059e+37  ;;  %v2954_v54 = vor.u32 1.1754944e-38, %v2953_v4  ;;  %v10011_v41 = vld [vmem:[#allocation16_spill] sm:$0xff]  ;;  %v10016_v38 = vld [vmem:[#allocation26_spill] sm:$0xff] }
 0x2df   : > { %v2946_v3 = vadd.f32 %v5612_v49, %v2945_v6  ;;  %v4252_v43 = vmul.f32 %v8459_v5, %v4231_v35  ;;  %v4301_v57 = vrot.slane %v4269_v2, 1  ;;  %v4302_v32 = vrot.slane %v4270_v28, 1  ;;  %v10014_v56 = vld [vmem:[#allocation4_spill] sm:$0xff] }
 0x2e0   : > { %v3166_v21 = vadd.f32 1.0, %v5375_v13  ;;  %v4736_v50 = vadd.f32 %v4714_v27, %v4663_v63  ;;  %v4223_v7 = vadd.f32 %v8515_v46, %v8508_v61  ;;  %v3483_v9 = vadd.f32 %v8520_v8, %v8500_v47  ;;  %v10018_v13 = vld [vmem:[#allocation17_spill] sm:$0xff] }
 0x2e1   : > { %v2950_v44 = vsel %vm2949_vm3, %v5612_v49, %v2946_v3  ;;  %v4342_v51 = vmul.f32 %v8474_v16, %v4231_v35  ;;  %v4343_v49 = vmul.f32 %v8474_v16, %v4232_v60  ;;  %v10013_v48 = vrot.slane %v8456_v19, 2  ;;  %v4234_v3 = vld [vmem:[#allocation2 + $0x158] sm:$0x3] }
 0x2e2   : > { %v3174_v17 = vmul.f32 %v3166_v21, %v8494_v10  ;;  %v2955_v53 = vsel %vm2952_vm4, %v2954_v54, %v2950_v44  ;;  %v8625_v40 = vadd.f32 %v8615_v36, %v4736_v50  ;;  %v4260_v14 = vadd.f32 %v4252_v43, %v4223_v7  ;;  %v8657_v54 = vld [vmem:[#allocation2 + $0x70] sm:$0xff]  ;;  %v5637_v44 = vld [vmem:[#allocation2 + $0x78] sm:$0x3] }
 0x2e3   : > { %v2956_v62 = vmul.f32 %v2955_v53, %v2931_v26  ;;  %v10012_v10 = vrot.slane %v10011_v41, 2  ;;  %v3238_v47 = vmul.f32 %v8441_v55, %v7487_v37  ;;  %v3374_v46 = vrot.slane %v8601_v11, 2  ;;  %v4233_v26 = vld [vmem:[#allocation2 + $0x150] sm:$0xff] }
 0x2e4   : > { %3183 = vst.msk [vmem:[#allocation2 + $0x1c1] sm:$0xff] %vm1248_vm10, %v3174_v17  ;;  %v8640_v4 = vmul.f32 0.70710677, %v8625_v40  ;;  %v4303_v6 = vsel %vm3281_vm7, %v4301_v57, %v4302_v32  ;;  %v3589_v24 = vmul.f32 %v9958_v59, %v10014_v56  ;;  %v10015_v19 = vrot.slane %v7949_v12, 1 }
 0x2e5   : > { %v3536_v61 = vsel %vm3355_vm5, %v10013_v48, %v10012_v10  ;;  %3191 = vst.msk [vmem:[#allocation2 + $0x1c0] sm:$0x1] %vm1257_vm13, %v3174_v17  ;;  %v5370_v8 = vclamps-f32 %v2956_v62, 1.0  ;;  %v10017_v35 = vrot.slane %v10016_v38, 1  ;;  %v2825_v55 = vmul.f32 0.5, %v8406_v45 }
 0x2e6   : > { %3199 = vst.msk [vmem:[#allocation2 + $0x1c2] sm:$0x80] %vm1266_vm14, %v3174_v17  ;;  %v3556_v11 = vadd.f32 %v3536_v61, %v3483_v9  ;;  %v3320_v27 = vadd.f32 %v10018_v13, %v3238_v47  ;;  %v4927_v28 = vmul.f32 %v8640_v4, %v8640_v4  ;;  %v4374_v63 = vrot.slane %v4342_v51, 2  ;;  %v10019_v17 = vld [vmem:[#allocation14_spill] sm:$0xff]  ;;  %v10022_v13 = vld [vmem:[#allocation24_spill] sm:$0xff] }
 0x2e7   : > { %v8650_v60 = vsel %vm3281_vm7, %v10017_v35, %v10015_v19  ;;  %v3161_v2 = vadd.f32 1.0, %v5370_v8  ;;  %v4375_v12 = vrot.slane %v4343_v49, 2  ;;  %v4333_v21 = vadd.f32 %v4303_v6, %v4260_v14  ;;  %v10021_v14 = vld [vmem:[#allocation28_spill] sm:$0xff] }
 0x2e8   : > { %v3587_v43 = vmul.f32 %v8657_v54, %v9958_v59  ;;  %v3588_v45 = vmul.f32 %v5637_v44, %v9958_v59  ;;  %v3662_v50 = vmul.f32 %v9960_v39, %v10014_v56  ;;  %v8664_v32 = vmin.f32 %v4927_v28, 16.0 }
 0x2e9   : > { %v3169_v57 = vmul.f32 %v3161_v2, %v2825_v55  ;;  %v10020_v53 = vrot.slane %v10019_v17, 2  ;;  %v3627_v9 = vrot.slane %v3589_v24, 1  ;;  %v4432_v62 = vmul.f32 %v8484_v33, %v4233_v26 }
 0x2ea   : > { %v4433_v51 = vmul.f32 %v8484_v33, %v4234_v3  ;;  %v8675_v41 = vmul.f32 %v10021_v14, %v10014_v56  ;;  %v4929_v10 = vmul.f32 2.1237322e-06, %v8664_v32  ;;  %v4940_v48 = vmul.f32 3.8918573e-05, %v8664_v32 }
 0x2eb   : > { %v3376_v7 = vsel %vm3355_vm5, %v3374_v46, %v10020_v53  ;;  %3178 = vst.msk [vmem:[#allocation2 + $0x171] sm:$0xff] %vm1248_vm10, %v3169_v57  ;;  %v4376_v61 = vsel %vm3355_vm5, %v4374_v63, %v4375_v12  ;;  %v3565_v47 = vmul.f32 %v8657_v54, %v10021_v14  ;;  %v3624_v6 = vrot.slane %v3587_v43, 1  ;;  %v8697_v43 = vld [vmem:[#allocation2 + $0x90] sm:$0xff] }
 0x2ec   : > { %v8671_v49 = vadd.f32 %v3376_v7, %v3320_v27  ;;  %v3203_v46 = vld [vmem:[#allocation2 + $0x1c0] sm:$0xff]  ;;  %3186 = vst.msk [vmem:[#allocation2 + $0x170] sm:$0x1] %vm1257_vm13, %v3169_v57  ;;  %v4406_v8 = vadd.f32 %v4376_v61, %v4333_v21  ;;  %v3625_v24 = vrot.slane %v3588_v45, 1  ;;  %v3700_v19 = vrot.slane %v3662_v50, 2 }
 0x2ed   : > { %v3204_v56 = vld [vmem:[#allocation2 + $0x1c8] sm:$0x3]  ;;  %3209 = vst.msk [vmem:[#allocation2 + $0x1d0] sm:$0xff] %vm1248_vm10, %v3203_v46  ;;  %v4930_v38 = vadd.f32 0.00028619796, %v4929_v10  ;;  %v4415_v35 = vmul.f32 %v8477_v30, %v4233_v26  ;;  %v4505_v55 = vmul.f32 %v8487_v29, %v4233_v26  ;;  %v10023_v27 = vrot.slane %v10022_v13, 1 }
 0x2ee   : > { %3210 = vst.msk [vmem:[#allocation2 + $0x1d8] sm:$0x3] %vm1281_vm12, %v3204_v56  ;;  %v4941_v28 = vadd.f32 0.001143296, %v4940_v48  ;;  %v4506_v63 = vmul.f32 %v8487_v29, %v4234_v3  ;;  %v3660_v12 = vmul.f32 %v8657_v54, %v9960_v39  ;;  %v3661_v21 = vmul.f32 %v5637_v44, %v9960_v39  ;;  %v10024_v3 = vld [vmem:[#allocation11_spill] sm:$0xff] }
 0x2ef   : > { %v8690_v2 = vsel %vm3281_vm7, %v3627_v9, %v10023_v27  ;;  %3194 = vst.msk [vmem:[#allocation2 + $0x172] sm:$0x80] %vm1266_vm14, %v3169_v57  ;;  %v4931_v26 = vmul.f32 %v4930_v38, %v8664_v32  ;;  %v4464_v45 = vrot.slane %v4432_v62, 1  ;;  %v4465_v50 = vrot.slane %v4433_v51, 1  ;;  %v10026_v46 = vld [vmem:[#allocation23_spill] sm:$0xff]  ;;  %v10028_v57 = vld [vmem:[#allocation22_spill] sm:$0xff] }
 0x2f0   : > { %v3573_v17 = vadd.f32 %v3565_v47, %v3556_v11  ;;  %v4942_v53 = vmul.f32 %v4941_v28, %v8664_v32  ;;  %v4423_v7 = vadd.f32 %v4415_v35, %v4406_v8  ;;  %v3626_v9 = vsel %vm3281_vm7, %v3624_v6, %v3625_v24 }
 0x2f1   : > { %v10025_v10 = vrot.slane %v10024_v3, 2  ;;  %v4932_v44 = vadd.f32 0.0036580483, %v4931_v26  ;;  %v4537_v61 = vrot.slane %v4505_v55, 2  ;;  %v10027_v56 = vrot.slane %v10026_v46, 2 }
 0x2f2   : > { %v10029_v13 = vrot.slane %v10028_v57, 2  ;;  %v8717_v11 = vmul.f32 %v10021_v14, %v8697_v43  ;;  %v4943_v51 = vadd.f32 0.014752088, %v4942_v53  ;;  %v4538_v47 = vrot.slane %v4506_v63, 2  ;;  %v8728_v55 = vld [vmem:[#allocation2 + $0x98] sm:$0x3] }
 0x2f3   : > { %v8706_v48 = vsel %vm3355_vm5, %v3700_v19, %v10025_v10  ;;  %v3697_v8 = vrot.slane %v3660_v12, 2  ;;  %v3698_v6 = vrot.slane %v3661_v21, 2  ;;  %v4466_v24 = vsel %vm3281_vm7, %v4464_v45, %v4465_v50 }
 0x2f4   : > { %v8713_v62 = vsel %vm3355_vm5, %v10029_v13, %v10027_v56  ;;  %10030 = vst [vmem:[#allocation16_spill] sm:$0xff] %v8717_v11  ;;  %v3646_v19 = vadd.f32 %v3626_v9, %v3573_v17  ;;  %v8722_v38 = vmul.f32 %v8239_v34, %v8308_v20  ;;  %v8726_v35 = vmul.f32 %v8239_v34, %v8313_v52  ;;  %v8748_v17 = vld [vmem:[#allocation2 + $0x110] sm:$0xff] }
 0x2f5   : > { %v4944_v27 = vmul.f32 %v4943_v51, %v8664_v32  ;;  %v4496_v28 = vadd.f32 %v4466_v24, %v4423_v7  ;;  %v8733_v63 = vmul.f32 %v8248_v22, %v8308_v20  ;;  %v8737_v12 = vmul.f32 %v8248_v22, %v8313_v52 }
 0x2f6   : > { %v4933_v21 = vmul.f32 %v4932_v44, %v8664_v32  ;;  %v3403_v26 = vmul.f32 %v8657_v54, %v7502_v15  ;;  %v3426_v45 = vmul.f32 %v8657_v54, %v9993_v42  ;;  %v8746_v50 = vmul.f32 %v9958_v59, %v8697_v43  ;;  %v10034_v42 = vld [vmem:[#allocation27_spill] sm:$0xff] }
 0x2f7   : > { %v4945_v53 = vadd.f32 0.112945676, %v4944_v27  ;;  %v4539_v7 = vsel %vm3355_vm5, %v4537_v61, %v4538_v47  ;;  %v3699_v52 = vsel %vm3355_vm5, %v3697_v8, %v3698_v6  ;;  %v8754_v9 = vmul.f32 %v9958_v59, %v8728_v55  ;;  %v4235_v47 = vld [vmem:[#allocation2 + $0x160] sm:$0xff]  ;;  %v4236_v8 = vld [vmem:[#allocation2 + $0x168] sm:$0x3] }
 0x2f8   : > { %v3719_v3 = vadd.f32 %v3699_v52, %v3646_v19  ;;  %v8758_v10 = vmul.f32 %v8236_v31, %v8308_v20  ;;  %v3970_v44 = vrot.slane %v8722_v38, 1  ;;  %v3971_v46 = vrot.slane %v8726_v35, 1  ;;  %v10033_v52 = vld [vmem:[#allocation8_spill] sm:$0xff] }
 0x2f9   : > { %v4946_v56 = vmul.f32 %v4945_v53, %v8664_v32  ;;  %v4569_v57 = vadd.f32 %v4539_v7, %v4496_v28  ;;  %v4043_v61 = vrot.slane %v8733_v63, 2  ;;  %v4044_v13 = vrot.slane %v8737_v12, 2  ;;  %v10031_v28 = vld [vmem:[#allocation44_spill] sm:$0xff]  ;;  %v10032_v53 = vld [vmem:[#allocation29_spill] sm:$0xff] }
 0x2fa   : > { %v4934_v51 = vadd.f32 0.05243302, %v4933_v21  ;;  %v8767_v6 = vmul.f32 %v8302_v18, %v8748_v17  ;;  %v3411_v20 = vadd.f32 %v3403_v26, %v8671_v49  ;;  %v3464_v24 = vrot.slane %v3426_v45, 1  ;;  %v5638_v21 = vld [vmem:[#allocation2 + $0xf0] sm:$0xff] }
 0x2fb   : > { %v4947_v19 = vadd.f32 0.4994258, %v4946_v56  ;;  %v4578_v38 = vmul.f32 %v8506_v1, %v4235_v47  ;;  %v4595_v35 = vmul.f32 %v8498_v23, %v4235_v47  ;;  %v4596_v27 = vmul.f32 %v8498_v23, %v4236_v8  ;;  %v10036_v1 = vld [vmem:[#allocation30_spill] sm:$0xff] }
 0x2fc   : > { %v4668_v63 = vmul.f32 %v10031_v28, %v4235_v47  ;;  %v4669_v12 = vmul.f32 %v10031_v28, %v4236_v8  ;;  %v3748_v7 = vmul.f32 %v5638_v21, %v10032_v53  ;;  %v3499_v15 = vmul.f32 %v8657_v54, %v10033_v52  ;;  %v5639_v52 = vld [vmem:[#allocation2 + $0xf8] sm:$0x3] }
 0x2fd   : > { %v4948_v49 = vmul.f32 %v4947_v19, %v8664_v32  ;;  %v4586_v26 = vadd.f32 %v4578_v38, %v4569_v57  ;;  %v4627_v45 = vrot.slane %v4595_v35, 1  ;;  %v4628_v56 = vrot.slane %v4596_v27, 1  ;;  %v8788_v38 = vld [vmem:[#allocation2 + $0x118] sm:$0x3]  ;;  %v10037_v35 = vld [vmem:[#allocation31_spill] sm:$0xff]  ;;  %v10038_v27 = vld [vmem:[#allocation36_spill] sm:$0xff] }
 0x2fe   : > { %v4935_v14 = vmul.f32 %v4934_v51, %v8664_v32  ;;  %v4700_v59 = vrot.slane %v4668_v63, 2  ;;  %v4701_v18 = vrot.slane %v4669_v12, 2  ;;  %v10035_v22 = vrot.slane %v10034_v42, 1 }
 0x2ff   : > { %v8783_v8 = vadd.f32 1.0, %v4948_v49  ;;  %v4629_v31 = vsel %vm3281_vm7, %v4627_v45, %v4628_v56  ;;  %v3770_v28 = vmul.f32 %v5638_v21, %v10036_v1  ;;  %v3771_v19 = vmul.f32 %v5639_v52, %v10036_v1 }
 0x300   : > { %v3466_v47 = vsel %vm3281_vm7, %v3464_v24, %v10035_v22  ;;  %v4659_v57 = vadd.f32 %v4629_v31, %v4586_v26  ;;  %v3843_v51 = vmul.f32 %v5638_v21, %v10037_v35  ;;  %v8793_v63 = vmul.f32 %v10038_v27, %v8748_v17 }
 0x301   : > { %v3537_v42 = vrot.slane %v3499_v15, 2  ;;  %5613 = vrcp.f32 %v8783_v8  ;;  %v4702_v22 = vsel %vm3355_vm5, %v4700_v59, %v4701_v18  ;;  %v3756_v24 = vadd.f32 %v3748_v7, %v3719_v3  ;;  %v10039_v18 = vld [vmem:[#allocation37_spill] sm:$0xff] }
 0x302   : > { %v3484_v12 = vadd.f32 %v3466_v47, %v3411_v20  ;;  %v4732_v49 = vadd.f32 %v4702_v22, %v4659_v57  ;;  %v3807_v45 = vrot.slane %v3770_v28, 1  ;;  %v3808_v56 = vrot.slane %v3771_v19, 1 }
 0x303   : > { %v3844_v31 = vmul.f32 %v5639_v52, %v10037_v35  ;;  %v4936_v26 = vadd.f32 0.18741608, %v4935_v14  ;;  %v3880_v23 = vrot.slane %v3843_v51, 2  ;;  %v3972_v21 = vsel %vm3281_vm7, %v3970_v44, %v3971_v46  ;;  %v10040_v44 = vld [vmem:[#allocation13_spill] sm:$0xff] }
 0x304   : > { %v4097_v30 = vmul.f32 %v10038_v27, %v8788_v38  ;;  %v8802_v15 = vadd.f32 %v8615_v36, %v4732_v49  ;;  %v3809_v11 = vsel %vm3281_vm7, %v3807_v45, %v3808_v56  ;;  %v8807_v3 = vmul.f32 %v10039_v18, %v8748_v17 }
 0x305   : > { %v3881_v59 = vrot.slane %v3844_v31, 2  ;;  %v3829_v20 = vadd.f32 %v3809_v11, %v3756_v24  ;;  %v4045_v28 = vsel %vm3355_vm5, %v4043_v61, %v4044_v13  ;;  %v8812_v14 = vmul.f32 %v10039_v18, %v8788_v38 }
 0x306   : > { %v10041_v46 = vrot.slane %v10040_v44, 2  ;;  %v8818_v52 = vmul.f32 0.70710677, %v8802_v15  ;;  %v4133_v19 = vrot.slane %v8793_v63, 1  ;;  %v4937_v11 = vmul.f32 %v4936_v26, %v8664_v32  ;;  %v5640_v32 = vld [vmem:[#allocation2 + $0x100] sm:$0xff] }
 0x307   : > { %v3882_v47 = vsel %vm3355_vm5, %v3880_v23, %v3881_v59  ;;  %v5614_v51 = vpop.eup %5613  ;;  %v4134_v13 = vrot.slane %v4097_v30, 1  ;;  %v3337_v22 = vmul.f32 %v8657_v54, %v7449_v0  ;;  %v4206_v49 = vrot.slane %v8807_v3, 2 }
 0x308   : > { %v3539_v7 = vsel %vm3355_vm5, %v3537_v42, %v10041_v46  ;;  %v3902_v61 = vadd.f32 %v3882_v47, %v3829_v20  ;;  %v4951_v24 = vmul.f32 %v5614_v51, %v8783_v8  ;;  %v4767_v42 = vmul.f32 %v8818_v52, %v8818_v52  ;;  %v5641_v47 = vld [vmem:[#allocation2 + $0x108] sm:$0x3] }
 0x309   : > { %v3557_v57 = vadd.f32 %v3539_v7, %v3484_v12  ;;  %v3239_v23 = vmul.f32 %v8657_v54, %v7487_v37  ;;  %v4207_v12 = vrot.slane %v8812_v14, 2  ;;  %v3772_v30 = vmul.f32 %v5640_v32, %v10036_v1 }
 0x30a   : > { %v3919_v63 = vadd.f32 %v8758_v10, %v3902_v61  ;;  %v3377_v45 = vrot.slane %v3337_v22, 2  ;;  %v4952_v56 = vsub.f32 1.0, %v4951_v24  ;;  %v8834_v31 = vmin.f32 %v4767_v42, 16.0 }
 0x30b   : > { %v3574_v26 = vadd.f32 %v8675_v41, %v3557_v57  ;;  %v3321_v59 = vadd.f32 %v8650_v60, %v3239_v23  ;;  %v4938_v20 = vadd.f32 1.1283791, %v4937_v11  ;;  %v4959_v3 = vand.u32 2147483647, %v8783_v8  ;;  %v10042_v57 = vld [vmem:[#allocation12_spill] sm:$0xff] }
 0x30c   : > { %v4961_v54 = vand.u32 2147483648, %v8783_v8  ;;  %v3992_v44 = vadd.f32 %v3972_v21, %v3919_v63  ;;  %v4953_v10 = vmul.f32 %v5614_v51, %v4952_v56  ;;  %vm4956_vm13 = vweird.f32 %v5614_v51 }
 0x30d   : > { %v4769_v14 = vmul.f32 2.1237322e-06, %v8834_v31  ;;  %v4780_v46 = vmul.f32 3.8918573e-05, %v8834_v31  ;;  %vm4955_vm14 = vweird.f32 %v8783_v8  ;;  %v3773_v41 = vmul.f32 %v5641_v47, %v10036_v1 }
 0x30e   : > { %v4065_v7 = vadd.f32 %v4045_v28, %v3992_v44  ;;  %v10043_v60 = vrot.slane %v10042_v57, 2  ;;  %v4954_v61 = vadd.f32 %v5614_v51, %v4953_v10  ;;  %v4939_v42 = vmul.f32 %v4938_v20, %v8640_v4  ;;  %vm4957_vm12 = vmor %vm4955_vm14, %vm4956_vm13 }
 0x30f   : > { %v4770_v22 = vadd.f32 0.00028619796, %v4769_v14  ;;  %v4781_v24 = vadd.f32 0.001143296, %v4780_v46  ;;  %vm4960_vm6 = vcmp.eq.f32.partialorder %v4959_v3, 8.507059e+37  ;;  %v4962_v23 = vor.u32 1.1754944e-38, %v4961_v54 }
 0x310   : > { %v3379_v11 = vsel %vm3355_vm5, %v3377_v45, %v10043_v60  ;;  %v3647_v63 = vadd.f32 %v8690_v2, %v3574_v26  ;;  %v4958_v8 = vsel %vm4957_vm12, %v5614_v51, %v4954_v61  ;;  %v4082_v44 = vadd.f32 %v8767_v6, %v4065_v7  ;;  %v10044_v2 = vld [vmem:[#allocation25_spill] sm:$0xff] }
 0x311   : > { %v3395_v21 = vadd.f32 %v3379_v11, %v3321_v59  ;;  %v4771_v28 = vmul.f32 %v4770_v22, %v8834_v31  ;;  %v4782_v56 = vmul.f32 %v4781_v24, %v8834_v31  ;;  %v4963_v57 = vsel %vm4960_vm6, %v4962_v23, %v4958_v8 }
 0x312   : > { %v4135_v45 = vsel %vm3281_vm7, %v4133_v19, %v4134_v13  ;;  %v8854_v10 = vmul.f32 %v5640_v32, %v10037_v35  ;;  %v8857_v4 = vmul.f32 %v5641_v47, %v10037_v35  ;;  %v4964_v59 = vmul.f32 %v4963_v57, %v4939_v42 }
 0x313   : > { %v4772_v20 = vadd.f32 0.0036580483, %v4771_v28  ;;  %v4783_v3 = vadd.f32 0.014752088, %v4782_v56  ;;  %v3412_v51 = vadd.f32 %v10044_v2, %v3395_v21  ;;  %v3720_v26 = vadd.f32 %v8706_v48, %v3647_v63  ;;  %v10046_v63 = vld [vmem:[#allocation45_spill] sm:$0xff] }
 0x314   : > { %v3749_v54 = vmul.f32 %v5640_v32, %v10032_v53  ;;  %v3810_v14 = vrot.slane %v3772_v30, 1  ;;  %v3811_v6 = vrot.slane %v3773_v41, 1  ;;  %v5380_v46 = vclamps-f32 %v4964_v59, 1.0  ;;  %v10045_v30 = vld [vmem:[#allocation21_spill] sm:$0xff] }
 0x315   : > { %v4773_v19 = vmul.f32 %v4772_v20, %v8834_v31  ;;  %v4784_v13 = vmul.f32 %v4783_v3, %v8834_v31  ;;  %v4155_v7 = vadd.f32 %v4135_v45, %v4082_v44  ;;  %v4755_v47 = vmul.f32 0.5, %v8625_v40 }
 0x316   : > { %v4208_v60 = vsel %vm3355_vm5, %v4206_v49, %v4207_v12  ;;  %v3883_v11 = vrot.slane %v8854_v10, 2  ;;  %v3630_v61 = vrot.slane %v8746_v50, 1  ;;  %v5091_v22 = vadd.f32 1.0, %v5380_v46  ;;  %v10047_v46 = vld [vmem:[#allocation42_spill] sm:$0xff] }
 0x317   : > { %v4785_v48 = vadd.f32 0.112945676, %v4784_v13  ;;  %v3884_v32 = vrot.slane %v8857_v4, 2  ;;  %v3485_v41 = vadd.f32 %v10045_v30, %v3412_v51  ;;  %v4774_v24 = vadd.f32 0.05243302, %v4773_v19 }
 0x318   : > { %v3812_v21 = vsel %vm3281_vm7, %v3810_v14, %v3811_v6  ;;  %v8873_v42 = vmul.f32 %v8239_v34, %v8748_v17  ;;  %v8877_v40 = vmul.f32 %v8239_v34, %v8788_v38  ;;  %v5099_v49 = vmul.f32 %v5091_v22, %v4755_v47 }
 0x319   : > { %v4786_v50 = vmul.f32 %v4785_v48, %v8834_v31  ;;  %v4228_v12 = vadd.f32 %v4208_v60, %v4155_v7  ;;  %v3757_v23 = vadd.f32 %v3749_v54, %v3720_v26  ;;  %v4257_v8 = vmul.f32 %v8459_v5, %v10046_v63  ;;  %v10048_v7 = vld [vmem:[#allocation15_spill] sm:$0xff]  ;;  %v8906_v60 = vld [vmem:[#allocation2 + $0x1b0] sm:$0xff] }
 0x31a   : > { %v4279_v28 = vmul.f32 %v8462_v58, %v10046_v63  ;;  %v4280_v56 = vmul.f32 %v8462_v58, %v8557_v25  ;;  %v4352_v44 = vmul.f32 %v8474_v16, %v10046_v63  ;;  %5388 = vmatmul.msk.f32.vlgmr.msra.gmra.mxu2 %vm1248_vm10, %v5099_v49  ;;  %v4353_v45 = vmul.f32 %v8474_v16, %v8557_v25 }
 0x31b   : > { %v4787_v57 = vadd.f32 0.4994258, %v4786_v50  ;;  %v3558_v59 = vadd.f32 %v8713_v62, %v3485_v41  ;;  %v3631_v20 = vrot.slane %v8754_v9, 1  ;;  %v4775_v3 = vmul.f32 %v4774_v24, %v8834_v31  ;;  %v8912_v24 = vld [vmem:[#allocation2 + $0x1b8] sm:$0x3] }
 0x31c   : > { %v4265_v2 = vadd.f32 %v4257_v8, %v4228_v12  ;;  %v4316_v51 = vrot.slane %v4279_v28, 1  ;;  %v4317_v26 = vrot.slane %v4280_v56, 1  ;;  %v4389_v14 = vrot.slane %v4352_v44, 2  ;;  %v10050_v56 = vld [vmem:[#allocation38_spill] sm:$0xff] }
 0x31d   : > { %v4788_v54 = vmul.f32 %v4787_v57, %v8834_v31  ;;  %v4390_v6 = vrot.slane %v4353_v45, 2  ;;  %v4442_v19 = vmul.f32 %v8484_v33, %v10047_v46  ;;  %v4443_v25 = vmul.f32 %v8484_v33, %v10048_v7 }
 0x31e   : > { %v4318_v13 = vsel %vm3281_vm7, %v4316_v51, %v4317_v26  ;;  %v3664_v62 = vmul.f32 %v9960_v39, %v8697_v43  ;;  %v3665_v9 = vmul.f32 %v9960_v39, %v8728_v55  ;;  %v4515_v48 = vmul.f32 %v8487_v29, %v10047_v46  ;;  %v10049_v43 = vld [vmem:[#allocation16_spill] sm:$0xff]  ;;  %v10051_v51 = vld [vmem:[#allocation41_spill] sm:$0xff] }
 0x31f   : > { %v8904_v47 = vadd.f32 1.0, %v4788_v54  ;;  %v4338_v22 = vadd.f32 %v4318_v13, %v4265_v2  ;;  %v4516_v30 = vmul.f32 %v8487_v29, %v10048_v7  ;;  %v4776_v41 = vadd.f32 0.18741608, %v4775_v3  ;;  %v10053_v7 = vld [vmem:[#allocation43_spill] sm:$0xff] }
 0x320   : > { %v4479_v49 = vrot.slane %v4442_v19, 1  ;;  %v4480_v50 = vrot.slane %v4443_v25, 1  ;;  %v3575_v12 = vadd.f32 %v10049_v43, %v3558_v59  ;;  %v4391_v55 = vsel %vm3355_vm5, %v4389_v14, %v4390_v6  ;;  %v10052_v6 = vld [vmem:[#allocation44_spill] sm:$0xff] }
 0x321   : > { %5615 = vrcp.f32 %v8904_v47  ;;  %v3830_v63 = vadd.f32 %v3812_v21, %v3757_v23  ;;  %v3632_v8 = vsel %vm3281_vm7, %v3630_v61, %v3631_v20  ;;  %v4411_v28 = vadd.f32 %v4391_v55, %v4338_v22 }
 0x322   : > { %v4420_v44 = vmul.f32 %v10050_v56, %v10047_v46  ;;  %v3703_v57 = vrot.slane %v3664_v62, 2  ;;  %v3704_v45 = vrot.slane %v3665_v9, 2  ;;  %v4552_v3 = vrot.slane %v4515_v48, 2  ;;  %v10054_v62 = vld [vmem:[#allocation32_spill] sm:$0xff] }
 0x323   : > { %v4553_v2 = vrot.slane %v4516_v30, 2  ;;  %v4605_v26 = vmul.f32 %v10051_v51, %v8906_v60  ;;  %v4606_v59 = vmul.f32 %v10051_v51, %v8912_v24  ;;  %v4777_v54 = vmul.f32 %v4776_v41, %v8834_v31 }
 0x324   : > { %v4428_v14 = vadd.f32 %v4420_v44, %v4411_v28  ;;  %v4481_v21 = vsel %vm3281_vm7, %v4479_v49, %v4480_v50  ;;  %v3648_v61 = vadd.f32 %v3632_v8, %v3575_v12  ;;  %v4678_v46 = vmul.f32 %v10052_v6, %v8906_v60 }
 0x325   : > { %v4642_v23 = vrot.slane %v4605_v26, 1  ;;  %v4643_v20 = vrot.slane %v4606_v59, 1  ;;  %v4679_v19 = vmul.f32 %v10052_v6, %v8912_v24  ;;  %v4583_v25 = vmul.f32 %v10053_v7, %v8906_v60 }
 0x326   : > { %v4501_v13 = vadd.f32 %v4481_v21, %v4428_v14  ;;  %v3885_v31 = vsel %vm3355_vm5, %v3883_v11, %v3884_v32  ;;  %v3912_v9 = vmul.f32 %v10054_v62, %v8748_v17  ;;  %v4554_v48 = vsel %vm3355_vm5, %v4552_v3, %v4553_v2 }
 0x327   : > { %v5616_v22 = vpop.eup %5615  ;;  %v3903_v30 = vadd.f32 %v3885_v31, %v3830_v63  ;;  %v3973_v41 = vrot.slane %v8873_v42, 1  ;;  %v3974_v49 = vrot.slane %v8877_v40, 1  ;;  %v4778_v50 = vadd.f32 1.1283791, %v4777_v54 }
 0x328   : > { %v4791_v43 = vmul.f32 %v5616_v22, %v8904_v47  ;;  %v4574_v12 = vadd.f32 %v4554_v48, %v4501_v13  ;;  %v3705_v4 = vsel %vm3355_vm5, %v3703_v57, %v3704_v45  ;;  %v4644_v10 = vsel %vm3281_vm7, %v4642_v23, %v4643_v20 }
 0x329   : > { %v4715_v11 = vrot.slane %v4678_v46, 2  ;;  %v4716_v32 = vrot.slane %v4679_v19, 2  ;;  %v3721_v55 = vadd.f32 %v3705_v4, %v3648_v61  ;;  %v3750_v63 = vmul.f32 %v10032_v53, %v8748_v17  ;;  %v10055_v4 = vld [vmem:[#allocation34_spill] sm:$0xff] }
 0x32a   : > { %v4792_v8 = vsub.f32 1.0, %v4791_v43  ;;  %v4591_v28 = vadd.f32 %v4583_v25, %v4574_v12  ;;  %v3774_v42 = vmul.f32 %v10036_v1, %v8748_v17  ;;  %v4799_v40 = vand.u32 2147483647, %v8904_v47 }
 0x32b   : > { %v4801_v44 = vand.u32 2147483648, %v8904_v47  ;;  %v3775_v57 = vmul.f32 %v10036_v1, %v8788_v38  ;;  %v3847_v45 = vmul.f32 %v10037_v35, %v8748_v17  ;;  %vm4796_vm8 = vweird.f32 %v5616_v22 }
 0x32c   : > { %v4793_v3 = vmul.f32 %v5616_v22, %v4792_v8  ;;  %v4664_v2 = vadd.f32 %v4644_v10, %v4591_v28  ;;  %v3758_v26 = vadd.f32 %v3750_v63, %v3721_v55  ;;  %v4717_v59 = vsel %vm3355_vm5, %v4715_v11, %v4716_v32  ;;  %v8972_v32 = vld [vmem:[#allocation2 + $0x120] sm:$0xff]  ;;  %v8978_v8 = vld [vmem:[#allocation2 + $0x48] sm:$0x3] }
 0x32d   : > { %v3813_v54 = vrot.slane %v3774_v42, 1  ;;  %v3814_v14 = vrot.slane %v3775_v57, 1  ;;  %v3848_v21 = vmul.f32 %v10037_v35, %v8788_v38  ;;  %vm4795_vm9 = vweird.f32 %v8904_v47  ;;  %v10056_v28 = vld [vmem:[#allocation7_spill] sm:$0xff]  ;;  %v5643_v57 = vld [vmem:[#allocation2 + $0x18] sm:$0x3] }
 0x32e   : > { %v4794_v61 = vadd.f32 %v5616_v22, %v4793_v3  ;;  %v4737_v23 = vadd.f32 %v4717_v59, %v4664_v2  ;;  %v3886_v20 = vrot.slane %v3847_v45, 2  ;;  %v4779_v46 = vmul.f32 %v4778_v50, %v8818_v52  ;;  %vm4797_vm11 = vmor %vm4795_vm9, %vm4796_vm8  ;;  %v10060_v42 = vld [vmem:[#allocation3_spill] sm:$0xff] }
 0x32f   : > { %v4802_v19 = vor.u32 1.1754944e-38, %v4801_v44  ;;  %v3815_v13 = vsel %vm3281_vm7, %v3813_v54, %v3814_v14  ;;  %v3887_v25 = vrot.slane %v3848_v21, 2  ;;  %vm4800_vm15 = vcmp.eq.f32.partialorder %v4799_v40, 8.507059e+37  ;;  %v10061_v40 = vld [vmem:[#allocation5_spill] sm:$0xff] }
 0x330   : > { %v4798_v31 = vsel %vm4797_vm11, %v5616_v22, %v4794_v61  ;;  %v8962_v48 = vadd.f32 %v8615_v36, %v4737_v23  ;;  %v3831_v43 = vadd.f32 %v3815_v13, %v3758_v26  ;;  %v4008_v10 = vmul.f32 %v10055_v4, %v8748_v17  ;;  %v8974_v22 = vld [vmem:[#allocation2 + $0x128] sm:$0x3]  ;;  %v9009_v13 = vld [vmem:[#allocation2 + $0x38] sm:$0x3] }
 0x331   : > { %v4803_v12 = vsel %vm4800_vm15, %v4802_v19, %v4798_v31  ;;  %v4009_v47 = vmul.f32 %v10055_v4, %v8788_v38  ;;  %v3888_v52 = vsel %vm3355_vm5, %v3886_v20, %v3887_v25  ;;  %v3920_v36 = vadd.f32 %v3912_v9, %v3903_v30  ;;  %v10058_v38 = vld [vmem:[#allocation8_spill] sm:$0xff]  ;;  %v9007_v19 = vld [vmem:[#allocation2 + $0x30] sm:$0xff] }
 0x332   : > { %v4804_v50 = vmul.f32 %v4803_v12, %v4779_v46  ;;  %v8970_v11 = vmul.f32 0.70710677, %v8962_v48  ;;  %v8976_v55 = vadd.f32 %v3888_v52, %v3831_v43  ;;  %v8982_v17 = vmul.f32 %v8978_v8, %v10056_v28  ;;  %v10062_v43 = vld [vmem:[#allocation35_spill] sm:$0xff] }
 0x333   : > { %v8986_v63 = vmul.f32 %v8978_v8, %v10058_v38  ;;  %v3251_v44 = vmul.f32 %v10061_v40, %v10060_v42  ;;  %v3252_v45 = vmul.f32 %v5643_v57, %v10061_v40  ;;  %v3975_v30 = vsel %vm3281_vm7, %v3973_v41, %v3974_v49 }
 0x334   : > { %10057 = vst [vmem:[#allocation4_spill] sm:$0xff] %v8982_v17  ;;  %v5376_v3 = vclamps-f32 %v4804_v50, 1.0  ;;  %v4967_v9 = vmul.f32 %v8970_v11, %v8970_v11  ;;  %v4046_v2 = vrot.slane %v4008_v10, 2  ;;  %v4047_v26 = vrot.slane %v4009_v47, 2 }
 0x335   : > { %10059 = vst [vmem:[#allocation26_spill] sm:$0xff] %v8986_v63  ;;  %v4098_v59 = vmul.f32 %v10038_v27, %v8972_v32  ;;  %v4099_v54 = vmul.f32 %v10038_v27, %v8974_v22  ;;  %v4751_v14 = vmul.f32 0.5, %v8802_v15  ;;  %v3993_v23 = vadd.f32 %v3975_v30, %v3920_v36 }
 0x336   : > { %v5087_v21 = vadd.f32 1.0, %v5376_v3  ;;  %v8999_v61 = vmin.f32 %v4967_v9, 16.0  ;;  %v3233_v46 = vmul.f32 %v7487_v37, %v10060_v42  ;;  %v3325_v41 = vmul.f32 %v7449_v0, %v10060_v42 }
 0x337   : > { %v3326_v49 = vmul.f32 %v5643_v57, %v7449_v0  ;;  %v4075_v12 = vmul.f32 %v10062_v43, %v8972_v32  ;;  %v3285_v10 = vrot.slane %v3251_v44, 1  ;;  %v4048_v47 = vsel %vm3355_vm5, %v4046_v2, %v4047_v26 }
 0x338   : > { %v5095_v25 = vmul.f32 %v5087_v21, %v4751_v14  ;;  %v4969_v15 = vmul.f32 2.1237322e-06, %v8999_v61  ;;  %v4980_v31 = vmul.f32 3.8918573e-05, %v8999_v61  ;;  %v4136_v52 = vrot.slane %v4098_v59, 1 }
 0x339   : > { %v4137_v50 = vrot.slane %v4099_v54, 1  ;;  %v3286_v36 = vrot.slane %v3252_v45, 1  ;;  %v4066_v3 = vadd.f32 %v4048_v47, %v3993_v23  ;;  %v3255_v9 = vmul.f32 %v10061_v40, %v9007_v19 }
 0x33a   : > { %5384 = vmatmul.msk.f32.vlgmr.msra.gmra.mxu0 %vm1248_vm10, %v5095_v25  ;;  %v4970_v42 = vadd.f32 0.00028619796, %v4969_v15  ;;  %v4981_v57 = vadd.f32 0.001143296, %v4980_v31  ;;  %v3256_v30 = vmul.f32 %v10061_v40, %v9009_v13  ;;  %v4171_v14 = vmul.f32 %v10039_v18, %v8972_v32 }
 0x33b   : > { %v4172_v44 = vmul.f32 %v10039_v18, %v8974_v22  ;;  %v3359_v2 = vrot.slane %v3325_v41, 2  ;;  %v4083_v59 = vadd.f32 %v4075_v12, %v4066_v3  ;;  %v3360_v54 = vrot.slane %v3326_v49, 2 }
 0x33c   : > { %v4971_v45 = vmul.f32 %v4970_v42, %v8999_v61  ;;  %v4982_v26 = vmul.f32 %v4981_v57, %v8999_v61  ;;  %v9029_v21 = vmul.f32 %v7449_v0, %v9009_v13  ;;  %v9033_v23 = vmul.f32 %v10056_v28, %v9009_v13 }
 0x33d   : > { %v4138_v25 = vsel %vm3281_vm7, %v4136_v52, %v4137_v50  ;;  %v3287_v15 = vsel %vm3281_vm7, %v3285_v10, %v3286_v36  ;;  %v9039_v41 = vmul.f32 %v10058_v38, %v9009_v13  ;;  %v3291_v12 = vrot.slane %v3255_v9, 1 }
 0x33e   : > { %10063 = vst [vmem:[#allocation17_spill] sm:$0xff] %v9029_v21  ;;  %v4972_v31 = vadd.f32 0.0036580483, %v4971_v45  ;;  %v4983_v47 = vadd.f32 0.014752088, %v4982_v26  ;;  %v3292_v49 = vrot.slane %v3256_v30, 1  ;;  %v4156_v35 = vadd.f32 %v4138_v25, %v4083_v59 }
 0x33f   : > { %v4209_v42 = vrot.slane %v4171_v14, 2  ;;  %v4210_v57 = vrot.slane %v4172_v44, 2  ;;  %v9044_v52 = vadd.f32 %v3287_v15, %v3233_v46  ;;  %v3361_v10 = vsel %vm3355_vm5, %v3359_v2, %v3360_v54  ;;  %v9050_v30 = vld [vmem:[#allocation2 + $0x20] sm:$0xff]  ;;  %v5645_v44 = vld [vmem:[#allocation2 + $0x28] sm:$0x3] }
 0x340   : > { %v4973_v20 = vmul.f32 %v4972_v31, %v8999_v61  ;;  %v4984_v17 = vmul.f32 %v4983_v47, %v8999_v61  ;;  %v3253_v14 = vmul.f32 %v9050_v30, %v10061_v40  ;;  %v3254_v45 = vmul.f32 %v5645_v44, %v10061_v40  ;;  %v5646_v40 = vld [vmem:[#allocation2 + $0x1a0] sm:$0xff] }
 0x341   : > { %v9056_v46 = vsel %vm3281_vm7, %v3291_v12, %v3292_v49  ;;  %v9059_v2 = vmul.f32 %v5645_v44, %v7449_v0  ;;  %v9062_v59 = vmul.f32 %v5645_v44, %v10056_v28  ;;  %v4211_v54 = vsel %vm3355_vm5, %v4209_v42, %v4210_v57  ;;  %v5647_v49 = vld [vmem:[#allocation2 + $0x1a8] sm:$0x3] }
 0x342   : > { %v4985_v26 = vadd.f32 0.112945676, %v4984_v17  ;;  %v9066_v25 = vmul.f32 %v5645_v44, %v10058_v38  ;;  %v4974_v15 = vadd.f32 0.05243302, %v4973_v20  ;;  %v4229_v47 = vadd.f32 %v4211_v54, %v4156_v35 }
 0x343   : > { %v4258_v17 = vmul.f32 %v5646_v40, %v8459_v5  ;;  %v4281_v12 = vmul.f32 %v5646_v40, %v8462_v58  ;;  %v4282_v3 = vmul.f32 %v5647_v49, %v8462_v58  ;;  %v4354_v50 = vmul.f32 %v5646_v40, %v8474_v16 }
 0x344   : > { %v4986_v31 = vmul.f32 %v4985_v26, %v8999_v61  ;;  %v3288_v9 = vrot.slane %v3253_v14, 1  ;;  %v3289_v36 = vrot.slane %v3254_v45, 1  ;;  %v4355_v57 = vmul.f32 %v5647_v49, %v8474_v16 }
 0x345   : > { %v4266_v44 = vadd.f32 %v4258_v17, %v4229_v47  ;;  %v4319_v26 = vrot.slane %v4281_v12, 1  ;;  %v4320_v35 = vrot.slane %v4282_v3, 1  ;;  %v4392_v63 = vrot.slane %v4354_v50, 2  ;;  %v9089_v17 = vld [vmem:[#allocation2 + $0x1c0] sm:$0xff]  ;;  %v9091_v12 = vld [vmem:[#allocation2 + $0x1c8] sm:$0x3] }
 0x346   : > { %v4987_v42 = vadd.f32 0.4994258, %v4986_v31  ;;  %v4393_v21 = vrot.slane %v4355_v57, 2  ;;  %v4444_v5 = vmul.f32 %v8484_v33, %v8906_v60  ;;  %v4975_v58 = vmul.f32 %v4974_v15, %v8999_v61  ;;  %10064 = vst [vmem:[#allocation14_spill] sm:$0xff] %v9089_v17  ;;  %v10066_v57 = vld [vmem:[#allocation10_spill] sm:$0xff] }
 0x347   : > { %v4321_v14 = vsel %vm3281_vm7, %v4319_v26, %v4320_v35  ;;  %v4445_v45 = vmul.f32 %v8484_v33, %v8912_v24  ;;  %v4517_v31 = vmul.f32 %v8487_v29, %v8906_v60  ;;  %v4518_v50 = vmul.f32 %v8487_v29, %v8912_v24  ;;  %10065 = vst [vmem:[#allocation24_spill] sm:$0xff] %v9091_v12 }
 0x348   : > { %v4988_v54 = vmul.f32 %v4987_v42, %v8999_v61  ;;  %v4339_v40 = vadd.f32 %v4321_v14, %v4266_v44  ;;  %v4421_v15 = vmul.f32 %v10050_v56, %v8906_v60  ;;  %v4482_v49 = vrot.slane %v4444_v5, 1 }
 0x349   : > { %v4483_v42 = vrot.slane %v4445_v45, 1  ;;  %v9097_v26 = vmul.f32 %v10066_v57, %v9007_v19  ;;  %v9100_v35 = vsel %vm3281_vm7, %v3288_v9, %v3289_v36  ;;  %v4976_v14 = vadd.f32 0.18741608, %v4975_v58  ;;  %v10068_v58 = vld [vmem:[#allocation28_spill] sm:$0xff] }
 0x34a   : > { %v9085_v3 = vadd.f32 1.0, %v4988_v54  ;;  %10067 = vst [vmem:[#allocation11_spill] sm:$0xff] %v9100_v35  ;;  %v4394_v54 = vsel %vm3355_vm5, %v4392_v63, %v4393_v21  ;;  %v4555_v47 = vrot.slane %v4517_v31, 2  ;;  %v9107_v5 = vmul.f32 %v10066_v57, %v9009_v13 }
 0x34b   : > { %v4412_v20 = vadd.f32 %v4394_v54, %v4339_v40  ;;  %v4484_v45 = vsel %vm3281_vm7, %v4482_v49, %v4483_v42  ;;  %v4556_v56 = vrot.slane %v4518_v50, 2  ;;  %v4607_v36 = vmul.f32 %v10051_v51, %v9089_v17 }
 0x34c   : > { %5617 = vrcp.f32 %v9085_v3  ;;  %v4608_v9 = vmul.f32 %v10051_v51, %v9091_v12  ;;  %v3389_v35 = vadd.f32 %v3361_v10, %v9044_v52  ;;  %v9117_v63 = vmul.f32 %v10068_v58, %v9007_v19 }
 0x34d   : > { %v4429_v44 = vadd.f32 %v4421_v15, %v4412_v20  ;;  %v4645_v31 = vrot.slane %v4607_v36, 1  ;;  %v4680_v50 = vmul.f32 %v10052_v6, %v9089_v17  ;;  %v4681_v49 = vmul.f32 %v10052_v6, %v9091_v12  ;;  %v10069_v6 = vld [vmem:[#allocation9_spill] sm:$0xff] }
 0x34e   : > { %v4646_v40 = vrot.slane %v4608_v9, 1  ;;  %v4584_v20 = vmul.f32 %v10053_v7, %v9089_v17  ;;  %v3416_v52 = vmul.f32 %v9050_v30, %v10056_v28  ;;  %v9130_v10 = vmul.f32 %v9960_v39, %v9007_v19 }
 0x34f   : > { %v4502_v42 = vadd.f32 %v4484_v45, %v4429_v44  ;;  %v4977_v54 = vmul.f32 %v4976_v14, %v8999_v61  ;;  %v4557_v36 = vsel %vm3355_vm5, %v4555_v47, %v4556_v56  ;;  %v3613_v9 = vrot.slane %v9107_v5, 1 }
 0x350   : > { %v9137_v44 = vmul.f32 %v9960_v39, %v9009_v13  ;;  %v3937_v7 = vmul.f32 %v8239_v34, %v8972_v32  ;;  %v3398_v51 = vmul.f32 %v9050_v30, %v10069_v6  ;;  %v4647_v29 = vsel %vm3281_vm7, %v4645_v31, %v4646_v40 }
 0x351   : > { %v4575_v21 = vadd.f32 %v4557_v36, %v4502_v42  ;;  %v4718_v61 = vrot.slane %v4680_v50, 2  ;;  %v4719_v14 = vrot.slane %v4681_v49, 2  ;;  %v3938_v56 = vmul.f32 %v8239_v34, %v8974_v22 }
 0x352   : > { %v5618_v15 = vpop.eup %5617  ;;  %v3449_v13 = vrot.slane %v3416_v52, 1  ;;  %v3685_v12 = vrot.slane %v9130_v10, 2  ;;  %v4978_v33 = vadd.f32 1.1283791, %v4977_v54  ;;  %v4999_v42 = vand.u32 2147483647, %v9085_v3 }
 0x353   : > { %v4991_v45 = vmul.f32 %v5618_v15, %v9085_v3  ;;  %v4592_v5 = vadd.f32 %v4584_v20, %v4575_v21  ;;  %v5001_v36 = vand.u32 2147483648, %v9085_v3  ;;  %v3489_v17 = vmul.f32 %v9050_v30, %v10058_v38 }
 0x354   : > { %vm4996_vm0 = vweird.f32 %v5618_v15  ;;  %v3913_v40 = vmul.f32 %v10054_v62, %v8972_v32  ;;  %v4720_v50 = vsel %vm3355_vm5, %v4718_v61, %v4719_v14  ;;  %v3976_v21 = vrot.slane %v3937_v7, 1  ;;  %v3741_v14 = vld [vmem:[#allocation2 + $0x138] sm:$0x3] }
 0x355   : > { %v4992_v47 = vsub.f32 1.0, %v4991_v45  ;;  %v4665_v31 = vadd.f32 %v4647_v29, %v4592_v5  ;;  %v3977_v49 = vrot.slane %v3938_v56, 1  ;;  %v3406_v20 = vadd.f32 %v3398_v51, %v3389_v35 }
 0x356   : > { %vm4995_vm1 = vweird.f32 %v9085_v3  ;;  %v10070_v54 = vrot.slane %v9062_v59, 1  ;;  %v5002_v29 = vor.u32 1.1754944e-38, %v5001_v36  ;;  %v4010_v5 = vmul.f32 %v10055_v4, %v8972_v32 }
 0x357   : > { %v4993_v16 = vmul.f32 %v5618_v15, %v4992_v47  ;;  %v4738_v10 = vadd.f32 %v4720_v50, %v4665_v31  ;;  %v4979_v47 = vmul.f32 %v4978_v33, %v8970_v11  ;;  %vm4997_vm2 = vmor %vm4995_vm1, %vm4996_vm0  ;;  %v4011_v7 = vmul.f32 %v10055_v4, %v8974_v22 }
 0x358   : > { %v3451_v45 = vsel %vm3281_vm7, %v3449_v13, %v10070_v54  ;;  %vm5000_vm3 = vcmp.eq.f32.partialorder %v4999_v42, 8.507059e+37  ;;  %v3921_v33 = vadd.f32 %v3913_v40, %v8976_v55  ;;  %v3978_v59 = vsel %vm3281_vm7, %v3976_v21, %v3977_v49 }
 0x359   : > { %v4994_v52 = vadd.f32 %v5618_v15, %v4993_v16  ;;  %v9167_v16 = vld [vmem:[%s9738_s4] ss:$0 sm:$0xff]  ;;  %v3686_v32 = vrot.slane %v9137_v44, 2  ;;  %v3418_v22 = vmul.f32 %v10056_v28, %v9007_v19  ;;  %v3522_v56 = vrot.slane %v3489_v17, 2 }
 0x35a   : > { %v9170_v51 = vadd.f32 %v9167_v16, %v4738_v10  ;;  %v9182_v13 = vmul.f32 %v10069_v6, %v9007_v19  ;;  %v4049_v55 = vrot.slane %v4010_v5, 2  ;;  %v4050_v42 = vrot.slane %v4011_v7, 2 }
 0x35b   : > { %v4998_v61 = vsel %vm4997_vm2, %v5618_v15, %v4994_v52  ;;  %v3740_v15 = vld [vmem:[#allocation2 + $0x130] sm:$0xff]  ;;  %v3479_v36 = vadd.f32 %v3451_v45, %v3406_v20  ;;  %v3491_v44 = vmul.f32 %v10058_v38, %v9007_v19  ;;  %v3994_v50 = vadd.f32 %v3978_v59, %v3921_v33 }
 0x35c   : > { %v5003_v11 = vsel %vm5000_vm3, %v5002_v29, %v4998_v61  ;;  %v9178_v35 = vmul.f32 0.70710677, %v9170_v51  ;;  %v10071_v21 = vrot.slane %v9097_v26, 1  ;;  %v4756_v17 = vmul.f32 0.5, %v8962_v48 }
 0x35d   : > { %v5004_v3 = vmul.f32 %v5003_v11, %v4979_v47  ;;  %v4100_v52 = vmul.f32 %v10038_v27, %v3740_v15  ;;  %v4101_v10 = vmul.f32 %v10038_v27, %v3741_v14  ;;  %v3452_v54 = vrot.slane %v3418_v22, 1 }
 0x35e   : > { %v5007_v40 = vmul.f32 %v9178_v35, %v9178_v35  ;;  %v3614_v49 = vsel %vm3281_vm7, %v10071_v21, %v3613_v9  ;;  %v10072_v47 = vrot.slane %v9066_v25, 2  ;;  %v3687_v5 = vsel %vm3355_vm5, %v3685_v12, %v3686_v32 }
 0x35f   : > { %v5381_v31 = vclamps-f32 %v5004_v3, 1.0  ;;  %v4051_v26 = vsel %vm3355_vm5, %v4049_v55, %v4050_v42  ;;  %v4076_v9 = vmul.f32 %v10062_v43, %v3740_v15  ;;  %v3525_v48 = vrot.slane %v3491_v44, 2 }
 0x360   : > { %v9194_v45 = vmin.f32 %v5007_v40, 16.0  ;;  %v3524_v29 = vsel %vm3355_vm5, %v3522_v56, %v10072_v47  ;;  %v4067_v59 = vadd.f32 %v4051_v26, %v3994_v50  ;;  %v4139_v22 = vrot.slane %v4100_v52, 1 }
 0x361   : > { %v5092_v20 = vadd.f32 1.0, %v5381_v31  ;;  %v3552_v7 = vadd.f32 %v3524_v29, %v3479_v36  ;;  %v4140_v3 = vrot.slane %v4101_v10, 1  ;;  %v9204_v31 = vld [vmem:[#allocation2 + $0x40] sm:$0xff]  ;;  %v3582_v12 = vmul.f32 %v8978_v8, %v10066_v57 }
 0x362   : > { %v5009_v33 = vmul.f32 2.1237322e-06, %v9194_v45  ;;  %v5020_v11 = vmul.f32 3.8918573e-05, %v9194_v45  ;;  %v3581_v25 = vmul.f32 %v9204_v31, %v10066_v57  ;;  %v10073_v55 = vrot.slane %v9033_v23, 1 }
 0x363   : > { %v5100_v61 = vmul.f32 %v5092_v20, %v4756_v17  ;;  %v9218_v36 = vmul.f32 %v9204_v31, %v10068_v58  ;;  %v4173_v44 = vmul.f32 %v10039_v18, %v3740_v15  ;;  %v4174_v40 = vmul.f32 %v10039_v18, %v3741_v14 }
 0x364   : > { %v5010_v32 = vadd.f32 0.00028619796, %v5009_v33  ;;  %v5021_v56 = vadd.f32 0.001143296, %v5020_v11  ;;  %v9214_v42 = vsel %vm3281_vm7, %v3452_v54, %v10073_v55  ;;  %v3569_v50 = vadd.f32 %v9117_v63, %v3552_v7 }
 0x365   : > { %5389 = vmatmul.msk.f32.gmra.mxu2 %vm1248_vm10, %v5100_v61  ;;  %v3327_v21 = vmul.f32 %v9050_v30, %v7449_v0  ;;  %v4084_v52 = vadd.f32 %v4076_v9, %v4067_v59  ;;  %v10074_v10 = vrot.slane %v9039_v41, 2  ;;  %v4141_v20 = vsel %vm3281_vm7, %v4139_v22, %v4140_v3  ;;  %v10075_v22 = vld [vmem:[#allocation6_spill] sm:$0xff] }
 0x366   : > { %v5011_v17 = vmul.f32 %v5010_v32, %v9194_v45  ;;  %v5022_v23 = vmul.f32 %v5021_v56, %v9194_v45  ;;  %v3615_v15 = vrot.slane %v3581_v25, 1  ;;  %v3616_v47 = vrot.slane %v3582_v12, 1  ;;  %v5650_v32 = vld [vmem:[#allocation2 + $0xb8] sm:$0x3] }
 0x367   : > { %v9230_v54 = vsel %vm3355_vm5, %v3525_v48, %v10074_v10  ;;  %v9235_v63 = vmul.f32 %v9204_v31, %v9960_v39  ;;  %v3235_v26 = vmul.f32 %v7487_v37, %v9007_v19  ;;  %v9241_v9 = vmul.f32 %v7449_v0, %v9007_v19 }
 0x368   : > { %v5012_v14 = vadd.f32 0.0036580483, %v5011_v17  ;;  %v5023_v29 = vadd.f32 0.014752088, %v5022_v23  ;;  %v4212_v41 = vrot.slane %v4173_v44, 2  ;;  %v4213_v7 = vrot.slane %v4174_v40, 2 }
 0x369   : > { %v3642_v48 = vadd.f32 %v3614_v49, %v3569_v50  ;;  %v3362_v61 = vrot.slane %v3327_v21, 2  ;;  %v4157_v59 = vadd.f32 %v4141_v20, %v4084_v52  ;;  %v3762_v3 = vmul.f32 %v10036_v1, %v10075_v22  ;;  %v10077_v20 = vld [vmem:[#allocation20_spill] sm:$0xff] }
 0x36a   : > { %v5013_v33 = vmul.f32 %v5012_v14, %v9194_v45  ;;  %v5024_v11 = vmul.f32 %v5023_v29, %v9194_v45  ;;  %v9248_v25 = vsel %vm3281_vm7, %v3615_v15, %v3616_v47  ;;  %v9252_v12 = vmul.f32 %v8978_v8, %v9960_v39  ;;  %v10079_v47 = vld [vmem:[#allocation18_spill] sm:$0xff] }
 0x36b   : > { %v9256_v19 = vadd.f32 %v9056_v46, %v3235_v26  ;;  %v3763_v56 = vmul.f32 %v5650_v32, %v10036_v1  ;;  %v3234_v55 = vmul.f32 %v9050_v30, %v7487_v37  ;;  %v4214_v40 = vsel %vm3355_vm5, %v4212_v41, %v4213_v7  ;;  %v10078_v30 = vld [vmem:[#allocation19_spill] sm:$0xff] }
 0x36c   : > { %v5025_v49 = vadd.f32 0.112945676, %v5024_v11  ;;  %v3715_v50 = vadd.f32 %v3687_v5, %v3642_v48  ;;  %v3744_v8 = vmul.f32 %v10032_v53, %v10075_v22  ;;  %v10076_v21 = vrot.slane %v9059_v2, 2  ;;  %v10080_v41 = vld [vmem:[#allocation31_spill] sm:$0xff] }
 0x36d   : > { %v5014_v17 = vadd.f32 0.05243302, %v5013_v33  ;;  %v4230_v52 = vadd.f32 %v4214_v40, %v4157_v59  ;;  %v3795_v10 = vrot.slane %v3762_v3, 1  ;;  %v4259_v37 = vmul.f32 %v10077_v20, %v8906_v60  ;;  %v10081_v40 = vld [vmem:[#allocation14_spill] sm:$0xff] }
 0x36e   : > { %v3364_v46 = vsel %vm3355_vm5, %v3362_v61, %v10076_v21  ;;  %v5026_v23 = vmul.f32 %v5025_v49, %v9194_v45  ;;  %v4283_v15 = vmul.f32 %v10078_v30, %v8906_v60  ;;  %v4284_v5 = vmul.f32 %v10078_v30, %v8912_v24  ;;  %v10082_v21 = vld [vmem:[#allocation39_spill] sm:$0xff]  ;;  %v10087_v30 = vld [vmem:[#allocation41_spill] sm:$0xff] }
 0x36f   : > { %v4356_v14 = vmul.f32 %v10079_v47, %v8906_v60  ;;  %v4357_v29 = vmul.f32 %v10079_v47, %v8912_v24  ;;  %v3796_v26 = vrot.slane %v3763_v56, 1  ;;  %v3835_v7 = vmul.f32 %v10080_v41, %v10075_v22  ;;  %v10083_v56 = vld [vmem:[#allocation24_spill] sm:$0xff] }
 0x370   : > { %v5027_v2 = vadd.f32 0.4994258, %v5026_v23  ;;  %v4267_v48 = vadd.f32 %v4259_v37, %v4230_v52  ;;  %v4322_v61 = vrot.slane %v4283_v15, 1  ;;  %v4323_v33 = vrot.slane %v4284_v5, 1  ;;  %v10084_v22 = vld [vmem:[#allocation40_spill] sm:$0xff] }
 0x371   : > { %v3836_v11 = vmul.f32 %v5650_v32, %v10080_v41  ;;  %v4395_v3 = vrot.slane %v4356_v14, 2  ;;  %v4396_v49 = vrot.slane %v4357_v29, 2  ;;  %v4446_v60 = vmul.f32 %v10082_v21, %v10081_v40  ;;  %v4249_v14 = vld [vmem:[#allocation2 + $0x1d0] sm:$0xff]  ;;  %v10085_v29 = vld [vmem:[#allocation38_spill] sm:$0xff] }
 0x372   : > { %v5028_v59 = vmul.f32 %v5027_v2, %v9194_v45  ;;  %v5015_v23 = vmul.f32 %v5014_v17, %v9194_v45  ;;  %v4324_v24 = vsel %vm3281_vm7, %v4322_v61, %v4323_v33  ;;  %v4447_v0 = vmul.f32 %v10082_v21, %v10083_v56  ;;  %v4250_v2 = vld [vmem:[#allocation2 + $0x1d8] sm:$0x3]  ;;  %v10086_v33 = vld [vmem:[#allocation11_spill] sm:$0xff] }
 0x373   : > { %v4519_v52 = vmul.f32 %v10084_v22, %v10081_v40  ;;  %v4340_v32 = vadd.f32 %v4324_v24, %v4267_v48  ;;  %v4520_v15 = vmul.f32 %v10084_v22, %v10083_v56  ;;  %v3752_v5 = vadd.f32 %v3744_v8, %v3715_v50 }
 0x374   : > { %v9291_v37 = vadd.f32 1.0, %v5028_v59  ;;  %v4422_v17 = vmul.f32 %v10085_v29, %v10081_v40  ;;  %v4485_v44 = vrot.slane %v4446_v60, 1  ;;  %v4486_v61 = vrot.slane %v4447_v0, 1 }
 0x375   : > { %v3316_v41 = vadd.f32 %v10086_v33, %v3234_v55  ;;  %v4397_v21 = vsel %vm3355_vm5, %v4395_v3, %v4396_v49  ;;  %v3797_v59 = vsel %vm3281_vm7, %v3795_v10, %v3796_v26  ;;  %v3868_v48 = vrot.slane %v3835_v7, 2  ;;  %v10088_v7 = vld [vmem:[#allocation44_spill] sm:$0xff] }
 0x376   : > { %5619 = vrcp.f32 %v9291_v37  ;;  %v5016_v24 = vadd.f32 0.18741608, %v5015_v23  ;;  %v4413_v47 = vadd.f32 %v4397_v21, %v4340_v32  ;;  %v4558_v56 = vrot.slane %v4519_v52, 2  ;;  %v9311_v52 = vld [vmem:[#allocation2 + $0xc0] sm:$0xff]  ;;  %v9315_v32 = vld [vmem:[#allocation2 + $0xc8] sm:$0x3] }
 0x377   : > { %v3869_v50 = vrot.slane %v3836_v11, 2  ;;  %v4487_v8 = vsel %vm3281_vm7, %v4485_v44, %v4486_v61  ;;  %v4559_v22 = vrot.slane %v4520_v15, 2  ;;  %v4609_v40 = vmul.f32 %v10087_v30, %v4249_v14  ;;  %v10089_v44 = vld [vmem:[#allocation43_spill] sm:$0xff] }
 0x378   : > { %v4610_v0 = vmul.f32 %v10087_v30, %v4250_v2  ;;  %v4430_v60 = vadd.f32 %v4422_v17, %v4413_v47  ;;  %v3825_v55 = vadd.f32 %v3797_v59, %v3752_v5  ;;  %v3390_v33 = vadd.f32 %v3364_v46, %v3316_v41 }
 0x379   : > { %v9306_v3 = vmul.f32 %v9204_v31, %v10069_v6  ;;  %v4648_v10 = vrot.slane %v4609_v40, 1  ;;  %v4682_v49 = vmul.f32 %v10088_v7, %v4249_v14  ;;  %v4683_v11 = vmul.f32 %v10088_v7, %v4250_v2  ;;  %v10090_v2 = vld [vmem:[#allocation17_spill] sm:$0xff] }
 0x37a   : > { %v4649_v26 = vrot.slane %v4610_v0, 1  ;;  %v4503_v21 = vadd.f32 %v4487_v8, %v4430_v60  ;;  %v4585_v23 = vmul.f32 %v10089_v44, %v4249_v14  ;;  %v3925_v47 = vmul.f32 %v9311_v52, %v8239_v34 }
 0x37b   : > { %v3926_v6 = vmul.f32 %v9315_v32, %v8239_v34  ;;  %v5017_v41 = vmul.f32 %v5016_v24, %v9194_v45  ;;  %v4560_v15 = vsel %vm3355_vm5, %v4558_v56, %v4559_v22  ;;  %v3870_v5 = vsel %vm3355_vm5, %v3868_v48, %v3869_v50 }
 0x37c   : > { %v5620_v46 = vpop.eup %5619  ;;  %v10091_v17 = vrot.slane %v10090_v2, 2  ;;  %v10092_v14 = vrot.slane %v9241_v9, 2  ;;  %v4576_v8 = vadd.f32 %v4560_v15, %v4503_v21  ;;  %v3898_v40 = vadd.f32 %v3870_v5, %v3825_v55 }
 0x37d   : > { %v5031_v59 = vmul.f32 %v5620_v46, %v9291_v37  ;;  %v3407_v0 = vadd.f32 %v9182_v13, %v3390_v33  ;;  %v4650_v60 = vsel %vm3281_vm7, %v4648_v10, %v4649_v26  ;;  %v4721_v34 = vrot.slane %v4682_v49, 2 }
 0x37e   : > { %v3367_v61 = vsel %vm3355_vm5, %v10092_v14, %v10091_v17  ;;  %v4722_v45 = vrot.slane %v4683_v11, 2  ;;  %v3907_v22 = vmul.f32 %v9311_v52, %v10054_v62  ;;  %v4593_v24 = vadd.f32 %v4585_v23, %v4576_v8 }
 0x37f   : > { %v5032_v48 = vsub.f32 1.0, %v5031_v59  ;;  %v3958_v56 = vrot.slane %v3925_v47, 1  ;;  %v3959_v50 = vrot.slane %v3926_v6, 1  ;;  %v5018_v9 = vadd.f32 1.1283791, %v5017_v41 }
 0x380   : > { %v5039_v2 = vand.u32 2147483647, %v9291_v37  ;;  %v5041_v17 = vand.u32 2147483648, %v9291_v37  ;;  %v3998_v55 = vmul.f32 %v9311_v52, %v10055_v4  ;;  %vm5036_vm4 = vweird.f32 %v5620_v46 }
 0x381   : > { %v5033_v13 = vmul.f32 %v5620_v46, %v5032_v48  ;;  %v4666_v33 = vadd.f32 %v4650_v60, %v4593_v24  ;;  %v3999_v10 = vmul.f32 %v9315_v32, %v10055_v4  ;;  %v4723_v26 = vsel %vm3355_vm5, %v4721_v34, %v4722_v45  ;;  %v9346_v34 = vld [vmem:[#allocation2 + $0xd0] sm:$0xff]  ;;  %v9356_v45 = vld [vmem:[#allocation2 + $0xd8] sm:$0x3] }
 0x382   : > { %v3915_v49 = vadd.f32 %v3907_v22, %v3898_v40  ;;  %v3391_v11 = vadd.f32 %v3367_v61, %v9256_v19  ;;  %v3420_v21 = vmul.f32 %v9204_v31, %v10056_v28  ;;  %vm5035_vm13 = vweird.f32 %v9291_v37 }
 0x383   : > { %v5034_v23 = vadd.f32 %v5620_v46, %v5033_v13  ;;  %v4739_v47 = vadd.f32 %v4723_v26, %v4666_v33  ;;  %v3960_v6 = vsel %vm3281_vm7, %v3958_v56, %v3959_v50  ;;  %v5019_v41 = vmul.f32 %v5018_v9, %v9178_v35  ;;  %vm5037_vm14 = vmor %vm5035_vm13, %vm5036_vm4 }
 0x384   : > { %vm5040_vm12 = vcmp.eq.f32.partialorder %v5039_v2, 8.507059e+37  ;;  %v5042_v15 = vor.u32 1.1754944e-38, %v5041_v17  ;;  %v3480_v5 = vadd.f32 %v9214_v42, %v3407_v0  ;;  %v4031_v28 = vrot.slane %v3998_v55, 2  ;;  %v5653_v42 = vld [vmem:[#allocation2 + $0x50] sm:$0xff]  ;;  %v5654_v0 = vld [vmem:[#allocation2 + $0x58] sm:$0x3] }
 0x385   : > { %v5038_v14 = vsel %vm5037_vm14, %v5620_v46, %v5034_v23  ;;  %v9349_v19 = vadd.f32 %v9167_v16, %v4739_v47  ;;  %v4032_v61 = vrot.slane %v3999_v10, 2  ;;  %v3988_v37 = vadd.f32 %v3960_v6, %v3915_v49 }
 0x386   : > { %v5043_v59 = vsel %vm5040_vm12, %v5042_v15, %v5038_v14  ;;  %v3455_v8 = vrot.slane %v3420_v21, 1  ;;  %v3493_v40 = vmul.f32 %v9204_v31, %v10058_v38  ;;  %v3583_v46 = vmul.f32 %v5653_v42, %v10066_v57 }
 0x387   : > { %v5044_v35 = vmul.f32 %v5043_v59, %v5019_v41  ;;  %v9354_v60 = vmul.f32 0.70710677, %v9349_v19  ;;  %v3584_v22 = vmul.f32 %v5654_v0, %v10066_v57  ;;  %v4070_v48 = vmul.f32 %v10062_v43, %v9346_v34 }
 0x388   : > { %v4088_v24 = vmul.f32 %v10038_v27, %v9346_v34  ;;  %v4089_v38 = vmul.f32 %v10038_v27, %v9356_v45  ;;  %v3553_v31 = vadd.f32 %v9230_v54, %v3480_v5  ;;  %v4033_v9 = vsel %vm3355_vm5, %v4031_v28, %v4032_v61 }
 0x389   : > { %v5382_v56 = vclamps-f32 %v5044_v35, 1.0  ;;  %v5047_v50 = vmul.f32 %v9354_v60, %v9354_v60  ;;  %v3408_v2 = vadd.f32 %v9306_v3, %v3391_v11  ;;  %v4757_v57 = vmul.f32 0.5, %v9170_v51  ;;  %v10093_v3 = vld [vmem:[#allocation4_spill] sm:$0xff] }
 0x38a   : > { %v4061_v17 = vadd.f32 %v4033_v9, %v3988_v37  ;;  %v4121_v55 = vrot.slane %v4088_v24, 1  ;;  %v4122_v13 = vrot.slane %v4089_v38, 1  ;;  %v4161_v26 = vmul.f32 %v10039_v18, %v9346_v34 }
 0x38b   : > { %v5093_v33 = vadd.f32 1.0, %v5382_v56  ;;  %v9372_v10 = vmin.f32 %v5047_v50, 16.0  ;;  %v4162_v54 = vmul.f32 %v10039_v18, %v9356_v45  ;;  %v3570_v21 = vadd.f32 %v9218_v36, %v3553_v31 }
 0x38c   : > { %v4078_v49 = vadd.f32 %v4070_v48, %v4061_v17  ;;  %v3689_v23 = vrot.slane %v9252_v12, 2  ;;  %v10094_v11 = vrot.slane %v10093_v3, 1  ;;  %v4123_v15 = vsel %vm3281_vm7, %v4121_v55, %v4122_v13  ;;  %v10099_v3 = vld [vmem:[#allocation18_spill] sm:$0xff] }
 0x38d   : > { %v5101_v47 = vmul.f32 %v5093_v33, %v4757_v57  ;;  %v5049_v6 = vmul.f32 2.1237322e-06, %v9372_v10  ;;  %v5060_v41 = vmul.f32 3.8918573e-05, %v9372_v10  ;;  %v3528_v14 = vrot.slane %v3493_v40, 2 }
 0x38e   : > { %v3457_v51 = vsel %vm3281_vm7, %v3455_v8, %v10094_v11  ;;  %v3618_v28 = vrot.slane %v3583_v46, 1  ;;  %v3619_v61 = vrot.slane %v3584_v22, 1  ;;  %v4194_v12 = vrot.slane %v4161_v26, 2  ;;  %v10096_v46 = vld [vmem:[#allocation26_spill] sm:$0xff] }
 0x38f   : > { %v3481_v5 = vadd.f32 %v3457_v51, %v3408_v2  ;;  %5390 = vmatmul.msk.f32.vlgmr.msra.gmra.mxu3 %vm1248_vm10, %v5101_v47  ;;  %v5050_v36 = vadd.f32 0.00028619796, %v5049_v6  ;;  %v5061_v59 = vadd.f32 0.001143296, %v5060_v41  ;;  %v4195_v37 = vrot.slane %v4162_v54, 2  ;;  %v5655_v54 = vld [vmem:[#allocation2 + $0x150] sm:$0xff] }
 0x390   : > { %v4151_v35 = vadd.f32 %v4123_v15, %v4078_v49  ;;  %v3643_v8 = vadd.f32 %v9248_v25, %v3570_v21  ;;  %v10095_v38 = vrot.slane %v9235_v63, 2  ;;  %v3563_v40 = vmul.f32 %v5653_v42, %v10068_v58  ;;  %v5656_v21 = vld [vmem:[#allocation2 + $0x158] sm:$0x3] }
 0x391   : > { %v5051_v48 = vmul.f32 %v5050_v36, %v9372_v10  ;;  %v5062_v24 = vmul.f32 %v5061_v59, %v9372_v10  ;;  %v10097_v22 = vrot.slane %v10096_v46, 2  ;;  %v9398_v50 = vsel %vm3281_vm7, %v3618_v28, %v3619_v61 }
 0x392   : > { %v3690_v31 = vsel %vm3355_vm5, %v10095_v38, %v3689_v23  ;;  %v9401_v9 = vmul.f32 %v5653_v42, %v9960_v39  ;;  %v9404_v25 = vmul.f32 %v5654_v0, %v9960_v39  ;;  %v4196_v63 = vsel %vm3355_vm5, %v4194_v12, %v4195_v37  ;;  %v10098_v0 = vld [vmem:[#allocation19_spill] sm:$0xff] }
 0x393   : > { %v3530_v56 = vsel %vm3355_vm5, %v3528_v14, %v10097_v22  ;;  %v5052_v2 = vadd.f32 0.0036580483, %v5051_v48  ;;  %v5063_v57 = vadd.f32 0.014752088, %v5062_v24  ;;  %v4224_v55 = vadd.f32 %v4196_v63, %v4151_v35  ;;  %v10100_v35 = vld [vmem:[#allocation31_spill] sm:$0xff] }
 0x394   : > { %v3554_v17 = vadd.f32 %v3530_v56, %v3481_v5  ;;  %v3716_v58 = vadd.f32 %v3690_v31, %v3643_v8  ;;  %v3745_v13 = vmul.f32 %v9311_v52, %v10032_v53  ;;  %v3764_v33 = vmul.f32 %v9311_v52, %v10036_v1  ;;  %v9425_v38 = vld [vmem:[#allocation2 + $0x160] sm:$0xff] }
 0x395   : > { %v5053_v26 = vmul.f32 %v5052_v2, %v9372_v10  ;;  %v5064_v42 = vmul.f32 %v5063_v57, %v9372_v10  ;;  %v4253_v39 = vmul.f32 %v5655_v54, %v10077_v20  ;;  %v4271_v49 = vmul.f32 %v5655_v54, %v10098_v0  ;;  %v10101_v31 = vld [vmem:[#allocation39_spill] sm:$0xff]  ;;  %v9429_v2 = vld [vmem:[#allocation2 + $0x170] sm:$0xff] }
 0x396   : > { %v4272_v23 = vmul.f32 %v5656_v21, %v10098_v0  ;;  %v4344_v11 = vmul.f32 %v5655_v54, %v10099_v3  ;;  %v4345_v51 = vmul.f32 %v5656_v21, %v10099_v3  ;;  %v3765_v47 = vmul.f32 %v9315_v32, %v10036_v1 }
 0x397   : > { %v5054_v6 = vadd.f32 0.05243302, %v5053_v26  ;;  %v5065_v41 = vadd.f32 0.112945676, %v5064_v42  ;;  %v4261_v15 = vadd.f32 %v4253_v39, %v4224_v55  ;;  %v4304_v5 = vrot.slane %v4271_v49, 1 }
 0x398   : > { %v4305_v14 = vrot.slane %v4272_v23, 1  ;;  %v4377_v28 = vrot.slane %v4344_v11, 2  ;;  %v4378_v61 = vrot.slane %v4345_v51, 2  ;;  %v3571_v36 = vadd.f32 %v3563_v40, %v3554_v17  ;;  %v9431_v40 = vld [vmem:[#allocation2 + $0x178] sm:$0x3] }
 0x399   : > { %v5066_v59 = vmul.f32 %v5065_v41, %v9372_v10  ;;  %v3753_v12 = vadd.f32 %v3745_v13, %v3716_v58  ;;  %v3798_v37 = vrot.slane %v3764_v33, 1  ;;  %v3837_v8 = vmul.f32 %v9311_v52, %v10100_v35  ;;  %v9435_v52 = vld [vmem:[#allocation2 + $0x168] sm:$0x3] }
 0x39a   : > { %v5055_v48 = vmul.f32 %v5054_v6, %v9372_v10  ;;  %v4306_v24 = vsel %vm3281_vm7, %v4304_v5, %v4305_v14  ;;  %v4434_v46 = vmul.f32 %v9425_v38, %v10101_v31  ;;  %v3799_v22 = vrot.slane %v3765_v47, 1  ;;  %v10102_v13 = vld [vmem:[#allocation40_spill] sm:$0xff] }
 0x39b   : > { %v5067_v56 = vadd.f32 0.4994258, %v5066_v59  ;;  %v4334_v57 = vadd.f32 %v4306_v24, %v4261_v15  ;;  %v4416_v63 = vmul.f32 %v9425_v38, %v10085_v29  ;;  %v4435_v17 = vmul.f32 %v9435_v52, %v10101_v31 }
 0x39c   : > { %v4379_v55 = vsel %vm3355_vm5, %v4377_v28, %v4378_v61  ;;  %v4467_v58 = vrot.slane %v4434_v46, 1  ;;  %v4507_v33 = vmul.f32 %v9425_v38, %v10102_v13  ;;  %v4508_v26 = vmul.f32 %v9435_v52, %v10102_v13 }
 0x39d   : > { %v5068_v42 = vmul.f32 %v5067_v56, %v9372_v10  ;;  %v4407_v54 = vadd.f32 %v4379_v55, %v4334_v57  ;;  %v4468_v39 = vrot.slane %v4435_v17, 1  ;;  %v3838_v49 = vmul.f32 %v9315_v32, %v10100_v35 }
 0x39e   : > { %v5056_v21 = vadd.f32 0.18741608, %v5055_v48  ;;  %v4540_v23 = vrot.slane %v4507_v33, 2  ;;  %v4597_v11 = vmul.f32 %v10087_v30, %v9429_v2  ;;  %v4598_v51 = vmul.f32 %v10087_v30, %v9431_v40 }
 0x39f   : > { %v5069_v47 = vadd.f32 1.0, %v5068_v42  ;;  %v4424_v6 = vadd.f32 %v4416_v63, %v4407_v54  ;;  %v4469_v41 = vsel %vm3281_vm7, %v4467_v58, %v4468_v39  ;;  %v4541_v15 = vrot.slane %v4508_v26, 2 }
 0x3a0   : > { %v3800_v5 = vsel %vm3281_vm7, %v3798_v37, %v3799_v22  ;;  %v3871_v14 = vrot.slane %v3837_v8, 2  ;;  %v3691_v28 = vrot.slane %v9401_v9, 2  ;;  %v3692_v32 = vrot.slane %v9404_v25, 2 }
 0x3a1   : > { %5621 = vrcp.f32 %v5069_v47  ;;  %v4630_v61 = vrot.slane %v4597_v11, 1  ;;  %v4631_v59 = vrot.slane %v4598_v51, 1  ;;  %v4670_v48 = vmul.f32 %v10088_v7, %v9429_v2  ;;  %v10103_v11 = vld [vmem:[#allocation33_spill] sm:$0xff] }
 0x3a2   : > { %v4497_v24 = vadd.f32 %v4469_v41, %v4424_v6  ;;  %v4579_v46 = vmul.f32 %v10089_v44, %v9429_v2  ;;  %v4671_v56 = vmul.f32 %v10088_v7, %v9431_v40  ;;  %v3872_v57 = vrot.slane %v3838_v49, 2 }
 0x3a3   : > { %v5057_v37 = vmul.f32 %v5056_v21, %v9372_v10  ;;  %v4542_v9 = vsel %vm3355_vm5, %v4540_v23, %v4541_v15  ;;  %v3826_v8 = vadd.f32 %v3800_v5, %v3753_v12  ;;  %v3644_v25 = vadd.f32 %v9398_v50, %v3571_v36 }
 0x3a4   : > { %v4570_v22 = vadd.f32 %v4542_v9, %v4497_v24  ;;  %v4632_v63 = vsel %vm3281_vm7, %v4630_v61, %v4631_v59  ;;  %v4703_v17 = vrot.slane %v4670_v48, 2  ;;  %v4704_v55 = vrot.slane %v4671_v56, 2  ;;  %v9479_v59 = vld [vmem:[#allocation2 + $0xe0] sm:$0xff] }
 0x3a5   : > { %v3873_v33 = vsel %vm3355_vm5, %v3871_v14, %v3872_v57  ;;  %v3693_v26 = vsel %vm3355_vm5, %v3691_v28, %v3692_v32  ;;  %v5058_v54 = vadd.f32 1.1283791, %v5057_v37  ;;  %v5079_v21 = vand.u32 2147483647, %v5069_v47 }
 0x3a6   : > { %v4587_v58 = vadd.f32 %v4579_v46, %v4570_v22  ;;  %v3899_v39 = vadd.f32 %v3873_v33, %v3826_v8  ;;  %v3717_v49 = vadd.f32 %v3693_v26, %v3644_v25  ;;  %v3908_v50 = vmul.f32 %v10054_v62, %v9346_v34 }
 0x3a7   : > { %v5622_v42 = vpop.eup %5621  ;;  %v5081_v36 = vand.u32 2147483648, %v5069_v47  ;;  %v4705_v12 = vsel %vm3355_vm5, %v4703_v17, %v4704_v55  ;;  %v3927_v51 = vmul.f32 %v10103_v11, %v9346_v34  ;;  %v3928_v6 = vmul.f32 %v10103_v11, %v9356_v45 }
 0x3a8   : > { %v5071_v10 = vmul.f32 %v5622_v42, %v5069_v47  ;;  %v4660_v23 = vadd.f32 %v4632_v63, %v4587_v58  ;;  %v4000_v5 = vmul.f32 %v10055_v4, %v9346_v34  ;;  %v4001_v14 = vmul.f32 %v10055_v4, %v9356_v45 }
 0x3a9   : > { %v5059_v28 = vmul.f32 %v5058_v54, %v9354_v60  ;;  %v3961_v32 = vrot.slane %v3927_v51, 1  ;;  %v3962_v61 = vrot.slane %v3928_v6, 1  ;;  %v4090_v48 = vmul.f32 %v9479_v59, %v10038_v27 }
 0x3aa   : > { %v5072_v41 = vsub.f32 1.0, %v5071_v10  ;;  %v4733_v15 = vadd.f32 %v4705_v12, %v4660_v23  ;;  %vm5076_vm6 = vweird.f32 %v5622_v42  ;;  %v3916_v56 = vadd.f32 %v3908_v50, %v3899_v39 }
 0x3ab   : > { %vm5075_vm8 = vweird.f32 %v5069_v47  ;;  %vm9486_vm9 = vcmp.eq.f32.partialorder %v5079_v21, 8.507059e+37  ;;  %v5082_v37 = vor.u32 1.1754944e-38, %v5081_v36  ;;  %v3963_v60 = vsel %vm3281_vm7, %v3961_v32, %v3962_v61 }
 0x3ac   : > { %v5073_v24 = vmul.f32 %v5622_v42, %v5072_v41  ;;  %v9484_v46 = vadd.f32 %v9167_v16, %v4733_v15  ;;  %v4034_v25 = vrot.slane %v4000_v5, 2  ;;  %v4035_v22 = vrot.slane %v4001_v14, 2  ;;  %vm5077_vm11 = vmor %vm5075_vm8, %vm5076_vm6 }
 0x3ad   : > { %v3746_v63 = vmul.f32 %v10032_v53, %v9346_v34  ;;  %v3766_v47 = vmul.f32 %v10036_v1, %v9346_v34  ;;  %v3767_v17 = vmul.f32 %v10036_v1, %v9356_v45  ;;  %v3839_v55 = vmul.f32 %v10100_v35, %v9346_v34 }
 0x3ae   : > { %v5074_v9 = vadd.f32 %v5622_v42, %v5073_v24  ;;  %v9492_v8 = vmul.f32 0.70710677, %v9484_v46  ;;  %v3989_v26 = vadd.f32 %v3963_v60, %v3916_v56  ;;  %v3840_v54 = vmul.f32 %v10100_v35, %v9356_v45 }
 0x3af   : > { %v3754_v39 = vadd.f32 %v3746_v63, %v3717_v49  ;;  %v3801_v10 = vrot.slane %v3766_v47, 1  ;;  %v3802_v21 = vrot.slane %v3767_v17, 1  ;;  %v3874_v1 = vrot.slane %v3839_v55, 2 }
 0x3b0   : > { %v5078_v58 = vsel %vm5077_vm11, %v5622_v42, %v5074_v9  ;;  %v4807_v33 = vmul.f32 %v9492_v8, %v9492_v8  ;;  %v4036_v34 = vsel %vm3355_vm5, %v4034_v25, %v4035_v22  ;;  %v9511_v42 = vld [vmem:[#allocation2 + $0xe8] sm:$0x3]  ;;  %v3875_v45 = vrot.slane %v3840_v54, 2 }
 0x3b1   : > { %v5083_v53 = vsel %vm9486_vm9, %v5082_v37, %v5078_v58  ;;  %v4091_v36 = vmul.f32 %v9511_v42, %v10038_v27  ;;  %v3803_v12 = vsel %vm3281_vm7, %v3801_v10, %v3802_v21  ;;  %v4062_v6 = vadd.f32 %v4036_v34, %v3989_v26 }
 0x3b2   : > { %v5084_v23 = vmul.f32 %v5083_v53, %v5059_v28  ;;  %v9508_v50 = vmin.f32 %v4807_v33, 16.0  ;;  %v4071_v41 = vmul.f32 %v9479_v59, %v10062_v43  ;;  %v4124_v15 = vrot.slane %v4090_v48, 1 }
 0x3b3   : > { %v3827_v5 = vadd.f32 %v3803_v12, %v3754_v39  ;;  %v3876_v14 = vsel %vm3355_vm5, %v3874_v1, %v3875_v45  ;;  %v4758_v28 = vmul.f32 0.5, %v9349_v19  ;;  %v4125_v56 = vrot.slane %v4091_v36, 1 }
 0x3b4   : > { %v5383_v35 = vclamps-f32 %v5084_v23, 1.0  ;;  %v4809_v51 = vmul.f32 2.1237322e-06, %v9508_v50  ;;  %v4820_v49 = vmul.f32 3.8918573e-05, %v9508_v50  ;;  %v4163_v57 = vmul.f32 %v9479_v59, %v10039_v18 }
 0x3b5   : > { %v4164_v37 = vmul.f32 %v9511_v42, %v10039_v18  ;;  %v9526_v60 = vadd.f32 %v3876_v14, %v3827_v5  ;;  %v4079_v22 = vadd.f32 %v4071_v41, %v4062_v6  ;;  %v4126_v47 = vsel %vm3281_vm7, %v4124_v15, %v4125_v56 }
 0x3b6   : > { %v5094_v32 = vadd.f32 1.0, %v5383_v35  ;;  %v4810_v61 = vadd.f32 0.00028619796, %v4809_v51  ;;  %v4821_v24 = vadd.f32 0.001143296, %v4820_v49  ;;  %v4197_v17 = vrot.slane %v4163_v57, 2 }
 0x3b7   : > { %v4198_v55 = vrot.slane %v4164_v37, 2  ;;  %v4152_v26 = vadd.f32 %v4126_v47, %v4079_v22  ;;  %v4254_v23 = vmul.f32 %v9425_v38, %v10077_v20  ;;  %v4273_v1 = vmul.f32 %v9425_v38, %v10098_v0  ;;  %v9561_v47 = vld [vmem:[#allocation2 + $0x180] sm:$0xff] }
 0x3b8   : > { %v5102_v9 = vmul.f32 %v5094_v32, %v4758_v28  ;;  %v4811_v48 = vmul.f32 %v4810_v61, %v9508_v50  ;;  %v4822_v25 = vmul.f32 %v4821_v24, %v9508_v50  ;;  %v4274_v34 = vmul.f32 %v9435_v52, %v10098_v0 }
 0x3b9   : > { %v4199_v53 = vsel %vm3355_vm5, %v4197_v17, %v4198_v55  ;;  %v4346_v36 = vmul.f32 %v9425_v38, %v10099_v3  ;;  %v4347_v45 = vmul.f32 %v9435_v52, %v10099_v3  ;;  %v4307_v51 = vrot.slane %v4273_v1, 1  ;;  %v9565_v55 = vld [vmem:[#allocation2 + $0x188] sm:$0x3] }
 0x3ba   : > { %5391 = vmatmul.msk.f32.gmra.mxu3 %vm1248_vm10, %v5102_v9  ;;  %v4812_v19 = vadd.f32 0.0036580483, %v4811_v48  ;;  %v4823_v63 = vadd.f32 0.014752088, %v4822_v25  ;;  %v4225_v21 = vadd.f32 %v4199_v53, %v4152_v26  ;;  %v4308_v49 = vrot.slane %v4274_v34, 1 }
 0x3bb   : > { %v4380_v41 = vrot.slane %v4346_v36, 2  ;;  %v4381_v15 = vrot.slane %v4347_v45, 2  ;;  %v4436_v5 = vmul.f32 %v10101_v31, %v9429_v2  ;;  %v4437_v38 = vmul.f32 %v10101_v31, %v9431_v40 }
 0x3bc   : > { %v4813_v58 = vmul.f32 %v4812_v19, %v9508_v50  ;;  %v4824_v33 = vmul.f32 %v4823_v63, %v9508_v50  ;;  %v4262_v35 = vadd.f32 %v4254_v23, %v4225_v21  ;;  %v4309_v28 = vsel %vm3281_vm7, %v4307_v51, %v4308_v49 }
 0x3bd   : > { %v4509_v52 = vmul.f32 %v10102_v13, %v9429_v2  ;;  %v4510_v24 = vmul.f32 %v10102_v13, %v9431_v40  ;;  %v4417_v56 = vmul.f32 %v10085_v29, %v9429_v2  ;;  %v4470_v57 = vrot.slane %v4436_v5, 1 }
 0x3be   : > { %v4825_v54 = vadd.f32 0.112945676, %v4824_v33  ;;  %v4814_v39 = vadd.f32 0.05243302, %v4813_v58  ;;  %v4335_v61 = vadd.f32 %v4309_v28, %v4262_v35  ;;  %v4471_v37 = vrot.slane %v4437_v38, 1 }
 0x3bf   : > { %v4382_v9 = vsel %vm3355_vm5, %v4380_v41, %v4381_v15  ;;  %v4543_v22 = vrot.slane %v4509_v52, 2  ;;  %v4544_v63 = vrot.slane %v4510_v24, 2  ;;  %v4599_v17 = vmul.f32 %v9561_v47, %v10087_v30 }
 0x3c0   : > { %v4826_v10 = vmul.f32 %v4825_v54, %v9508_v50  ;;  %v4815_v14 = vmul.f32 %v4814_v39, %v9508_v50  ;;  %v4408_v25 = vadd.f32 %v4382_v9, %v4335_v61  ;;  %v4472_v19 = vsel %vm3281_vm7, %v4470_v57, %v4471_v37 }
 0x3c1   : > { %v4600_v58 = vmul.f32 %v9565_v55, %v10087_v30  ;;  %v4672_v26 = vmul.f32 %v9561_v47, %v10088_v7  ;;  %v4673_v54 = vmul.f32 %v9565_v55, %v10088_v7  ;;  %v4545_v21 = vsel %vm3355_vm5, %v4543_v22, %v4544_v63 }
 0x3c2   : > { %v4827_v12 = vadd.f32 0.4994258, %v4826_v10  ;;  %v4816_v48 = vadd.f32 0.18741608, %v4815_v14  ;;  %v4425_v33 = vadd.f32 %v4417_v56, %v4408_v25  ;;  %v4633_v23 = vrot.slane %v4599_v17, 1 }
 0x3c3   : > { %v4634_v1 = vrot.slane %v4600_v58, 1  ;;  %v4706_v45 = vrot.slane %v4672_v26, 2  ;;  %v4707_v35 = vrot.slane %v4673_v54, 2  ;;  %v3930_v5 = vmul.f32 %v9511_v42, %v10103_v11 }
 0x3c4   : > { %v4828_v6 = vmul.f32 %v4827_v12, %v9508_v50  ;;  %v4498_v53 = vadd.f32 %v4472_v19, %v4425_v33  ;;  %v4817_v10 = vmul.f32 %v4816_v48, %v9508_v50  ;;  %v4580_v12 = vmul.f32 %v9561_v47, %v10089_v44 }
 0x3c5   : > { %v4635_v50 = vsel %vm3281_vm7, %v4633_v23, %v4634_v1  ;;  %v4708_v52 = vsel %vm3355_vm5, %v4706_v45, %v4707_v35  ;;  %v3909_v61 = vmul.f32 %v9479_v59, %v10054_v62  ;;  %v4002_v24 = vmul.f32 %v9479_v59, %v10055_v4 }
 0x3c6   : > { %v4829_v32 = vadd.f32 1.0, %v4828_v6  ;;  %v4571_v36 = vadd.f32 %v4545_v21, %v4498_v53  ;;  %v3929_v6 = vmul.f32 %v9479_v59, %v10103_v11  ;;  %v4818_v41 = vadd.f32 1.1283791, %v4817_v10  ;;  %v5663_v53 = vld [vmem:[#allocation2 + $0xf0] sm:$0xff]  ;;  %v5664_v10 = vld [vmem:[#allocation2 + $0xf8] sm:$0x3] }
 0x3c7   : > { %v3917_v11 = vadd.f32 %v3909_v61, %v9526_v60  ;;  %v3965_v48 = vrot.slane %v3930_v5, 1  ;;  %v4003_v25 = vmul.f32 %v9511_v42, %v10055_v4  ;;  %v4037_v58 = vrot.slane %v4002_v24, 2 }
 0x3c8   : > { %5623 = vrcp.f32 %v4829_v32  ;;  %v4588_v49 = vadd.f32 %v4580_v12, %v4571_v36  ;;  %v4841_v15 = vand.u32 2147483648, %v4829_v32  ;;  %v4839_v28 = vand.u32 2147483647, %v4829_v32 }
 0x3c9   : > { %vm4835_vm0 = vweird.f32 %v4829_v32  ;;  %v3964_v37 = vrot.slane %v3929_v6, 1  ;;  %v4819_v22 = vmul.f32 %v4818_v41, %v9492_v8  ;;  %v4038_v60 = vrot.slane %v4003_v25, 2 }
 0x3ca   : > { %v4661_v38 = vadd.f32 %v4635_v50, %v4588_v49  ;;  %v4842_v9 = vor.u32 1.1754944e-38, %v4841_v15  ;;  %vm4840_vm2 = vcmp.eq.f32.partialorder %v4839_v28, 8.507059e+37  ;;  %v4752_v8 = vmul.f32 0.5, %v9484_v46 }
 0x3cb   : > { %v3966_v17 = vsel %vm3281_vm7, %v3964_v37, %v3965_v48  ;;  %v4093_v21 = vmul.f32 %v5664_v10, %v10038_v27  ;;  %v4072_v45 = vmul.f32 %v5663_v53, %v10062_v43  ;;  %v4165_v49 = vmul.f32 %v5663_v53, %v10039_v18 }
 0x3cc   : > { %v4734_v57 = vadd.f32 %v4708_v52, %v4661_v38  ;;  %v3990_v42 = vadd.f32 %v3966_v17, %v3917_v11  ;;  %v4166_v6 = vmul.f32 %v5664_v10, %v10039_v18  ;;  %v4255_v37 = vmul.f32 %v10077_v20, %v9429_v2 }
 0x3cd   : > { %v4200_v28 = vrot.slane %v4165_v49, 2  ;;  %v4276_v11 = vmul.f32 %v10098_v0, %v9431_v40  ;;  %v4348_v48 = vmul.f32 %v10099_v3, %v9429_v2  ;;  %v4438_v20 = vmul.f32 %v9561_v47, %v10101_v31 }
 0x3ce   : > { %v5624_v39 = vpop.eup %5623  ;;  %v9592_v62 = vadd.f32 %v9167_v16, %v4734_v57  ;;  %v4039_v16 = vsel %vm3355_vm5, %v4037_v58, %v4038_v60  ;;  %v4201_v38 = vrot.slane %v4166_v6, 2 }
 0x3cf   : > { %v4831_v34 = vmul.f32 %v5624_v39, %v4829_v32  ;;  %vm4836_vm15 = vweird.f32 %v5624_v39  ;;  %v4063_v36 = vadd.f32 %v4039_v16, %v3990_v42  ;;  %v4311_v17 = vrot.slane %v4276_v11, 1 }
 0x3d0   : > { %vm4837_vm1 = vmor %vm4835_vm0, %vm4836_vm15  ;;  %v9595_v32 = vmul.f32 0.70710677, %v9592_v62  ;;  %v4383_v60 = vrot.slane %v4348_v48, 2  ;;  %v4473_v16 = vrot.slane %v4438_v20, 1 }
 0x3d1   : > { %v4832_v51 = vsub.f32 1.0, %v4831_v34  ;;  %v4080_v15 = vadd.f32 %v4072_v45, %v4063_v36  ;;  %v5666_v36 = vld [vmem:[#allocation2 + $0x198] sm:$0x3] }
 0x3d2   : > { %v4847_v4 = vmul.f32 %v9595_v32, %v9595_v32  ;;  %v4675_v45 = vmul.f32 %v5666_v36, %v10088_v7 }
 0x3d3   : > { %v4833_v14 = vmul.f32 %v5624_v39, %v4832_v51  ;;  %v4128_v51 = vrot.slane %v4093_v21, 1 }
 0x3d4   : > { %v9601_v54 = vmin.f32 %v4847_v4, 16.0  ;;  %v4511_v4 = vmul.f32 %v9561_v47, %v10102_v13 }
 0x3d5   : > { %v4834_v56 = vadd.f32 %v5624_v39, %v4833_v14 }
 0x3d6   : > { %v4849_v1 = vmul.f32 2.1237322e-06, %v9601_v54  ;;  %v4860_v34 = vmul.f32 3.8918573e-05, %v9601_v54  ;;  %v4546_v10 = vrot.slane %v4511_v4, 2 }
 0x3d7   : > { %v4838_v19 = vsel %vm4837_vm1, %v5624_v39, %v4834_v56  ;;  %v4092_v39 = vmul.f32 %v5663_v53, %v10038_v27  ;;  %v4202_v56 = vsel %vm3355_vm5, %v4200_v28, %v4201_v38 }
 0x3d8   : > { %v4843_v59 = vsel %vm4840_vm2, %v4842_v9, %v4838_v19  ;;  %v4850_v46 = vadd.f32 0.00028619796, %v4849_v1  ;;  %v4861_v12 = vadd.f32 0.001143296, %v4860_v34  ;;  %v4275_v9 = vmul.f32 %v10098_v0, %v9429_v2  ;;  %v5665_v1 = vld [vmem:[#allocation2 + $0x190] sm:$0xff] }
 0x3d9   : > { %v4844_v63 = vmul.f32 %v4843_v59, %v4819_v22  ;;  %v4127_v35 = vrot.slane %v4092_v39, 1  ;;  %v4349_v19 = vmul.f32 %v10099_v3, %v9431_v40  ;;  %v4439_v0 = vmul.f32 %v9565_v55, %v10101_v31 }
 0x3da   : > { %v4851_v27 = vmul.f32 %v4850_v46, %v9601_v54  ;;  %v4862_v41 = vmul.f32 %v4861_v12, %v9601_v54  ;;  %v4418_v31 = vmul.f32 %v9561_v47, %v10085_v29  ;;  %v4601_v34 = vmul.f32 %v5665_v1, %v10087_v30 }
 0x3db   : > { %v5377_v33 = vclamps-f32 %v4844_v63, 1.0  ;;  %v4129_v14 = vsel %vm3281_vm7, %v4127_v35, %v4128_v51  ;;  %v4310_v63 = vrot.slane %v4275_v9, 1  ;;  %v4474_v53 = vrot.slane %v4439_v0, 1 }
 0x3dc   : > { %v4852_v50 = vadd.f32 0.0036580483, %v4851_v27  ;;  %v4863_v5 = vadd.f32 0.014752088, %v4862_v41  ;;  %v4153_v43 = vadd.f32 %v4129_v14, %v4080_v15  ;;  %v4602_v46 = vmul.f32 %v5666_v36, %v10087_v30 }
 0x3dd   : > { %v5088_v26 = vadd.f32 1.0, %v5377_v33  ;;  %v4384_v33 = vrot.slane %v4349_v19, 2  ;;  %v4312_v2 = vsel %vm3281_vm7, %v4310_v63, %v4311_v17  ;;  %v4636_v49 = vrot.slane %v4601_v34, 1  ;;  %v5176_v34 = vld [vmem:[%s9672_s18 + $0x30] sm:$0xff] }
 0x3de   : > { %v4864_v52 = vmul.f32 %v4863_v5, %v9601_v54  ;;  %v4853_v61 = vmul.f32 %v4852_v50, %v9601_v54  ;;  %v4226_v57 = vadd.f32 %v4202_v56, %v4153_v43  ;;  %v4637_v6 = vrot.slane %v4602_v46, 1 }
 0x3df   : > { %v5096_v23 = vmul.f32 %v5088_v26, %v4752_v8  ;;  %v4512_v8 = vmul.f32 %v9565_v55, %v10102_v13  ;;  %v4385_v26 = vsel %vm3355_vm5, %v4383_v60, %v4384_v33  ;;  %v4475_v13 = vsel %vm3281_vm7, %v4473_v16, %v4474_v53  ;;  %v5174_v16 = vld [vmem:[%s9672_s18 + $0x20] sm:$0xff] }
 0x3e0   : > { %v4865_v24 = vadd.f32 0.112945676, %v4864_v52  ;;  %v4854_v25 = vadd.f32 0.05243302, %v4853_v61  ;;  %v4263_v59 = vadd.f32 %v4255_v37, %v4226_v57  ;;  %v4674_v55 = vmul.f32 %v5665_v1, %v10088_v7  ;;  %v5667_v37 = vld [vmem:[%s9738_s4] ss:$0 sm:$0xff] }
 0x3e1   : > { %5385 = vmatmul.msk.f32.gmra.mxu0 %vm1248_vm10, %v5096_v23  ;;  %v4547_v23 = vrot.slane %v4512_v8, 2  ;;  %v4581_v15 = vmul.f32 %v5665_v1, %v10089_v44  ;;  %v4710_v50 = vrot.slane %v4675_v45, 2  ;;  %v4638_v7 = vsel %vm3281_vm7, %v4636_v49, %v4637_v6  ;;  %v9678_v53 = vld [vmem:[%s9740_s6] ss:$0 sm:$0xff] }
 0x3e2   : > { %v4866_v18 = vmul.f32 %v4865_v24, %v9601_v54  ;;  %v4855_v3 = vmul.f32 %v4854_v25, %v9601_v54  ;;  %v4336_v42 = vadd.f32 %v4312_v2, %v4263_v59  ;;  %v4709_v30 = vrot.slane %v4674_v55, 2 }
 0x3e3   : > { %v4548_v47 = vsel %vm3355_vm5, %v4546_v10, %v4547_v23  ;;  %v4753_v19 = vmul.f32 0.5, %v9592_v62  ;;  %vm5197_vm7 = vcmask 31744  }
 0x3e4   : > { %v4867_v22 = vadd.f32 0.4994258, %v4866_v18  ;;  %v4409_v39 = vadd.f32 %v4385_v26, %v4336_v42  ;;  %v4856_v21 = vadd.f32 0.18741608, %v4855_v3  ;;  %v4711_v61 = vsel %vm3355_vm5, %v4709_v30, %v4710_v50  ;;  %v5156_v26 = vpop.f32.mrf.mxu2 }
 0x3e6   : > { %v4868_v58 = vmul.f32 %v4867_v22, %v9601_v54  ;;  %v4426_v12 = vadd.f32 %v4418_v31, %v4409_v39  ;;  %v4857_v29 = vmul.f32 %v4856_v21, %v9601_v54  ;;  %v5144_v39 = vpop.f32.mrf.mxu0  ;;  %v5170_v31 = vld [vmem:[%s9672_s18] sm:$0xff]  ;;  %v5182_v21 = vadd.f32 %v5174_v16, %v5156_v26 }
 0x3e7   : > { %v5178_v23 = vadd.f32 %v5170_v31, %v5144_v39 }
 0x3e8   : > { %v4869_v40 = vadd.f32 1.0, %v4868_v58  ;;  %v4499_v35 = vadd.f32 %v4475_v13, %v4426_v12  ;;  %v4858_v28 = vadd.f32 1.1283791, %v4857_v29  ;;  %v5193_v13 = vadd.f32 %v9678_v53, %v5182_v21  ;;  %v5175_v29 = vld [vmem:[%s9672_s18 + $0x28] sm:$0xff] }
 0x3e9   : > { %v5189_v55 = vadd.f32 %v9678_v53, %v5178_v23 }
 0x3ea   : > { %5625 = vrcp.f32 %v4869_v40  ;;  %v4572_v41 = vadd.f32 %v4548_v47, %v4499_v35  ;;  %v4881_v38 = vand.u32 2147483648, %v4869_v40  ;;  %v4879_v43 = vand.u32 2147483647, %v4869_v40  ;;  %5202 = vst.msk [vmem:[%s9685_s12 + $0x20] sm:$0xff] %vm5197_vm7, %v5193_v13 }
 0x3eb   : > { %vm4875_vm4 = vweird.f32 %v4869_v40  ;;  %v4859_v44 = vmul.f32 %v4858_v28, %v9595_v32  ;;  %5198 = vst.msk [vmem:[%s9685_s12] sm:$0xff] %vm5197_vm7, %v5189_v55 }
 0x3ec   : > { %v4589_v14 = vadd.f32 %v4581_v15, %v4572_v41  ;;  %v4882_v18 = vor.u32 1.1754944e-38, %v4881_v38  ;;  %vm4880_vm14 = vcmp.eq.f32.partialorder %v4879_v43, 8.507059e+37  ;;  %v5159_v47 = vpop.f32.mrf.mxu2 }
 0x3ed   : > { %v5183_v49 = vadd.f32 %v5175_v29, %v5159_v47 }
 0x3ee   : > { %v4662_v54 = vadd.f32 %v4638_v7, %v4589_v14 }
 0x3f0   : > { %v5626_v51 = vpop.eup %5625  ;;  %v4735_v56 = vadd.f32 %v4711_v61, %v4662_v54 }
 0x3f1   : > { %v4871_v27 = vmul.f32 %v5626_v51, %v4869_v40  ;;  %vm4876_vm3 = vweird.f32 %v5626_v51 }
 0x3f2   : > { %vm4877_vm13 = vmor %vm4875_vm4, %vm4876_vm3  ;;  %v9657_v9 = vadd.f32 %v5667_v37, %v4735_v56 }
 0x3f3   : > { %v4872_v5 = vsub.f32 1.0, %v4871_v27  ;;  %v5194_v27 = vadd.f32 %v9678_v53, %v5183_v49 }
 0x3f4   : > { %v9660_v25 = vmul.f32 0.70710677, %v9657_v9 }
 0x3f5   : > { %v4873_v52 = vmul.f32 %v5626_v51, %v4872_v5  ;;  %5203 = vst.msk [vmem:[%s9685_s12 + $0x28] sm:$0xff] %vm5197_vm7, %v5194_v27 }
 0x3f6   : > { %v4887_v32 = vmul.f32 %v9660_v25, %v9660_v25 }
 0x3f7   : > { %v4874_v24 = vadd.f32 %v5626_v51, %v4873_v52 }
 0x3f8   : > { %v4888_v63 = vmin.f32 %v4887_v32, 16.0 }
 0x3f9   : > { %v4878_v57 = vsel %vm4877_vm13, %v5626_v51, %v4874_v24 }
 0x3fa   : > { %v4883_v11 = vsel %vm4880_vm14, %v4882_v18, %v4878_v57  ;;  %v4889_v20 = vmul.f32 2.1237322e-06, %v4888_v63  ;;  %v4900_v58 = vmul.f32 3.8918573e-05, %v4888_v63  ;;  %v4754_v18 = vmul.f32 0.5, %v9657_v9  ;;  %v5172_v9 = vld [vmem:[%s9672_s18 + $0x10] sm:$0xff] }
 0x3fb   : > { %v4884_v48 = vmul.f32 %v4883_v11, %v4859_v44  ;;  %v5177_v11 = vld [vmem:[%s9672_s18 + $0x38] sm:$0xff] }
 0x3fc   : > { %v4890_v60 = vadd.f32 0.00028619796, %v4889_v20  ;;  %v4901_v33 = vadd.f32 0.001143296, %v4900_v58  ;;  %v5173_v58 = vld [vmem:[%s9672_s18 + $0x18] sm:$0xff] }
 0x3fd   : > { %v5378_v22 = vclamps-f32 %v4884_v48, 1.0 }
 0x3fe   : > { %v4891_v0 = vmul.f32 %v4890_v60, %v4888_v63  ;;  %v4902_v2 = vmul.f32 %v4901_v33, %v4888_v63 }
 0x3ff   : > { %v5089_v59 = vadd.f32 1.0, %v5378_v22  ;;  %v5171_v22 = vld [vmem:[%s9672_s18 + $0x8] sm:$0xff] }
 0x400   : > { %v4903_v4 = vadd.f32 0.014752088, %v4902_v2  ;;  %v4892_v3 = vadd.f32 0.0036580483, %v4891_v0 }
 0x401   : > { %v5097_v17 = vmul.f32 %v5089_v59, %v4753_v19 }
 0x402   : > { %v4904_v62 = vmul.f32 %v4903_v4, %v4888_v63  ;;  %v4893_v42 = vmul.f32 %v4892_v3, %v4888_v63 }
 0x403   : > { %5386 = vmatmul.msk.f32.vlgmr.msra.gmra.mxu1 %vm1248_vm10, %v5097_v17 }
 0x404   : > { %v4905_v40 = vadd.f32 0.112945676, %v4904_v62  ;;  %v4894_v36 = vadd.f32 0.05243302, %v4893_v42 }
 0x406   : > { %v4906_v8 = vmul.f32 %v4905_v40, %v4888_v63  ;;  %v4895_v51 = vmul.f32 %v4894_v36, %v4888_v63 }
 0x408   : > { %v4907_v10 = vadd.f32 0.4994258, %v4906_v8  ;;  %v4896_v6 = vadd.f32 0.18741608, %v4895_v51 }
 0x40a   : > { %v4908_v12 = vmul.f32 %v4907_v10, %v4888_v63  ;;  %v4897_v15 = vmul.f32 %v4896_v6, %v4888_v63 }
 0x40c   : > { %v4909_v35 = vadd.f32 1.0, %v4908_v12  ;;  %v4898_v14 = vadd.f32 1.1283791, %v4897_v15 }
 0x40e   : > { %5627 = vrcp.f32 %v4909_v35  ;;  %v4921_v5 = vand.u32 2147483648, %v4909_v35  ;;  %v4919_v38 = vand.u32 2147483647, %v4909_v35  ;;  %vm4915_vm12 = vweird.f32 %v4909_v35 }
 0x40f   : > { %v4899_v43 = vmul.f32 %v4898_v14, %v9660_v25 }
 0x410   : > { %v4922_v52 = vor.u32 1.1754944e-38, %v4921_v5  ;;  %vm4920_vm8 = vcmp.eq.f32.partialorder %v4919_v38, 8.507059e+37 }
 0x412   : > { %v5162_v1 = vpop.f32.mrf.mxu3 }
 0x413   : > { %v5184_v46 = vadd.f32 %v5176_v34, %v5162_v1 }
 0x414   : > { %v5628_v41 = vpop.eup %5627 }
 0x415   : > { %v5195_v45 = vadd.f32 %v9678_v53, %v5184_v46  ;;  %v4911_v30 = vmul.f32 %v5628_v41, %v4909_v35  ;;  %vm4916_vm5 = vweird.f32 %v5628_v41 }
 0x416   : > { %vm4917_vm6 = vmor %vm4915_vm12, %vm4916_vm5 }
 0x417   : > { %5204 = vst.msk [vmem:[%s9685_s12 + $0x30] sm:$0xff] %vm5197_vm7, %v5195_v45  ;;  %v4912_v50 = vsub.f32 1.0, %v4911_v30 }
 0x419   : > { %v4913_v28 = vmul.f32 %v5628_v41, %v4912_v50 }
 0x41b   : > { %v4914_v7 = vadd.f32 %v5628_v41, %v4913_v28 }
 0x41d   : > { %v4918_v54 = vsel %vm4917_vm6, %v5628_v41, %v4914_v7 }
 0x41e   : > { %v4923_v61 = vsel %vm4920_vm8, %v4922_v52, %v4918_v54 }
 0x41f   : > { %v4924_v24 = vmul.f32 %v4923_v61, %v4899_v43 }
 0x421   : > { %v5379_v56 = vclamps-f32 %v4924_v24, 1.0 }
 0x423   : > { %v5090_v44 = vadd.f32 1.0, %v5379_v56 }
 0x425   : > { %v5098_v57 = vmul.f32 %v5090_v44, %v4754_v18 }
 0x427   : > { %5387 = vmatmul.msk.f32.gmra.mxu1 %vm1248_vm10, %v5098_v57 }
 0x43d   : > { %v5165_v37 = vpop.f32.mrf.mxu3 }
 0x43e   : > { %v5185_v48 = vadd.f32 %v5177_v11, %v5165_v37 }
 0x440   : > { %v5196_v25 = vadd.f32 %v9678_v53, %v5185_v48 }
 0x442   : > { %5205 = vst.msk [vmem:[%s9685_s12 + $0x38] sm:$0xff] %vm5197_vm7, %v5196_v25 }
 0x45e   : > { %v5147_v32 = vpop.f32.mrf.mxu0 }
 0x45f   : > { %v5179_v19 = vadd.f32 %v5171_v22, %v5147_v32 }
 0x461   : > { %v5190_v59 = vadd.f32 %v9678_v53, %v5179_v19 }
 0x463   : > { %5199 = vst.msk [vmem:[%s9685_s12 + $0x8] sm:$0xff] %vm5197_vm7, %v5190_v59 }
 0x480   : > { %v5150_v63 = vpop.f32.mrf.mxu1 }
 0x481   : > { %v5180_v17 = vadd.f32 %v5172_v9, %v5150_v63 }
 0x483   : > { %v5191_v20 = vadd.f32 %v9678_v53, %v5180_v17 }
 0x485   : > { %5200 = vst.msk [vmem:[%s9685_s12 + $0x10] sm:$0xff] %vm5197_vm7, %v5191_v20 }
 0x4a4   : > { %v5153_v60 = vpop.f32.mrf.mxu1 }
 0x4a5   : > { %v5181_v33 = vadd.f32 %v5173_v58, %v5153_v60 }
 0x4a7   : > { %v5192_v0 = vadd.f32 %v9678_v53, %v5181_v33 }
 0x4a9   : > { %5201 = vst.msk [vmem:[%s9685_s12 + $0x18] sm:$0xff] %vm5197_vm7, %v5192_v0 }
 0x4aa PF: > { %s17_s28 = sadd.s32 1, %s5706_s28   ;;  %s10106_s24 = smov %s5698_s26 }
 0x4ab   : > { %p14_p12 = scmp.ge.s32.totalorder %s17_s28, 10   ;;  %s10107_s25 = smov %s5702_s27 }
 0x4ac   : > { %s10108_s26 = smov %s10111_s29  ;;  %s10109_s27 = smov %s10115_s30 }
 0x4ad   :  { %16 = sbr.rel (!%p14_p12) target bundleno = 3 (0x3), region = 93 }

</bundles_post_ra>
